<compile_context>
chip_gen: v7x
topology: tpu7x:2x2x1
jax: 0.10.0
libtpu: 0.0.40
codegen_flags: <defaults>
</compile_context>

<pallas_src>
import functools
import math

import jax
import jax.numpy as jnp
from jax.experimental import pallas as pl
from jax.experimental.pallas import tpu as pltpu


# ----------------------------------------------------------------------------
# In-kernel helpers (trace-time functions over VMEM-resident values)
# ----------------------------------------------------------------------------
def _pad1_hw(x):
    """Zero-pad H and W by 1 on each side via concatenation. x: (N,H,W,C)."""
    N, H, W, C = x.shape
    zrow = jnp.zeros((N, 1, W, C), x.dtype)
    x = jnp.concatenate([zrow, x, zrow], axis=1)
    zcol = jnp.zeros((N, H + 2, 1, C), x.dtype)
    return jnp.concatenate([zcol, x, zcol], axis=2)


def _conv3x3_matmul(x, w_flat):
    """3x3 'same' conv as ONE im2col matmul.

    x: (N,H,W,Cin) bf16, w_flat: (9*Cin, Cout) bf16.  Padding / patch buffer
    stay bf16 (half the VMEM of the old f32 im2col).  Returns (N*H*W, Cout) f32.
    """
    N, H, W, Cin = x.shape
    xp = _pad1_hw(x)
    cols = [xp[:, dy:dy + H, dx:dx + W, :] for dy in range(3) for dx in range(3)]
    patches = jnp.concatenate(cols, axis=-1).reshape(N * H * W, 9 * Cin)
    return jnp.dot(patches, w_flat, preferred_element_type=jnp.float32)


def _max_pool2(x):
    """2x2 stride-2 max pool on an NHWC value (exact on bf16).

    Built only from leading-dim reshapes, contiguous sublane slices and
    sublane-dim concatenation (the same primitive set as the im2col path).
    """
    N, H, W, C = x.shape
    a = x.reshape(N * (H // 2), 2, W, C)
    a = jnp.maximum(a[:, 0:1], a[:, 1:2]).reshape(N * (H // 2), W, C)
    cols = [jnp.maximum(a[:, 2 * w:2 * w + 1, :], a[:, 2 * w + 1:2 * w + 2, :])
            for w in range(W // 2)]
    p = jnp.concatenate(cols, axis=1) if len(cols) > 1 else cols[0]
    return p.reshape(N, H // 2, W // 2, C)


def _bn_leaky(h, gamma, beta, *, eps, slope):
    """Training-mode BatchNorm2d (biased batch stats over rows) + LeakyReLU.

    h: (M, C) f32 with M = N*H*W; gamma/beta: (1, C) f32.  All math in f32
    (v5e VPU has no bf16 elementwise).
    """
    mean = jnp.mean(h, axis=0, keepdims=True)
    var = jnp.mean(jnp.square(h - mean), axis=0, keepdims=True)
    scale = gamma * jax.lax.rsqrt(var + eps)
    shift = beta - mean * scale
    y = h * scale + shift
    return jnp.where(y >= 0, y, slope * y)


# ----------------------------------------------------------------------------
# Fused block kernel
# ----------------------------------------------------------------------------
def _fused_block_kernel(*refs, num_inputs, pool_inputs, head, eps, slope):
    """[pool] -> conv3x3(split-K) -> BN -> LReLU -> conv3x3 -> BN -> LReLU
    -> [head conv3x3+bias | 1x1 conv+sigmoid], all on VMEM-resident values."""
    i = 0
    x_refs = refs[i:i + num_inputs]; i += num_inputs
    w1_refs = refs[i:i + num_inputs]; i += num_inputs
    b1_ref, g1_ref, t1_ref = refs[i:i + 3]; i += 3
    w2_ref, b2_ref, g2_ref, t2_ref = refs[i:i + 4]; i += 4
    if head is not None:
        wh_ref, bh_ref = refs[i:i + 2]; i += 2
    o_ref = refs[i]

    xs = [r[...] for r in x_refs]                      # bf16 NHWC
    if pool_inputs:
        xs = [_max_pool2(x) for x in xs]
    N, H, W, _ = xs[0].shape
    C1 = w1_refs[0].shape[-1]
    C2 = w2_ref.shape[-1]

    # conv1: split-K over the logical channel-concat of the inputs (torch
    # order [dec, enc]) -- no cross-lane concat, two dots into one f32 acc.
    h = _conv3x3_matmul(xs[0], w1_refs[0][...])
    for x, wr in zip(xs[1:], w1_refs[1:]):
        h = h + _conv3x3_matmul(x, wr[...])
    h = _bn_leaky(h + b1_ref[...], g1_ref[...], t1_ref[...], eps=eps, slope=slope)

    # conv2 (intermediate never leaves VMEM)
    h = _conv3x3_matmul(h.reshape(N, H, W, C1).astype(jnp.bfloat16), w2_ref[...])
    h = _bn_leaky(h + b2_ref[...], g2_ref[...], t2_ref[...], eps=eps, slope=slope)

    if head is None:
        o_ref[...] = h.reshape(N, H, W, C2).astype(o_ref.dtype)
    elif head == "conv3x3":                            # fused subpixel-upconv
        Ch = wh_ref.shape[-1]
        y = _conv3x3_matmul(h.reshape(N, H, W, C2).astype(jnp.bfloat16),
                            wh_ref[...]) + bh_ref[...]
        o_ref[...] = y.reshape(N, H, W, Ch).astype(o_ref.dtype)
    else:                                              # "final": 1x1 conv + sigmoid
        Ch = wh_ref.shape[-1]
        y = jnp.dot(h.astype(jnp.bfloat16), wh_ref[...],
                    preferred_element_type=jnp.float32) + bh_ref[...]
        o_ref[...] = jax.nn.sigmoid(y).reshape(N, H, W, Ch).astype(o_ref.dtype)


# ----------------------------------------------------------------------------
# pallas_call wrapper (single-step grid; blocks cover the full arrays)
# ----------------------------------------------------------------------------
def _full_specs(shapes):
    return [pl.BlockSpec(s, lambda i, _nd=len(s): (0,) * _nd) for s in shapes]


def fused_block_pallas(xs, p, *, pool_inputs=False, head=None, head_p=None,
                       eps=1e-5, slope=0.2):
    """xs: list of bf16 NHWC arrays, logically concatenated along C (torch order)."""
    N, H, W = xs[0].shape[0], xs[0].shape[1], xs[0].shape[2]
    if pool_inputs:
        H, W = H // 2, W // 2
    cins = [a.shape[-1] for a in xs]
    c1 = p["conv1"]["w"].shape[-1]
    c2 = p["conv2"]["w"].shape[-1]

    # split-K conv1 weights: one (9*Ci, c1) bf16 slab per input
    w1 = p["conv1"]["w"]
    w1_parts, off = [], 0
    for ci in cins:
        w1_parts.append(w1[:, :, off:off + ci, :].reshape(9 * ci, c1)
                        .astype(jnp.bfloat16))
        off += ci
    w2f = p["conv2"]["w"].reshape(9 * c1, c2).astype(jnp.bfloat16)

    args = list(xs) + w1_parts + [
        p["conv1"]["b"].reshape(1, c1),
        p["gamma1"].reshape(1, c1), p["beta1"].reshape(1, c1),
        w2f, p["conv2"]["b"].reshape(1, c2),
        p["gamma2"].reshape(1, c2), p["beta2"].reshape(1, c2),
    ]

    if head is None:
        cout, out_dtype = c2, jnp.bfloat16
    elif head == "conv3x3":
        cout = head_p["w"].shape[-1]
        args += [head_p["w"].reshape(9 * c2, cout).astype(jnp.bfloat16),
                 head_p["b"].reshape(1, cout)]
        out_dtype = jnp.bfloat16
    elif head == "final":
        cout = head_p["w"].shape[-1]
        args += [head_p["w"].reshape(c2, cout).astype(jnp.bfloat16),
                 head_p["b"].reshape(1, cout)]
        out_dtype = jnp.float32
    else:
        raise ValueError(head)

    kernel = functools.partial(_fused_block_kernel, num_inputs=len(xs),
                               pool_inputs=pool_inputs, head=head,
                               eps=eps, slope=slope)
    return pl.pallas_call(
        kernel,
        out_shape=jax.ShapeDtypeStruct((N, H, W, cout), out_dtype),
        grid=(1,),
        in_specs=_full_specs([a.shape for a in args]),
        out_specs=pl.BlockSpec((N, H, W, cout), lambda i: (0, 0, 0, 0)),
        compiler_params=pltpu.CompilerParams(dimension_semantics=("arbitrary",)),
    )(*args)


# ----------------------------------------------------------------------------
# Plain-JAX glue (pure layout op, bf16)
# ----------------------------------------------------------------------------
def pixel_shuffle_nhwc(x, r):
    # out[n, h*r+i, w*r+j, c] = in[n, h, w, c*r*r + i*r + j]  (matches torch)
    N, H, W, C = x.shape
    Co = C // (r * r)
    x = x.reshape(N, H, W, Co, r, r)
    x = jnp.transpose(x, (0, 1, 4, 2, 5, 3))
    return x.reshape(N, H * r, W * r, Co)


# ----------------------------------------------------------------------------
# Parameters (deterministic, PyTorch-default-style init)
# ----------------------------------------------------------------------------
def init_conv_params(key, kh, kw, cin, cout):
    k_w, k_b = jax.random.split(key)
    bound = 1.0 / math.sqrt(cin * kh * kw)
    w = jax.random.uniform(k_w, (kh, kw, cin, cout), jnp.float32, -bound, bound)
    b = jax.random.uniform(k_b, (cout,), jnp.float32, -bound, bound)
    return {"w": w, "b": b}


def init_block_params(key, cin, cout):
    k1, k2 = jax.random.split(key)
    return {
        "conv1": init_conv_params(k1, 3, 3, cin, cout),
        "gamma1": jnp.ones((cout,), jnp.float32),
        "beta1": jnp.zeros((cout,), jnp.float32),
        "conv2": init_conv_params(k2, 3, 3, cout, cout),
        "gamma2": jnp.ones((cout,), jnp.float32),
        "beta2": jnp.zeros((cout,), jnp.float32),
    }


def init_params(key, features):
    ks = jax.random.split(key, 14)
    f = features
    return {
        "enc1": init_block_params(ks[0], 1, f),
        "enc2": init_block_params(ks[1], f, 2 * f),
        "enc3": init_block_params(ks[2], 2 * f, 4 * f),
        "enc4": init_block_params(ks[3], 4 * f, 8 * f),
        "bottleneck": init_block_params(ks[4], 8 * f, 16 * f),
        "upconv4": init_conv_params(ks[5], 3, 3, 16 * f, 8 * f * 4),
        "dec4": init_block_params(ks[6], 16 * f, 8 * f),
        "upconv3": init_conv_params(ks[7], 3, 3, 8 * f, 4 * f * 4),
        "dec3": init_block_params(ks[8], 8 * f, 4 * f),
        "upconv2": init_conv_params(ks[9], 3, 3, 4 * f, 2 * f * 4),
        "dec2": init_block_params(ks[10], 4 * f, 2 * f),
        "upconv1": init_conv_params(ks[11], 3, 3, 2 * f, f * 4),
        "dec1": init_block_params(ks[12], 2 * f, f),
        "final": init_conv_params(ks[13], 1, 1, f, 1),
    }


# ----------------------------------------------------------------------------
# Forward pass (9 pallas_calls + 4 tiny pixel-shuffle layout ops)
# ----------------------------------------------------------------------------
def unet_forward(params, x_nchw):
    x = jnp.transpose(x_nchw, (0, 2, 3, 1)).astype(jnp.bfloat16)   # NCHW -> NHWC

    enc1 = fused_block_pallas([x], params["enc1"])
    enc2 = fused_block_pallas([enc1], params["enc2"], pool_inputs=True)
    enc3 = fused_block_pallas([enc2], params["enc3"], pool_inputs=True)
    enc4 = fused_block_pallas([enc3], params["enc4"], pool_inputs=True)

    # bottleneck block + fused upconv4 conv (activation never hits HBM)
    u4 = fused_block_pallas([enc4], params["bottleneck"], pool_inputs=True,
                            head="conv3x3", head_p=params["upconv4"])
    d4in = pixel_shuffle_nhwc(u4, 2)
    u3 = fused_block_pallas([d4in, enc4], params["dec4"],
                            head="conv3x3", head_p=params["upconv3"])
    d3in = pixel_shuffle_nhwc(u3, 2)
    u2 = fused_block_pallas([d3in, enc3], params["dec3"],
                            head="conv3x3", head_p=params["upconv2"])
    d2in = pixel_shuffle_nhwc(u2, 2)
    u1 = fused_block_pallas([d2in, enc2], params["dec2"],
                            head="conv3x3", head_p=params["upconv1"])
    d1in = pixel_shuffle_nhwc(u1, 2)
    out = fused_block_pallas([d1in, enc1], params["dec1"],
                             head="final", head_p=params["final"])
    return jnp.transpose(out, (0, 3, 1, 2))                        # NHWC -> NCHW


# ----------------------------------------------------------------------------
# Pure-JAX reference (mirrors the kernel's quantization points:
#   bf16 conv operands / bf16 inter-layer activations, f32 accumulation + BN)
# ----------------------------------------------------------------------------
def _ref_conv3x3(x, w, b):
    return jax.lax.conv_general_dilated(
        x.astype(jnp.bfloat16), w.astype(jnp.bfloat16), (1, 1), "SAME",
        dimension_numbers=("NHWC", "HWIO", "NHWC"),
        preferred_element_type=jnp.float32) + b


def _ref_bn_leaky(x, g, bt, eps=1e-5, slope=0.2):
    mean = jnp.mean(x, axis=(0, 1, 2), keepdims=True)
    var = jnp.mean(jnp.square(x - mean), axis=(0, 1, 2), keepdims=True)
    scale = g * jax.lax.rsqrt(var + eps)
    y = x * scale + (bt - mean * scale)
    return jnp.where(y >= 0, y, slope * y)


def _ref_block(xs, p):
    x = xs[0] if len(xs) == 1 else jnp.concatenate(xs, axis=-1)
    h = _ref_bn_leaky(_ref_conv3x3(x, p["conv1"]["w"], p["conv1"]["b"]),
                      p["gamma1"], p["beta1"])
    h = _ref_bn_leaky(_ref_conv3x3(h, p["conv2"]["w"], p["conv2"]["b"]),
                      p["gamma2"], p["beta2"])
    return h.astype(jnp.bfloat16)


def _ref_pool(x):
    N, H, W, C = x.shape
    return jnp.max(x.reshape(N, H // 2, 2, W // 2, 2, C), axis=(2, 4))


def _ref_upsample(x, p, r=2):
    return pixel_shuffle_nhwc(
        _ref_conv3x3(x, p["w"], p["b"]).astype(jnp.bfloat16), r)


def ref_forward(params, x_nchw):
    x = jnp.transpose(x_nchw, (0, 2, 3, 1)).astype(jnp.bfloat16)
    enc1 = _ref_block([x], params["enc1"])
    enc2 = _ref_block([_ref_pool(enc1)], params["enc2"])
    enc3 = _ref_block([_ref_pool(enc2)], params["enc3"])
    enc4 = _ref_block([_ref_pool(enc3)], params["enc4"])
    bott = _ref_block([_ref_pool(enc4)], params["bottleneck"])
    d4 = _ref_block([_ref_upsample(bott, params["upconv4"]), enc4], params["dec4"])
    d3 = _ref_block([_ref_upsample(d4, params["upconv3"]), enc3], params["dec3"])
    d2 = _ref_block([_ref_upsample(d3, params["upconv2"]), enc2], params["dec2"])
    d1 = _ref_block([_ref_upsample(d2, params["upconv1"]), enc1], params["dec1"])
    wf = params["final"]["w"][0, 0].astype(jnp.bfloat16)           # (Cin, 1)
    logits = jnp.einsum("nhwc,co->nhwo", d1, wf,
                        preferred_element_type=jnp.float32) + params["final"]["b"]
    return jnp.transpose(jax.nn.sigmoid(logits), (0, 3, 1, 2))


# ----------------------------------------------------------------------------
# Main
# ----------------------------------------------------------------------------
if __name__ == "__main__":
    key = jax.random.PRNGKey(0)
    k_param, k_x = jax.random.split(key)

    features = 8
    params = init_params(k_param, features)
    x = jax.random.normal(k_x, (2, 1, 16, 16), jnp.float32)   # NCHW like torch

    # Spot-check one fused conv block against the pure-JAX reference.
    x_nhwc = jnp.transpose(x, (0, 2, 3, 1)).astype(jnp.bfloat16)
    blk_got = fused_block_pallas([x_nhwc], params["enc1"]).astype(jnp.float32)
    blk_ref = _ref_block([x_nhwc], params["enc1"]).astype(jnp.float32)
    assert jnp.allclose(blk_ref, blk_got, atol=5e-2, rtol=5e-2), \
        "fused conv_block kernel mismatch"

    fwd = jax.jit(unet_forward)
    out = jax.block_until_ready(fwd(params, x))

    assert out.shape == (2, 1, 16, 16), out.shape
    assert bool(jnp.all(jnp.isfinite(out)))
    assert bool(jnp.all((out >= 0.0) & (out <= 1.0)))   # sigmoid output range

    ref = jax.jit(ref_forward)(params, x)
    assert jnp.allclose(ref, out, atol=2e-2), \
        f"full-network mismatch, max abs diff {float(jnp.max(jnp.abs(ref - out)))}"

    print("KERNEL_OK")
</pallas_src>

<mosaic_0001>
module attributes {stable_mosaic.version = 11 : i64} {
  func.func @_fused_block_kernel(%arg0: i32, %arg1: memref<2x16x16x1xbf16, #tpu.memory_space<vmem>>, %arg2: memref<9x8xbf16, #tpu.memory_space<vmem>>, %arg3: memref<1x8xf32, #tpu.memory_space<vmem>>, %arg4: memref<1x8xf32, #tpu.memory_space<vmem>>, %arg5: memref<1x8xf32, #tpu.memory_space<vmem>>, %arg6: memref<72x8xbf16, #tpu.memory_space<vmem>>, %arg7: memref<1x8xf32, #tpu.memory_space<vmem>>, %arg8: memref<1x8xf32, #tpu.memory_space<vmem>>, %arg9: memref<1x8xf32, #tpu.memory_space<vmem>>, %arg10: memref<2x16x16x8xbf16, #tpu.memory_space<vmem>>) attributes {dimension_semantics = [#tpu.dimension_semantics<arbitrary>], iteration_bounds = array<i64: 1>, scalar_prefetch = 0 : i64, scratch_operands = 0 : i64, tpu.core_type = #tpu.core_type<tc>, window_params = [{pipeline_mode = #tpu.pipeline_mode<synchronous>, transform_indices = @transform_0, window_bounds = array<i64: 2, 16, 16, 1>}, {pipeline_mode = #tpu.pipeline_mode<synchronous>, transform_indices = @transform_1, window_bounds = array<i64: 9, 8>}, {pipeline_mode = #tpu.pipeline_mode<synchronous>, transform_indices = @transform_2, window_bounds = array<i64: 1, 8>}, {pipeline_mode = #tpu.pipeline_mode<synchronous>, transform_indices = @transform_3, window_bounds = array<i64: 1, 8>}, {pipeline_mode = #tpu.pipeline_mode<synchronous>, transform_indices = @transform_4, window_bounds = array<i64: 1, 8>}, {pipeline_mode = #tpu.pipeline_mode<synchronous>, transform_indices = @transform_5, window_bounds = array<i64: 72, 8>}, {pipeline_mode = #tpu.pipeline_mode<synchronous>, transform_indices = @transform_6, window_bounds = array<i64: 1, 8>}, {pipeline_mode = #tpu.pipeline_mode<synchronous>, transform_indices = @transform_7, window_bounds = array<i64: 1, 8>}, {pipeline_mode = #tpu.pipeline_mode<synchronous>, transform_indices = @transform_8, window_bounds = array<i64: 1, 8>}, {pipeline_mode = #tpu.pipeline_mode<synchronous>, transform_indices = @transform_9, window_bounds = array<i64: 2, 16, 16, 8>}]} {
    %c0 = arith.constant 0 : index
    %c0_0 = arith.constant 0 : index
    %c0_1 = arith.constant 0 : index
    %c0_2 = arith.constant 0 : index
    %0 = vector.load %arg1[%c0, %c0_0, %c0_1, %c0_2] : memref<2x16x16x1xbf16, #tpu.memory_space<vmem>>, vector<2x16x16x1xbf16>
    %c0_3 = arith.constant 0 : index
    %c0_4 = arith.constant 0 : index
    %1 = vector.load %arg2[%c0_3, %c0_4] : memref<9x8xbf16, #tpu.memory_space<vmem>>, vector<9x8xbf16>
    %cst = arith.constant 0.000000e+00 : bf16
    %2 = vector.broadcast %cst : bf16 to vector<2x1x16x1xbf16>
    %3 = tpu.concatenate %2, %0, %2 in 1 : vector<2x1x16x1xbf16>, vector<2x16x16x1xbf16>, vector<2x1x16x1xbf16> -> vector<2x18x16x1xbf16>
    %cst_5 = arith.constant 0.000000e+00 : bf16
    %4 = vector.broadcast %cst_5 : bf16 to vector<2x18x1x1xbf16>
    %5 = tpu.concatenate %4, %3, %4 in 2 : vector<2x18x1x1xbf16>, vector<2x18x16x1xbf16>, vector<2x18x1x1xbf16> -> vector<2x18x18x1xbf16>
    %6 = vector.extract_strided_slice %5 {offsets = [0, 0, 0, 0], sizes = [2, 16, 16, 1], strides = [1, 1, 1, 1]} : vector<2x18x18x1xbf16> to vector<2x16x16x1xbf16>
    %7 = vector.extract_strided_slice %5 {offsets = [0, 0, 1, 0], sizes = [2, 16, 16, 1], strides = [1, 1, 1, 1]} : vector<2x18x18x1xbf16> to vector<2x16x16x1xbf16>
    %8 = vector.extract_strided_slice %5 {offsets = [0, 0, 2, 0], sizes = [2, 16, 16, 1], strides = [1, 1, 1, 1]} : vector<2x18x18x1xbf16> to vector<2x16x16x1xbf16>
    %9 = vector.extract_strided_slice %5 {offsets = [0, 1, 0, 0], sizes = [2, 16, 16, 1], strides = [1, 1, 1, 1]} : vector<2x18x18x1xbf16> to vector<2x16x16x1xbf16>
    %10 = vector.extract_strided_slice %5 {offsets = [0, 1, 1, 0], sizes = [2, 16, 16, 1], strides = [1, 1, 1, 1]} : vector<2x18x18x1xbf16> to vector<2x16x16x1xbf16>
    %11 = vector.extract_strided_slice %5 {offsets = [0, 1, 2, 0], sizes = [2, 16, 16, 1], strides = [1, 1, 1, 1]} : vector<2x18x18x1xbf16> to vector<2x16x16x1xbf16>
    %12 = vector.extract_strided_slice %5 {offsets = [0, 2, 0, 0], sizes = [2, 16, 16, 1], strides = [1, 1, 1, 1]} : vector<2x18x18x1xbf16> to vector<2x16x16x1xbf16>
    %13 = vector.extract_strided_slice %5 {offsets = [0, 2, 1, 0], sizes = [2, 16, 16, 1], strides = [1, 1, 1, 1]} : vector<2x18x18x1xbf16> to vector<2x16x16x1xbf16>
    %14 = vector.extract_strided_slice %5 {offsets = [0, 2, 2, 0], sizes = [2, 16, 16, 1], strides = [1, 1, 1, 1]} : vector<2x18x18x1xbf16> to vector<2x16x16x1xbf16>
    %15 = tpu.concatenate %6, %7, %8, %9, %10, %11, %12, %13, %14 in 3 : vector<2x16x16x1xbf16>, vector<2x16x16x1xbf16>, vector<2x16x16x1xbf16>, vector<2x16x16x1xbf16>, vector<2x16x16x1xbf16>, vector<2x16x16x1xbf16>, vector<2x16x16x1xbf16>, vector<2x16x16x1xbf16>, vector<2x16x16x1xbf16> -> vector<2x16x16x9xbf16>
    %16 = vector.shape_cast %15 : vector<2x16x16x9xbf16> to vector<512x9xbf16>
    %cst_6 = arith.constant dense<0.000000e+00> : vector<512x8xf32>
    %17 = tpu.matmul %16, %1, %cst_6 {dimension_numbers = #tpu.dot_dimension_numbers<[1], [0], [0], [1], [0, 0, 1, 1], [], []>} : vector<512x9xbf16>, vector<9x8xbf16>, vector<512x8xf32> -> vector<512x8xf32>
    %c0_7 = arith.constant 0 : index
    %c0_8 = arith.constant 0 : index
    %18 = vector.load %arg3[%c0_7, %c0_8] : memref<1x8xf32, #tpu.memory_space<vmem>>, vector<1x8xf32>
    %19 = vector.broadcast %18 : vector<1x8xf32> to vector<512x8xf32>
    %20 = arith.addf %17, %19 : vector<512x8xf32>
    %c0_9 = arith.constant 0 : index
    %c0_10 = arith.constant 0 : index
    %21 = vector.load %arg4[%c0_9, %c0_10] : memref<1x8xf32, #tpu.memory_space<vmem>>, vector<1x8xf32>
    %c0_11 = arith.constant 0 : index
    %c0_12 = arith.constant 0 : index
    %22 = vector.load %arg5[%c0_11, %c0_12] : memref<1x8xf32, #tpu.memory_space<vmem>>, vector<1x8xf32>
    %cst_13 = arith.constant dense<0.000000e+00> : vector<8xf32>
    %23 = vector.multi_reduction <add>, %20, %cst_13 [0] : vector<512x8xf32> to vector<8xf32>
    %24 = vector.shape_cast %23 : vector<8xf32> to vector<1x8xf32>
    %cst_14 = arith.constant 5.120000e+02 : f32
    %25 = vector.broadcast %cst_14 : f32 to vector<1x8xf32>
    %26 = arith.divf %24, %25 : vector<1x8xf32>
    %27 = vector.broadcast %26 : vector<1x8xf32> to vector<512x8xf32>
    %28 = arith.subf %20, %27 : vector<512x8xf32>
    %29 = arith.mulf %28, %28 : vector<512x8xf32>
    %cst_15 = arith.constant dense<0.000000e+00> : vector<8xf32>
    %30 = vector.multi_reduction <add>, %29, %cst_15 [0] : vector<512x8xf32> to vector<8xf32>
    %31 = vector.shape_cast %30 : vector<8xf32> to vector<1x8xf32>
    %cst_16 = arith.constant 5.120000e+02 : f32
    %32 = vector.broadcast %cst_16 : f32 to vector<1x8xf32>
    %33 = arith.divf %31, %32 : vector<1x8xf32>
    %cst_17 = arith.constant 9.99999974E-6 : f32
    %34 = vector.broadcast %cst_17 : f32 to vector<1x8xf32>
    %35 = arith.addf %33, %34 : vector<1x8xf32>
    %36 = math.rsqrt %35 : vector<1x8xf32>
    %37 = arith.mulf %21, %36 : vector<1x8xf32>
    %38 = arith.mulf %26, %37 : vector<1x8xf32>
    %39 = arith.subf %22, %38 : vector<1x8xf32>
    %40 = vector.broadcast %37 : vector<1x8xf32> to vector<512x8xf32>
    %41 = arith.mulf %20, %40 : vector<512x8xf32>
    %42 = vector.broadcast %39 : vector<1x8xf32> to vector<512x8xf32>
    %43 = arith.addf %41, %42 : vector<512x8xf32>
    %cst_18 = arith.constant 0.000000e+00 : f32
    %44 = vector.broadcast %cst_18 : f32 to vector<512x8xf32>
    %45 = arith.cmpf oge, %43, %44 : vector<512x8xf32>
    %cst_19 = arith.constant 2.000000e-01 : f32
    %46 = vector.broadcast %cst_19 : f32 to vector<512x8xf32>
    %47 = arith.mulf %46, %43 : vector<512x8xf32>
    %48 = arith.select %45, %43, %47 : vector<512x8xi1>, vector<512x8xf32>
    %49 = vector.shape_cast %48 : vector<512x8xf32> to vector<2x16x16x8xf32>
    %50 = arith.truncf %49 : vector<2x16x16x8xf32> to vector<2x16x16x8xbf16>
    %c0_20 = arith.constant 0 : index
    %c0_21 = arith.constant 0 : index
    %51 = vector.load %arg6[%c0_20, %c0_21] : memref<72x8xbf16, #tpu.memory_space<vmem>>, vector<72x8xbf16>
    %cst_22 = arith.constant 0.000000e+00 : bf16
    %52 = vector.broadcast %cst_22 : bf16 to vector<2x1x16x8xbf16>
    %53 = tpu.concatenate %52, %50, %52 in 1 : vector<2x1x16x8xbf16>, vector<2x16x16x8xbf16>, vector<2x1x16x8xbf16> -> vector<2x18x16x8xbf16>
    %cst_23 = arith.constant 0.000000e+00 : bf16
    %54 = vector.broadcast %cst_23 : bf16 to vector<2x18x1x8xbf16>
    %55 = tpu.concatenate %54, %53, %54 in 2 : vector<2x18x1x8xbf16>, vector<2x18x16x8xbf16>, vector<2x18x1x8xbf16> -> vector<2x18x18x8xbf16>
    %56 = vector.extract_strided_slice %55 {offsets = [0, 0, 0, 0], sizes = [2, 16, 16, 8], strides = [1, 1, 1, 1]} : vector<2x18x18x8xbf16> to vector<2x16x16x8xbf16>
    %57 = vector.extract_strided_slice %55 {offsets = [0, 0, 1, 0], sizes = [2, 16, 16, 8], strides = [1, 1, 1, 1]} : vector<2x18x18x8xbf16> to vector<2x16x16x8xbf16>
    %58 = vector.extract_strided_slice %55 {offsets = [0, 0, 2, 0], sizes = [2, 16, 16, 8], strides = [1, 1, 1, 1]} : vector<2x18x18x8xbf16> to vector<2x16x16x8xbf16>
    %59 = vector.extract_strided_slice %55 {offsets = [0, 1, 0, 0], sizes = [2, 16, 16, 8], strides = [1, 1, 1, 1]} : vector<2x18x18x8xbf16> to vector<2x16x16x8xbf16>
    %60 = vector.extract_strided_slice %55 {offsets = [0, 1, 1, 0], sizes = [2, 16, 16, 8], strides = [1, 1, 1, 1]} : vector<2x18x18x8xbf16> to vector<2x16x16x8xbf16>
    %61 = vector.extract_strided_slice %55 {offsets = [0, 1, 2, 0], sizes = [2, 16, 16, 8], strides = [1, 1, 1, 1]} : vector<2x18x18x8xbf16> to vector<2x16x16x8xbf16>
    %62 = vector.extract_strided_slice %55 {offsets = [0, 2, 0, 0], sizes = [2, 16, 16, 8], strides = [1, 1, 1, 1]} : vector<2x18x18x8xbf16> to vector<2x16x16x8xbf16>
    %63 = vector.extract_strided_slice %55 {offsets = [0, 2, 1, 0], sizes = [2, 16, 16, 8], strides = [1, 1, 1, 1]} : vector<2x18x18x8xbf16> to vector<2x16x16x8xbf16>
    %64 = vector.extract_strided_slice %55 {offsets = [0, 2, 2, 0], sizes = [2, 16, 16, 8], strides = [1, 1, 1, 1]} : vector<2x18x18x8xbf16> to vector<2x16x16x8xbf16>
    %65 = tpu.concatenate %56, %57, %58, %59, %60, %61, %62, %63, %64 in 3 : vector<2x16x16x8xbf16>, vector<2x16x16x8xbf16>, vector<2x16x16x8xbf16>, vector<2x16x16x8xbf16>, vector<2x16x16x8xbf16>, vector<2x16x16x8xbf16>, vector<2x16x16x8xbf16>, vector<2x16x16x8xbf16>, vector<2x16x16x8xbf16> -> vector<2x16x16x72xbf16>
    %66 = vector.shape_cast %65 : vector<2x16x16x72xbf16> to vector<512x72xbf16>
    %cst_24 = arith.constant dense<0.000000e+00> : vector<512x8xf32>
    %67 = tpu.matmul %66, %51, %cst_24 {dimension_numbers = #tpu.dot_dimension_numbers<[1], [0], [0], [1], [0, 0, 1, 1], [], []>} : vector<512x72xbf16>, vector<72x8xbf16>, vector<512x8xf32> -> vector<512x8xf32>
    %c0_25 = arith.constant 0 : index
    %c0_26 = arith.constant 0 : index
    %68 = vector.load %arg7[%c0_25, %c0_26] : memref<1x8xf32, #tpu.memory_space<vmem>>, vector<1x8xf32>
    %69 = vector.broadcast %68 : vector<1x8xf32> to vector<512x8xf32>
    %70 = arith.addf %67, %69 : vector<512x8xf32>
    %c0_27 = arith.constant 0 : index
    %c0_28 = arith.constant 0 : index
    %71 = vector.load %arg8[%c0_27, %c0_28] : memref<1x8xf32, #tpu.memory_space<vmem>>, vector<1x8xf32>
    %c0_29 = arith.constant 0 : index
    %c0_30 = arith.constant 0 : index
    %72 = vector.load %arg9[%c0_29, %c0_30] : memref<1x8xf32, #tpu.memory_space<vmem>>, vector<1x8xf32>
    %cst_31 = arith.constant dense<0.000000e+00> : vector<8xf32>
    %73 = vector.multi_reduction <add>, %70, %cst_31 [0] : vector<512x8xf32> to vector<8xf32>
    %74 = vector.shape_cast %73 : vector<8xf32> to vector<1x8xf32>
    %cst_32 = arith.constant 5.120000e+02 : f32
    %75 = vector.broadcast %cst_32 : f32 to vector<1x8xf32>
    %76 = arith.divf %74, %75 : vector<1x8xf32>
    %77 = vector.broadcast %76 : vector<1x8xf32> to vector<512x8xf32>
    %78 = arith.subf %70, %77 : vector<512x8xf32>
    %79 = arith.mulf %78, %78 : vector<512x8xf32>
    %cst_33 = arith.constant dense<0.000000e+00> : vector<8xf32>
    %80 = vector.multi_reduction <add>, %79, %cst_33 [0] : vector<512x8xf32> to vector<8xf32>
    %81 = vector.shape_cast %80 : vector<8xf32> to vector<1x8xf32>
    %cst_34 = arith.constant 5.120000e+02 : f32
    %82 = vector.broadcast %cst_34 : f32 to vector<1x8xf32>
    %83 = arith.divf %81, %82 : vector<1x8xf32>
    %cst_35 = arith.constant 9.99999974E-6 : f32
    %84 = vector.broadcast %cst_35 : f32 to vector<1x8xf32>
    %85 = arith.addf %83, %84 : vector<1x8xf32>
    %86 = math.rsqrt %85 : vector<1x8xf32>
    %87 = arith.mulf %71, %86 : vector<1x8xf32>
    %88 = arith.mulf %76, %87 : vector<1x8xf32>
    %89 = arith.subf %72, %88 : vector<1x8xf32>
    %90 = vector.broadcast %87 : vector<1x8xf32> to vector<512x8xf32>
    %91 = arith.mulf %70, %90 : vector<512x8xf32>
    %92 = vector.broadcast %89 : vector<1x8xf32> to vector<512x8xf32>
    %93 = arith.addf %91, %92 : vector<512x8xf32>
    %cst_36 = arith.constant 0.000000e+00 : f32
    %94 = vector.broadcast %cst_36 : f32 to vector<512x8xf32>
    %95 = arith.cmpf oge, %93, %94 : vector<512x8xf32>
    %cst_37 = arith.constant 2.000000e-01 : f32
    %96 = vector.broadcast %cst_37 : f32 to vector<512x8xf32>
    %97 = arith.mulf %96, %93 : vector<512x8xf32>
    %98 = arith.select %95, %93, %97 : vector<512x8xi1>, vector<512x8xf32>
    %99 = vector.shape_cast %98 : vector<512x8xf32> to vector<2x16x16x8xf32>
    %100 = arith.truncf %99 : vector<2x16x16x8xf32> to vector<2x16x16x8xbf16>
    %c0_38 = arith.constant 0 : index
    %c0_39 = arith.constant 0 : index
    %c0_40 = arith.constant 0 : index
    %c0_41 = arith.constant 0 : index
    %101 = vector.load %arg10[%c0_38, %c0_39, %c0_40, %c0_41] : memref<2x16x16x8xbf16, #tpu.memory_space<vmem>>, vector<2x16x16x8xbf16>
    tpu.vector_store %arg10[%c0_38, %c0_39, %c0_40, %c0_41], %100 {strides = array<i32>} : memref<2x16x16x8xbf16, #tpu.memory_space<vmem>>, vector<2x16x16x8xbf16>,
    return
  }
  func.func @transform_0(%arg0: i32) -> (i32, i32, i32, i32) {
    %c0_i32 = arith.constant 0 : i32
    %c0_i32_0 = arith.constant 0 : i32
    %c0_i32_1 = arith.constant 0 : i32
    %c0_i32_2 = arith.constant 0 : i32
    %c0_i32_3 = arith.constant 0 : i32
    return %c0_i32, %c0_i32_0, %c0_i32_1, %c0_i32_2 : i32, i32, i32, i32
  }
  func.func @transform_1(%arg0: i32) -> (i32, i32) {
    %c0_i32 = arith.constant 0 : i32
    %c0_i32_0 = arith.constant 0 : i32
    %c0_i32_1 = arith.constant 0 : i32
    return %c0_i32, %c0_i32_0 : i32, i32
  }
  func.func @transform_2(%arg0: i32) -> (i32, i32) {
    %c0_i32 = arith.constant 0 : i32
    %c0_i32_0 = arith.constant 0 : i32
    %c0_i32_1 = arith.constant 0 : i32
    return %c0_i32, %c0_i32_0 : i32, i32
  }
  func.func @transform_3(%arg0: i32) -> (i32, i32) {
    %c0_i32 = arith.constant 0 : i32
    %c0_i32_0 = arith.constant 0 : i32
    %c0_i32_1 = arith.constant 0 : i32
    return %c0_i32, %c0_i32_0 : i32, i32
  }
  func.func @transform_4(%arg0: i32) -> (i32, i32) {
    %c0_i32 = arith.constant 0 : i32
    %c0_i32_0 = arith.constant 0 : i32
    %c0_i32_1 = arith.constant 0 : i32
    return %c0_i32, %c0_i32_0 : i32, i32
  }
  func.func @transform_5(%arg0: i32) -> (i32, i32) {
    %c0_i32 = arith.constant 0 : i32
    %c0_i32_0 = arith.constant 0 : i32
    %c0_i32_1 = arith.constant 0 : i32
    return %c0_i32, %c0_i32_0 : i32, i32
  }
  func.func @transform_6(%arg0: i32) -> (i32, i32) {
    %c0_i32 = arith.constant 0 : i32
    %c0_i32_0 = arith.constant 0 : i32
    %c0_i32_1 = arith.constant 0 : i32
    return %c0_i32, %c0_i32_0 : i32, i32
  }
  func.func @transform_7(%arg0: i32) -> (i32, i32) {
    %c0_i32 = arith.constant 0 : i32
    %c0_i32_0 = arith.constant 0 : i32
    %c0_i32_1 = arith.constant 0 : i32
    return %c0_i32, %c0_i32_0 : i32, i32
  }
  func.func @transform_8(%arg0: i32) -> (i32, i32) {
    %c0_i32 = arith.constant 0 : i32
    %c0_i32_0 = arith.constant 0 : i32
    %c0_i32_1 = arith.constant 0 : i32
    return %c0_i32, %c0_i32_0 : i32, i32
  }
  func.func @transform_9(%arg0: i32) -> (i32, i32, i32, i32) {
    %c0_i32 = arith.constant 0 : i32
    %c0_i32_0 = arith.constant 0 : i32
    %c0_i32_1 = arith.constant 0 : i32
    %c0_i32_2 = arith.constant 0 : i32
    %c0_i32_3 = arith.constant 0 : i32
    return %c0_i32, %c0_i32_0, %c0_i32_1, %c0_i32_2 : i32, i32, i32, i32
  }
}

</mosaic_0001>

<bundles_post_ra>
// kernel: tpu_custom_call.1
= control target key start
LH: loop header
LB: loop body
LE: loop exit
PB: predicated region body
PF: predicated region fallthrough
CT: control target
= control target key end

     0   :  { %vm556_vm0 = vcmask 1040384   ;;  %vm557_vm1 = vsmask.f32 256  ;;  %v7227_v0 = vmov 0   ;;  %v13686_v2 = vmov 0  ;;  %s7228_s15 = smov 2   ;;  %s13473_s0 = inlined_call_operand.vmem [shape: bf16[2,16,16,1], index: 0, kind: input, shape index: {}]   ;;  %s13474_s1 = inlined_call_operand.vmem [shape: bf16[9,8], index: 1, kind: input, shape index: {}]   ;;  %s13475_s2 = inlined_call_operand.vmem [shape: f32[1,8], index: 2, kind: input, shape index: {}]   ;;  %s13476_s3 = inlined_call_operand.vmem [shape: f32[1,8], index: 3, kind: input, shape index: {}]   ;;  %s13477_s4 = inlined_call_operand.vmem [shape: f32[1,8], index: 4, kind: input, shape index: {}]   ;;  %s13478_s5 = inlined_call_operand.vmem [shape: bf16[72,8], index: 5, kind: input, shape index: {}]   ;;  %s13479_s6 = inlined_call_operand.vmem [shape: f32[1,8], index: 6, kind: input, shape index: {}]   ;;  %s13480_s7 = inlined_call_operand.vmem [shape: f32[1,8], index: 7, kind: input, shape index: {}]   ;;  %s13481_s8 = inlined_call_operand.vmem [shape: f32[1,8], index: 8, kind: input, shape index: {}]   ;;  %s13482_s9 = inlined_call_operand.vmem [shape: bf16[2,16,16,8], index: 9, kind: output, shape index: {}]  }
   0x1   :  { %v262_v1 = vrot.slane %v7227_v0, 7  ;;  %vm7294_vm2 = vmand %vm556_vm0, %vm557_vm1  ;;  %vm13561_vm3 = vsmask.f32 7424  ;;  %v7185_v3 = vld [vmem:[%s13473_s0 + $0x8] sm:$0xff]   ;;  %vm13562_vm4 = vcmask 1046528   ;;  %v7186_v6 = vld [vmem:[%s13473_s0] sm:$0xff]  }
   0x2   :  { %v13687_v2 = vsel %vm7294_vm2, 4294967295, %v13686_v2  ;;  %v7187_v11 = vld [vmem:[%s13473_s0 + $0x10] sm:$0xff]   ;;  %v274_v13 = vshrl.u32 %v7185_v3, 16  ;;  %v277_v14 = vshll.u32 %v7185_v3, 16  ;;  %v267_v15 = vshrl.u32 %v7186_v6, 16  ;;  %s7229_s16 = smov 1  }
   0x3   :  { %13688 = vst [vmem:[#allocation2_spill] sm:$0xff] %v13687_v2  ;;  %v7303_v4 = vsel %vm7294_vm2, 0, %v262_v1  ;;  %v592_v5 = vsel %vm7294_vm2, %v262_v1, 0  ;;  %v270_v18 = vshll.u32 %v7186_v6, 16  ;;  %v281_v19 = vshrl.u32 %v7187_v11, 16  ;;  %s7230_s17 = smov 3  }
   0x4   :  { %13689 = vst [vmem:[#allocation3_spill] sm:$0xff] %v7303_v4  ;;  %v1123_v7 = vrot.slane %v7303_v4, 1  ;;  %v1124_v8 = vrot.slane %v592_v5, 1  ;;  %v627_v9 = vshrl.u32 %v7303_v4, 16  ;;  %v629_v10 = vshll.u32 %v7303_v4, 16  ;;  %v7188_v55 = vld [vmem:[%s13473_s0 + $0x18] sm:$0xff]  }
   0x5   :  { %v634_v12 = vshll.u32 %v592_v5, 16  ;;  %v276_v21 = vrot.slane %v274_v13, 7  ;;  %v269_v22 = vrot.slane %v267_v15, 7  ;;  %v284_v23 = vshll.u32 %v7187_v11, 16  ;;  %s7231_s20 = smov 5   ;;  %s7232_s21 = smov 4  }
   0x6   :  { %v7317_v16 = vsel %vm13562_vm4, %v1123_v7, %v1124_v8  ;;  %v631_v17 = vrot.slane %v629_v10, 1  ;;  %v283_v25 = vrot.slane %v281_v19, 7  ;;  %v288_v61 = vshrl.u32 %v7188_v55, 16  ;;  %s7233_s22 = smov 6   ;;  %v7189_v6 = vld [vmem:[%s13473_s0 + $0x20] sm:$0xff]   ;;  %s7234_s25 = smov 7  }
   0x7   :  { %13690 = vst [vmem:[#allocation4_spill] sm:$0xff] %v7317_v16  ;;  %1216 = vrot.lane.b32.xlu1 %v7317_v16, %s7228_s15  ;;  %v636_v20 = vrot.slane %v634_v12, 1  ;;  %v279_v26 = vor.u32 %v277_v14, %v276_v21  ;;  %v272_v27 = vor.u32 %v270_v18, %v269_v22  ;;  %v593_v28 = vsel %vm7294_vm2, %v269_v22, 0  ;;  %s7235_s26 = smov 8   ;;  %v7195_v22 = vld [vmem:[%s13474_s1] sm:$0x1f]  }
   0x8   :  { %v632_v24 = vor.u32 %v631_v17, %v627_v9  ;;  %v594_v29 = vsel %vm7294_vm2, %v276_v21, 0  ;;  %v1127_v31 = vrot.slane %v593_v28, 1  ;;  %v286_v35 = vor.u32 %v284_v23, %v283_v25  ;;  %s7242_s27 = smov 32   ;;  %s7243_s28 = smov 56  }
   0x9   :  { %v7332_v32 = vsel %vm7294_vm2, 0, %v279_v26  ;;  %v7336_v33 = vsel %vm7294_vm2, 0, %v272_v27  ;;  %v1130_v34 = vrot.slane %v594_v29, 1  ;;  %v658_v38 = vshll.u32 %v594_v29, 16 }
   0xa   :  { %v7326_v30 = vsel %vm13561_vm3, %v632_v24, %v636_v20  ;;  %v1126_v36 = vrot.slane %v7336_v33, 1  ;;  %v653_v37 = vshll.u32 %v7332_v32, 16  ;;  %v646_v39 = vshll.u32 %v593_v28, 16 }
   0xb   :  { %13691 = vst [vmem:[#allocation5_spill] sm:$0xff] %v7326_v30  ;;  %998 = vrot.lane.b32.xlu0 %v7326_v30, %s7229_s16  ;;  %1282 = vrot.lane.b32.xlu1 %v7332_v32, %s7230_s17  ;;  %v1129_v40 = vrot.slane %v7332_v32, 1  ;;  %v651_v41 = vshrl.u32 %v7332_v32, 16  ;;  %v639_v42 = vshrl.u32 %v7336_v33, 16  ;;  %v641_v43 = vshll.u32 %v7336_v33, 16 }
   0xc   :  { %v1128_v44 = vsel %vm13562_vm4, %v1126_v36, %v1127_v31  ;;  %v655_v45 = vrot.slane %v653_v37, 1  ;;  %v7349_v46 = vsel %vm7294_vm2, 0, %v286_v35  ;;  %v660_v48 = vrot.slane %v658_v38, 1  ;;  %v7190_v37 = vld [vmem:[%s13473_s0 + $0x28] sm:$0xff]  }
   0xd   :  { %v643_v47 = vrot.slane %v641_v43, 1  ;;  %v648_v49 = vrot.slane %v646_v39, 1  ;;  %v1131_v50 = vsel %vm13562_vm4, %v1129_v40, %v1130_v34  ;;  %v665_v53 = vshll.u32 %v7349_v46, 16 }
   0xe   :  { %v656_v51 = vor.u32 %v655_v45, %v651_v41  ;;  %v595_v54 = vsel %vm7294_vm2, %v283_v25, 0  ;;  %v663_v57 = vshrl.u32 %v7349_v46, 16  ;;  %v290_v0 = vrot.slane %v288_v61, 7 }
   0xf   :  { %1280 = vrot.lane.b32.xlu0 %v7336_v33, %s7230_s17  ;;  %1218 = vrot.lane.b32.xlu1 %v1128_v44, %s7228_s15  ;;  %v644_v52 = vor.u32 %v643_v47, %v639_v42  ;;  %v667_v59 = vrot.slane %v665_v53, 1  ;;  %v670_v60 = vshll.u32 %v595_v54, 16  ;;  %v291_v1 = vshll.u32 %v7188_v55, 16 }
  0x10   :  { %v661_v58 = vsel %vm13561_vm3, %v656_v51, %v660_v48  ;;  %v295_v8 = vshrl.u32 %v7189_v6, 16  ;;  %v1132_v9 = vrot.slane %v7349_v46, 1  ;;  %v1133_v10 = vrot.slane %v595_v54, 1 }
  0x11   :  { %v649_v56 = vsel %vm13561_vm3, %v644_v52, %v648_v49  ;;  %v668_v62 = vor.u32 %v667_v59, %v663_v57  ;;  %v672_v63 = vrot.slane %v670_v60, 1  ;;  %v293_v5 = vor.u32 %v291_v1, %v290_v0 }
  0x12   :  { %v596_v11 = vsel %vm7294_vm2, %v290_v0, 0  ;;  %v297_v13 = vrot.slane %v295_v8, 7  ;;  %v298_v14 = vshll.u32 %v7189_v6, 16  ;;  %v1134_v17 = vsel %vm13562_vm4, %v1132_v9, %v1133_v10 }
  0x13   :  { %1440 = vrot.lane.b32.xlu0 %v1128_v44, %s7231_s20  ;;  %1442 = vrot.lane.b32.xlu1 %v1131_v50, %s7231_s20  ;;  %v673_v3 = vsel %vm13561_vm3, %v668_v62, %v672_v63  ;;  %v7380_v7 = vsel %vm7294_vm2, 0, %v293_v5  ;;  %v682_v15 = vshll.u32 %v596_v11, 16  ;;  %vm13560_vm5 = vcmask 1043456  }
  0x14   :  { %v677_v12 = vshll.u32 %v7380_v7, 16  ;;  %v675_v18 = vshrl.u32 %v7380_v7, 16  ;;  %v300_v20 = vor.u32 %v298_v14, %v297_v13  ;;  %vm2281_vm6 = vcmask 1044480  }
  0x15   :  { %v684_v21 = vrot.slane %v682_v15, 1  ;;  %v7236_v25 = vmov 65535   ;;  %v1135_v31 = vrot.slane %v7380_v7, 1  ;;  %v1136_v34 = vrot.slane %v596_v11, 1  ;;  %v7192_v11 = vld [vmem:[%s13473_s0 + $0x38] sm:$0xff]  }
  0x16   :  { %v679_v19 = vrot.slane %v677_v12, 1  ;;  %v7399_v24 = vsel %vm7294_vm2, 0, %v300_v20  ;;  %v2282_v26 = vsel %vm13560_vm5, 4294967295, %v7236_v25  ;;  %v597_v36 = vsel %vm7294_vm2, %v297_v13, 0  ;;  %v7193_v25 = vld [vmem:[%s13473_s0 + $0x40] sm:$0xff]  }
  0x17   :  { %1000 = vrot.lane.b32.xlu0 %v649_v56, %s7229_s16  ;;  %1370 = vrot.lane.b32.xlu1 %v661_v58, %s7232_s21  ;;  %v2283_v27 = vsel %vm2281_vm6, %v2282_v26, 0  ;;  %v689_v35 = vshll.u32 %v7399_v24, 16  ;;  %v1137_v38 = vsel %vm13562_vm4, %v1135_v31, %v1136_v34  ;;  %v687_v39 = vshrl.u32 %v7399_v24, 16 }
  0x18   :  { %v680_v23 = vor.u32 %v679_v19, %v675_v18  ;;  %v2285_v28 = vand.u32 %v7195_v22, %v2283_v27  ;;  %v694_v41 = vshll.u32 %v597_v36, 16  ;;  %v302_v42 = vshrl.u32 %v7190_v37, 16 }
  0x19   :  { %v691_v40 = vrot.slane %v689_v35, 1  ;;  %v305_v47 = vshll.u32 %v7190_v37, 16  ;;  %v1138_v53 = vrot.slane %v7399_v24, 1  ;;  %v1139_v54 = vrot.slane %v597_v36, 1 }
  0x1a   :  { %v685_v29 = vsel %vm13561_vm3, %v680_v23, %v684_v21  ;;  %7016 = vmatprep.subr.bf16.mxu0 %v2285_v28  ;;  %v696_v44 = vrot.slane %v694_v41, 1  ;;  %v304_v45 = vrot.slane %v302_v42, 7  ;;  %v319_v21 = vshll.u32 %v7192_v11, 16 }
  0x1b   :  { %1368 = vrot.lane.b32.xlu0 %v649_v56, %s7232_s21  ;;  %1506 = vrot.lane.b32.xlu1 %v7349_v46, %s7233_s22  ;;  %v692_v43 = vor.u32 %v691_v40, %v687_v39  ;;  %v1140_v59 = vsel %vm13562_vm4, %v1138_v53, %v1139_v54  ;;  %v323_v27 = vshrl.u32 %v7193_v25, 16  ;;  %v326_v36 = vshll.u32 %v7193_v25, 16 }
  0x1c   :  { %7017 = vmatpush3.bf16.msra.mxu0 %v2285_v28  ;;  %v307_v49 = vor.u32 %v305_v47, %v304_v45  ;;  %v598_v56 = vsel %vm7294_vm2, %v304_v45, 0  ;;  %vm1690_vm7 = vcmask 7168   ;;  %vm1753_vm8 = vcmask 15360  }
  0x1d   :  { %v697_v48 = vsel %vm13561_vm3, %v692_v43, %v696_v44  ;;  %v706_v62 = vshll.u32 %v598_v56, 16  ;;  %v1142_v8 = vrot.slane %v598_v56, 1  ;;  %v325_v35 = vrot.slane %v323_v27, 7 }
  0x1e   :  { %v7432_v51 = vsel %vm7294_vm2, 0, %v307_v49  ;;  %vm1816_vm9 = vcmask 23552   ;;  %vm1881_vm10 = vcmask 31744   ;;  %vm1946_vm11 = vcmask 39936  }
  0x1f   :  { %1504 = vrot.lane.b32.xlu0 %v7332_v32, %s7233_s22  ;;  %1568 = vrot.lane.b32.xlu1 %v673_v3, %s7234_s25  ;;  %v701_v55 = vshll.u32 %v7432_v51, 16  ;;  %v699_v60 = vshrl.u32 %v7432_v51, 16  ;;  %v708_v1 = vrot.slane %v706_v62, 1  ;;  %v1141_v6 = vrot.slane %v7432_v51, 1 }
  0x20   :  { %v328_v41 = vor.u32 %v326_v36, %v325_v35  ;;  %vm2011_vm12 = vcmask 48128   ;;  %vm13556_vm13 = vcmask 64512   ;;  %vm2075_vm14 = vcmask 56320  }
  0x21   :  { %v703_v61 = vrot.slane %v701_v55, 1  ;;  %v1143_v12 = vsel %vm13562_vm4, %v1141_v6, %v1142_v8  ;;  %v7196_v6 = vld [vmem:[%s13473_s0 + $0x50] sm:$0xff]   ;;  %vm2215_vm15 = vcmask 72704  }
  0x22   :  { %v7496_v44 = vsel %vm7294_vm2, 0, %v328_v41 }
  0x23   :  { %1566 = vrot.lane.b32.xlu0 %v661_v58, %s7234_s25  ;;  %1002 = vrot.lane.b32.xlu1 %v661_v58, %s7229_s16  ;;  %v704_v0 = vor.u32 %v703_v61, %v699_v60  ;;  %v737_v49 = vshll.u32 %v7496_v44, 16  ;;  %v735_v54 = vshrl.u32 %v7496_v44, 16 }
  0x25   :  { %v709_v5 = vsel %vm13561_vm3, %v704_v0, %v708_v1  ;;  %v739_v55 = vrot.slane %v737_v49, 1 }
  0x27   :  { %1628 = vrot.lane.b32.xlu0 %v1131_v50, %s7235_s26  ;;  %1004 = vrot.lane.b32.xlu1 %v673_v3, %s7229_s16 }
  0x2b   :  { %1630 = vrot.lane.b32.xlu0 %v1134_v17, %s7235_s26  ;;  %1222 = vrot.lane.b32.xlu1 %v1134_v17, %s7228_s15 }
  0x2f   :  { %1220 = vrot.lane.b32.xlu0 %v1131_v50, %s7228_s15  ;;  %1286 = vrot.lane.b32.xlu1 %v7380_v7, %s7230_s17  ;;  %v7191_v50 = vld [vmem:[%s13473_s0 + $0x30] sm:$0xff]  }
  0x30   :  { %v309_v52 = vshrl.u32 %v7191_v50, 16  ;;  %v312_v58 = vshll.u32 %v7191_v50, 16  ;;  %v601_v50 = vsel %vm7294_vm2, %v325_v35, 0 }
  0x31   :  { %v742_v56 = vshll.u32 %v601_v50, 16 }
  0x32   :  { %v311_v57 = vrot.slane %v309_v52, 7  ;;  %v7194_v52 = vld [vmem:[%s13473_s0 + $0x48] sm:$0xff]  }
  0x33   :  { %1284 = vrot.lane.b32.xlu0 %v7349_v46, %s7230_s17  ;;  %1374 = vrot.lane.b32.xlu1 %v685_v29, %s7232_s21  ;;  %v744_v60 = vrot.slane %v742_v56, 1  ;;  %v333_v62 = vshll.u32 %v7194_v52, 16 }
  0x34   :  { %v314_v63 = vor.u32 %v312_v58, %v311_v57  ;;  %v599_v10 = vsel %vm7294_vm2, %v311_v57, 0  ;;  %v330_v57 = vshrl.u32 %v7194_v52, 16 }
  0x35   :  { %v718_v15 = vshll.u32 %v599_v10, 16 }
  0x36   :  { %v332_v61 = vrot.slane %v330_v57, 7 }
  0x37   :  { %1372 = vrot.lane.b32.xlu0 %v673_v3, %s7232_s21  ;;  %1446 = vrot.lane.b32.xlu1 %v1137_v38, %s7231_s20  ;;  %v7448_v3 = vsel %vm7294_vm2, 0, %v314_v63  ;;  %v720_v19 = vrot.slane %v718_v15, 1 }
  0x38   :  { %v713_v9 = vshll.u32 %v7448_v3, 16  ;;  %v711_v13 = vshrl.u32 %v7448_v3, 16  ;;  %v1144_v28 = vrot.slane %v7448_v3, 1 }
  0x3a   :  { %v715_v14 = vrot.slane %v713_v9, 1 }
  0x3b   :  { %1444 = vrot.lane.b32.xlu0 %v1134_v17, %s7231_s20  ;;  %1510 = vrot.lane.b32.xlu1 %v7399_v24, %s7233_s22  ;;  %v316_v17 = vshrl.u32 %v7192_v11, 16  ;;  %v337_v11 = vshrl.u32 %v7196_v6, 16 }
  0x3c   :  { %v716_v18 = vor.u32 %v715_v14, %v711_v13  ;;  %v1151_v13 = vrot.slane %v601_v50, 1  ;;  %v7197_v50 = vld [vmem:[%s13473_s0 + $0x58] sm:$0xff]  }
  0x3d   :  { %v318_v20 = vrot.slane %v316_v17, 7 }
  0x3e   :  { %v721_v22 = vsel %vm13561_vm3, %v716_v18, %v720_v19  ;;  %v602_v18 = vsel %vm7294_vm2, %v332_v61, 0  ;;  %v339_v19 = vrot.slane %v337_v11, 7 }
  0x3f   :  { %1508 = vrot.lane.b32.xlu0 %v7380_v7, %s7233_s22  ;;  %1572 = vrot.lane.b32.xlu1 %v697_v48, %s7234_s25  ;;  %v321_v23 = vor.u32 %v319_v21, %v318_v20  ;;  %v600_v34 = vsel %vm7294_vm2, %v318_v20, 0  ;;  %v340_v20 = vshll.u32 %v7196_v6, 16  ;;  %v754_v27 = vshll.u32 %v602_v18, 16 }
  0x40   :  { %v730_v40 = vshll.u32 %v600_v34, 16  ;;  %v7566_v49 = vsel %vm7294_vm2, %v339_v19, 0 }
  0x41   :  { %v7480_v26 = vsel %vm7294_vm2, 0, %v321_v23  ;;  %v756_v36 = vrot.slane %v754_v27, 1 }
  0x42   :  { %v725_v31 = vshll.u32 %v7480_v26, 16  ;;  %v732_v43 = vrot.slane %v730_v40, 1  ;;  %v1147_v47 = vrot.slane %v7480_v26, 1 }
  0x43   :  { %1570 = vrot.lane.b32.xlu0 %v685_v29, %s7234_s25  ;;  %1006 = vrot.lane.b32.xlu1 %v685_v29, %s7229_s16  ;;  %v1145_v29 = vrot.slane %v599_v10, 1 }
  0x44   :  { %v727_v39 = vrot.slane %v725_v31, 1 }
  0x45   :  { %v1146_v37 = vsel %vm13562_vm4, %v1144_v28, %v1145_v29  ;;  %v342_v29 = vor.u32 %v340_v20, %v339_v19 }
  0x47   :  { %1632 = vrot.lane.b32.xlu0 %v1137_v38, %s7235_s26  ;;  %1008 = vrot.lane.b32.xlu1 %v697_v48, %s7229_s16 }
  0x4b   :  { %1634 = vrot.lane.b32.xlu0 %v1140_v59, %s7235_s26  ;;  %1226 = vrot.lane.b32.xlu1 %v1140_v59, %s7228_s15 }
  0x4f   :  { %1224 = vrot.lane.b32.xlu0 %v1137_v38, %s7228_s15  ;;  %1290 = vrot.lane.b32.xlu1 %v7432_v51, %s7230_s17  ;;  %v723_v38 = vshrl.u32 %v7480_v26, 16 }
  0x51   :  { %v728_v42 = vor.u32 %v727_v39, %v723_v38  ;;  %v7550_v38 = vsel %vm7294_vm2, 0, %v342_v29 }
  0x52   :  { %v759_v57 = vshrl.u32 %v7550_v38, 16 }
  0x53   :  { %1288 = vrot.lane.b32.xlu0 %v7399_v24, %s7230_s17  ;;  %1378 = vrot.lane.b32.xlu1 %v709_v5, %s7232_s21  ;;  %v733_v45 = vsel %vm13561_vm3, %v728_v42, %v732_v43  ;;  %v1154_v43 = vrot.slane %v602_v18, 1 }
  0x57   :  { %1376 = vrot.lane.b32.xlu0 %v697_v48, %s7232_s21  ;;  %1450 = vrot.lane.b32.xlu1 %v1143_v12, %s7231_s20  ;;  %v1148_v48 = vrot.slane %v600_v34, 1 }
  0x59   :  { %v1149_v53 = vsel %vm13562_vm4, %v1147_v47, %v1148_v48 }
  0x5b   :  { %1448 = vrot.lane.b32.xlu0 %v1140_v59, %s7231_s20  ;;  %1514 = vrot.lane.b32.xlu1 %v7448_v3, %s7233_s22  ;;  %v740_v59 = vor.u32 %v739_v55, %v735_v54 }
  0x5d   :  { %v7520_v0 = vsel %vm13561_vm3, %v740_v59, %v744_v60  ;;  %v766_v59 = vshll.u32 %v7566_v49, 16 }
  0x5f   :  { %1512 = vrot.lane.b32.xlu0 %v7432_v51, %s7233_s22  ;;  %1576 = vrot.lane.b32.xlu1 %v721_v22, %s7234_s25  ;;  %v768_v11 = vrot.slane %v766_v59, 1 }
  0x63   :  { %1574 = vrot.lane.b32.xlu0 %v709_v5, %s7234_s25  ;;  %1010 = vrot.lane.b32.xlu1 %v709_v5, %s7229_s16  ;;  %v335_v5 = vor.u32 %v333_v62, %v332_v61  ;;  %v344_v62 = vshrl.u32 %v7197_v50, 16 }
  0x65   :  { %v7531_v10 = vsel %vm7294_vm2, 0, %v335_v5 }
  0x66   :  { %v749_v15 = vshll.u32 %v7531_v10, 16  ;;  %v747_v23 = vshrl.u32 %v7531_v10, 16  ;;  %v1153_v42 = vrot.slane %v7531_v10, 1 }
  0x67   :  { %1636 = vrot.lane.b32.xlu0 %v1143_v12, %s7235_s26  ;;  %1012 = vrot.lane.b32.xlu1 %v721_v22, %s7229_s16 }
  0x68   :  { %v751_v25 = vrot.slane %v749_v15, 1  ;;  %v7579_v56 = vsel %vm13562_vm4, %v1153_v42, %v1154_v43 }
  0x6a   :  { %v752_v35 = vor.u32 %v751_v25, %v747_v23 }
  0x6b   :  { %1638 = vrot.lane.b32.xlu0 %v1146_v37, %s7235_s26  ;;  %1230 = vrot.lane.b32.xlu1 %v1146_v37, %s7228_s15 }
  0x6c   :  { %v757_v41 = vsel %vm13561_vm3, %v752_v35, %v756_v36 }
  0x6f   :  { %1228 = vrot.lane.b32.xlu0 %v1143_v12, %s7228_s15  ;;  %1294 = vrot.lane.b32.xlu1 %v7480_v26, %s7230_s17  ;;  %v1150_v12 = vrot.slane %v7496_v44, 1 }
  0x71   :  { %v1152_v21 = vsel %vm13562_vm4, %v1150_v12, %v1151_v13 }
  0x73   :  { %1292 = vrot.lane.b32.xlu0 %v7448_v3, %s7230_s17  ;;  %1382 = vrot.lane.b32.xlu1 %v733_v45, %s7232_s21 }
  0x77   :  { %1380 = vrot.lane.b32.xlu0 %v721_v22, %s7232_s21  ;;  %1454 = vrot.lane.b32.xlu1 %v1149_v53, %s7231_s20 }
  0x79   :  { %v1217_v58 = vpop.permute.xlu1 %1216 }
  0x7b   :  { %1452 = vrot.lane.b32.xlu0 %v1146_v37, %s7231_s20  ;;  %1518 = vrot.lane.b32.xlu1 %v7496_v44, %s7233_s22 }
  0x7d   :  { %v999_v63 = vpop.permute.xlu0 %998  ;;  %v1283_v1 = vpop.permute.xlu1 %1282 }
  0x7e   :  { %v1692_v39 = vsel %vm1690_vm7, %v7303_v4, %v999_v63 }
  0x7f   :  { %1516 = vrot.lane.b32.xlu0 %v7480_v26, %s7233_s22  ;;  %1580 = vrot.lane.b32.xlu1 %v7520_v0, %s7234_s25  ;;  %v7562_v47 = vsel %vm1753_vm8, %v1692_v39, %v1217_v58 }
  0x81   :  { %v1281_v8 = vpop.permute.xlu0 %1280  ;;  %v1219_v9 = vpop.permute.xlu1 %1218 }
  0x82   :  { %v1818_v52 = vsel %vm1816_vm9, %v7562_v47, %v1281_v8 }
  0x83   :  { %1578 = vrot.lane.b32.xlu0 %v733_v45, %s7234_s25  ;;  %1014 = vrot.lane.b32.xlu1 %v733_v45, %s7229_s16  ;;  %v761_v45 = vshll.u32 %v7550_v38, 16 }
  0x85   :  { %v1441_v14 = vpop.permute.xlu0 %1440  ;;  %v1443_v17 = vpop.permute.xlu1 %1442  ;;  %v763_v58 = vrot.slane %v761_v45, 1 }
  0x87   :  { %1640 = vrot.lane.b32.xlu0 %v1149_v53, %s7235_s26  ;;  %1016 = vrot.lane.b32.xlu1 %v7520_v0, %s7229_s16 }
  0x89   :  { %v1001_v22 = vpop.permute.xlu0 %1000  ;;  %v1371_v28 = vpop.permute.xlu1 %1370 }
  0x8a   :  { %v1694_v31 = vsel %vm1690_vm7, %v7336_v33, %v1001_v22 }
  0x8b   :  { %1642 = vrot.lane.b32.xlu0 %v1152_v21, %s7235_s26  ;;  %1234 = vrot.lane.b32.xlu1 %v1152_v21, %s7228_s15  ;;  %v1757_v40 = vsel %vm1753_vm8, %v1694_v31, %v1219_v9  ;;  %v764_v9 = vor.u32 %v763_v58, %v759_v57  ;;  %v1156_v31 = vrot.slane %v7550_v38, 1 }
  0x8d   :  { %v1369_v34 = vpop.permute.xlu0 %1368  ;;  %v1507_v37 = vpop.permute.xlu1 %1506  ;;  %v7602_v19 = vsel %vm13561_vm3, %v764_v9, %v768_v11 }
  0x8e   :  { %v1883_v54 = vsel %vm1881_vm10, %v1818_v52, %v1369_v34  ;;  %v1157_v34 = vrot.slane %v7566_v49, 1 }
  0x8f   :  { %1232 = vrot.lane.b32.xlu0 %v1149_v53, %s7228_s15  ;;  %1298 = vrot.lane.b32.xlu1 %v7531_v10, %s7230_s17  ;;  %v1820_v53 = vsel %vm1816_vm9, %v1757_v40, %v1283_v1  ;;  %v1948_v63 = vsel %vm1946_vm11, %v1883_v54, %v1441_v14  ;;  %v346_v14 = vrot.slane %v344_v62, 7 }
  0x90   :  { %v1885_v60 = vsel %vm1881_vm10, %v1820_v53, %v1371_v28 }
  0x91   :  { %v1505_v33 = vpop.permute.xlu0 %1504  ;;  %v1569_v48 = vpop.permute.xlu1 %1568  ;;  %v1950_v5 = vsel %vm1946_vm11, %v1885_v60, %v1443_v17  ;;  %v604_v39 = vsel %vm7294_vm2, %v346_v14, 0 }
  0x92   :  { %v2013_v1 = vsel %vm2011_vm12, %v1948_v63, %v1505_v33  ;;  %v2015_v15 = vsel %vm2011_vm12, %v1950_v5, %v1507_v37  ;;  %v1160_v59 = vrot.slane %v604_v39, 1 }
  0x93   :  { %1296 = vrot.lane.b32.xlu0 %v7496_v44, %s7230_s17  ;;  %1386 = vrot.lane.b32.xlu1 %v757_v41, %s7232_s21  ;;  %v2079_v17 = vsel %vm2075_vm14, %v2015_v15, %v1569_v48  ;;  %v778_v48 = vshll.u32 %v604_v39, 16 }
  0x95   :  { %v1567_v55 = vpop.permute.xlu0 %1566  ;;  %v7584_v61 = vpop.permute.xlu1 %1002  ;;  %v780_v54 = vrot.slane %v778_v48, 1 }
  0x96   :  { %v2077_v6 = vsel %vm2075_vm14, %v2013_v1, %v1567_v55 }
  0x97   :  { %1384 = vrot.lane.b32.xlu0 %v7520_v0, %s7232_s21  ;;  %1458 = vrot.lane.b32.xlu1 %v7579_v56, %s7231_s20  ;;  %v347_v0 = vshll.u32 %v7197_v50, 16 }
  0x99   :  { %v1629_v8 = vpop.permute.xlu0 %1628  ;;  %v1005_v12 = vpop.permute.xlu1 %1004  ;;  %v349_v23 = vor.u32 %v347_v0, %v346_v14 }
  0x9a   :  { %v2141_v13 = vsel %vm13556_vm13, %v2077_v6, %v1629_v8  ;;  %v1696_v6 = vsel %vm1690_vm7, %v7332_v32, %v7584_v61  ;;  %v1698_v8 = vsel %vm1690_vm7, %v7349_v46, %v1005_v12 }
  0x9b   :  { %1456 = vrot.lane.b32.xlu0 %v1152_v21, %s7231_s20  ;;  %7018 = vmatprep.mubr.msk.bf16.mxu0 %vm2215_vm15, %v2141_v13  ;;  %v7198_v21 = vld [vmem:[%s13473_s0 + $0x60] sm:$0xff]   ;;  %v7615_v28 = vsel %vm7294_vm2, 0, %v349_v23 }
  0x9c   :  { %1522 = vrot.lane.b32.xlu1 %v7550_v38, %s7233_s22  ;;  %v351_v29 = vshrl.u32 %v7198_v21, 16  ;;  %v773_v36 = vshll.u32 %v7615_v28, 16  ;;  %v354_v33 = vshll.u32 %v7198_v21, 16  ;;  %v771_v43 = vshrl.u32 %v7615_v28, 16 }
  0x9d   :  { %v1631_v18 = vpop.permute.xlu0 %1630  ;;  %v1223_v20 = vpop.permute.xlu1 %1222  ;;  %v1159_v58 = vrot.slane %v7615_v28, 1 }
  0x9e   :  { %v2143_v22 = vsel %vm13556_vm13, %v2079_v17, %v1631_v18  ;;  %v353_v40 = vrot.slane %v351_v29, 7  ;;  %v775_v45 = vrot.slane %v773_v36, 1  ;;  %v1761_v46 = vsel %vm1753_vm8, %v1698_v8, %v1223_v20 }
  0x9f   :  { %1520 = vrot.lane.b32.xlu0 %v7531_v10, %s7233_s22  ;;  %7019 = vmatmul.mubr.msk.bf16.vlgmr.msra.gmra.mrb[0].mxu0 %vm2215_vm15, %v2143_v22  ;;  %v7660_v11 = vsel %vm13562_vm4, %v1159_v58, %v1160_v59 }
  0xa0   :  { %1584 = vrot.lane.b32.xlu1 %v7602_v19, %s7234_s25  ;;  %v356_v50 = vor.u32 %v354_v33, %v353_v40  ;;  %v776_v53 = vor.u32 %v775_v45, %v771_v43  ;;  %v7645_v5 = vsel %vm7294_vm2, %v353_v40, 0 }
  0xa1   :  { %v1221_v25 = vpop.permute.xlu0 %1220  ;;  %v1287_v27 = vpop.permute.xlu1 %1286  ;;  %v790_v32 = vshll.u32 %v7645_v5, 16 }
  0xa2   :  { %v7634_v57 = vsel %vm7294_vm2, 0, %v356_v50  ;;  %v781_v62 = vsel %vm13561_vm3, %v776_v53, %v780_v54  ;;  %v1759_v9 = vsel %vm1753_vm8, %v1696_v6, %v1221_v25  ;;  %v1824_v23 = vsel %vm1816_vm9, %v1761_v46, %v1287_v27 }
  0xa3   :  { %1582 = vrot.lane.b32.xlu0 %v757_v41, %s7234_s25  ;;  %v785_v63 = vshll.u32 %v7634_v57, 16  ;;  %v783_v0 = vshrl.u32 %v7634_v57, 16  ;;  %v792_v29 = vrot.slane %v790_v32, 1  ;;  %v1162_v53 = vrot.slane %v7634_v57, 1 }
  0xa4   :  { %1018 = vrot.lane.b32.xlu1 %v757_v41, %s7229_s16  ;;  %v1158_v41 = vsel %vm13562_vm4, %v1156_v31, %v1157_v34  ;;  %v1163_v54 = vrot.slane %v7645_v5, 1 }
  0xa5   :  { %v1285_v35 = vpop.permute.xlu0 %1284  ;;  %v1375_v37 = vpop.permute.xlu1 %1374  ;;  %v787_v15 = vrot.slane %v785_v63, 1 }
  0xa6   :  { %v1822_v13 = vsel %vm1816_vm9, %v1759_v9, %v1285_v35  ;;  %v1889_v31 = vsel %vm1881_vm10, %v1824_v23, %v1375_v37 }
  0xa7   :  { %1644 = vrot.lane.b32.xlu0 %v7579_v56, %s7235_s26  ;;  %v788_v25 = vor.u32 %v787_v15, %v783_v0 }
  0xa8   :  { %1020 = vrot.lane.b32.xlu1 %v7602_v19, %s7229_s16 }
  0xa9   :  { %v1373_v42 = vpop.permute.xlu0 %1372  ;;  %v1447_v49 = vpop.permute.xlu1 %1446  ;;  %v7687_v37 = vsel %vm13561_vm3, %v788_v25, %v792_v29 }
  0xaa   :  { %v1887_v61 = vsel %vm1881_vm10, %v1822_v13, %v1373_v42  ;;  %v7200_v42 = vld [vmem:[%s13473_s0 + $0x70] sm:$0xff]  }
  0xab   :  { %1646 = vrot.lane.b32.xlu0 %v1158_v41, %s7235_s26 }
  0xac   :  { %1238 = vrot.lane.b32.xlu1 %v1158_v41, %s7228_s15 }
  0xad   :  { %v1445_v52 = vpop.permute.xlu0 %1444  ;;  %v1511_v55 = vpop.permute.xlu1 %1510 }
  0xae   :  { %v1952_v18 = vsel %vm1946_vm11, %v1887_v61, %v1445_v52 }
  0xaf   :  { %1236 = vrot.lane.b32.xlu0 %v7579_v56, %s7228_s15  ;;  %v7199_v56 = vld [vmem:[%s13473_s0 + $0x68] sm:$0xff]  }
  0xb0   :  { %1302 = vrot.lane.b32.xlu1 %v7615_v28, %s7230_s17  ;;  %v358_v17 = vshrl.u32 %v7199_v56, 16  ;;  %v361_v39 = vshll.u32 %v7199_v56, 16 }
  0xb1   :  { %v1509_v60 = vpop.permute.xlu0 %1508  ;;  %v1573_v1 = vpop.permute.xlu1 %1572 }
  0xb2   :  { %v2017_v22 = vsel %vm2011_vm12, %v1952_v18, %v1509_v60  ;;  %v360_v36 = vrot.slane %v358_v17, 7  ;;  %v368_v60 = vshll.u32 %v7200_v42, 16 }
  0xb3   :  { %1300 = vrot.lane.b32.xlu0 %v7550_v38, %s7230_s17 }
  0xb4   :  { %1390 = vrot.lane.b32.xlu1 %v781_v62, %s7232_s21  ;;  %v363_v45 = vor.u32 %v361_v39, %v360_v36 }
  0xb5   :  { %v1571_v14 = vpop.permute.xlu0 %1570  ;;  %v7667_v12 = vpop.permute.xlu1 %1006 }
  0xb6   :  { %v2081_v21 = vsel %vm2075_vm14, %v2017_v22, %v1571_v14  ;;  %v7700_v52 = vsel %vm7294_vm2, 0, %v363_v45 }
  0xb7   :  { %1388 = vrot.lane.b32.xlu0 %v7602_v19, %s7232_s21  ;;  %v1954_v19 = vsel %vm1946_vm11, %v1889_v31, %v1447_v49  ;;  %v365_v49 = vshrl.u32 %v7200_v42, 16  ;;  %v797_v58 = vshll.u32 %v7700_v52, 16  ;;  %v795_v5 = vshrl.u32 %v7700_v52, 16 }
  0xb8   :  { %1462 = vrot.lane.b32.xlu1 %v7660_v11, %s7231_s20  ;;  %v2019_v27 = vsel %vm2011_vm12, %v1954_v19, %v1511_v55  ;;  %v1165_v22 = vrot.slane %v7700_v52, 1 }
  0xb9   :  { %v1633_v20 = vpop.permute.xlu0 %1632  ;;  %v1009_v34 = vpop.permute.xlu1 %1008  ;;  %v2083_v40 = vsel %vm2075_vm14, %v2019_v27, %v1573_v1  ;;  %v367_v59 = vrot.slane %v365_v49, 7  ;;  %v606_v1 = vsel %vm7294_vm2, %v360_v36, 0  ;;  %v799_v6 = vrot.slane %v797_v58, 1 }
  0xba   :  { %v2145_v35 = vsel %vm13556_vm13, %v2081_v21, %v1633_v20  ;;  %v802_v8 = vshll.u32 %v606_v1, 16  ;;  %v1166_v23 = vrot.slane %v606_v1, 1  ;;  %v7201_v20 = vld [vmem:[%s13473_s0 + $0x78] sm:$0xff]   ;;  %v1702_v29 = vsel %vm1690_vm7, %v7399_v24, %v1009_v34 }
  0xbb   :  { %1460 = vrot.lane.b32.xlu0 %v1158_v41, %s7231_s20  ;;  %7022 = vmatprep.mubr.msk.bf16.mxu0 %vm2215_vm15, %v2145_v35  ;;  %v370_v9 = vor.u32 %v368_v60, %v367_v59  ;;  %v800_v0 = vor.u32 %v799_v6, %v795_v5  ;;  %v607_v21 = vsel %vm7294_vm2, %v367_v59, 0 }
  0xbc   :  { %1526 = vrot.lane.b32.xlu1 %v7634_v57, %s7233_s22  ;;  %v804_v15 = vrot.slane %v802_v8, 1  ;;  %v814_v39 = vshll.u32 %v607_v21, 16 }
  0xbd   :  { %v1635_v33 = vpop.permute.xlu0 %1634  ;;  %v1227_v43 = vpop.permute.xlu1 %1226  ;;  %v7719_v32 = vsel %vm7294_vm2, 0, %v370_v9 }
  0xbe   :  { %v2147_v41 = vsel %vm13556_vm13, %v2083_v40, %v1635_v33  ;;  %v809_v61 = vshll.u32 %v7719_v32, 16  ;;  %v805_v18 = vsel %vm13561_vm3, %v800_v0, %v804_v15  ;;  %v807_v35 = vshrl.u32 %v7719_v32, 16 }
  0xbf   :  { %1524 = vrot.lane.b32.xlu0 %v7615_v28, %s7233_s22  ;;  %7023 = vmatmul.mubr.msk.bf16.gmra.mrb[4].mxu0 %vm2215_vm15, %v2147_v41  ;;  %v1167_v40 = vsel %vm13562_vm4, %v1165_v22, %v1166_v23  ;;  %v816_v45 = vrot.slane %v814_v39, 1  ;;  %v7203_v39 = vld [vmem:[%s13473_s0 + $0x88] sm:$0xff]  }
  0xc0   :  { %1588 = vrot.lane.b32.xlu1 %v7687_v37, %s7234_s25  ;;  %v811_v36 = vrot.slane %v809_v61, 1 }
  0xc1   :  { %v1225_v48 = vpop.permute.xlu0 %1224  ;;  %v1291_v50 = vpop.permute.xlu1 %1290 }
  0xc2   :  { %v812_v41 = vor.u32 %v811_v36, %v807_v35 }
  0xc3   :  { %1586 = vrot.lane.b32.xlu0 %v781_v62, %s7234_s25 }
  0xc4   :  { %1022 = vrot.lane.b32.xlu1 %v781_v62, %s7229_s16  ;;  %v1164_v62 = vsel %vm13562_vm4, %v1162_v53, %v1163_v54  ;;  %v375_v54 = vshll.u32 %v7201_v20, 16 }
  0xc5   :  { %v1289_v55 = vpop.permute.xlu0 %1288  ;;  %v1379_v63 = vpop.permute.xlu1 %1378 }
  0xc7   :  { %1648 = vrot.lane.b32.xlu0 %v7660_v11, %s7235_s26 }
  0xc8   :  { %1024 = vrot.lane.b32.xlu1 %v7687_v37, %s7229_s16 }
  0xc9   :  { %v1377_v56 = vpop.permute.xlu0 %1376  ;;  %v1451_v13 = vpop.permute.xlu1 %1450 }
  0xcb   :  { %1650 = vrot.lane.b32.xlu0 %v1164_v62, %s7235_s26 }
  0xcc   :  { %1242 = vrot.lane.b32.xlu1 %v1164_v62, %s7228_s15 }
  0xcd   :  { %v1449_v14 = vpop.permute.xlu0 %1448  ;;  %v1515_v46 = vpop.permute.xlu1 %1514 }
  0xcf   :  { %1240 = vrot.lane.b32.xlu0 %v7660_v11, %s7228_s15  ;;  %v1700_v11 = vsel %vm1690_vm7, %v7380_v7, %v7667_v12  ;;  %v372_v7 = vshrl.u32 %v7201_v20, 16  ;;  %v1765_v12 = vsel %vm1753_vm8, %v1702_v29, %v1227_v43 }
  0xd0   :  { %1306 = vrot.lane.b32.xlu1 %v7700_v52, %s7230_s17  ;;  %v1763_v31 = vsel %vm1753_vm8, %v1700_v11, %v1225_v48  ;;  %v1828_v48 = vsel %vm1816_vm9, %v1765_v12, %v1291_v50 }
  0xd1   :  { %v1513_v17 = vpop.permute.xlu0 %1512  ;;  %v1577_v25 = vpop.permute.xlu1 %1576  ;;  %v1826_v19 = vsel %vm1816_vm9, %v1763_v31, %v1289_v55  ;;  %v374_v53 = vrot.slane %v372_v7, 7  ;;  %v1893_v55 = vsel %vm1881_vm10, %v1828_v48, %v1379_v63 }
  0xd2   :  { %v1891_v24 = vsel %vm1881_vm10, %v1826_v19, %v1377_v56  ;;  %v817_v56 = vsel %vm13561_vm3, %v812_v41, %v816_v45  ;;  %v386_v41 = vshrl.u32 %v7203_v39, 16 }
  0xd3   :  { %1304 = vrot.lane.b32.xlu0 %v7634_v57, %s7230_s17  ;;  %v1956_v33 = vsel %vm1946_vm11, %v1891_v24, %v1449_v14  ;;  %v377_v63 = vor.u32 %v375_v54, %v374_v53  ;;  %v1169_v14 = vrot.slane %v607_v21, 1  ;;  %v7202_v21 = vld [vmem:[%s13473_s0 + $0x80] sm:$0xff]  }
  0xd4   :  { %1394 = vrot.lane.b32.xlu1 %v805_v18, %s7232_s21  ;;  %v2021_v42 = vsel %vm2011_vm12, %v1956_v33, %v1513_v17  ;;  %v379_v35 = vshrl.u32 %v7202_v21, 16  ;;  %v382_v33 = vshll.u32 %v7202_v21, 16 }
  0xd5   :  { %v1575_v27 = vpop.permute.xlu0 %1574  ;;  %v7747_v34 = vpop.permute.xlu1 %1010  ;;  %v7773_v8 = vsel %vm7294_vm2, 0, %v377_v63 }
  0xd6   :  { %v2085_v49 = vsel %vm2075_vm14, %v2021_v42, %v1575_v27  ;;  %v1347_v0 = vshll.u32 %v7773_v8, 16  ;;  %v1345_v22 = vshrl.u32 %v7773_v8, 16  ;;  %v1434_v7 = vrot.slane %v7773_v8, 1 }
  0xd7   :  { %1392 = vrot.lane.b32.xlu0 %v7687_v37, %s7232_s21  ;;  %v1958_v37 = vsel %vm1946_vm11, %v1893_v55, %v1451_v13  ;;  %v1168_v13 = vrot.slane %v7719_v32, 1  ;;  %v381_v24 = vrot.slane %v379_v35, 7  ;;  %v1704_v45 = vsel %vm1690_vm7, %v7432_v51, %v7747_v34 }
  0xd8   :  { %1466 = vrot.lane.b32.xlu1 %v1167_v40, %s7231_s20  ;;  %v2023_v60 = vsel %vm2011_vm12, %v1958_v37, %v1515_v46  ;;  %v608_v46 = vsel %vm7294_vm2, %v374_v53, 0  ;;  %v1349_v23 = vrot.slane %v1347_v0, 1 }
  0xd9   :  { %v1637_v43 = vpop.permute.xlu0 %1636  ;;  %v1013_v58 = vpop.permute.xlu1 %1012  ;;  %v2087_v50 = vsel %vm2075_vm14, %v2023_v60, %v1577_v25  ;;  %v1170_v17 = vsel %vm13562_vm4, %v1168_v13, %v1169_v14  ;;  %v1435_v12 = vrot.slane %v608_v46, 1  ;;  %v384_v54 = vor.u32 %v382_v33, %v381_v24  ;;  %v7204_v13 = vld [vmem:[%s13473_s0 + $0x90] sm:$0xff]  }
  0xda   :  { %v2149_v59 = vsel %vm13556_vm13, %v2085_v49, %v1637_v43  ;;  %v1350_v11 = vor.u32 %v1349_v23, %v1345_v22  ;;  %v609_v23 = vsel %vm7294_vm2, %v381_v24, 0 }
  0xdb   :  { %1464 = vrot.lane.b32.xlu0 %v1164_v62, %s7231_s20  ;;  %7026 = vmatprep.mubr.msk.bf16.mxu0 %vm2215_vm15, %v2149_v59  ;;  %v1436_v53 = vsel %vm13562_vm4, %v1434_v7, %v1435_v12  ;;  %v7821_v63 = vsel %vm7294_vm2, 0, %v384_v54 }
  0xdc   :  { %1530 = vrot.lane.b32.xlu1 %v7719_v32, %s7233_s22  ;;  %v821_v0 = vshll.u32 %v7821_v63, 16 }
  0xdd   :  { %v1639_v1 = vpop.permute.xlu0 %1638  ;;  %v1231_v5 = vpop.permute.xlu1 %1230 }
  0xde   :  { %v2151_v6 = vsel %vm13556_vm13, %v2087_v50, %v1639_v1  ;;  %v823_v21 = vrot.slane %v821_v0, 1 }
  0xdf   :  { %1528 = vrot.lane.b32.xlu0 %v7700_v52, %s7233_s22  ;;  %7027 = vmatmul.mubr.msk.bf16.gmra.mrb[8].mxu0 %vm2215_vm15, %v2151_v6 }
  0xe0   :  { %1592 = vrot.lane.b32.xlu1 %v817_v56, %s7234_s25 }
  0xe1   :  { %v1229_v62 = vpop.permute.xlu0 %1228  ;;  %v1295_v9 = vpop.permute.xlu1 %1294 }
  0xe2   :  { %v1767_v48 = vsel %vm1753_vm8, %v1704_v45, %v1229_v62 }
  0xe3   :  { %1590 = vrot.lane.b32.xlu0 %v805_v18, %s7234_s25 }
  0xe4   :  { %1026 = vrot.lane.b32.xlu1 %v805_v18, %s7229_s16  ;;  %v1352_v18 = vshll.u32 %v608_v46, 16 }
  0xe5   :  { %v1293_v15 = vpop.permute.xlu0 %1292  ;;  %v1383_v61 = vpop.permute.xlu1 %1382 }
  0xe6   :  { %v1354_v29 = vrot.slane %v1352_v18, 1  ;;  %v1830_v49 = vsel %vm1816_vm9, %v1767_v48, %v1293_v15  ;;  %v393_v18 = vshrl.u32 %v7204_v13, 16 }
  0xe7   :  { %1652 = vrot.lane.b32.xlu0 %v1167_v40, %s7235_s26 }
  0xe8   :  { %1028 = vrot.lane.b32.xlu1 %v817_v56, %s7229_s16  ;;  %v1355_v19 = vsel %vm13561_vm3, %v1350_v11, %v1354_v29  ;;  %v1171_v29 = vrot.slane %v7821_v63, 1 }
  0xe9   :  { %v1381_v20 = vpop.permute.xlu0 %1380  ;;  %v1455_v25 = vpop.permute.xlu1 %1454 }
  0xea   :  { %v1895_v51 = vsel %vm1881_vm10, %v1830_v49, %v1381_v20  ;;  %v819_v20 = vshrl.u32 %v7821_v63, 16 }
  0xeb   :  { %1654 = vrot.lane.b32.xlu0 %v1170_v17, %s7235_s26 }
  0xec   :  { %1246 = vrot.lane.b32.xlu1 %v1170_v17, %s7228_s15  ;;  %v824_v7 = vor.u32 %v823_v21, %v819_v20 }
  0xed   :  { %v1453_v31 = vpop.permute.xlu0 %1452  ;;  %v1519_v36 = vpop.permute.xlu1 %1518 }
  0xee   :  { %v1960_v59 = vsel %vm1946_vm11, %v1895_v51, %v1453_v31  ;;  %v1172_v31 = vrot.slane %v609_v23, 1 }
  0xef   :  { %1244 = vrot.lane.b32.xlu0 %v1167_v40, %s7228_s15  ;;  %v1706_v40 = vsel %vm1690_vm7, %v7448_v3, %v1013_v58  ;;  %v388_v3 = vrot.slane %v386_v41, 7  ;;  %v389_v58 = vshll.u32 %v7203_v39, 16 }
  0xf0   :  { %1310 = vrot.lane.b32.xlu1 %v7773_v8, %s7230_s17  ;;  %v1769_v55 = vsel %vm1753_vm8, %v1706_v40, %v1231_v5  ;;  %v1173_v33 = vsel %vm13562_vm4, %v1171_v29, %v1172_v31 }
  0xf1   :  { %v1517_v27 = vpop.permute.xlu0 %1516  ;;  %v1581_v42 = vpop.permute.xlu1 %1580  ;;  %v1832_v60 = vsel %vm1816_vm9, %v1769_v55, %v1295_v9  ;;  %v610_v39 = vsel %vm7294_vm2, %v388_v3, 0 }
  0xf2   :  { %v2025_v37 = vsel %vm2011_vm12, %v1960_v59, %v1517_v27  ;;  %v1897_v5 = vsel %vm1881_vm10, %v1832_v60, %v1383_v61  ;;  %v396_v27 = vshll.u32 %v7204_v13, 16  ;;  %v838_v45 = vshll.u32 %v610_v39, 16 }
  0xf3   :  { %1308 = vrot.lane.b32.xlu0 %v7719_v32, %s7230_s17  ;;  %v1962_v9 = vsel %vm1946_vm11, %v1897_v5, %v1455_v25  ;;  %v826_v25 = vshll.u32 %v609_v23, 16  ;;  %v1175_v59 = vrot.slane %v610_v39, 1 }
  0xf4   :  { %1398 = vrot.lane.b32.xlu1 %v1355_v19, %s7232_s21  ;;  %v2027_v14 = vsel %vm2011_vm12, %v1962_v9, %v1519_v36  ;;  %v840_v54 = vrot.slane %v838_v45, 1 }
  0xf5   :  { %v1579_v43 = vpop.permute.xlu0 %1578  ;;  %v7811_v34 = vpop.permute.xlu1 %1014  ;;  %v2091_v15 = vsel %vm2075_vm14, %v2027_v14, %v1581_v42  ;;  %v828_v12 = vrot.slane %v826_v25, 1 }
  0xf6   :  { %v2089_v50 = vsel %vm2075_vm14, %v2025_v37, %v1579_v43 }
  0xf7   :  { %1396 = vrot.lane.b32.xlu0 %v817_v56, %s7232_s21  ;;  %v391_v56 = vor.u32 %v389_v58, %v388_v3 }
  0xf8   :  { %1470 = vrot.lane.b32.xlu1 %v1436_v53, %s7231_s20 }
  0xf9   :  { %v1641_v1 = vpop.permute.xlu0 %1640  ;;  %v7824_v6 = vpop.permute.xlu1 %1016 }
  0xfa   :  { %v2153_v62 = vsel %vm13556_vm13, %v2089_v50, %v1641_v1  ;;  %v7205_v1 = vld [vmem:[%s13473_s0 + $0x98] sm:$0xff]  }
  0xfb   :  { %1468 = vrot.lane.b32.xlu0 %v1170_v17, %s7231_s20  ;;  %7030 = vmatprep.mubr.msk.bf16.mxu0 %vm2215_vm15, %v2153_v62  ;;  %v7845_v17 = vsel %vm7294_vm2, 0, %v391_v56  ;;  %v400_v0 = vshrl.u32 %v7205_v1, 16 }
  0xfc   :  { %1534 = vrot.lane.b32.xlu1 %v7303_v4, %s7233_s22  ;;  %v833_v35 = vshll.u32 %v7845_v17, 16  ;;  %v831_v42 = vshrl.u32 %v7845_v17, 16  ;;  %v1174_v58 = vrot.slane %v7845_v17, 1 }
  0xfd   :  { %v1643_v46 = vpop.permute.xlu0 %1642  ;;  %v7838_v61 = vpop.permute.xlu1 %1234 }
  0xfe   :  { %v2155_v22 = vsel %vm13556_vm13, %v2091_v15, %v1643_v46  ;;  %v835_v41 = vrot.slane %v833_v35, 1  ;;  %v7886_v62 = vsel %vm13562_vm4, %v1174_v58, %v1175_v59  ;;  %v1708_v15 = vsel %vm1690_vm7, %v7480_v26, %v7811_v34 }
  0xff   :  { %1532 = vrot.lane.b32.xlu0 %v7773_v8, %s7233_s22  ;;  %7031 = vmatmul.mubr.msk.bf16.gmra.mrb[12].mxu0 %vm2215_vm15, %v2155_v22  ;;  %v395_v8 = vrot.slane %v393_v18, 7  ;;  %v1710_v46 = vsel %vm1690_vm7, %v7496_v44, %v7824_v6  ;;  %v402_v44 = vrot.slane %v400_v0, 7  ;;  %v403_v6 = vshll.u32 %v7205_v1, 16 }
 0x100   :  { %1596 = vrot.lane.b32.xlu1 %v7326_v30, %s7234_s25  ;;  %v836_v43 = vor.u32 %v835_v41, %v831_v42  ;;  %v1773_v25 = vsel %vm1753_vm8, %v1710_v46, %v7838_v61 }
 0x101   :  { %v1233_v11 = vpop.permute.xlu0 %1232  ;;  %v1299_v36 = vpop.permute.xlu1 %1298  ;;  %v398_v48 = vor.u32 %v396_v27, %v395_v8  ;;  %v7877_v50 = vsel %vm7294_vm2, %v395_v8, 0  ;;  %v612_v58 = vsel %vm7294_vm2, %v402_v44, 0 }
 0x102   :  { %v850_v9 = vshll.u32 %v7877_v50, 16  ;;  %v1771_v22 = vsel %vm1753_vm8, %v1708_v15, %v1233_v11  ;;  %v1836_v31 = vsel %vm1816_vm9, %v1773_v25, %v1299_v36 }
 0x103   :  { %1594 = vrot.lane.b32.xlu0 %v1355_v19, %s7234_s25  ;;  %v829_v19 = vsel %vm13561_vm3, %v824_v7, %v828_v12  ;;  %v7867_v51 = vsel %vm7294_vm2, 0, %v398_v48  ;;  %v405_v12 = vor.u32 %v403_v6, %v402_v44 }
 0x104   :  { %1658 = vrot.lane.b32.xlu1 %v7317_v16, %s7235_s26  ;;  %v845_v37 = vshll.u32 %v7867_v51, 16  ;;  %v843_v56 = vshrl.u32 %v7867_v51, 16  ;;  %v852_v21 = vrot.slane %v850_v9, 1 }
 0x105   :  { %v1297_v24 = vpop.permute.xlu0 %1296  ;;  %v1387_v40 = vpop.permute.xlu1 %1386  ;;  %v7934_v48 = vsel %vm7294_vm2, 0, %v405_v12 }
 0x106   :  { %v847_v13 = vrot.slane %v845_v37, 1  ;;  %v1834_v23 = vsel %vm1816_vm9, %v1771_v22, %v1297_v24  ;;  %v1901_v8 = vsel %vm1881_vm10, %v1836_v31, %v1387_v40  ;;  %v7206_v24 = vld [vmem:[%s13473_s0 + $0xa0] sm:$0xff]  }
 0x107   :  { %1656 = vrot.lane.b32.xlu0 %v1436_v53, %s7235_s26  ;;  %v841_v53 = vsel %vm13561_vm3, %v836_v43, %v840_v54  ;;  %v1178_v43 = vrot.slane %v7877_v50, 1  ;;  %v410_v37 = vshll.u32 %v7206_v24, 16  ;;  %v855_v50 = vshrl.u32 %v7934_v48, 16 }
 0x108   :  { %1248 = vrot.lane.b32.xlu1 %v1173_v33, %s7228_s15  ;;  %v848_v20 = vor.u32 %v847_v13, %v843_v56 }
 0x109   :  { %v1385_v49 = vpop.permute.xlu0 %1384  ;;  %v1459_v55 = vpop.permute.xlu1 %1458 }
 0x10a   :  { %v1899_v26 = vsel %vm1881_vm10, %v1834_v23, %v1385_v49  ;;  %v7914_v39 = vsel %vm13561_vm3, %v848_v20, %v852_v21  ;;  %v1177_v49 = vrot.slane %v7867_v51, 1  ;;  %v1181_v20 = vrot.slane %v612_v58, 1 }
 0x10b   :  { %1030 = vrot.lane.b32.xlu0 %v829_v19, %s7229_s16 }
 0x10c   :  { %1314 = vrot.lane.b32.xlu1 %v7845_v17, %s7230_s17 }
 0x10d   :  { %v1457_v3 = vpop.permute.xlu0 %1456 }
 0x10e   :  { %v1523_v60 = vpop.permute.xlu1 %1522  ;;  %v1964_v29 = vsel %vm1946_vm11, %v1899_v26, %v1457_v3 }
 0x10f   :  { %1312 = vrot.lane.b32.xlu0 %v7821_v63, %s7230_s17 }
 0x110   :  { %1402 = vrot.lane.b32.xlu1 %v841_v53, %s7232_s21 }
 0x111   :  { %v1521_v5 = vpop.permute.xlu0 %1520 }
 0x112   :  { %v1585_v14 = vpop.permute.xlu1 %1584  ;;  %v2029_v11 = vsel %vm2011_vm12, %v1964_v29, %v1521_v5  ;;  %v862_v5 = vshll.u32 %v612_v58, 16 }
 0x113   :  { %1400 = vrot.lane.b32.xlu0 %v829_v19, %s7232_s21  ;;  %v407_v19 = vshrl.u32 %v7206_v24, 16 }
 0x114   :  { %1474 = vrot.lane.b32.xlu1 %v7886_v62, %s7231_s20  ;;  %v864_v0 = vrot.slane %v862_v5, 1 }
 0x115   :  { %v1583_v18 = vpop.permute.xlu0 %1582  ;;  %v409_v59 = vrot.slane %v407_v19, 7 }
 0x116   :  { %v7904_v34 = vpop.permute.xlu1 %1018  ;;  %v2093_v35 = vsel %vm2075_vm14, %v2029_v11, %v1583_v18  ;;  %v1180_v18 = vrot.slane %v7934_v48, 1 }
 0x117   :  { %1472 = vrot.lane.b32.xlu0 %v1173_v33, %s7231_s20  ;;  %v1966_v33 = vsel %vm1946_vm11, %v1901_v8, %v1459_v55  ;;  %v857_v55 = vshll.u32 %v7934_v48, 16  ;;  %v412_v13 = vor.u32 %v410_v37, %v409_v59  ;;  %v7965_v26 = vsel %vm7294_vm2, %v409_v59, 0  ;;  %v7208_v37 = vld [vmem:[%s13473_s0 + $0xb0] sm:$0xff]  }
 0x118   :  { %1538 = vrot.lane.b32.xlu1 %v7867_v51, %s7233_s22  ;;  %v2031_v36 = vsel %vm2011_vm12, %v1966_v33, %v1523_v60  ;;  %v7974_v6 = vsel %vm13562_vm4, %v1180_v18, %v1181_v20  ;;  %v874_v31 = vshll.u32 %v7965_v26, 16  ;;  %v1712_v8 = vsel %vm1690_vm7, %v7531_v10, %v7904_v34 }
 0x119   :  { %v1645_v61 = vpop.permute.xlu0 %1644  ;;  %v2095_v42 = vsel %vm2075_vm14, %v2031_v36, %v1585_v14  ;;  %v859_v1 = vrot.slane %v857_v55, 1  ;;  %v7954_v46 = vsel %vm7294_vm2, 0, %v412_v13  ;;  %v421_v13 = vshrl.u32 %v7208_v37, 16 }
 0x11a   :  { %v7917_v27 = vpop.permute.xlu1 %1020  ;;  %v2157_v7 = vsel %vm13556_vm13, %v2093_v35, %v1645_v61  ;;  %v869_v21 = vshll.u32 %v7954_v46, 16  ;;  %v867_v29 = vshrl.u32 %v7954_v46, 16 }
 0x11b   :  { %1536 = vrot.lane.b32.xlu0 %v7845_v17, %s7233_s22  ;;  %7034 = vmatprep.mubr.msk.bf16.mxu0 %vm2215_vm15, %v2157_v7  ;;  %v860_v14 = vor.u32 %v859_v1, %v855_v50  ;;  %v1714_v7 = vsel %vm1690_vm7, %v7550_v38, %v7917_v27  ;;  %v423_v20 = vrot.slane %v421_v13, 7 }
 0x11c   :  { %1600 = vrot.lane.b32.xlu1 %v7914_v39, %s7234_s25  ;;  %v871_v11 = vrot.slane %v869_v21, 1  ;;  %v424_v21 = vshll.u32 %v7208_v37, 16 }
 0x11d   :  { %v1647_v41 = vpop.permute.xlu0 %1646  ;;  %v865_v23 = vsel %vm13561_vm3, %v860_v14, %v864_v0  ;;  %v1184_v14 = vrot.slane %v7965_v26, 1 }
 0x11e   :  { %v1239_v45 = vpop.permute.xlu1 %1238  ;;  %v2159_v40 = vsel %vm13556_vm13, %v2095_v42, %v1647_v41  ;;  %v872_v36 = vor.u32 %v871_v11, %v867_v29  ;;  %v876_v42 = vrot.slane %v874_v31, 1  ;;  %v426_v11 = vor.u32 %v424_v21, %v423_v20  ;;  %v7210_v21 = vld [vmem:[%s13473_s0 + $0xc0] sm:$0xff]  }
 0x11f   :  { %1598 = vrot.lane.b32.xlu0 %v841_v53, %s7234_s25  ;;  %7035 = vmatmul.mubr.msk.bf16.gmra.mrb[16].mxu0 %vm2215_vm15, %v2159_v40  ;;  %v1777_v41 = vsel %vm1753_vm8, %v1714_v7, %v1239_v45 }
 0x120   :  { %1032 = vrot.lane.b32.xlu1 %v841_v53, %s7229_s16  ;;  %v1179_v53 = vsel %vm13562_vm4, %v1177_v49, %v1178_v43  ;;  %v8002_v43 = vsel %vm13561_vm3, %v872_v36, %v876_v42  ;;  %v8042_v7 = vsel %vm7294_vm2, 0, %v426_v11  ;;  %v435_v11 = vshrl.u32 %v7210_v21, 16 }
 0x121   :  { %v1237_v54 = vpop.permute.xlu0 %1236  ;;  %v893_v42 = vshll.u32 %v8042_v7, 16 }
 0x122   :  { %v1303_v3 = vpop.permute.xlu1 %1302  ;;  %v1775_v12 = vsel %vm1753_vm8, %v1712_v8, %v1237_v54 }
 0x123   :  { %1660 = vrot.lane.b32.xlu0 %v7886_v62, %s7235_s26  ;;  %v1840_v19 = vsel %vm1816_vm9, %v1777_v41, %v1303_v3 }
 0x124   :  { %1034 = vrot.lane.b32.xlu1 %v7914_v39, %s7229_s16 }
 0x125   :  { %v1301_v60 = vpop.permute.xlu0 %1300 }
 0x126   :  { %v1391_v56 = vpop.permute.xlu1 %1390  ;;  %v1838_v24 = vsel %vm1816_vm9, %v1775_v12, %v1301_v60 }
 0x127   :  { %1662 = vrot.lane.b32.xlu0 %v1179_v53, %s7235_s26  ;;  %v1905_v54 = vsel %vm1881_vm10, %v1840_v19, %v1391_v56 }
 0x128   :  { %1252 = vrot.lane.b32.xlu1 %v1179_v53, %s7228_s15 }
 0x129   :  { %v1389_v9 = vpop.permute.xlu0 %1388 }
 0x12a   :  { %v1463_v15 = vpop.permute.xlu1 %1462  ;;  %v1903_v10 = vsel %vm1881_vm10, %v1838_v24, %v1389_v9  ;;  %v1183_v9 = vrot.slane %v7954_v46, 1 }
 0x12b   :  { %1250 = vrot.lane.b32.xlu0 %v7886_v62, %s7228_s15  ;;  %v7207_v62 = vld [vmem:[%s13473_s0 + $0xa8] sm:$0xff]  }
 0x12c   :  { %1318 = vrot.lane.b32.xlu1 %v7934_v48, %s7230_s17  ;;  %v414_v61 = vshrl.u32 %v7207_v62, 16  ;;  %v417_v27 = vshll.u32 %v7207_v62, 16 }
 0x12d   :  { %v1461_v22 = vpop.permute.xlu0 %1460 }
 0x12e   :  { %v1527_v25 = vpop.permute.xlu1 %1526  ;;  %v416_v38 = vrot.slane %v414_v61, 7 }
 0x12f   :  { %1316 = vrot.lane.b32.xlu0 %v7867_v51, %s7230_s17 }
 0x130   :  { %1406 = vrot.lane.b32.xlu1 %v865_v23, %s7232_s21  ;;  %v419_v59 = vor.u32 %v417_v27, %v416_v38  ;;  %v614_v18 = vsel %vm7294_vm2, %v416_v38, 0 }
 0x131   :  { %v1525_v44 = vpop.permute.xlu0 %1524  ;;  %v1187_v36 = vrot.slane %v614_v18, 1 }
 0x132   :  { %v1589_v35 = vpop.permute.xlu1 %1588  ;;  %v8022_v56 = vsel %vm7294_vm2, 0, %v419_v59 }
 0x133   :  { %1404 = vrot.lane.b32.xlu0 %v7914_v39, %s7232_s21  ;;  %v1968_v39 = vsel %vm1946_vm11, %v1903_v10, %v1461_v22  ;;  %v879_v26 = vshrl.u32 %v8022_v56, 16  ;;  %v8053_v10 = vsel %vm7294_vm2, %v423_v20, 0 }
 0x134   :  { %1478 = vrot.lane.b32.xlu1 %v7974_v6, %s7231_s20  ;;  %v2033_v40 = vsel %vm2011_vm12, %v1968_v39, %v1525_v44  ;;  %v886_v44 = vshll.u32 %v614_v18, 16  ;;  %v891_v39 = vshrl.u32 %v8042_v7, 16  ;;  %v898_v19 = vshll.u32 %v8053_v10, 16 }
 0x135   :  { %v1587_v33 = vpop.permute.xlu0 %1586 }
 0x136   :  { %v7992_v34 = vpop.permute.xlu1 %1022  ;;  %v2097_v49 = vsel %vm2075_vm14, %v2033_v40, %v1587_v33  ;;  %v888_v61 = vrot.slane %v886_v44, 1  ;;  %v1186_v33 = vrot.slane %v8022_v56, 1  ;;  %v895_v40 = vrot.slane %v893_v42, 1 }
 0x137   :  { %1476 = vrot.lane.b32.xlu0 %v1179_v53, %s7231_s20  ;;  %v1970_v53 = vsel %vm1946_vm11, %v1905_v54, %v1463_v15  ;;  %v881_v15 = vshll.u32 %v8022_v56, 16  ;;  %v1716_v54 = vsel %vm1690_vm7, %v7615_v28, %v7992_v34  ;;  %v438_v42 = vshll.u32 %v7210_v21, 16 }
 0x138   :  { %1542 = vrot.lane.b32.xlu1 %v7954_v46, %s7233_s22  ;;  %v2035_v3 = vsel %vm2011_vm12, %v1970_v53, %v1527_v25  ;;  %v8062_v27 = vsel %vm13562_vm4, %v1186_v33, %v1187_v36  ;;  %v437_v36 = vrot.slane %v435_v11, 7 }
 0x139   :  { %v1649_v45 = vpop.permute.xlu0 %1648  ;;  %v2099_v60 = vsel %vm2075_vm14, %v2035_v3, %v1589_v35  ;;  %v883_v62 = vrot.slane %v881_v15, 1  ;;  %v896_v3 = vor.u32 %v895_v40, %v891_v39 }
 0x13a   :  { %v8005_v55 = vpop.permute.xlu1 %1024  ;;  %v2161_v58 = vsel %vm13556_vm13, %v2097_v49, %v1649_v45  ;;  %v440_v40 = vor.u32 %v438_v42, %v437_v36 }
 0x13b   :  { %1540 = vrot.lane.b32.xlu0 %v7934_v48, %s7233_s22  ;;  %7038 = vmatprep.mubr.msk.bf16.mxu0 %vm2215_vm15, %v2161_v58  ;;  %v884_v35 = vor.u32 %v883_v62, %v879_v26  ;;  %v1718_v58 = vsel %vm1690_vm7, %v7634_v57, %v8005_v55 }
 0x13c   :  { %1604 = vrot.lane.b32.xlu1 %v8002_v43, %s7234_s25 }
 0x13d   :  { %v1651_v50 = vpop.permute.xlu0 %1650  ;;  %v889_v24 = vsel %vm13561_vm3, %v884_v35, %v888_v61  ;;  %v1190_v35 = vrot.slane %v8053_v10, 1 }
 0x13e   :  { %v1243_v1 = vpop.permute.xlu1 %1242  ;;  %v2163_v5 = vsel %vm13556_vm13, %v2099_v60, %v1651_v50  ;;  %v900_v60 = vrot.slane %v898_v19, 1 }
 0x13f   :  { %1602 = vrot.lane.b32.xlu0 %v865_v23, %s7234_s25  ;;  %7039 = vmatmul.mubr.msk.bf16.gmra.mrb[20].mxu0 %vm2215_vm15, %v2163_v5  ;;  %v1781_v50 = vsel %vm1753_vm8, %v1718_v58, %v1243_v1  ;;  %v8128_v58 = vsel %vm7294_vm2, 0, %v440_v40 }
 0x140   :  { %1036 = vrot.lane.b32.xlu1 %v865_v23, %s7229_s16  ;;  %v1185_v23 = vsel %vm13562_vm4, %v1183_v9, %v1184_v14  ;;  %v8090_v14 = vsel %vm13561_vm3, %v896_v3, %v900_v60  ;;  %v917_v60 = vshll.u32 %v8128_v58, 16 }
 0x141   :  { %v1241_v0 = vpop.permute.xlu0 %1240 }
 0x142   :  { %v1307_v22 = vpop.permute.xlu1 %1306  ;;  %v1779_v59 = vsel %vm1753_vm8, %v1716_v54, %v1241_v0 }
 0x143   :  { %1664 = vrot.lane.b32.xlu0 %v7974_v6, %s7235_s26  ;;  %v1844_v13 = vsel %vm1816_vm9, %v1781_v50, %v1307_v22 }
 0x144   :  { %1038 = vrot.lane.b32.xlu1 %v8002_v43, %s7229_s16 }
 0x145   :  { %v1305_v25 = vpop.permute.xlu0 %1304 }
 0x146   :  { %v1395_v29 = vpop.permute.xlu1 %1394  ;;  %v1842_v37 = vsel %vm1816_vm9, %v1779_v59, %v1305_v25 }
 0x147   :  { %1666 = vrot.lane.b32.xlu0 %v1185_v23, %s7235_s26  ;;  %v1909_v0 = vsel %vm1881_vm10, %v1844_v13, %v1395_v29  ;;  %v919_v13 = vrot.slane %v917_v60, 1 }
 0x148   :  { %1256 = vrot.lane.b32.xlu1 %v1185_v23, %s7228_s15 }
 0x149   :  { %v1393_v31 = vpop.permute.xlu0 %1392 }
 0x14a   :  { %v1467_v8 = vpop.permute.xlu1 %1466  ;;  %v1907_v28 = vsel %vm1881_vm10, %v1842_v37, %v1393_v31  ;;  %v1189_v31 = vrot.slane %v8042_v7, 1 }
 0x14b   :  { %1254 = vrot.lane.b32.xlu0 %v7974_v6, %s7228_s15  ;;  %v7209_v6 = vld [vmem:[%s13473_s0 + $0xb8] sm:$0xff]  }
 0x14c   :  { %1322 = vrot.lane.b32.xlu1 %v8022_v56, %s7230_s17  ;;  %v428_v45 = vshrl.u32 %v7209_v6, 16  ;;  %v431_v55 = vshll.u32 %v7209_v6, 16 }
 0x14d   :  { %v1465_v12 = vpop.permute.xlu0 %1464 }
 0x14e   :  { %v1531_v41 = vpop.permute.xlu1 %1530  ;;  %v430_v57 = vrot.slane %v428_v45, 7 }
 0x14f   :  { %1320 = vrot.lane.b32.xlu0 %v7954_v46, %s7230_s17 }
 0x150   :  { %1410 = vrot.lane.b32.xlu1 %v889_v24, %s7232_s21  ;;  %v433_v20 = vor.u32 %v431_v55, %v430_v57  ;;  %v616_v33 = vsel %vm7294_vm2, %v430_v57, 0 }
 0x151   :  { %v1529_v38 = vpop.permute.xlu0 %1528  ;;  %v1193_v3 = vrot.slane %v616_v33, 1 }
 0x152   :  { %v1593_v49 = vpop.permute.xlu1 %1592  ;;  %v8108_v29 = vsel %vm7294_vm2, 0, %v433_v20 }
 0x153   :  { %1408 = vrot.lane.b32.xlu0 %v8002_v43, %s7232_s21  ;;  %v1972_v43 = vsel %vm1946_vm11, %v1907_v28, %v1465_v12  ;;  %v903_v10 = vshrl.u32 %v8108_v29, 16  ;;  %v8141_v28 = vsel %vm7294_vm2, %v437_v36, 0 }
 0x154   :  { %1482 = vrot.lane.b32.xlu1 %v8062_v27, %s7231_s20  ;;  %v2037_v5 = vsel %vm2011_vm12, %v1972_v43, %v1529_v38  ;;  %v910_v38 = vshll.u32 %v616_v33, 16 }
 0x155   :  { %v1591_v53 = vpop.permute.xlu0 %1590 }
 0x156   :  { %v8080_v34 = vpop.permute.xlu1 %1026  ;;  %v2101_v9 = vsel %vm2075_vm14, %v2037_v5, %v1591_v53  ;;  %v912_v45 = vrot.slane %v910_v38, 1  ;;  %v1192_v53 = vrot.slane %v8108_v29, 1  ;;  %v915_v5 = vshrl.u32 %v8128_v58, 16 }
 0x157   :  { %1480 = vrot.lane.b32.xlu0 %v1185_v23, %s7231_s20  ;;  %v1974_v23 = vsel %vm1946_vm11, %v1909_v0, %v1467_v8  ;;  %v905_v8 = vshll.u32 %v8108_v29, 16 }
 0x158   :  { %1546 = vrot.lane.b32.xlu1 %v8042_v7, %s7233_s22  ;;  %v2039_v22 = vsel %vm2011_vm12, %v1974_v23, %v1531_v41  ;;  %v8152_v43 = vsel %vm13562_vm4, %v1192_v53, %v1193_v3  ;;  %v1196_v53 = vrot.slane %v8141_v28, 1 }
 0x159   :  { %v1653_v1 = vpop.permute.xlu0 %1652  ;;  %v2103_v25 = vsel %vm2075_vm14, %v2039_v22, %v1593_v49  ;;  %v907_v6 = vrot.slane %v905_v8, 1 }
 0x15a   :  { %v1029_v15 = vpop.permute.xlu1 %1028  ;;  %v2165_v18 = vsel %vm13556_vm13, %v2101_v9, %v1653_v1  ;;  %v922_v9 = vshll.u32 %v8141_v28, 16 }
 0x15b   :  { %1544 = vrot.lane.b32.xlu0 %v8022_v56, %s7233_s22  ;;  %7042 = vmatprep.mubr.msk.bf16.mxu0 %vm2215_vm15, %v2165_v18  ;;  %v908_v49 = vor.u32 %v907_v6, %v903_v10  ;;  %v1722_v57 = vsel %vm1690_vm7, %v7719_v32, %v1029_v15  ;;  %v1720_v32 = vsel %vm1690_vm7, %v7700_v52, %v8080_v34 }
 0x15c   :  { %1608 = vrot.lane.b32.xlu1 %v8090_v14, %s7234_s25  ;;  %v920_v52 = vor.u32 %v919_v13, %v915_v5  ;;  %v924_v34 = vrot.slane %v922_v9, 1 }
 0x15d   :  { %v1655_v26 = vpop.permute.xlu0 %1654  ;;  %v913_v37 = vsel %vm13561_vm3, %v908_v49, %v912_v45 }
 0x15e   :  { %v1247_v62 = vpop.permute.xlu1 %1246  ;;  %v2167_v44 = vsel %vm13556_vm13, %v2103_v25, %v1655_v26 }
 0x15f   :  { %1606 = vrot.lane.b32.xlu0 %v889_v24, %s7234_s25  ;;  %7043 = vmatmul.mubr.msk.bf16.gmra.mrb[24].mxu0 %vm2215_vm15, %v2167_v44  ;;  %v1785_v15 = vsel %vm1753_vm8, %v1722_v57, %v1247_v62 }
 0x160   :  { %1040 = vrot.lane.b32.xlu1 %v889_v24, %s7229_s16  ;;  %v1191_v24 = vsel %vm13562_vm4, %v1189_v31, %v1190_v35 }
 0x161   :  { %v1245_v61 = vpop.permute.xlu0 %1244 }
 0x162   :  { %v1311_v12 = vpop.permute.xlu1 %1310  ;;  %v1783_v21 = vsel %vm1753_vm8, %v1720_v32, %v1245_v61 }
 0x163   :  { %1668 = vrot.lane.b32.xlu0 %v8062_v27, %s7235_s26  ;;  %v1848_v62 = vsel %vm1816_vm9, %v1785_v15, %v1311_v12 }
 0x164   :  { %1042 = vrot.lane.b32.xlu1 %v8090_v14, %s7229_s16 }
 0x165   :  { %v1309_v41 = vpop.permute.xlu0 %1308 }
 0x166   :  { %v1399_v39 = vpop.permute.xlu1 %1398  ;;  %v1846_v22 = vsel %vm1816_vm9, %v1783_v21, %v1309_v41  ;;  %v8191_v41 = vsel %vm13561_vm3, %v920_v52, %v924_v34 }
 0x167   :  { %1670 = vrot.lane.b32.xlu0 %v1191_v24, %s7235_s26  ;;  %v1913_v35 = vsel %vm1881_vm10, %v1848_v62, %v1399_v39  ;;  %v7212_v39 = vld [vmem:[%s13473_s0 + $0xd0] sm:$0xff]  }
 0x168   :  { %1260 = vrot.lane.b32.xlu1 %v1191_v24, %s7228_s15  ;;  %v452_v5 = vshll.u32 %v7212_v39, 16 }
 0x169   :  { %v1397_v19 = vpop.permute.xlu0 %1396 }
 0x16a   :  { %v1471_v54 = vpop.permute.xlu1 %1470  ;;  %v1911_v44 = vsel %vm1881_vm10, %v1846_v22, %v1397_v19 }
 0x16b   :  { %1258 = vrot.lane.b32.xlu0 %v8062_v27, %s7228_s15  ;;  %v7211_v27 = vld [vmem:[%s13473_s0 + $0xc8] sm:$0xff]   ;;  %v1978_v8 = vsel %vm1946_vm11, %v1913_v35, %v1471_v54  ;;  %v449_v54 = vshrl.u32 %v7212_v39, 16 }
 0x16c   :  { %1326 = vrot.lane.b32.xlu1 %v8108_v29, %s7230_s17  ;;  %v442_v18 = vshrl.u32 %v7211_v27, 16  ;;  %v445_v31 = vshll.u32 %v7211_v27, 16 }
 0x16d   :  { %v1469_v59 = vpop.permute.xlu0 %1468 }
 0x16e   :  { %v8137_v50 = vpop.permute.xlu1 %1534  ;;  %v1976_v61 = vsel %vm1946_vm11, %v1911_v44, %v1469_v59  ;;  %v1195_v59 = vrot.slane %v8128_v58, 1 }
 0x16f   :  { %1324 = vrot.lane.b32.xlu0 %v8042_v7, %s7230_s17  ;;  %v2043_v12 = vsel %vm2011_vm12, %v1978_v8, %v8137_v50 }
 0x170   :  { %1414 = vrot.lane.b32.xlu1 %v913_v37, %s7232_s21 }
 0x171   :  { %v1533_v55 = vpop.permute.xlu0 %1532 }
 0x172   :  { %v8156_v1 = vpop.permute.xlu1 %1596  ;;  %v8158_v0 = vpop.f32.mrb[0].mxu0  ;;  %v2041_v33 = vsel %vm2011_vm12, %v1976_v61, %v1533_v55  ;;  %v451_v55 = vrot.slane %v449_v54, 7 }
 0x173   :  { %v8164_v20 = vpop.f32.mrb[1].mxu0  ;;  %1412 = vrot.lane.b32.xlu0 %v8090_v14, %s7232_s21  ;;  %v444_v14 = vrot.slane %v442_v18, 7  ;;  %v2107_v10 = vsel %vm2075_vm14, %v2043_v12, %v8156_v1 }
 0x174   :  { %1486 = vrot.lane.b32.xlu1 %v8152_v43, %s7231_s20  ;;  %v8171_v23 = vpop.f32.mrb[2].mxu0  ;;  %v454_v15 = vor.u32 %v452_v5, %v451_v55 }
 0x175   :  { %v8174_v25 = vpop.f32.mrb[3].mxu0  ;;  %v1595_v26 = vpop.permute.xlu0 %1594  ;;  %v447_v38 = vor.u32 %v445_v31, %v444_v14  ;;  %v618_v57 = vsel %vm7294_vm2, %v444_v14, 0 }
 0x176   :  { %v8178_v11 = vpop.permute.xlu1 %1658  ;;  %v2105_v36 = vsel %vm2075_vm14, %v2041_v33, %v1595_v26  ;;  %v934_v18 = vshll.u32 %v618_v57, 16  ;;  %v8228_v34 = vsel %vm7294_vm2, 0, %v454_v15  ;;  %v1199_v44 = vrot.slane %v618_v57, 1 }
 0x177   :  { %1484 = vrot.lane.b32.xlu0 %v1191_v24, %s7231_s20  ;;  %v2171_v40 = vsel %vm13556_vm13, %v2107_v10, %v8178_v11  ;;  %v8209_v45 = vsel %vm7294_vm2, 0, %v447_v38  ;;  %v941_v61 = vshll.u32 %v8228_v34, 16  ;;  %v8241_v33 = vsel %vm7294_vm2, %v451_v55, 0 }
 0x178   :  { %1550 = vrot.lane.b32.xlu1 %v8128_v58, %s7233_s22  ;;  %v929_v60 = vshll.u32 %v8209_v45, 16  ;;  %v927_v28 = vshrl.u32 %v8209_v45, 16  ;;  %v936_v26 = vrot.slane %v934_v18, 1  ;;  %v1198_v62 = vrot.slane %v8209_v45, 1 }
 0x179   :  { %v1657_v42 = vpop.permute.xlu0 %1656  ;;  %v939_v10 = vshrl.u32 %v8228_v34, 16  ;;  %v946_v38 = vshll.u32 %v8241_v33, 16 }
 0x17a   :  { %v1249_v24 = vpop.permute.xlu1 %1248  ;;  %v2169_v6 = vsel %vm13556_vm13, %v2105_v36, %v1657_v42  ;;  %v931_v9 = vrot.slane %v929_v60, 1 }
 0x17b   :  { %1548 = vrot.lane.b32.xlu0 %v8108_v29, %s7233_s22  ;;  %7046 = vmatprep.mubr.msk.bf16.mxu0 %vm2215_vm15, %v2169_v6  ;;  %v943_v6 = vrot.slane %v941_v61, 1  ;;  %v948_v5 = vrot.slane %v946_v38, 1 }
 0x17c   :  { %1612 = vrot.lane.b32.xlu1 %v8191_v41, %s7234_s25  ;;  %7047 = vmatmul.mubr.msk.bf16.gmra.mrb[28].mxu0 %vm2215_vm15, %v2171_v40  ;;  %v932_v22 = vor.u32 %v931_v9, %v927_v28 }
 0x17d   :  { %v1031_v19 = vpop.permute.xlu0 %1030 }
 0x17e   :  { %v1315_v49 = vpop.permute.xlu1 %1314  ;;  %v1724_v14 = vsel %vm1690_vm7, %v7821_v63, %v1031_v19  ;;  %v937_v35 = vsel %vm13561_vm3, %v932_v22, %v936_v26  ;;  %v8251_v63 = vsel %vm13562_vm4, %v1198_v62, %v1199_v44 }
 0x17f   :  { %1610 = vrot.lane.b32.xlu0 %v913_v37, %s7234_s25  ;;  %v1787_v12 = vsel %vm1753_vm8, %v1724_v14, %v1249_v24 }
 0x180   :  { %1044 = vrot.lane.b32.xlu1 %v913_v37, %s7229_s16  ;;  %v1197_v37 = vsel %vm13562_vm4, %v1195_v59, %v1196_v53  ;;  %v1852_v54 = vsel %vm1816_vm9, %v1787_v12, %v1315_v49  ;;  %v944_v49 = vor.u32 %v943_v6, %v939_v10 }
 0x181   :  { %v1313_v3 = vpop.permute.xlu0 %1312 }
 0x182   :  { %v1403_v27 = vpop.permute.xlu1 %1402  ;;  %v1850_v36 = vsel %vm1816_vm9, %v7562_v47, %v1313_v3 }
 0x183   :  { %1672 = vrot.lane.b32.xlu0 %v8152_v43, %s7235_s26 }
 0x184   :  { %1046 = vrot.lane.b32.xlu1 %v8191_v41, %s7229_s16 }
 0x185   :  { %v1401_v13 = vpop.permute.xlu0 %1400 }
 0x186   :  { %v1475_v32 = vpop.permute.xlu1 %1474  ;;  %v1915_v39 = vsel %vm1881_vm10, %v1850_v36, %v1401_v13  ;;  %v1917_v13 = vsel %vm1881_vm10, %v1852_v54, %v1403_v27  ;;  %v8286_v27 = vsel %vm13561_vm3, %v944_v49, %v948_v5 }
 0x187   :  { %1674 = vrot.lane.b32.xlu0 %v1197_v37, %s7235_s26  ;;  %v1982_v15 = vsel %vm1946_vm11, %v1917_v13, %v1475_v32 }
 0x188   :  { %1264 = vrot.lane.b32.xlu1 %v1197_v37, %s7228_s15 }
 0x189   :  { %v1473_v21 = vpop.permute.xlu0 %1472 }
 0x18a   :  { %v1539_v52 = vpop.permute.xlu1 %1538  ;;  %v1980_v59 = vsel %vm1946_vm11, %v1915_v39, %v1473_v21 }
 0x18b   :  { %1262 = vrot.lane.b32.xlu0 %v8152_v43, %s7228_s15  ;;  %v7213_v43 = vld [vmem:[%s13473_s0 + $0xd8] sm:$0xff]   ;;  %v2047_v21 = vsel %vm2011_vm12, %v1982_v15, %v1539_v52 }
 0x18c   :  { %1330 = vrot.lane.b32.xlu1 %v8209_v45, %s7230_s17  ;;  %v456_v24 = vshrl.u32 %v7213_v43, 16  ;;  %v459_v18 = vshll.u32 %v7213_v43, 16  ;;  %v1202_v43 = vrot.slane %v8241_v33, 1 }
 0x18d   :  { %v1537_v31 = vpop.permute.xlu0 %1536 }
 0x18e   :  { %v1601_v8 = vpop.permute.xlu1 %1600  ;;  %v2045_v47 = vsel %vm2011_vm12, %v1980_v59, %v1537_v31 }
 0x18f   :  { %1328 = vrot.lane.b32.xlu0 %v8128_v58, %s7230_s17  ;;  %v2111_v22 = vsel %vm2075_vm14, %v2047_v21, %v1601_v8  ;;  %v1201_v8 = vrot.slane %v8228_v34, 1 }
 0x190   :  { %1418 = vrot.lane.b32.xlu1 %v937_v35, %s7232_s21 }
 0x191   :  { %v1599_v42 = vpop.permute.xlu0 %1598 }
 0x192   :  { %v8258_v40 = vpop.permute.xlu1 %1032  ;;  %v8260_v19 = vpop.f32.mrb[4].mxu0  ;;  %v2109_v60 = vsel %vm2075_vm14, %v2045_v47, %v1599_v42 }
 0x193   :  { %v8264_v53 = vpop.f32.mrb[5].mxu0  ;;  %1416 = vrot.lane.b32.xlu0 %v8191_v41, %s7232_s21  ;;  %v458_v41 = vrot.slane %v456_v24, 7 }
 0x194   :  { %1490 = vrot.lane.b32.xlu1 %v8251_v63, %s7231_s20  ;;  %v8271_v3 = vpop.f32.mrb[6].mxu0 }
 0x195   :  { %v8274_v57 = vpop.f32.mrb[7].mxu0  ;;  %v1661_v55 = vpop.permute.xlu0 %1660  ;;  %v461_v14 = vor.u32 %v459_v18, %v458_v41  ;;  %v620_v10 = vsel %vm7294_vm2, %v458_v41, 0 }
 0x196   :  { %v1035_v28 = vpop.permute.xlu1 %1034  ;;  %v2173_v9 = vsel %vm13556_vm13, %v2109_v60, %v1661_v55  ;;  %v958_v54 = vshll.u32 %v620_v10, 16  ;;  %v1205_v41 = vrot.slane %v620_v10, 1 }
 0x197   :  { %1488 = vrot.lane.b32.xlu0 %v1197_v37, %s7231_s20  ;;  %7050 = vmatprep.mubr.msk.bf16.mxu0 %vm2215_vm15, %v2173_v9  ;;  %v7214_v37 = vld [vmem:[%s13473_s0 + $0xe0] sm:$0xff]   ;;  %v8299_v31 = vsel %vm7294_vm2, 0, %v461_v14  ;;  %v1728_v14 = vsel %vm1690_vm7, %v7867_v51, %v1035_v28 }
 0x198   :  { %1554 = vrot.lane.b32.xlu1 %v8228_v34, %s7233_s22  ;;  %v463_v61 = vshrl.u32 %v7214_v37, 16  ;;  %v953_v36 = vshll.u32 %v8299_v31, 16  ;;  %v466_v38 = vshll.u32 %v7214_v37, 16  ;;  %v951_v33 = vshrl.u32 %v8299_v31, 16 }
 0x199   :  { %v1663_v26 = vpop.permute.xlu0 %1662  ;;  %v960_v49 = vrot.slane %v958_v54, 1  ;;  %v1204_v9 = vrot.slane %v8299_v31, 1 }
 0x19a   :  { %v1253_v62 = vpop.permute.xlu1 %1252  ;;  %v2175_v44 = vsel %vm13556_vm13, %v2111_v22, %v1663_v26  ;;  %v465_v6 = vrot.slane %v463_v61, 7  ;;  %v955_v24 = vrot.slane %v953_v36, 1 }
 0x19b   :  { %1552 = vrot.lane.b32.xlu0 %v8209_v45, %s7233_s22  ;;  %7051 = vmatmul.mubr.msk.bf16.gmra.mrb[32].mxu0 %vm2215_vm15, %v2175_v44  ;;  %v1726_v44 = vsel %vm1690_vm7, %v7845_v17, %v8258_v40  ;;  %v8344_v61 = vsel %vm13562_vm4, %v1204_v9, %v1205_v41  ;;  %v1791_v51 = vsel %vm1753_vm8, %v1728_v14, %v1253_v62 }
 0x19c   :  { %1616 = vrot.lane.b32.xlu1 %v8286_v27, %s7234_s25  ;;  %v468_v47 = vor.u32 %v466_v38, %v465_v6  ;;  %v956_v55 = vor.u32 %v955_v24, %v951_v33  ;;  %v8329_v26 = vsel %vm7294_vm2, %v465_v6, 0 }
 0x19d   :  { %v1251_v32 = vpop.permute.xlu0 %1250  ;;  %v970_v17 = vshll.u32 %v8329_v26, 16 }
 0x19e   :  { %v1319_v52 = vpop.permute.xlu1 %1318  ;;  %v8318_v13 = vsel %vm7294_vm2, 0, %v468_v47  ;;  %v961_v15 = vsel %vm13561_vm3, %v956_v55, %v960_v49  ;;  %v1789_v37 = vsel %vm1753_vm8, %v1726_v44, %v1251_v32 }
 0x19f   :  { %1614 = vrot.lane.b32.xlu0 %v937_v35, %s7234_s25  ;;  %v965_v21 = vshll.u32 %v8318_v13, 16  ;;  %v963_v36 = vshrl.u32 %v8318_v13, 16  ;;  %v972_v55 = vrot.slane %v970_v17, 1 }
 0x1a0   :  { %1048 = vrot.lane.b32.xlu1 %v937_v35, %s7229_s16  ;;  %v1203_v35 = vsel %vm13562_vm4, %v1201_v8, %v1202_v43 }
 0x1a1   :  { %v1317_v12 = vpop.permute.xlu0 %1316  ;;  %v967_v10 = vrot.slane %v965_v21, 1 }
 0x1a2   :  { %v1407_v42 = vpop.permute.xlu1 %1406  ;;  %v1854_v8 = vsel %vm1816_vm9, %v1789_v37, %v1317_v12 }
 0x1a3   :  { %1676 = vrot.lane.b32.xlu0 %v8251_v63, %s7235_s26 }
 0x1a4   :  { %1050 = vrot.lane.b32.xlu1 %v8286_v27, %s7229_s16 }
 0x1a5   :  { %v1405_v39 = vpop.permute.xlu0 %1404 }
 0x1a6   :  { %v1479_v59 = vpop.permute.xlu1 %1478  ;;  %v1919_v40 = vsel %vm1881_vm10, %v1854_v8, %v1405_v39  ;;  %v1856_v39 = vsel %vm1816_vm9, %v1791_v51, %v1319_v52 }
 0x1a7   :  { %1678 = vrot.lane.b32.xlu0 %v1203_v35, %s7235_s26  ;;  %v1921_v49 = vsel %vm1881_vm10, %v1856_v39, %v1407_v42 }
 0x1a8   :  { %1268 = vrot.lane.b32.xlu1 %v1203_v35, %s7228_s15  ;;  %v1986_v21 = vsel %vm1946_vm11, %v1921_v49, %v1479_v59 }
 0x1a9   :  { %v1477_v60 = vpop.permute.xlu0 %1476 }
 0x1aa   :  { %v1543_v5 = vpop.permute.xlu1 %1542  ;;  %v1984_v38 = vsel %vm1946_vm11, %v1919_v40, %v1477_v60  ;;  %v968_v60 = vor.u32 %v967_v10, %v963_v36  ;;  %v1207_v36 = vrot.slane %v8318_v13, 1  ;;  %v1208_v10 = vrot.slane %v8329_v26, 1 }
 0x1ab   :  { %1266 = vrot.lane.b32.xlu0 %v8251_v63, %s7228_s15  ;;  %v7215_v63 = vld [vmem:[%s13473_s0 + $0xe8] sm:$0xff]   ;;  %v2051_v52 = vsel %vm2011_vm12, %v1986_v21, %v1543_v5 }
 0x1ac   :  { %1334 = vrot.lane.b32.xlu1 %v8299_v31, %s7230_s17  ;;  %v470_v6 = vshrl.u32 %v7215_v63, 16  ;;  %v8379_v42 = vsel %vm13561_vm3, %v968_v60, %v972_v55 }
 0x1ad   :  { %v1541_v18 = vpop.permute.xlu0 %1540 }
 0x1ae   :  { %v1605_v22 = vpop.permute.xlu1 %1604  ;;  %v2049_v12 = vsel %vm2011_vm12, %v1984_v38, %v1541_v18  ;;  %v472_v41 = vrot.slane %v470_v6, 7  ;;  %v473_v18 = vshll.u32 %v7215_v63, 16 }
 0x1af   :  { %1332 = vrot.lane.b32.xlu0 %v8228_v34, %s7230_s17  ;;  %v2115_v44 = vsel %vm2075_vm14, %v2051_v52, %v1605_v22 }
 0x1b0   :  { %1422 = vrot.lane.b32.xlu1 %v961_v15, %s7232_s21  ;;  %v475_v8 = vor.u32 %v473_v18, %v472_v41  ;;  %v622_v6 = vsel %vm7294_vm2, %v472_v41, 0 }
 0x1b1   :  { %v1603_v43 = vpop.permute.xlu0 %1602 }
 0x1b2   :  { %v8351_v28 = vpop.permute.xlu1 %1036  ;;  %v8353_v32 = vpop.f32.mrb[8].mxu0  ;;  %v2113_v24 = vsel %vm2075_vm14, %v2049_v12, %v1603_v43  ;;  %v8392_v22 = vsel %vm7294_vm2, 0, %v475_v8 }
 0x1b3   :  { %v8356_v33 = vpop.f32.mrb[9].mxu0  ;;  %1420 = vrot.lane.b32.xlu0 %v8286_v27, %s7232_s21  ;;  %v977_v51 = vshll.u32 %v8392_v22, 16  ;;  %v975_v26 = vshrl.u32 %v8392_v22, 16  ;;  %v1210_v52 = vrot.slane %v8392_v22, 1 }
 0x1b4   :  { %1494 = vrot.lane.b32.xlu1 %v8344_v61, %s7231_s20  ;;  %v8363_v62 = vpop.f32.mrb[10].mxu0 }
 0x1b5   :  { %v8367_v54 = vpop.f32.mrb[11].mxu0  ;;  %v1665_v47 = vpop.permute.xlu0 %1664 }
 0x1b6   :  { %v1039_v9 = vpop.permute.xlu1 %1038  ;;  %v2177_v27 = vsel %vm13556_vm13, %v2113_v24, %v1665_v47  ;;  %v979_v24 = vrot.slane %v977_v51, 1  ;;  %v982_v47 = vshll.u32 %v622_v6, 16 }
 0x1b7   :  { %1492 = vrot.lane.b32.xlu0 %v1203_v35, %s7231_s20  ;;  %7054 = vmatprep.mubr.msk.bf16.mxu0 %vm2215_vm15, %v2177_v27  ;;  %v7216_v35 = vld [vmem:[%s13473_s0 + $0xf0] sm:$0xff]  }
 0x1b8   :  { %1558 = vrot.lane.b32.xlu1 %v8318_v13, %s7233_s22  ;;  %v477_v43 = vshrl.u32 %v7216_v35, 16  ;;  %v480_v12 = vshll.u32 %v7216_v35, 16  ;;  %v980_v27 = vor.u32 %v979_v24, %v975_v26  ;;  %v984_v41 = vrot.slane %v982_v47, 1 }
 0x1b9   :  { %v1667_v14 = vpop.permute.xlu0 %1666 }
 0x1ba   :  { %v1257_v37 = vpop.permute.xlu1 %1256  ;;  %v2179_v63 = vsel %vm13556_vm13, %v2115_v44, %v1667_v14  ;;  %v479_v38 = vrot.slane %v477_v43, 7  ;;  %v1211_v44 = vrot.slane %v622_v6, 1 }
 0x1bb   :  { %1556 = vrot.lane.b32.xlu0 %v8299_v31, %s7233_s22  ;;  %7055 = vmatmul.mubr.msk.bf16.gmra.mrb[36].mxu0 %vm2215_vm15, %v2179_v63  ;;  %v985_v63 = vsel %vm13561_vm3, %v980_v27, %v984_v41 }
 0x1bc   :  { %1620 = vrot.lane.b32.xlu1 %v8379_v42, %s7234_s25  ;;  %v482_v55 = vor.u32 %v480_v12, %v479_v38  ;;  %v8422_v43 = vsel %vm7294_vm2, %v479_v38, 0  ;;  %v8437_v6 = vsel %vm13562_vm4, %v1210_v52, %v1211_v44 }
 0x1bd   :  { %v1255_v59 = vpop.permute.xlu0 %1254 }
 0x1be   :  { %v1323_v5 = vpop.permute.xlu1 %1322  ;;  %v8411_v21 = vsel %vm7294_vm2, 0, %v482_v55 }
 0x1bf   :  { %1618 = vrot.lane.b32.xlu0 %v961_v15, %s7234_s25  ;;  %v989_v8 = vshll.u32 %v8411_v21, 16  ;;  %v987_v26 = vshrl.u32 %v8411_v21, 16 }
 0x1c0   :  { %1052 = vrot.lane.b32.xlu1 %v961_v15, %s7229_s16  ;;  %v1209_v15 = vsel %vm13562_vm4, %v1207_v36, %v1208_v10  ;;  %v1730_v36 = vsel %vm1690_vm7, %v7934_v48, %v8351_v28  ;;  %v1732_v10 = vsel %vm1690_vm7, %v7954_v46, %v1039_v9  ;;  %v994_v48 = vshll.u32 %v8422_v43, 16 }
 0x1c1   :  { %v1321_v17 = vpop.permute.xlu0 %1320  ;;  %v1793_v51 = vsel %vm1753_vm8, %v1730_v36, %v1255_v59  ;;  %v991_v24 = vrot.slane %v989_v8, 1  ;;  %v1795_v46 = vsel %vm1753_vm8, %v1732_v10, %v1257_v37 }
 0x1c2   :  { %v1411_v40 = vpop.permute.xlu1 %1410  ;;  %v1858_v38 = vsel %vm1816_vm9, %v1793_v51, %v1321_v17  ;;  %v996_v8 = vrot.slane %v994_v48, 1 }
 0x1c3   :  { %1680 = vrot.lane.b32.xlu0 %v8344_v61, %s7235_s26 }
 0x1c4   :  { %1054 = vrot.lane.b32.xlu1 %v8379_v42, %s7229_s16 }
 0x1c5   :  { %v1409_v39 = vpop.permute.xlu0 %1408 }
 0x1c6   :  { %v1483_v60 = vpop.permute.xlu1 %1482  ;;  %v1923_v28 = vsel %vm1881_vm10, %v1858_v38, %v1409_v39  ;;  %v1860_v39 = vsel %vm1816_vm9, %v1795_v46, %v1323_v5  ;;  %v1214_v46 = vrot.slane %v8422_v43, 1 }
 0x1c7   :  { %1682 = vrot.lane.b32.xlu0 %v1209_v15, %s7235_s26  ;;  %v1925_v36 = vsel %vm1881_vm10, %v1860_v39, %v1411_v40 }
 0x1c8   :  { %1272 = vrot.lane.b32.xlu1 %v1209_v15, %s7228_s15  ;;  %v1990_v38 = vsel %vm1946_vm11, %v1925_v36, %v1483_v60 }
 0x1c9   :  { %v1481_v49 = vpop.permute.xlu0 %1480 }
 0x1ca   :  { %v1547_v18 = vpop.permute.xlu1 %1546  ;;  %v1988_v55 = vsel %vm1946_vm11, %v1923_v28, %v1481_v49  ;;  %v992_v49 = vor.u32 %v991_v24, %v987_v26 }
 0x1cb   :  { %1270 = vrot.lane.b32.xlu0 %v8344_v61, %s7228_s15  ;;  %v7217_v61 = vld [vmem:[%s13473_s0 + $0xf8] sm:$0xff]   ;;  %v2055_v5 = vsel %vm2011_vm12, %v1990_v38, %v1547_v18 }
 0x1cc   :  { %1338 = vrot.lane.b32.xlu1 %v8392_v22, %s7230_s17  ;;  %v484_v47 = vshrl.u32 %v7217_v61, 16  ;;  %v487_v51 = vshll.u32 %v7217_v61, 16  ;;  %v997_v40 = vsel %vm13561_vm3, %v992_v49, %v996_v8 }
 0x1cd   :  { %v1545_v14 = vpop.permute.xlu0 %1544 }
 0x1ce   :  { %v1609_v35 = vpop.permute.xlu1 %1608  ;;  %v2053_v17 = vsel %vm2011_vm12, %v1988_v55, %v1545_v14  ;;  %v486_v14 = vrot.slane %v484_v47, 7 }
 0x1cf   :  { %1336 = vrot.lane.b32.xlu0 %v8318_v13, %s7230_s17 }
 0x1d0   :  { %1426 = vrot.lane.b32.xlu1 %v985_v63, %s7232_s21  ;;  %v489_v61 = vor.u32 %v487_v51, %v486_v14 }
 0x1d1   :  { %v1607_v12 = vpop.permute.xlu0 %1606 }
 0x1d2   :  { %v8444_v9 = vpop.permute.xlu1 %1040  ;;  %v8446_v59 = vpop.f32.mrb[12].mxu0  ;;  %v2117_v41 = vsel %vm2075_vm14, %v2053_v17, %v1607_v12  ;;  %v2119_v12 = vsel %vm2075_vm14, %v2055_v5, %v1609_v35  ;;  %v8479_v18 = vsel %vm7294_vm2, 0, %v489_v61  ;;  %v1213_v35 = vrot.slane %v8411_v21, 1 }
 0x1d3   :  { %v8449_v27 = vpop.f32.mrb[13].mxu0  ;;  %1424 = vrot.lane.b32.xlu0 %v8379_v42, %s7232_s21  ;;  %v1359_v47 = vshll.u32 %v8479_v18, 16  ;;  %v624_v17 = vsel %vm7294_vm2, %v486_v14, 0  ;;  %v1437_v5 = vrot.slane %v8479_v18, 1 }
 0x1d4   :  { %1498 = vrot.lane.b32.xlu1 %v8437_v6, %s7231_s20  ;;  %v8456_v37 = vpop.f32.mrb[14].mxu0  ;;  %v1215_v39 = vsel %vm13562_vm4, %v1213_v35, %v1214_v46  ;;  %v1364_v49 = vshll.u32 %v624_v17, 16 }
 0x1d5   :  { %v8460_v52 = vpop.f32.mrb[15].mxu0  ;;  %v1669_v44 = vpop.permute.xlu0 %1668 }
 0x1d6   :  { %v1043_v10 = vpop.permute.xlu1 %1042  ;;  %v2181_v42 = vsel %vm13556_vm13, %v2117_v41, %v1669_v44  ;;  %v1361_v44 = vrot.slane %v1359_v47, 1 }
 0x1d7   :  { %1496 = vrot.lane.b32.xlu0 %v1209_v15, %s7231_s20  ;;  %7058 = vmatprep.mubr.msk.bf16.mxu0 %vm2215_vm15, %v2181_v42  ;;  %v1366_v42 = vrot.slane %v1364_v49, 1  ;;  %v1736_v61 = vsel %vm1690_vm7, %v8042_v7, %v1043_v10 }
 0x1d8   :  { %1562 = vrot.lane.b32.xlu1 %v8411_v21, %s7233_s22 }
 0x1d9   :  { %v1671_v26 = vpop.permute.xlu0 %1670 }
 0x1da   :  { %v1261_v24 = vpop.permute.xlu1 %1260  ;;  %v2183_v48 = vsel %vm13556_vm13, %v2119_v12, %v1671_v26  ;;  %v1438_v12 = vrot.slane %v624_v17, 1 }
 0x1db   :  { %1560 = vrot.lane.b32.xlu0 %v8392_v22, %s7233_s22  ;;  %7059 = vmatmul.mubr.msk.bf16.gmra.mrb[40].mxu0 %vm2215_vm15, %v2183_v48  ;;  %v1734_v48 = vsel %vm1690_vm7, %v8022_v56, %v8444_v9  ;;  %v1799_v17 = vsel %vm1753_vm8, %v1736_v61, %v1261_v24 }
 0x1dc   :  { %1624 = vrot.lane.b32.xlu1 %v997_v40, %s7234_s25  ;;  %v1439_v47 = vsel %vm13562_vm4, %v1437_v5, %v1438_v12 }
 0x1dd   :  { %v1259_v15 = vpop.permute.xlu0 %1258 }
 0x1de   :  { %v1327_v60 = vpop.permute.xlu1 %1326 }
 0x1df   :  { %1622 = vrot.lane.b32.xlu0 %v985_v63, %s7234_s25 }
 0x1e0   :  { %1056 = vrot.lane.b32.xlu1 %v985_v63, %s7229_s16  ;;  %v1357_v63 = vshrl.u32 %v8479_v18, 16 }
 0x1e1   :  { %v1325_v28 = vpop.permute.xlu0 %1324 }
 0x1e2   :  { %v1415_v55 = vpop.permute.xlu1 %1414  ;;  %v1362_v36 = vor.u32 %v1361_v44, %v1357_v63  ;;  %v1864_v44 = vsel %vm1816_vm9, %v1799_v17, %v1327_v60 }
 0x1e3   :  { %1684 = vrot.lane.b32.xlu0 %v8437_v6, %s7235_s26 }
 0x1e4   :  { %1058 = vrot.lane.b32.xlu1 %v997_v40, %s7229_s16  ;;  %v1367_v38 = vsel %vm13561_vm3, %v1362_v36, %v1366_v42  ;;  %v1929_v36 = vsel %vm1881_vm10, %v1864_v44, %v1415_v55 }
 0x1e5   :  { %v1413_v41 = vpop.permute.xlu0 %1412 }
 0x1e6   :  { %v1487_v43 = vpop.permute.xlu1 %1486 }
 0x1e7   :  { %1686 = vrot.lane.b32.xlu0 %v1215_v39, %s7235_s26 }
 0x1e8   :  { %1276 = vrot.lane.b32.xlu1 %v1215_v39, %s7228_s15 }
 0x1e9   :  { %v1485_v8 = vpop.permute.xlu0 %1484 }
 0x1ea   :  { %v1551_v14 = vpop.permute.xlu1 %1550 }
 0x1eb   :  { %1274 = vrot.lane.b32.xlu0 %v8437_v6, %s7228_s15  ;;  %v1797_v6 = vsel %vm1753_vm8, %v1734_v48, %v1259_v15 }
 0x1ec   :  { %1342 = vrot.lane.b32.xlu1 %v8479_v18, %s7230_s17  ;;  %v1862_v35 = vsel %vm1816_vm9, %v1797_v6, %v1325_v28 }
 0x1ed   :  { %v1549_v51 = vpop.permute.xlu0 %1548  ;;  %v1927_v63 = vsel %vm1881_vm10, %v1862_v35, %v1413_v41 }
 0x1ee   :  { %v1613_v26 = vpop.permute.xlu1 %1612  ;;  %v1992_v7 = vsel %vm1946_vm11, %v1927_v63, %v1485_v8 }
 0x1ef   :  { %1340 = vrot.lane.b32.xlu0 %v8411_v21, %s7230_s17  ;;  %v2057_v15 = vsel %vm2011_vm12, %v1992_v7, %v1549_v51 }
 0x1f0   :  { %1430 = vrot.lane.b32.xlu1 %v1367_v38, %s7232_s21 }
 0x1f1   :  { %v1611_v46 = vpop.permute.xlu0 %1610 }
 0x1f2   :  { %v1045_v56 = vpop.permute.xlu1 %1044  ;;  %v8514_v9 = vpop.f32.mrb[16].mxu0  ;;  %v2121_v24 = vsel %vm2075_vm14, %v2057_v15, %v1611_v46 }
 0x1f3   :  { %v8517_v10 = vpop.f32.mrb[17].mxu0  ;;  %1428 = vrot.lane.b32.xlu0 %v997_v40, %s7232_s21  ;;  %v1994_v40 = vsel %vm1946_vm11, %v1929_v36, %v1487_v43 }
 0x1f4   :  { %1502 = vrot.lane.b32.xlu1 %v1439_v47, %s7231_s20  ;;  %v8522_v28 = vpop.f32.mrb[18].mxu0  ;;  %v2059_v51 = vsel %vm2011_vm12, %v1994_v40, %v1551_v14 }
 0x1f5   :  { %v8526_v41 = vpop.f32.mrb[19].mxu0  ;;  %v1673_v49 = vpop.permute.xlu0 %1672  ;;  %v2123_v60 = vsel %vm2075_vm14, %v2059_v51, %v1613_v26 }
 0x1f6   :  { %v1047_v8 = vpop.permute.xlu1 %1046  ;;  %v2185_v42 = vsel %vm13556_vm13, %v2121_v24, %v1673_v49 }
 0x1f7   :  { %1500 = vrot.lane.b32.xlu0 %v1215_v39, %s7231_s20  ;;  %7062 = vmatprep.mubr.msk.bf16.mxu0 %vm2215_vm15, %v2185_v42  ;;  %v1740_v17 = vsel %vm1690_vm7, %v8128_v58, %v1047_v8 }
 0x1f8   :  { %1626 = vrot.lane.b32.xlu1 %v1367_v38, %s7234_s25  ;;  %s7241_s25 = smov 64  }
 0x1f9   :  { %v1675_v5 = vpop.permute.xlu0 %1674 }
 0x1fa   :  { %v1265_v12 = vpop.permute.xlu1 %1264  ;;  %v2187_v48 = vsel %vm13556_vm13, %v2123_v60, %v1675_v5 }
 0x1fb   :  { %1564 = vrot.lane.b32.xlu0 %v8479_v18, %s7233_s22  ;;  %7063 = vmatmul.mubr.msk.bf16.gmra.mrb[44].mxu0 %vm2215_vm15, %v2187_v48  ;;  %v1738_v18 = vsel %vm1690_vm7, %v8108_v29, %v1045_v56  ;;  %s7240_s22 = smov 40  }
 0x1fc   :  { %4065 = vrot.lane.b32.xlu1 %v7326_v30, %s7235_s26 }
 0x1fd   :  { %v1263_v55 = vpop.permute.xlu0 %1262 }
 0x1fe   :  { %v1331_v39 = vpop.permute.xlu1 %1330  ;;  %v1801_v63 = vsel %vm1753_vm8, %v1738_v18, %v1263_v55 }
 0x1ff   :  { %1688 = vrot.lane.b32.xlu0 %v1439_v47, %s7235_s26  ;;  %v1803_v47 = vsel %vm1753_vm8, %v1740_v17, %v1265_v12 }
 0x200   :  { %v1868_v58 = vsel %vm1816_vm9, %v1803_v47, %v1331_v39 }
 0x201   :  { %v1329_v43 = vpop.permute.xlu0 %1328 }
 0x202   :  { %v1419_v14 = vpop.permute.xlu1 %1418  ;;  %v1866_v7 = vsel %vm1816_vm9, %v1801_v63, %v1329_v43 }
 0x203   :  { %v1933_v60 = vsel %vm1881_vm10, %v1868_v58, %v1419_v14 }
 0x205   :  { %v1417_v38 = vpop.permute.xlu0 %1416 }
 0x206   :  { %v1491_v26 = vpop.permute.xlu1 %1490  ;;  %v1931_v44 = vsel %vm1881_vm10, %v1866_v7, %v1417_v38 }
 0x207   :  { %v1998_v48 = vsel %vm1946_vm11, %v1933_v60, %v1491_v26 }
 0x209   :  { %v1489_v61 = vpop.permute.xlu0 %1488 }
 0x20a   :  { %v1555_v6 = vpop.permute.xlu1 %1554  ;;  %v1996_v36 = vsel %vm1946_vm11, %v1931_v44, %v1489_v61 }
 0x20b   :  { %v2063_v55 = vsel %vm2011_vm12, %v1998_v48, %v1555_v6 }
 0x20d   :  { %v1553_v35 = vpop.permute.xlu0 %1552 }
 0x20e   :  { %v1617_v46 = vpop.permute.xlu1 %1616  ;;  %v2061_v29 = vsel %vm2011_vm12, %v1996_v36, %v1553_v35 }
 0x20f   :  { %v2127_v43 = vsel %vm2075_vm14, %v2063_v55, %v1617_v46 }
 0x211   :  { %v1615_v15 = vpop.permute.xlu0 %1614 }
 0x212   :  { %v1049_v24 = vpop.permute.xlu1 %1048  ;;  %v8551_v49 = vpop.f32.mrb[20].mxu0  ;;  %v2125_v8 = vsel %vm2075_vm14, %v2061_v29, %v1615_v15 }
 0x213   :  { %v8554_v42 = vpop.f32.mrb[21].mxu0  ;;  %v1742_v6 = vsel %vm1690_vm7, %v8209_v45, %v1049_v24 }
 0x214   :  { %v8557_v56 = vpop.f32.mrb[22].mxu0 }
 0x215   :  { %v8561_v40 = vpop.f32.mrb[23].mxu0  ;;  %v1677_v51 = vpop.permute.xlu0 %1676 }
 0x216   :  { %v1051_v5 = vpop.permute.xlu1 %1050  ;;  %v2189_v12 = vsel %vm13556_vm13, %v2125_v8, %v1677_v51 }
 0x217   :  { %7066 = vmatprep.mubr.msk.bf16.mxu0 %vm2215_vm15, %v2189_v12  ;;  %v1744_v46 = vsel %vm1690_vm7, %v8228_v34, %v1051_v5 }
 0x219   :  { %v1679_v38 = vpop.permute.xlu0 %1678 }
 0x21a   :  { %v1269_v39 = vpop.permute.xlu1 %1268  ;;  %v2191_v61 = vsel %vm13556_vm13, %v2127_v43, %v1679_v38 }
 0x21b   :  { %7067 = vmatmul.mubr.msk.bf16.gmra.mrb[48].mxu0 %vm2215_vm15, %v2191_v61  ;;  %v1807_v8 = vsel %vm1753_vm8, %v1744_v46, %v1269_v39 }
 0x21d   :  { %v1267_v35 = vpop.permute.xlu0 %1266 }
 0x21e   :  { %v1335_v18 = vpop.permute.xlu1 %1334  ;;  %v1805_v36 = vsel %vm1753_vm8, %v1742_v6, %v1267_v35 }
 0x21f   :  { %v1872_v34 = vsel %vm1816_vm9, %v1807_v8, %v1335_v18 }
 0x221   :  { %v1333_v14 = vpop.permute.xlu0 %1332 }
 0x222   :  { %v1423_v17 = vpop.permute.xlu1 %1422  ;;  %v1870_v29 = vsel %vm1816_vm9, %v1805_v36, %v1333_v14 }
 0x223   :  { %v1937_v39 = vsel %vm1881_vm10, %v1872_v34, %v1423_v17 }
 0x225   :  { %v1421_v63 = vpop.permute.xlu0 %1420 }
 0x226   :  { %v1495_v7 = vpop.permute.xlu1 %1494  ;;  %v1935_v51 = vsel %vm1881_vm10, %v1870_v29, %v1421_v63 }
 0x227   :  { %v2002_v14 = vsel %vm1946_vm11, %v1937_v39, %v1495_v7 }
 0x229   :  { %v1493_v15 = vpop.permute.xlu0 %1492 }
 0x22a   :  { %v1559_v26 = vpop.permute.xlu1 %1558  ;;  %v2000_v48 = vsel %vm1946_vm11, %v1935_v51, %v1493_v15 }
 0x22b   :  { %v2067_v63 = vsel %vm2011_vm12, %v2002_v14, %v1559_v26 }
 0x22d   :  { %v1557_v47 = vpop.permute.xlu0 %1556 }
 0x22e   :  { %v1621_v44 = vpop.permute.xlu1 %1620  ;;  %v2065_v45 = vsel %vm2011_vm12, %v2000_v48, %v1557_v47 }
 0x22f   :  { %v2131_v15 = vsel %vm2075_vm14, %v2067_v63, %v1621_v44 }
 0x231   :  { %v1619_v58 = vpop.permute.xlu0 %1618 }
 0x232   :  { %v1053_v60 = vpop.permute.xlu1 %1052  ;;  %v8579_v12 = vpop.f32.mrb[24].mxu0  ;;  %v2129_v5 = vsel %vm2075_vm14, %v2065_v45, %v1619_v58 }
 0x233   :  { %v8582_v55 = vpop.f32.mrb[25].mxu0  ;;  %v1746_v26 = vsel %vm1690_vm7, %v8299_v31, %v1053_v60 }
 0x234   :  { %v8585_v24 = vpop.f32.mrb[26].mxu0 }
 0x235   :  { %v8589_v43 = vpop.f32.mrb[27].mxu0  ;;  %v1681_v38 = vpop.permute.xlu0 %1680 }
 0x236   :  { %v1055_v61 = vpop.permute.xlu1 %1054  ;;  %v2193_v35 = vsel %vm13556_vm13, %v2129_v5, %v1681_v38 }
 0x237   :  { %7070 = vmatprep.mubr.msk.bf16.mxu0 %vm2215_vm15, %v2193_v35  ;;  %v1748_v44 = vsel %vm1690_vm7, %v8318_v13, %v1055_v61 }
 0x239   :  { %v1683_v47 = vpop.permute.xlu0 %1682 }
 0x23a   :  { %v1273_v18 = vpop.permute.xlu1 %1272  ;;  %v2195_v6 = vsel %vm13556_vm13, %v2131_v15, %v1683_v47 }
 0x23b   :  { %7071 = vmatmul.mubr.msk.bf16.gmra.mrb[52].mxu0 %vm2215_vm15, %v2195_v6  ;;  %v1811_v63 = vsel %vm1753_vm8, %v1748_v44, %v1273_v18 }
 0x23d   :  { %v1271_v46 = vpop.permute.xlu0 %1270 }
 0x23e   :  { %v1339_v36 = vpop.permute.xlu1 %1338  ;;  %v1809_v5 = vsel %vm1753_vm8, %v1746_v26, %v1271_v46 }
 0x23f   :  { %v1876_v61 = vsel %vm1816_vm9, %v1811_v63, %v1339_v36 }
 0x241   :  { %v1337_v17 = vpop.permute.xlu0 %1336 }
 0x242   :  { %v1427_v29 = vpop.permute.xlu1 %1426  ;;  %v1874_v39 = vsel %vm1816_vm9, %v1809_v5, %v1337_v17 }
 0x243   :  { %v1941_v17 = vsel %vm1881_vm10, %v1876_v61, %v1427_v29 }
 0x245   :  { %v1425_v58 = vpop.permute.xlu0 %1424 }
 0x246   :  { %v1499_v8 = vpop.permute.xlu1 %1498  ;;  %v1939_v15 = vsel %vm1881_vm10, %v1874_v39, %v1425_v58 }
 0x247   :  { %v2006_v18 = vsel %vm1946_vm11, %v1941_v17, %v1499_v8 }
 0x249   :  { %v1497_v51 = vpop.permute.xlu0 %1496 }
 0x24a   :  { %v1563_v7 = vpop.permute.xlu1 %1562  ;;  %v2004_v13 = vsel %vm1946_vm11, %v1939_v15, %v1497_v51 }
 0x24b   :  { %v2071_v58 = vsel %vm2011_vm12, %v2006_v18, %v1563_v7 }
 0x24d   :  { %v1561_v48 = vpop.permute.xlu0 %1560 }
 0x24e   :  { %v1625_v45 = vpop.permute.xlu1 %1624  ;;  %v2069_v60 = vsel %vm2011_vm12, %v2004_v13, %v1561_v48 }
 0x24f   :  { %v8603_v34 = vpop.f32.mrb[28].mxu0  ;;  %v2135_v51 = vsel %vm2075_vm14, %v2071_v58, %v1625_v45 }
 0x250   :  { %v8606_v38 = vpop.f32.mrb[29].mxu0 }
 0x251   :  { %v8609_v35 = vpop.f32.mrb[30].mxu0  ;;  %v1623_v14 = vpop.permute.xlu0 %1622 }
 0x252   :  { %v1057_v47 = vpop.permute.xlu1 %1056  ;;  %v8613_v31 = vpop.f32.mrb[31].mxu0  ;;  %v2133_v6 = vsel %vm2075_vm14, %v2069_v60, %v1623_v14 }
 0x253   :  { %v1750_v45 = vsel %vm1690_vm7, %v8392_v22, %v1057_v47 }
 0x255   :  { %v1685_v46 = vpop.permute.xlu0 %1684 }
 0x256   :  { %v1059_v26 = vpop.permute.xlu1 %1058  ;;  %v2197_v5 = vsel %vm13556_vm13, %v2133_v6, %v1685_v46 }
 0x257   :  { %7074 = vmatprep.mubr.msk.bf16.mxu0 %vm2215_vm15, %v2197_v5  ;;  %v1752_v63 = vsel %vm1690_vm7, %v8411_v21, %v1059_v26 }
 0x259   :  { %v1687_v44 = vpop.permute.xlu0 %1686 }
 0x25a   :  { %v1277_v48 = vpop.permute.xlu1 %1276  ;;  %v2199_v36 = vsel %vm13556_vm13, %v2135_v51, %v1687_v44 }
 0x25b   :  { %7075 = vmatmul.mubr.msk.bf16.gmra.mrb[56].mxu0 %vm2215_vm15, %v2199_v36  ;;  %v1815_v8 = vsel %vm1753_vm8, %v1752_v63, %v1277_v48 }
 0x25d   :  { %v1275_v39 = vpop.permute.xlu0 %1274 }
 0x25e   :  { %v1343_v14 = vpop.permute.xlu1 %1342  ;;  %v1813_v46 = vsel %vm1753_vm8, %v1750_v45, %v1275_v39 }
 0x25f   :  { %v1880_v7 = vsel %vm1816_vm9, %v1815_v8, %v1343_v14 }
 0x261   :  { %v1341_v29 = vpop.permute.xlu0 %1340 }
 0x262   :  { %v1431_v15 = vpop.permute.xlu1 %1430  ;;  %v1878_v5 = vsel %vm1816_vm9, %v1813_v46, %v1341_v29 }
 0x263   :  { %v1945_v61 = vsel %vm1881_vm10, %v1880_v7, %v1431_v15  ;;  %v8661_v15 = vld [vmem:[%s13475_s2] ss:$0 sm:$0xff]  ;;  %s7237_s2 = smov 16  }
 0x264   :  { %v8669_v8 = vadd.f32 %v8661_v15, %v8164_v20  ;;  %v8687_v20 = vadd.f32 %v8661_v15, %v8264_v53  ;;  %v8695_v46 = vadd.f32 %v8661_v15, %v8274_v57  ;;  %v8701_v53 = vadd.f32 %v8260_v19, %v8661_v15 }
 0x265   :  { %v1429_v13 = vpop.permute.xlu0 %1428 }
 0x266   :  { %v1503_v60 = vpop.permute.xlu1 %1502  ;;  %v1943_v21 = vsel %vm1881_vm10, %v1878_v5, %v1429_v13  ;;  %13693 = vst [vmem:[#allocation7_spill] sm:$0xff] %v8687_v20  ;;  %13694 = vst [vmem:[#allocation8_spill] sm:$0xff] %v8695_v46  ;;  %v2589_v57 = vsel %vm13556_vm13, %v8701_v53, 0.0 }
 0x267   :  { %v2010_v17 = vsel %vm1946_vm11, %v1945_v61, %v1503_v60  ;;  %v2578_v60 = vsel %vm13556_vm13, %v8669_v8, 0.0  ;;  %13695 = vst [vmem:[#allocation9_spill] sm:$0xff] %v8701_v53 }
 0x268   :  { %v2074_v26 = vsel %vm2011_vm12, %v2010_v17, %v8137_v50 }
 0x269   :  { %v1501_v6 = vpop.permute.xlu0 %1500  ;;  %v2138_v36 = vsel %vm2075_vm14, %v2074_v26, %v8156_v1  ;;  %v8665_v1 = vadd.f32 %v8661_v15, %v8174_v25  ;;  %v8683_v25 = vadd.f32 %v8171_v23, %v8661_v15  ;;  %v2587_v23 = vsel %vm13556_vm13, %v8695_v46, 0.0 }
 0x26a   :  { %v2008_v18 = vsel %vm1946_vm11, %v1943_v21, %v1501_v6  ;;  %v1627_v22 = vpop.permute.xlu1 %1626  ;;  %v2202_v63 = vsel %vm13556_vm13, %v2138_v36, %v8178_v11  ;;  %v8675_v11 = vadd.f32 %v8158_v0, %v8661_v15  ;;  %v2585_v6 = vsel %vm13556_vm13, %v8687_v20, 0.0 }
 0x26b   :  { %v2579_v13 = vsel %vm13556_vm13, %v8665_v1, 0.0  ;;  %13692 = vst [vmem:[#allocation6_spill] sm:$0xff] %v8683_v25  ;;  %v2583_v0 = vsel %vm13556_vm13, %v8683_v25, 0.0 }
 0x26c   :  { %v2580_v7 = vadd.f32 %v2579_v13, %v2578_v60  ;;  %v2581_v45 = vsel %vm13556_vm13, %v8675_v11, 0.0 }
 0x26d   :  { %v1565_v58 = vpop.permute.xlu0 %1564 }
 0x26e   :  { %v2073_v51 = vsel %vm2011_vm12, %v2008_v18, %v1565_v58  ;;  %v8642_v47 = vpop.f32.mrb[32].mxu0  ;;  %v2582_v61 = vadd.f32 %v2581_v45, %v2580_v7  ;;  %v8739_v45 = vadd.f32 %v8363_v62, %v8661_v15 }
 0x26f   :  { %v8644_v44 = vpop.f32.mrb[33].mxu0  ;;  %v2137_v39 = vsel %vm2075_vm14, %v2073_v51, %v1627_v22  ;;  %v8713_v51 = vadd.f32 %v8271_v3, %v8661_v15  ;;  %v8717_v22 = vadd.f32 %v8661_v15, %v8356_v33  ;;  %v8733_v33 = vadd.f32 %v8353_v32, %v8661_v15 }
 0x270   :  { %v8646_v48 = vpop.f32.mrb[34].mxu0  ;;  %v2584_v17 = vadd.f32 %v2583_v0, %v2582_v61  ;;  %13700 = vst [vmem:[#allocation14_spill] sm:$0xff] %v8739_v45  ;;  %v2599_v0 = vsel %vm13556_vm13, %v8739_v45, 0.0 }
 0x271   :  { %v8651_v14 = vpop.f32.mrb[35].mxu0  ;;  %v1689_v50 = vpop.permute.xlu0 %1688  ;;  %13696 = vst [vmem:[#allocation10_spill] sm:$0xff] %v8713_v51  ;;  %13697 = vst [vmem:[#allocation11_spill] sm:$0xff] %v8717_v22  ;;  %v2597_v7 = vsel %vm13556_vm13, %v8733_v33, 0.0 }
 0x272   :  { %v2201_v29 = vsel %vm13556_vm13, %v2137_v39, %v1689_v50  ;;  %v2586_v5 = vadd.f32 %v2585_v6, %v2584_v17  ;;  %v2591_v39 = vsel %vm13556_vm13, %v8713_v51, 0.0  ;;  %v2593_v50 = vsel %vm13556_vm13, %v8717_v22, 0.0  ;;  %13699 = vst [vmem:[#allocation13_spill] sm:$0xff] %v8733_v33 }
 0x273   :  { %7078 = vmatprep.mubr.msk.bf16.mxu0 %vm2215_vm15, %v2201_v29  ;;  %v8727_v29 = vadd.f32 %v8661_v15, %v8367_v54  ;;  %v8743_v54 = vadd.f32 %v8661_v15, %v8449_v27  ;;  %v8751_v6 = vadd.f32 %v8661_v15, %v8460_v52  ;;  %v8757_v27 = vadd.f32 %v8446_v59, %v8661_v15 }
 0x274   :  { %7079 = vmatmul.mubr.msk.bf16.gmra.mrb[60].mxu0 %vm2215_vm15, %v2202_v63  ;;  %v2588_v21 = vadd.f32 %v2587_v23, %v2586_v5  ;;  %v8767_v52 = vadd.f32 %v8661_v15, %v8517_v10 }
 0x275   :  { %13698 = vst [vmem:[#allocation12_spill] sm:$0xff] %v8727_v29  ;;  %v2595_v13 = vsel %vm13556_vm13, %v8727_v29, 0.0  ;;  %13701 = vst [vmem:[#allocation15_spill] sm:$0xff] %v8743_v54  ;;  %v2601_v32 = vsel %vm13556_vm13, %v8743_v54, 0.0  ;;  %v2603_v62 = vsel %vm13556_vm13, %v8751_v6, 0.0 }
 0x276   :  { %v2590_v36 = vadd.f32 %v2589_v57, %v2588_v21  ;;  %13702 = vst [vmem:[#allocation16_spill] sm:$0xff] %v8751_v6  ;;  %13703 = vst [vmem:[#allocation17_spill] sm:$0xff] %v8757_v27  ;;  %v2605_v21 = vsel %vm13556_vm13, %v8757_v27, 0.0  ;;  %v8763_v57 = vadd.f32 %v8456_v37, %v8661_v15  ;;  %v8781_v37 = vadd.f32 %v8661_v15, %v8526_v41 }
 0x277   :  { %13705 = vst [vmem:[#allocation19_spill] sm:$0xff] %v8767_v52  ;;  %v8799_v41 = vadd.f32 %v8661_v15, %v8554_v42  ;;  %v8813_v42 = vadd.f32 %v8551_v49, %v8661_v15 }
 0x278   :  { %v2592_v63 = vadd.f32 %v2591_v39, %v2590_v36  ;;  %13704 = vst [vmem:[#allocation18_spill] sm:$0xff] %v8763_v57  ;;  %v2607_v59 = vsel %vm13556_vm13, %v8763_v57, 0.0  ;;  %13706 = vst [vmem:[#allocation20_spill] sm:$0xff] %v8781_v37 }
 0x279   :  { %13709 = vst [vmem:[#allocation23_spill] sm:$0xff] %v8799_v41  ;;  %13711 = vst [vmem:[#allocation25_spill] sm:$0xff] %v8813_v42 }
 0x27a   :  { %v2594_v3 = vadd.f32 %v2593_v50, %v2592_v63 }
 0x27c   :  { %v2596_v60 = vadd.f32 %v2595_v13, %v2594_v3  ;;  %v2609_v3 = vsel %vm13556_vm13, %v8767_v52, 0.0 }
 0x27e   :  { %v2598_v61 = vadd.f32 %v2597_v7, %v2596_v60  ;;  %v2611_v7 = vsel %vm13556_vm13, %v8781_v37, 0.0 }
 0x280   :  { %v2600_v17 = vadd.f32 %v2599_v0, %v2598_v61  ;;  %v8789_v61 = vadd.f32 %v8514_v9, %v8661_v15  ;;  %v2617_v9 = vsel %vm13556_vm13, %v8799_v41, 0.0 }
 0x282   :  { %v2602_v5 = vadd.f32 %v2601_v32, %v2600_v17  ;;  %13707 = vst [vmem:[#allocation21_spill] sm:$0xff] %v8789_v61  ;;  %v2613_v32 = vsel %vm13556_vm13, %v8789_v61, 0.0  ;;  %v8795_v17 = vadd.f32 %v8522_v28, %v8661_v15 }
 0x284   :  { %v2604_v23 = vadd.f32 %v2603_v62, %v2602_v5  ;;  %13708 = vst [vmem:[#allocation22_spill] sm:$0xff] %v8795_v17  ;;  %v2615_v62 = vsel %vm13556_vm13, %v8795_v17, 0.0 }
 0x286   :  { %v2606_v36 = vadd.f32 %v2605_v21, %v2604_v23  ;;  %v8807_v23 = vadd.f32 %v8661_v15, %v8561_v40  ;;  %v8823_v40 = vadd.f32 %v8661_v15, %v8582_v55 }
 0x288   :  { %v2608_v10 = vadd.f32 %v2607_v59, %v2606_v36  ;;  %13710 = vst [vmem:[#allocation24_spill] sm:$0xff] %v8807_v23  ;;  %v2619_v28 = vsel %vm13556_vm13, %v8807_v23, 0.0  ;;  %13713 = vst [vmem:[#allocation27_spill] sm:$0xff] %v8823_v40  ;;  %v2625_v49 = vsel %vm13556_vm13, %v8823_v40, 0.0 }
 0x28a   :  { %v2610_v60 = vadd.f32 %v2609_v3, %v2608_v10  ;;  %v2621_v3 = vsel %vm13556_vm13, %v8813_v42, 0.0  ;;  %v8819_v10 = vadd.f32 %v8557_v56, %v8661_v15 }
 0x28c   :  { %v2612_v0 = vadd.f32 %v2611_v7, %v2610_v60  ;;  %13712 = vst [vmem:[#allocation26_spill] sm:$0xff] %v8819_v10  ;;  %v2623_v7 = vsel %vm13556_vm13, %v8819_v10, 0.0 }
 0x28e   :  { %v8703_v26 = vpop.f32.mrb[36].mxu0  ;;  %v2614_v5 = vadd.f32 %v2613_v32, %v2612_v0  ;;  %v8831_v0 = vadd.f32 %v8661_v15, %v8589_v43 }
 0x28f   :  { %v8705_v18 = vpop.f32.mrb[37].mxu0 }
 0x290   :  { %v8707_v58 = vpop.f32.mrb[38].mxu0  ;;  %v2616_v21 = vadd.f32 %v2615_v62, %v2614_v5  ;;  %13714 = vst [vmem:[#allocation28_spill] sm:$0xff] %v8831_v0  ;;  %v2627_v55 = vsel %vm13556_vm13, %v8831_v0, 0.0 }
 0x291   :  { %v8719_v19 = vpop.f32.mrb[39].mxu0  ;;  %v8921_v16 = vadd.f32 %v8707_v58, %v8661_v15 }
 0x292   :  { %v2618_v36 = vadd.f32 %v2617_v9, %v2616_v21 }
 0x294   :  { %v2620_v59 = vadd.f32 %v2619_v28, %v2618_v36  ;;  %v8843_v36 = vadd.f32 %v8579_v12, %v8661_v15 }
 0x296   :  { %v2622_v60 = vadd.f32 %v2621_v3, %v2620_v59  ;;  %v2629_v43 = vsel %vm13556_vm13, %v8843_v36, 0.0  ;;  %v8849_v59 = vadd.f32 %v8585_v24, %v8661_v15  ;;  %v8853_v3 = vadd.f32 %v8661_v15, %v8606_v38 }
 0x297   :  { %v8867_v38 = vadd.f32 %v8603_v34, %v8661_v15 }
 0x298   :  { %v2624_v32 = vadd.f32 %v2623_v7, %v2622_v60  ;;  %v2631_v7 = vsel %vm13556_vm13, %v8849_v59, 0.0  ;;  %v2633_v12 = vsel %vm13556_vm13, %v8853_v3, 0.0 }
 0x29a   :  { %v2626_v62 = vadd.f32 %v2625_v49, %v2624_v32  ;;  %v8861_v49 = vadd.f32 %v8661_v15, %v8613_v31  ;;  %v8877_v31 = vadd.f32 %v8661_v15, %v8644_v44  ;;  %v8891_v44 = vadd.f32 %v8642_v47, %v8661_v15 }
 0x29c   :  { %v2628_v28 = vadd.f32 %v2627_v55, %v2626_v62  ;;  %v2635_v24 = vsel %vm13556_vm13, %v8861_v49, 0.0  ;;  %v2641_v34 = vsel %vm13556_vm13, %v8877_v31, 0.0  ;;  %v2645_v2 = vsel %vm13556_vm13, %v8891_v44, 0.0 }
 0x29e   :  { %v2630_v60 = vadd.f32 %v2629_v43, %v2628_v28  ;;  %v2637_v28 = vsel %vm13556_vm13, %v8867_v38, 0.0  ;;  %v8873_v43 = vadd.f32 %v8609_v35, %v8661_v15 }
 0x2a0   :  { %v2632_v32 = vadd.f32 %v2631_v7, %v2630_v60  ;;  %v2639_v7 = vsel %vm13556_vm13, %v8873_v43, 0.0 }
 0x2a2   :  { %v2634_v62 = vadd.f32 %v2633_v12, %v2632_v32  ;;  %v8885_v12 = vadd.f32 %v8661_v15, %v8651_v14  ;;  %v8897_v14 = vadd.f32 %v8646_v48, %v8661_v15 }
 0x2a4   :  { %v2636_v55 = vadd.f32 %v2635_v24, %v2634_v62  ;;  %v2643_v35 = vsel %vm13556_vm13, %v8885_v12, 0.0  ;;  %v2647_v47 = vsel %vm13556_vm13, %v8897_v14, 0.0 }
 0x2a6   :  { %v2638_v60 = vadd.f32 %v2637_v28, %v2636_v55 }
 0x2a8   :  { %v2640_v32 = vadd.f32 %v2639_v7, %v2638_v60  ;;  %v8901_v60 = vadd.f32 %v8661_v15, %v8705_v18  ;;  %v8915_v18 = vadd.f32 %v8703_v26, %v8661_v15 }
 0x2aa   :  { %v2642_v62 = vadd.f32 %v2641_v34, %v2640_v32  ;;  %v2649_v34 = vsel %vm13556_vm13, %v8901_v60, 0.0  ;;  %v8909_v32 = vadd.f32 %v8661_v15, %v8719_v19 }
 0x2ac   :  { %v2644_v28 = vadd.f32 %v2643_v35, %v2642_v62  ;;  %v2651_v48 = vsel %vm13556_vm13, %v8909_v32, 0.0 }
 0x2ae   :  { %v8769_v39 = vpop.f32.mrb[40].mxu0  ;;  %v2646_v7 = vadd.f32 %v2645_v2, %v2644_v28  ;;  %v2653_v28 = vsel %vm13556_vm13, %v8915_v18, 0.0 }
 0x2af   :  { %v8771_v50 = vpop.f32.mrb[41].mxu0 }
 0x2b0   :  { %v8773_v63 = vpop.f32.mrb[42].mxu0  ;;  %v2648_v62 = vadd.f32 %v2647_v47, %v2646_v7  ;;  %v8925_v19 = vadd.f32 %v8661_v15, %v8771_v50  ;;  %v2655_v47 = vsel %vm13556_vm13, %v8921_v16, 0.0  ;;  %v8939_v50 = vadd.f32 %v8769_v39, %v8661_v15 }
 0x2b1   :  { %v8783_v13 = vpop.f32.mrb[43].mxu0 }
 0x2b2   :  { %v2650_v35 = vadd.f32 %v2649_v34, %v2648_v62  ;;  %13715 = vst [vmem:[#allocation29_spill] sm:$0xff] %v8925_v19  ;;  %v2657_v26 = vsel %vm13556_vm13, %v8925_v19, 0.0  ;;  %v8933_v34 = vadd.f32 %v8661_v15, %v8783_v13  ;;  %13716 = vst [vmem:[#allocation30_spill] sm:$0xff] %v8939_v50  ;;  %v8945_v19 = vadd.f32 %v8773_v63, %v8661_v15 }
 0x2b4   :  { %v2652_v2 = vadd.f32 %v2651_v48, %v2650_v35  ;;  %v2659_v58 = vsel %vm13556_vm13, %v8933_v34, 0.0  ;;  %13717 = vst [vmem:[#allocation31_spill] sm:$0xff] %v8945_v19  ;;  %v2663_v39 = vsel %vm13556_vm13, %v8945_v19, 0.0 }
 0x2b6   :  { %v2654_v7 = vadd.f32 %v2653_v28, %v2652_v2  ;;  %v2661_v28 = vsel %vm13556_vm13, %v8939_v50, 0.0 }
 0x2b8   :  { %v2656_v62 = vadd.f32 %v2655_v47, %v2654_v7 }
 0x2ba   :  { %v2658_v35 = vadd.f32 %v2657_v26, %v2656_v62 }
 0x2bc   :  { %v2660_v48 = vadd.f32 %v2659_v58, %v2658_v35 }
 0x2be   :  { %v2662_v47 = vadd.f32 %v2661_v28, %v2660_v48 }
 0x2c0   :  { %v2664_v50 = vadd.f32 %v2663_v39, %v2662_v47 }
 0x2ce   :  { %v8833_v5 = vpop.f32.mrb[44].mxu0 }
 0x2cf   :  { %v2497_v56 = vpop.f32.mrb[45].mxu0  ;;  %v8962_v48 = vadd.f32 %v8833_v5, %v8661_v15 }
 0x2d0   :  { %v8835_v9 = vpop.f32.mrb[46].mxu0  ;;  %v8948_v13 = vadd.f32 %v8661_v15, %v2497_v56 }
 0x2d1   :  { %v8839_v21 = vpop.f32.mrb[47].mxu0  ;;  %v2669_v19 = vsel %vm13556_vm13, %v8962_v48, 0.0 }
 0x2d2   :  { %13718 = vst [vmem:[#allocation32_spill] sm:$0xff] %v8948_v13  ;;  %v2665_v35 = vsel %vm13556_vm13, %v8948_v13, 0.0  ;;  %v8956_v58 = vadd.f32 %v8661_v15, %v8839_v21  ;;  %v8968_v13 = vadd.f32 %v8835_v9, %v8661_v15 }
 0x2d3   :  { %v2666_v63 = vadd.f32 %v2665_v35, %v2664_v50 }
 0x2d4   :  { %v2667_v56 = vsel %vm13556_vm13, %v8956_v58, 0.0  ;;  %13719 = vst [vmem:[#allocation33_spill] sm:$0xff] %v8968_v13  ;;  %v2671_v50 = vsel %vm13556_vm13, %v8968_v13, 0.0 }
 0x2d5   :  { %v2668_v28 = vadd.f32 %v2667_v56, %v2666_v63 }
 0x2d7   :  { %v2670_v47 = vadd.f32 %v2669_v19, %v2668_v28 }
 0x2d9   :  { %v2672_v35 = vadd.f32 %v2671_v50, %v2670_v47 }
 0x2ee   :  { %v7068_v24 = vpop.f32.mrb[48].mxu0 }
 0x2ef   :  { %v2513_v55 = vpop.f32.mrb[49].mxu0  ;;  %v8983_v9 = vadd.f32 %v7068_v24, %v8661_v15 }
 0x2f0   :  { %v7069_v30 = vpop.f32.mrb[50].mxu0  ;;  %v8971_v21 = vadd.f32 %v8661_v15, %v2513_v55 }
 0x2f1   :  { %v2516_v4 = vpop.f32.mrb[51].mxu0  ;;  %v2677_v19 = vsel %vm13556_vm13, %v8983_v9, 0.0  ;;  %v8988_v28 = vadd.f32 %v7069_v30, %v8661_v15 }
 0x2f2   :  { %13720 = vst [vmem:[#allocation34_spill] sm:$0xff] %v8971_v21  ;;  %v2673_v39 = vsel %vm13556_vm13, %v8971_v21, 0.0  ;;  %v8978_v5 = vadd.f32 %v8661_v15, %v2516_v4 }
 0x2f3   :  { %v2674_v63 = vadd.f32 %v2673_v39, %v2672_v35  ;;  %13721 = vst [vmem:[#allocation35_spill] sm:$0xff] %v8988_v28  ;;  %v2679_v47 = vsel %vm13556_vm13, %v8988_v28, 0.0 }
 0x2f4   :  { %v2675_v56 = vsel %vm13556_vm13, %v8978_v5, 0.0 }
 0x2f5   :  { %v2676_v55 = vadd.f32 %v2675_v56, %v2674_v63 }
 0x2f7   :  { %v2678_v4 = vadd.f32 %v2677_v19, %v2676_v55 }
 0x2f9   :  { %v2680_v35 = vadd.f32 %v2679_v47, %v2678_v4 }
 0x30e   :  { %v7072_v2 = vpop.f32.mrb[52].mxu0 }
 0x30f   :  { %v2529_v7 = vpop.f32.mrb[53].mxu0  ;;  %v9003_v55 = vadd.f32 %v7072_v2, %v8661_v15 }
 0x310   :  { %v7073_v26 = vpop.f32.mrb[54].mxu0  ;;  %v8991_v21 = vadd.f32 %v8661_v15, %v2529_v7 }
 0x311   :  { %v2532_v62 = vpop.f32.mrb[55].mxu0  ;;  %13723 = vst [vmem:[#allocation37_spill] sm:$0xff] %v9003_v55  ;;  %v2685_v28 = vsel %vm13556_vm13, %v9003_v55, 0.0 }
 0x312   :  { %13722 = vst [vmem:[#allocation36_spill] sm:$0xff] %v8991_v21  ;;  %v2681_v50 = vsel %vm13556_vm13, %v8991_v21, 0.0  ;;  %v8998_v24 = vadd.f32 %v8661_v15, %v2532_v62  ;;  %v9008_v21 = vadd.f32 %v7073_v26, %v8661_v15 }
 0x313   :  { %v2682_v30 = vadd.f32 %v2681_v50, %v2680_v35 }
 0x314   :  { %v2683_v7 = vsel %vm13556_vm13, %v8998_v24, 0.0  ;;  %13724 = vst [vmem:[#allocation38_spill] sm:$0xff] %v9008_v21  ;;  %v2687_v47 = vsel %vm13556_vm13, %v9008_v21, 0.0 }
 0x315   :  { %v2684_v19 = vadd.f32 %v2683_v7, %v2682_v30 }
 0x317   :  { %v2686_v4 = vadd.f32 %v2685_v28, %v2684_v19 }
 0x319   :  { %v2688_v35 = vadd.f32 %v2687_v47, %v2686_v4 }
 0x32e   :  { %v7076_v13 = vpop.f32.mrb[56].mxu0 }
 0x32f   :  { %v2545_v39 = vpop.f32.mrb[57].mxu0  ;;  %v9023_v26 = vadd.f32 %v7076_v13, %v8661_v15 }
 0x330   :  { %v7077_v63 = vpop.f32.mrb[58].mxu0  ;;  %v9011_v62 = vadd.f32 %v8661_v15, %v2545_v39 }
 0x331   :  { %v2548_v56 = vpop.f32.mrb[59].mxu0  ;;  %13727 = vst [vmem:[#allocation41_spill] sm:$0xff] %v9023_v26  ;;  %v2693_v28 = vsel %vm13556_vm13, %v9023_v26, 0.0  ;;  %v9028_v19 = vadd.f32 %v7077_v63, %v8661_v15 }
 0x332   :  { %13725 = vst [vmem:[#allocation39_spill] sm:$0xff] %v9011_v62  ;;  %v2689_v50 = vsel %vm13556_vm13, %v9011_v62, 0.0  ;;  %v9018_v2 = vadd.f32 %v8661_v15, %v2548_v56 }
 0x333   :  { %v2690_v30 = vadd.f32 %v2689_v50, %v2688_v35  ;;  %13728 = vst [vmem:[#allocation42_spill] sm:$0xff] %v9028_v19  ;;  %v2695_v50 = vsel %vm13556_vm13, %v9028_v19, 0.0 }
 0x334   :  { %13726 = vst [vmem:[#allocation40_spill] sm:$0xff] %v9018_v2  ;;  %v2691_v7 = vsel %vm13556_vm13, %v9018_v2, 0.0 }
 0x335   :  { %v2692_v39 = vadd.f32 %v2691_v7, %v2690_v30 }
 0x337   :  { %v2694_v62 = vadd.f32 %v2693_v28, %v2692_v39 }
 0x339   :  { %v2696_v30 = vadd.f32 %v2695_v50, %v2694_v62 }
 0x347   :  { %v7080_v21 = vpop.f32.mrb[60].mxu0 }
 0x348   :  { %v2561_v55 = vpop.f32.mrb[61].mxu0  ;;  %v9043_v39 = vadd.f32 %v7080_v21, %v8661_v15 }
 0x349   :  { %v9031_v56 = vadd.f32 %v8661_v15, %v2561_v55  ;;  %v7081_v4 = vpop.f32.mrb[62].mxu0 }
 0x34a   :  { %v2564_v47 = vpop.f32.mrb[63].mxu0  ;;  %v2701_v28 = vsel %vm13556_vm13, %v9043_v39, 0.0  ;;  %v9048_v19 = vadd.f32 %v7081_v4, %v8661_v15 }
 0x34b   :  { %13729 = vst [vmem:[#allocation43_spill] sm:$0xff] %v9031_v56  ;;  %v2697_v13 = vsel %vm13556_vm13, %v9031_v56, 0.0  ;;  %v9038_v35 = vadd.f32 %v8661_v15, %v2564_v47 }
 0x34c   :  { %v2698_v63 = vadd.f32 %v2697_v13, %v2696_v30  ;;  %v2703_v47 = vsel %vm13556_vm13, %v9048_v19, 0.0 }
 0x34d   :  { %13730 = vst [vmem:[#allocation44_spill] sm:$0xff] %v9038_v35  ;;  %v2699_v7 = vsel %vm13556_vm13, %v9038_v35, 0.0 }
 0x34e   :  { %v2700_v55 = vadd.f32 %v2699_v7, %v2698_v63 }
 0x350   :  { %v2702_v26 = vadd.f32 %v2701_v28, %v2700_v55 }
 0x352   :  { %v2704_v56 = vadd.f32 %v2703_v47, %v2702_v26 }
 0x354   :  { %v2705_v62 = vrot.slane %v2704_v56, 4 }
 0x356   :  { %v2706_v50 = vadd.f32 %v2705_v62, %v2704_v56 }
 0x358   :  { %v2707_v13 = vrot.slane %v2706_v50, 2 }
 0x35a   :  { %v2708_v30 = vadd.f32 %v2707_v13, %v2706_v50 }
 0x35c   :  { %v2709_v35 = vrot.slane %v2708_v30, 1 }
 0x35e   :  { %v2710_v2 = vadd.f32 %v2709_v35, %v2708_v30 }
 0x360   :  { %v9052_v21 = vmul.f32 0.001953125, %v2710_v2 }
 0x362   :  { %v2713_v63 = vsub.f32 %v8669_v8, %v9052_v21  ;;  %v2714_v15 = vsub.f32 %v8665_v1, %v9052_v21  ;;  %v2715_v4 = vsub.f32 %v8675_v11, %v9052_v21  ;;  %v2716_v26 = vsub.f32 %v8683_v25, %v9052_v21 }
 0x363   :  { %v2717_v55 = vsub.f32 %v8687_v20, %v9052_v21  ;;  %v2718_v2 = vsub.f32 %v8695_v46, %v9052_v21  ;;  %v2719_v13 = vsub.f32 %v8701_v53, %v9052_v21  ;;  %v2720_v20 = vsub.f32 %v8713_v51, %v9052_v21 }
 0x364   :  { %v2777_v7 = vmul.f32 %v2713_v63, %v2713_v63  ;;  %v2778_v56 = vmul.f32 %v2714_v15, %v2714_v15  ;;  %v2779_v35 = vmul.f32 %v2715_v4, %v2715_v4  ;;  %v2780_v28 = vmul.f32 %v2716_v26, %v2716_v26 }
 0x365   :  { %v2781_v30 = vmul.f32 %v2717_v55, %v2717_v55  ;;  %v2782_v4 = vmul.f32 %v2718_v2, %v2718_v2  ;;  %v2721_v26 = vsub.f32 %v8717_v22, %v9052_v21  ;;  %v2722_v55 = vsub.f32 %v8727_v29, %v9052_v21 }
 0x366   :  { %v2841_v47 = vsel %vm13556_vm13, %v2777_v7, 0.0  ;;  %v2842_v62 = vsel %vm13556_vm13, %v2778_v56, 0.0  ;;  %v2844_v63 = vsel %vm13556_vm13, %v2779_v35, 0.0  ;;  %v2846_v25 = vsel %vm13556_vm13, %v2780_v28, 0.0 }
 0x367   :  { %v2843_v50 = vadd.f32 %v2842_v62, %v2841_v47  ;;  %v2783_v7 = vmul.f32 %v2719_v13, %v2719_v13  ;;  %v2848_v56 = vsel %vm13556_vm13, %v2781_v30, 0.0  ;;  %v2784_v62 = vmul.f32 %v2720_v20, %v2720_v20 }
 0x368   :  { %v2850_v35 = vsel %vm13556_vm13, %v2782_v4, 0.0  ;;  %v2723_v2 = vsub.f32 %v8733_v33, %v9052_v21  ;;  %v2724_v13 = vsub.f32 %v8739_v45, %v9052_v21  ;;  %v2725_v20 = vsub.f32 %v8743_v54, %v9052_v21 }
 0x369   :  { %v2845_v15 = vadd.f32 %v2844_v63, %v2843_v50  ;;  %v2785_v63 = vmul.f32 %v2721_v26, %v2721_v26  ;;  %v2726_v26 = vsub.f32 %v8751_v6, %v9052_v21 }
 0x36b   :  { %v2847_v46 = vadd.f32 %v2846_v25, %v2845_v15  ;;  %v2852_v25 = vsel %vm13556_vm13, %v2783_v7, 0.0  ;;  %v2786_v15 = vmul.f32 %v2722_v55, %v2722_v55  ;;  %v2856_v4 = vsel %vm13556_vm13, %v2785_v63, 0.0 }
 0x36c   :  { %v2727_v55 = vsub.f32 %v8757_v27, %v9052_v21 }
 0x36d   :  { %v2849_v47 = vadd.f32 %v2848_v56, %v2847_v46  ;;  %v2854_v46 = vsel %vm13556_vm13, %v2784_v62, 0.0  ;;  %v2787_v56 = vmul.f32 %v2723_v2, %v2723_v2  ;;  %v2858_v7 = vsel %vm13556_vm13, %v2786_v15, 0.0 }
 0x36e   :  { %v2728_v2 = vsub.f32 %v8763_v57, %v9052_v21 }
 0x36f   :  { %v2851_v50 = vadd.f32 %v2850_v35, %v2849_v47  ;;  %v2788_v35 = vmul.f32 %v2724_v13, %v2724_v13  ;;  %v2860_v62 = vsel %vm13556_vm13, %v2787_v56, 0.0  ;;  %v2729_v13 = vsub.f32 %v8767_v52, %v9052_v21 }
 0x371   :  { %v2853_v28 = vadd.f32 %v2852_v25, %v2851_v50  ;;  %v2789_v25 = vmul.f32 %v2725_v20, %v2725_v20  ;;  %v2862_v63 = vsel %vm13556_vm13, %v2788_v35, 0.0  ;;  %v2730_v20 = vsub.f32 %v8781_v37, %v9052_v21 }
 0x373   :  { %v2855_v30 = vadd.f32 %v2854_v46, %v2853_v28  ;;  %v2790_v46 = vmul.f32 %v2726_v26, %v2726_v26  ;;  %v2864_v15 = vsel %vm13556_vm13, %v2789_v25, 0.0  ;;  %v2731_v26 = vsub.f32 %v8789_v61, %v9052_v21 }
 0x375   :  { %v2857_v47 = vadd.f32 %v2856_v4, %v2855_v30  ;;  %v2791_v4 = vmul.f32 %v2727_v55, %v2727_v55  ;;  %v2866_v56 = vsel %vm13556_vm13, %v2790_v46, 0.0  ;;  %v2732_v55 = vsub.f32 %v8795_v17, %v9052_v21 }
 0x377   :  { %v2859_v50 = vadd.f32 %v2858_v7, %v2857_v47  ;;  %v2792_v7 = vmul.f32 %v2728_v2, %v2728_v2  ;;  %v2868_v35 = vsel %vm13556_vm13, %v2791_v4, 0.0  ;;  %v2733_v2 = vsub.f32 %v8799_v41, %v9052_v21 }
 0x379   :  { %v2861_v28 = vadd.f32 %v2860_v62, %v2859_v50  ;;  %v2793_v62 = vmul.f32 %v2729_v13, %v2729_v13  ;;  %v2870_v25 = vsel %vm13556_vm13, %v2792_v7, 0.0  ;;  %v2734_v13 = vsub.f32 %v8807_v23, %v9052_v21 }
 0x37b   :  { %v2863_v30 = vadd.f32 %v2862_v63, %v2861_v28  ;;  %v2794_v63 = vmul.f32 %v2730_v20, %v2730_v20  ;;  %v2872_v46 = vsel %vm13556_vm13, %v2793_v62, 0.0  ;;  %v2735_v20 = vsub.f32 %v8813_v42, %v9052_v21 }
 0x37d   :  { %v2865_v47 = vadd.f32 %v2864_v15, %v2863_v30  ;;  %v2795_v15 = vmul.f32 %v2731_v26, %v2731_v26  ;;  %v2874_v4 = vsel %vm13556_vm13, %v2794_v63, 0.0  ;;  %v2736_v26 = vsub.f32 %v8819_v10, %v9052_v21 }
 0x37f   :  { %v2867_v50 = vadd.f32 %v2866_v56, %v2865_v47  ;;  %v2796_v56 = vmul.f32 %v2732_v55, %v2732_v55  ;;  %v2876_v7 = vsel %vm13556_vm13, %v2795_v15, 0.0  ;;  %v2737_v55 = vsub.f32 %v8823_v40, %v9052_v21 }
 0x381   :  { %v2869_v28 = vadd.f32 %v2868_v35, %v2867_v50  ;;  %v2797_v35 = vmul.f32 %v2733_v2, %v2733_v2  ;;  %v2878_v62 = vsel %vm13556_vm13, %v2796_v56, 0.0  ;;  %v2738_v2 = vsub.f32 %v8831_v0, %v9052_v21 }
 0x383   :  { %v2871_v30 = vadd.f32 %v2870_v25, %v2869_v28  ;;  %v2798_v25 = vmul.f32 %v2734_v13, %v2734_v13  ;;  %v2880_v63 = vsel %vm13556_vm13, %v2797_v35, 0.0  ;;  %v2739_v13 = vsub.f32 %v8843_v36, %v9052_v21 }
 0x385   :  { %v2873_v47 = vadd.f32 %v2872_v46, %v2871_v30  ;;  %v2799_v46 = vmul.f32 %v2735_v20, %v2735_v20  ;;  %v2882_v15 = vsel %vm13556_vm13, %v2798_v25, 0.0  ;;  %v2740_v20 = vsub.f32 %v8849_v59, %v9052_v21 }
 0x387   :  { %v2875_v50 = vadd.f32 %v2874_v4, %v2873_v47  ;;  %v2800_v4 = vmul.f32 %v2736_v26, %v2736_v26  ;;  %v2884_v56 = vsel %vm13556_vm13, %v2799_v46, 0.0  ;;  %v2741_v26 = vsub.f32 %v8853_v3, %v9052_v21 }
 0x389   :  { %v2877_v28 = vadd.f32 %v2876_v7, %v2875_v50  ;;  %v2801_v7 = vmul.f32 %v2737_v55, %v2737_v55  ;;  %v2886_v35 = vsel %vm13556_vm13, %v2800_v4, 0.0  ;;  %v2742_v55 = vsub.f32 %v8861_v49, %v9052_v21 }
 0x38b   :  { %v2879_v30 = vadd.f32 %v2878_v62, %v2877_v28  ;;  %v2802_v62 = vmul.f32 %v2738_v2, %v2738_v2  ;;  %v2888_v25 = vsel %vm13556_vm13, %v2801_v7, 0.0  ;;  %v2743_v2 = vsub.f32 %v8867_v38, %v9052_v21 }
 0x38d   :  { %v2881_v47 = vadd.f32 %v2880_v63, %v2879_v30  ;;  %v2803_v63 = vmul.f32 %v2739_v13, %v2739_v13  ;;  %v2890_v46 = vsel %vm13556_vm13, %v2802_v62, 0.0  ;;  %v2744_v13 = vsub.f32 %v8873_v43, %v9052_v21 }
 0x38f   :  { %v2883_v50 = vadd.f32 %v2882_v15, %v2881_v47  ;;  %v2804_v15 = vmul.f32 %v2740_v20, %v2740_v20  ;;  %v2892_v4 = vsel %vm13556_vm13, %v2803_v63, 0.0  ;;  %v2745_v20 = vsub.f32 %v8877_v31, %v9052_v21 }
 0x391   :  { %v2885_v28 = vadd.f32 %v2884_v56, %v2883_v50  ;;  %v2805_v56 = vmul.f32 %v2741_v26, %v2741_v26  ;;  %v2894_v7 = vsel %vm13556_vm13, %v2804_v15, 0.0  ;;  %v2746_v26 = vsub.f32 %v8885_v12, %v9052_v21 }
 0x393   :  { %v2887_v30 = vadd.f32 %v2886_v35, %v2885_v28  ;;  %v2806_v35 = vmul.f32 %v2742_v55, %v2742_v55  ;;  %v2896_v62 = vsel %vm13556_vm13, %v2805_v56, 0.0  ;;  %v2747_v55 = vsub.f32 %v8891_v44, %v9052_v21 }
 0x395   :  { %v2889_v47 = vadd.f32 %v2888_v25, %v2887_v30  ;;  %v2807_v25 = vmul.f32 %v2743_v2, %v2743_v2  ;;  %v2898_v63 = vsel %vm13556_vm13, %v2806_v35, 0.0  ;;  %v2748_v2 = vsub.f32 %v8897_v14, %v9052_v21 }
 0x397   :  { %v2891_v50 = vadd.f32 %v2890_v46, %v2889_v47  ;;  %v2808_v46 = vmul.f32 %v2744_v13, %v2744_v13  ;;  %v2900_v15 = vsel %vm13556_vm13, %v2807_v25, 0.0  ;;  %v2749_v13 = vsub.f32 %v8901_v60, %v9052_v21 }
 0x399   :  { %v2893_v28 = vadd.f32 %v2892_v4, %v2891_v50  ;;  %v2809_v4 = vmul.f32 %v2745_v20, %v2745_v20  ;;  %v2902_v56 = vsel %vm13556_vm13, %v2808_v46, 0.0  ;;  %v2750_v20 = vsub.f32 %v8909_v32, %v9052_v21 }
 0x39a   :  { %v2751_v46 = vsub.f32 %v8915_v18, %v9052_v21 }
 0x39b   :  { %v2895_v30 = vadd.f32 %v2894_v7, %v2893_v28  ;;  %v2810_v7 = vmul.f32 %v2746_v26, %v2746_v26  ;;  %v2904_v35 = vsel %vm13556_vm13, %v2809_v4, 0.0  ;;  %v13731_v26 = vld [vmem:[#allocation4_spill] sm:$0xff]  ;;  %v2752_v4 = vsub.f32 %v8921_v16, %v9052_v21 }
 0x39c   :  { %4277 = vrot.lane.b32.xlu1 %v13731_v26, %s7237_s2 }
 0x39d   :  { %v2897_v47 = vadd.f32 %v2896_v62, %v2895_v30  ;;  %v2811_v62 = vmul.f32 %v2747_v55, %v2747_v55  ;;  %v2906_v25 = vsel %vm13556_vm13, %v2810_v7, 0.0  ;;  %v13732_v7 = vld [vmem:[#allocation29_spill] sm:$0xff]  ;;  %v2816_v0 = vmul.f32 %v2752_v4, %v2752_v4 }
 0x39f   :  { %v2899_v50 = vadd.f32 %v2898_v63, %v2897_v47  ;;  %v2812_v63 = vmul.f32 %v2748_v2, %v2748_v2  ;;  %v2908_v55 = vsel %vm13556_vm13, %v2811_v62, 0.0 }
 0x3a1   :  { %v2901_v28 = vadd.f32 %v2900_v15, %v2899_v50  ;;  %v2813_v15 = vmul.f32 %v2749_v13, %v2749_v13  ;;  %v2910_v2 = vsel %vm13556_vm13, %v2812_v63, 0.0  ;;  %v2754_v13 = vsub.f32 %v8933_v34, %v9052_v21 }
 0x3a3   :  { %v2903_v30 = vadd.f32 %v2902_v56, %v2901_v28  ;;  %v2814_v56 = vmul.f32 %v2750_v20, %v2750_v20  ;;  %v2818_v10 = vmul.f32 %v2754_v13, %v2754_v13  ;;  %v2759_v13 = vsub.f32 %v8962_v48, %v9052_v21 }
 0x3a5   :  { %v2905_v47 = vadd.f32 %v2904_v35, %v2903_v30  ;;  %v2753_v35 = vsub.f32 %v13732_v7, %v9052_v21  ;;  %v2914_v62 = vsel %vm13556_vm13, %v2814_v56, 0.0  ;;  %v2823_v41 = vmul.f32 %v2759_v13, %v2759_v13 }
 0x3a7   :  { %v2907_v50 = vadd.f32 %v2906_v25, %v2905_v47  ;;  %v2815_v47 = vmul.f32 %v2751_v46, %v2751_v46  ;;  %v2912_v25 = vsel %vm13556_vm13, %v2813_v15, 0.0  ;;  %v2817_v40 = vmul.f32 %v2753_v35, %v2753_v35 }
 0x3a8   :  { %v2918_v15 = vsel %vm13556_vm13, %v2816_v0, 0.0  ;;  %v2758_v35 = vsub.f32 %v8956_v58, %v9052_v21 }
 0x3a9   :  { %v2909_v28 = vadd.f32 %v2908_v55, %v2907_v50  ;;  %v13733_v55 = vld [vmem:[#allocation30_spill] sm:$0xff]  ;;  %v2916_v63 = vsel %vm13556_vm13, %v2815_v47, 0.0  ;;  %v2922_v47 = vsel %vm13556_vm13, %v2818_v10, 0.0 }
 0x3aa   :  { %v2755_v20 = vsub.f32 %v13733_v55, %v9052_v21  ;;  %v2822_v23 = vmul.f32 %v2758_v35, %v2758_v35  ;;  %v2763_v35 = vsub.f32 %v8983_v9, %v9052_v21 }
 0x3ab   :  { %v2911_v30 = vadd.f32 %v2910_v2, %v2909_v28  ;;  %v13734_v2 = vld [vmem:[#allocation31_spill] sm:$0xff] }
 0x3ac   :  { %v2756_v46 = vsub.f32 %v13734_v2, %v9052_v21  ;;  %v2819_v42 = vmul.f32 %v2755_v20, %v2755_v20  ;;  %v2827_v61 = vmul.f32 %v2763_v35, %v2763_v35 }
 0x3ad   :  { %v2913_v26 = vadd.f32 %v2912_v25, %v2911_v30  ;;  %v13735_v25 = vld [vmem:[#allocation32_spill] sm:$0xff] }
 0x3ae   :  { %v2757_v4 = vsub.f32 %v13735_v25, %v9052_v21  ;;  %v2924_v0 = vsel %vm13556_vm13, %v2819_v42, 0.0  ;;  %v2930_v42 = vsel %vm13556_vm13, %v2822_v23, 0.0 }
 0x3af   :  { %v2915_v50 = vadd.f32 %v2914_v62, %v2913_v26  ;;  %v2920_v26 = vsel %vm13556_vm13, %v2817_v40, 0.0  ;;  %v2820_v62 = vmul.f32 %v2756_v46, %v2756_v46 }
 0x3b1   :  { %v2917_v28 = vadd.f32 %v2916_v63, %v2915_v50  ;;  %v2821_v63 = vmul.f32 %v2757_v4, %v2757_v4  ;;  %v2926_v40 = vsel %vm13556_vm13, %v2820_v62, 0.0  ;;  %v2762_v4 = vsub.f32 %v8978_v5, %v9052_v21 }
 0x3b2   :  { %v2932_v62 = vsel %vm13556_vm13, %v2823_v41, 0.0 }
 0x3b3   :  { %v2919_v30 = vadd.f32 %v2918_v15, %v2917_v28  ;;  %v13736_v15 = vld [vmem:[#allocation33_spill] sm:$0xff]  ;;  %v2928_v10 = vsel %vm13556_vm13, %v2821_v63, 0.0  ;;  %v2826_v17 = vmul.f32 %v2762_v4, %v2762_v4 }
 0x3b4   :  { %v2760_v20 = vsub.f32 %v13736_v15, %v9052_v21 }
 0x3b5   :  { %v2921_v56 = vadd.f32 %v2920_v26, %v2919_v30  ;;  %v13737_v26 = vld [vmem:[#allocation34_spill] sm:$0xff]  ;;  %v2938_v41 = vsel %vm13556_vm13, %v2826_v17, 0.0 }
 0x3b6   :  { %v2761_v46 = vsub.f32 %v13737_v26, %v9052_v21 }
 0x3b7   :  { %v2923_v50 = vadd.f32 %v2922_v47, %v2921_v56  ;;  %v2824_v47 = vmul.f32 %v2760_v20, %v2760_v20 }
 0x3b9   :  { %v2925_v28 = vadd.f32 %v2924_v0, %v2923_v50  ;;  %v2825_v0 = vmul.f32 %v2761_v46, %v2761_v46  ;;  %v2934_v63 = vsel %vm13556_vm13, %v2824_v47, 0.0  ;;  %v2766_v46 = vsub.f32 %v8998_v24, %v9052_v21 }
 0x3ba   :  { %v2940_v47 = vsel %vm13556_vm13, %v2827_v61, 0.0 }
 0x3bb   :  { %v2927_v30 = vadd.f32 %v2926_v40, %v2925_v28  ;;  %v13738_v40 = vld [vmem:[#allocation35_spill] sm:$0xff]  ;;  %v2936_v23 = vsel %vm13556_vm13, %v2825_v0, 0.0  ;;  %v2830_v52 = vmul.f32 %v2766_v46, %v2766_v46 }
 0x3bc   :  { %v2764_v13 = vsub.f32 %v13738_v40, %v9052_v21 }
 0x3bd   :  { %v2929_v56 = vadd.f32 %v2928_v10, %v2927_v30  ;;  %v13739_v10 = vld [vmem:[#allocation36_spill] sm:$0xff]  ;;  %v2946_v61 = vsel %vm13556_vm13, %v2830_v52, 0.0 }
 0x3be   :  { %v2765_v20 = vsub.f32 %v13739_v10, %v9052_v21 }
 0x3bf   :  { %v2931_v50 = vadd.f32 %v2930_v42, %v2929_v56  ;;  %v2828_v42 = vmul.f32 %v2764_v13, %v2764_v13 }
 0x3c0   :  { %v2829_v37 = vmul.f32 %v2765_v20, %v2765_v20 }
 0x3c1   :  { %v2933_v28 = vadd.f32 %v2932_v62, %v2931_v50  ;;  %v13740_v62 = vld [vmem:[#allocation37_spill] sm:$0xff]  ;;  %v2942_v0 = vsel %vm13556_vm13, %v2828_v42, 0.0 }
 0x3c2   :  { %v2767_v4 = vsub.f32 %v13740_v62, %v9052_v21  ;;  %v2944_v17 = vsel %vm13556_vm13, %v2829_v37, 0.0 }
 0x3c3   :  { %v2935_v30 = vadd.f32 %v2934_v63, %v2933_v28  ;;  %v13741_v63 = vld [vmem:[#allocation38_spill] sm:$0xff] }
 0x3c4   :  { %v2768_v35 = vsub.f32 %v13741_v63, %v9052_v21  ;;  %v2831_v57 = vmul.f32 %v2767_v4, %v2767_v4 }
 0x3c5   :  { %v2937_v56 = vadd.f32 %v2936_v23, %v2935_v30  ;;  %v13742_v23 = vld [vmem:[#allocation39_spill] sm:$0xff] }
 0x3c6   :  { %v2769_v13 = vsub.f32 %v13742_v23, %v9052_v21  ;;  %v2832_v27 = vmul.f32 %v2768_v35, %v2768_v35  ;;  %v2948_v42 = vsel %vm13556_vm13, %v2831_v57, 0.0 }
 0x3c7   :  { %v2939_v50 = vadd.f32 %v2938_v41, %v2937_v56  ;;  %v13743_v41 = vld [vmem:[#allocation40_spill] sm:$0xff] }
 0x3c8   :  { %v2770_v20 = vsub.f32 %v13743_v41, %v9052_v21  ;;  %v2833_v6 = vmul.f32 %v2769_v13, %v2769_v13  ;;  %v2950_v37 = vsel %vm13556_vm13, %v2832_v27, 0.0 }
 0x3c9   :  { %v2941_v28 = vadd.f32 %v2940_v47, %v2939_v50  ;;  %v13744_v47 = vld [vmem:[#allocation41_spill] sm:$0xff] }
 0x3ca   :  { %v2771_v46 = vsub.f32 %v13744_v47, %v9052_v21  ;;  %v2834_v54 = vmul.f32 %v2770_v20, %v2770_v20  ;;  %v2952_v52 = vsel %vm13556_vm13, %v2833_v6, 0.0  ;;  %v2775_v20 = vsub.f32 %v9043_v39, %v9052_v21 }
 0x3cb   :  { %v2943_v30 = vadd.f32 %v2942_v0, %v2941_v28  ;;  %v13745_v0 = vld [vmem:[#allocation42_spill] sm:$0xff] }
 0x3cc   :  { %v2772_v4 = vsub.f32 %v13745_v0, %v9052_v21  ;;  %v2835_v45 = vmul.f32 %v2771_v46, %v2771_v46  ;;  %v2954_v57 = vsel %vm13556_vm13, %v2834_v54, 0.0  ;;  %v2776_v46 = vsub.f32 %v9048_v19, %v9052_v21 }
 0x3cd   :  { %v2945_v56 = vadd.f32 %v2944_v17, %v2943_v30  ;;  %v13746_v17 = vld [vmem:[#allocation43_spill] sm:$0xff] }
 0x3ce   :  { %v2773_v35 = vsub.f32 %v13746_v17, %v9052_v21  ;;  %v2836_v33 = vmul.f32 %v2772_v4, %v2772_v4  ;;  %v2956_v27 = vsel %vm13556_vm13, %v2835_v45, 0.0  ;;  %v2840_v54 = vmul.f32 %v2776_v46, %v2776_v46 }
 0x3cf   :  { %v2947_v50 = vadd.f32 %v2946_v61, %v2945_v56  ;;  %v13747_v61 = vld [vmem:[#allocation44_spill] sm:$0xff] }
 0x3d0   :  { %v2774_v13 = vsub.f32 %v13747_v61, %v9052_v21  ;;  %v2958_v6 = vsel %vm13556_vm13, %v2836_v33, 0.0  ;;  %v2966_v45 = vsel %vm13556_vm13, %v2840_v54, 0.0 }
 0x3d1   :  { %v2949_v28 = vadd.f32 %v2948_v42, %v2947_v50  ;;  %v2837_v42 = vmul.f32 %v2773_v35, %v2773_v35 }
 0x3d3   :  { %v2951_v30 = vadd.f32 %v2950_v37, %v2949_v28  ;;  %v2838_v37 = vmul.f32 %v2774_v13, %v2774_v13  ;;  %v2960_v4 = vsel %vm13556_vm13, %v2837_v42, 0.0  ;;  %v2981_v42 = vlaneseq }
 0x3d5   :  { %v2953_v56 = vadd.f32 %v2952_v52, %v2951_v30  ;;  %v2839_v52 = vmul.f32 %v2775_v20, %v2775_v20  ;;  %v2982_v46 = vshrl.u32 %v2981_v42, 7 }
 0x3d7   :  { %v2955_v50 = vadd.f32 %v2954_v57, %v2953_v56  ;;  %v2962_v56 = vsel %vm13556_vm13, %v2838_v37, 0.0  ;;  %v2964_v35 = vsel %vm13556_vm13, %v2839_v52, 0.0  ;;  %v9251_v37 = vsub.s32 0, %v2982_v46 }
 0x3d9   :  { %v2957_v28 = vadd.f32 %v2956_v27, %v2955_v50  ;;  %13748 = vst [vmem:[#allocation29_spill] sm:$0xff] %v9251_v37 }
 0x3db   :  { %v2959_v30 = vadd.f32 %v2958_v6, %v2957_v28 }
 0x3dd   :  { %v2961_v29 = vadd.f32 %v2960_v4, %v2959_v30 }
 0x3df   :  { %v2963_v57 = vadd.f32 %v2962_v56, %v2961_v29  ;;  %v2576_v29 = vld [vmem:[%s13476_s3] sm:$0x1]  ;;  %s7238_s3 = smov 24  }
 0x3e1   :  { %v2965_v22 = vadd.f32 %v2964_v35, %v2963_v57 }
 0x3e3   :  { %v2967_v50 = vadd.f32 %v2966_v45, %v2965_v22  ;;  %v2577_v22 = vld [vmem:[%s13477_s4] sm:$0x1]  ;;  %s7239_s4 = smov 48  }
 0x3e5   :  { %v2968_v27 = vrot.slane %v2967_v50, 4 }
 0x3e7   :  { %v2969_v51 = vadd.f32 %v2968_v27, %v2967_v50 }
 0x3e9   :  { %v2970_v13 = vrot.slane %v2969_v51, 2 }
 0x3eb   :  { %v2971_v53 = vadd.f32 %v2970_v13, %v2969_v51 }
 0x3ed   :  { %v2972_v33 = vrot.slane %v2971_v53, 1 }
 0x3ef   :  { %v2973_v28 = vadd.f32 %v2972_v33, %v2971_v53 }
 0x3f1   :  { %v2974_v20 = vmul.f32 0.001953125, %v2973_v28 }
 0x3f3   :  { %v2975_v6 = vadd.f32 1e-05, %v2974_v20 }
 0x3f5   :  { %7223 = vrsqrt.f32 %v2975_v6 }
 0x3ff   :  { %v7224_v30 = vpop.eup %7223 }
 0x400   :  { %v2977_v52 = vmul.f32 %v7224_v30, %v2576_v29 }
 0x402   :  { %v2978_v51 = vmul.f32 %v2977_v52, %v9052_v21  ;;  %v9258_v53 = vrot.slane %v2977_v52, %v9251_v37 }
 0x404   :  { %13749 = vst [vmem:[#allocation30_spill] sm:$0xff] %v9258_v53  ;;  %v2979_v4 = vsub.f32 %v2577_v22, %v2978_v51  ;;  %v3046_v54 = vmul.f32 %v9258_v53, %v13746_v17  ;;  %v3047_v56 = vmul.f32 %v9258_v53, %v13747_v61  ;;  %v3012_v17 = vmul.f32 %v9258_v53, %v8843_v36 }
 0x405   :  { %v3013_v61 = vmul.f32 %v9258_v53, %v8849_v59  ;;  %v3014_v28 = vmul.f32 %v9258_v53, %v8853_v3  ;;  %v3015_v20 = vmul.f32 %v9258_v53, %v8861_v49  ;;  %v3016_v6 = vmul.f32 %v9258_v53, %v8867_v38 }
 0x406   :  { %v9265_v57 = vrot.slane %v2979_v4, %v9251_v37  ;;  %v3017_v42 = vmul.f32 %v9258_v53, %v8873_v43  ;;  %v3018_v46 = vmul.f32 %v9258_v53, %v8877_v31  ;;  %v3019_v36 = vmul.f32 %v9258_v53, %v8885_v12  ;;  %v13780_v37 = vld [vmem:[#allocation20_spill] sm:$0xff] }
 0x407   :  { %v3020_v59 = vmul.f32 %v9258_v53, %v8891_v44  ;;  %v3021_v3 = vmul.f32 %v9258_v53, %v8897_v14  ;;  %v3022_v49 = vmul.f32 %v9258_v53, %v8901_v60  ;;  %v3023_v38 = vmul.f32 %v9258_v53, %v8909_v32 }
 0x408   :  { %13750 = vst [vmem:[#allocation31_spill] sm:$0xff] %v9265_v57  ;;  %v3116_v35 = vadd.f32 %v9265_v57, %v3046_v54  ;;  %v3117_v45 = vadd.f32 %v9265_v57, %v3047_v56  ;;  %v3024_v43 = vmul.f32 %v9258_v53, %v8915_v18  ;;  %v3025_v31 = vmul.f32 %v9258_v53, %v8921_v16 }
 0x409   :  { %v3026_v12 = vmul.f32 %v9258_v53, %v13732_v7  ;;  %v3027_v44 = vmul.f32 %v9258_v53, %v8933_v34  ;;  %v3028_v14 = vmul.f32 %v9258_v53, %v13733_v55  ;;  %v3029_v60 = vmul.f32 %v9258_v53, %v13734_v2 }
 0x40a   :  { %vm3180_vm0 = vcmp.ge.f32.partialorder %v3116_v35, 0.0  ;;  %vm3181_vm1 = vcmp.ge.f32.partialorder %v3117_v45, 0.0  ;;  %v3244_v21 = vmul.f32 0.2, %v3116_v35  ;;  %v3245_v50 = vmul.f32 0.2, %v3117_v45 }
 0x40b   :  { %v3030_v32 = vmul.f32 %v9258_v53, %v13735_v25  ;;  %v3031_v18 = vmul.f32 %v9258_v53, %v8956_v58  ;;  %v3032_v16 = vmul.f32 %v9258_v53, %v8962_v48  ;;  %v3033_v7 = vmul.f32 %v9258_v53, %v13736_v15 }
 0x40c   :  { %v3308_v27 = vsel %vm3180_vm0, %v3116_v35, %v3244_v21  ;;  %v3309_v13 = vsel %vm3181_vm1, %v3117_v45, %v3245_v50  ;;  %v3034_v34 = vmul.f32 %v9258_v53, %v13737_v26  ;;  %v3035_v55 = vmul.f32 %v9258_v53, %v8978_v5 }
 0x40d   :  { %v9269_v33 = vpack.c.bf16 %v3309_v13, %v3308_v27  ;;  %v3036_v2 = vmul.f32 %v9258_v53, %v8983_v9  ;;  %v3037_v25 = vmul.f32 %v9258_v53, %v13738_v40  ;;  %v3038_v58 = vmul.f32 %v9258_v53, %v13739_v10 }
 0x40e   :  { %v3039_v48 = vmul.f32 %v9258_v53, %v8998_v24  ;;  %v3040_v15 = vmul.f32 %v9258_v53, %v13740_v62  ;;  %v3041_v26 = vmul.f32 %v9258_v53, %v13741_v63  ;;  %v3042_v5 = vmul.f32 %v9258_v53, %v13742_v23 }
 0x40f   :  { %13751 = vst [vmem:[#allocation32_spill] sm:$0xff] %v9269_v33  ;;  %v3043_v9 = vmul.f32 %v9258_v53, %v13743_v41  ;;  %v3044_v40 = vmul.f32 %v9258_v53, %v13744_v47  ;;  %v3045_v10 = vmul.f32 %v9258_v53, %v13745_v0  ;;  %v3048_v24 = vmul.f32 %v9258_v53, %v9043_v39  ;;  %v13781_v33 = vld [vmem:[#allocation21_spill] sm:$0xff] }
 0x410   :  { %v3049_v62 = vmul.f32 %v9258_v53, %v9048_v19  ;;  %v9344_v63 = vadd.f32 %v9265_v57, %v3012_v17  ;;  %v9347_v23 = vadd.f32 %v9265_v57, %v3013_v61  ;;  %v9350_v41 = vadd.f32 %v9265_v57, %v3014_v28 }
 0x411   :  { %v9353_v47 = vadd.f32 %v9265_v57, %v3015_v20  ;;  %v9356_v0 = vadd.f32 %v9265_v57, %v3016_v6  ;;  %v9359_v39 = vadd.f32 %v9265_v57, %v3017_v42  ;;  %v9362_v19 = vadd.f32 %v9265_v57, %v3018_v46 }
 0x412   :  { %v9365_v29 = vadd.f32 %v9265_v57, %v3019_v36  ;;  %v9368_v30 = vadd.f32 %v9265_v57, %v3020_v59  ;;  %v9371_v52 = vadd.f32 %v9265_v57, %v3021_v3  ;;  %v9374_v22 = vadd.f32 %v9265_v57, %v3022_v49 }
 0x413   :  { %13752 = vst [vmem:[#allocation33_spill] sm:$0xff] %v9356_v0  ;;  %13753 = vst [vmem:[#allocation34_spill] sm:$0xff] %v9359_v39  ;;  %v9377_v51 = vadd.f32 %v9265_v57, %v3023_v38  ;;  %v9380_v4 = vadd.f32 %v9265_v57, %v3024_v43  ;;  %v9383_v54 = vadd.f32 %v9265_v57, %v3025_v31  ;;  %vm3147_vm13 = vcmp.ge.f32.partialorder %v9347_v23, 0.0 }
 0x414   :  { %v9386_v56 = vadd.f32 %v9265_v57, %v3026_v12  ;;  %v9389_v35 = vadd.f32 %v9265_v57, %v3027_v44  ;;  %v9392_v45 = vadd.f32 %v9265_v57, %v3028_v14  ;;  %v9395_v21 = vadd.f32 %v9265_v57, %v3029_v60 }
 0x415   :  { %v9398_v50 = vadd.f32 %v9265_v57, %v3030_v32  ;;  %v9401_v27 = vadd.f32 %v9265_v57, %v3031_v18  ;;  %v9404_v13 = vadd.f32 %v9265_v57, %v3032_v16  ;;  %v9407_v17 = vadd.f32 %v9265_v57, %v3033_v7  ;;  %v13766_v32 = vld [vmem:[#allocation6_spill] sm:$0xff]  ;;  %v13767_v16 = vld [vmem:[#allocation7_spill] sm:$0xff] }
 0x416   :  { %13754 = vst [vmem:[#allocation35_spill] sm:$0xff] %v9392_v45  ;;  %v9410_v61 = vadd.f32 %v9265_v57, %v3034_v34  ;;  %v9413_v28 = vadd.f32 %v9265_v57, %v3035_v55  ;;  %v9416_v20 = vadd.f32 %v9265_v57, %v3036_v2  ;;  %v9419_v6 = vadd.f32 %v9265_v57, %v3037_v25  ;;  %v13768_v34 = vld [vmem:[#allocation8_spill] sm:$0xff]  ;;  %v13769_v2 = vld [vmem:[#allocation9_spill] sm:$0xff] }
 0x417   :  { %13755 = vst [vmem:[#allocation36_spill] sm:$0xff] %v9398_v50  ;;  %13756 = vst [vmem:[#allocation37_spill] sm:$0xff] %v9404_v13  ;;  %v9422_v42 = vadd.f32 %v9265_v57, %v3038_v58  ;;  %v9425_v46 = vadd.f32 %v9265_v57, %v3039_v48  ;;  %v9428_v36 = vadd.f32 %v9265_v57, %v3040_v15  ;;  %v13770_v58 = vld [vmem:[#allocation10_spill] sm:$0xff]  ;;  %v13771_v48 = vld [vmem:[#allocation11_spill] sm:$0xff]  ;;  %vm3165_vm3 = vcmp.ge.f32.partialorder %v9401_v27, 0.0 }
 0x418   :  { %13757 = vst [vmem:[#allocation38_spill] sm:$0xff] %v9407_v17  ;;  %13758 = vst [vmem:[#allocation39_spill] sm:$0xff] %v9410_v61  ;;  %v9431_v59 = vadd.f32 %v9265_v57, %v3041_v26  ;;  %v9434_v3 = vadd.f32 %v9265_v57, %v3042_v5  ;;  %v9437_v49 = vadd.f32 %v9265_v57, %v3043_v9  ;;  %v13772_v15 = vld [vmem:[#allocation12_spill] sm:$0xff]  ;;  %v13773_v26 = vld [vmem:[#allocation13_spill] sm:$0xff]  ;;  %vm3168_vm4 = vcmp.ge.f32.partialorder %v9410_v61, 0.0 }
 0x419   :  { %13759 = vst [vmem:[#allocation40_spill] sm:$0xff] %v9413_v28  ;;  %13760 = vst [vmem:[#allocation41_spill] sm:$0xff] %v9416_v20  ;;  %v9440_v38 = vadd.f32 %v9265_v57, %v3044_v40  ;;  %v9443_v43 = vadd.f32 %v9265_v57, %v3045_v10  ;;  %v9446_v31 = vadd.f32 %v9265_v57, %v3048_v24  ;;  %v13774_v9 = vld [vmem:[#allocation14_spill] sm:$0xff]  ;;  %v13775_v10 = vld [vmem:[#allocation15_spill] sm:$0xff]  ;;  %vm3174_vm5 = vcmp.ge.f32.partialorder %v9428_v36, 0.0 }
 0x41a   :  { %13761 = vst [vmem:[#allocation42_spill] sm:$0xff] %v9419_v6  ;;  %13762 = vst [vmem:[#allocation43_spill] sm:$0xff] %v9422_v42  ;;  %v9449_v12 = vadd.f32 %v9265_v57, %v3049_v62  ;;  %v2986_v44 = vmul.f32 %v9258_v53, %v8669_v8  ;;  %v2987_v14 = vmul.f32 %v9258_v53, %v8665_v1  ;;  %v13776_v62 = vld [vmem:[#allocation16_spill] sm:$0xff] }
 0x41b   :  { %13763 = vst [vmem:[#allocation44_spill] sm:$0xff] %v9428_v36  ;;  %13764 = vst [vmem:[#allocation45_spill] sm:$0xff] %v9446_v31  ;;  %v2988_v60 = vmul.f32 %v9258_v53, %v8675_v11  ;;  %v2989_v18 = vmul.f32 %v9258_v53, %v13766_v32  ;;  %v2990_v7 = vmul.f32 %v9258_v53, %v13767_v16  ;;  %v13777_v16 = vld [vmem:[#allocation17_spill] sm:$0xff]  ;;  %v13787_v31 = vld [vmem:[#allocation24_spill] sm:$0xff] }
 0x41c   :  { %13765 = vst [vmem:[#allocation46_spill] sm:$0xff] %v9449_v12  ;;  %v2991_v55 = vmul.f32 %v9258_v53, %v13768_v34  ;;  %v2992_v25 = vmul.f32 %v9258_v53, %v13769_v2  ;;  %v2993_v8 = vmul.f32 %v9258_v53, %v13770_v58  ;;  %v2994_v1 = vmul.f32 %v9258_v53, %v13771_v48  ;;  %v13778_v2 = vld [vmem:[#allocation18_spill] sm:$0xff]  ;;  %v13779_v48 = vld [vmem:[#allocation19_spill] sm:$0xff] }
 0x41d   :  { %v2995_v11 = vmul.f32 %v9258_v53, %v13772_v15  ;;  %v2996_v5 = vmul.f32 %v9258_v53, %v13773_v26  ;;  %v2997_v40 = vmul.f32 %v9258_v53, %v13774_v9  ;;  %v2998_v24 = vmul.f32 %v9258_v53, %v13775_v10  ;;  %v13783_v10 = vld [vmem:[#allocation22_spill] sm:$0xff] }
 0x41e   :  { %v2999_v32 = vmul.f32 %v9258_v53, %v13776_v62  ;;  %v3000_v34 = vmul.f32 %v9258_v53, %v13777_v16  ;;  %v3001_v58 = vmul.f32 %v9258_v53, %v13778_v2  ;;  %v3002_v15 = vmul.f32 %v9258_v53, %v13779_v48  ;;  %v13785_v62 = vld [vmem:[#allocation23_spill] sm:$0xff] }
 0x41f   :  { %v3003_v26 = vmul.f32 %v9258_v53, %v13780_v37  ;;  %v9489_v9 = vmul.f32 %v9258_v53, %v13781_v33  ;;  %v9493_v12 = vmul.f32 %v9258_v53, %v13783_v10  ;;  %v9497_v16 = vmul.f32 %v9258_v53, %v13785_v62 }
 0x420   :  { %v9501_v2 = vmul.f32 %v9258_v53, %v13787_v31  ;;  %v3056_v48 = vadd.f32 %v9265_v57, %v2986_v44  ;;  %v3058_v37 = vadd.f32 %v9265_v57, %v2988_v60  ;;  %v3059_v39 = vadd.f32 %v9265_v57, %v2989_v18 }
 0x421   :  { %13782 = vst [vmem:[#allocation6_spill] sm:$0xff] %v9489_v9  ;;  %13784 = vst [vmem:[#allocation7_spill] sm:$0xff] %v9493_v12  ;;  %v3057_v33 = vadd.f32 %v9265_v57, %v2987_v14  ;;  %v3060_v0 = vadd.f32 %v9265_v57, %v2990_v7  ;;  %v9509_v10 = vadd.f32 %v9265_v57, %v2991_v55 }
 0x422   :  { %13786 = vst [vmem:[#allocation8_spill] sm:$0xff] %v9497_v16  ;;  %13788 = vst [vmem:[#allocation9_spill] sm:$0xff] %v9501_v2  ;;  %v9512_v62 = vadd.f32 %v9265_v57, %v2992_v25  ;;  %v9515_v16 = vadd.f32 %v9265_v57, %v2993_v8  ;;  %v9518_v31 = vadd.f32 %v9265_v57, %v2994_v1  ;;  %v3186_v1 = vmul.f32 0.2, %v3058_v37 }
 0x423   :  { %v9521_v44 = vadd.f32 %v9265_v57, %v2995_v11  ;;  %v9524_v60 = vadd.f32 %v9265_v57, %v2996_v5  ;;  %v9527_v14 = vadd.f32 %v9265_v57, %v2997_v40  ;;  %v9530_v18 = vadd.f32 %v9265_v57, %v2998_v24 }
 0x424   :  { %v9533_v7 = vadd.f32 %v9265_v57, %v2999_v32  ;;  %v9536_v55 = vadd.f32 %v9265_v57, %v3000_v34  ;;  %v9539_v25 = vadd.f32 %v9265_v57, %v3001_v58  ;;  %v9542_v8 = vadd.f32 %v9265_v57, %v3002_v15 }
 0x425   :  { %v3187_v11 = vmul.f32 0.2, %v3059_v39  ;;  %vm3120_vm6 = vcmp.ge.f32.partialorder %v3056_v48, 0.0  ;;  %vm3121_vm7 = vcmp.ge.f32.partialorder %v3057_v33, 0.0  ;;  %vm3122_vm8 = vcmp.ge.f32.partialorder %v3058_v37, 0.0 }
 0x426   :  { %13789 = vst [vmem:[#allocation10_spill] sm:$0xff] %v9536_v55  ;;  %13790 = vst [vmem:[#allocation11_spill] sm:$0xff] %v9539_v25  ;;  %vm3123_vm9 = vcmp.ge.f32.partialorder %v3059_v39, 0.0  ;;  %vm3124_vm10 = vcmp.ge.f32.partialorder %v3060_v0, 0.0  ;;  %vm3125_vm11 = vcmp.ge.f32.partialorder %v9509_v10, 0.0  ;;  %vm3126_vm12 = vcmp.ge.f32.partialorder %v9512_v62, 0.0 }
 0x427   :  { %13791 = vst [vmem:[#allocation12_spill] sm:$0xff] %v9542_v8  ;;  %v3184_v5 = vmul.f32 0.2, %v3056_v48  ;;  %vm3127_vm14 = vcmp.ge.f32.partialorder %v9515_v16, 0.0  ;;  %vm3128_vm15 = vcmp.ge.f32.partialorder %v9518_v31, 0.0  ;;  %vm3129_vm0 = vcmp.ge.f32.partialorder %v9521_v44, 0.0 }
 0x428   :  { %v3185_v40 = vmul.f32 0.2, %v3057_v33  ;;  %v3188_v24 = vmul.f32 0.2, %v3060_v0  ;;  %v3189_v32 = vmul.f32 0.2, %v9509_v10  ;;  %v3250_v34 = vsel %vm3122_vm8, %v3058_v37, %v3186_v1 }
 0x429   :  { %v3251_v58 = vsel %vm3123_vm9, %v3059_v39, %v3187_v11  ;;  %v9551_v15 = vadd.f32 %v9265_v57, %v3003_v26  ;;  %vm3130_vm1 = vcmp.ge.f32.partialorder %v9524_v60, 0.0  ;;  %v3190_v2 = vmul.f32 0.2, %v9512_v62 }
 0x42a   :  { %v3191_v53 = vmul.f32 0.2, %v9515_v16  ;;  %v3192_v8 = vmul.f32 0.2, %v9518_v31  ;;  %v3193_v12 = vmul.f32 0.2, %v9521_v44  ;;  %v9565_v39 = vsel %vm3120_vm6, %v3056_v48, %v3184_v5 }
 0x42b   :  { %13792 = vst [vmem:[#allocation13_spill] sm:$0xff] %v9551_v15  ;;  %v9559_v9 = vmul.f32 0.2, %v9524_v60  ;;  %v9562_v25 = vmul.f32 0.2, %v9527_v14  ;;  %13793 = vst [vmem:[#allocation14_spill] sm:$0xff] %v9565_v39  ;;  %v9577_v11 = vpack.c.bf16 %v3251_v58, %v3250_v34  ;;  %v9591_v57 = vsel %vm3121_vm7, %v3057_v33, %v3185_v40 }
 0x42c   :  { %vm3131_vm8 = vcmp.ge.f32.partialorder %v9527_v14, 0.0  ;;  %v9569_v26 = vmul.f32 0.2, %v9530_v18  ;;  %v9572_v37 = vmul.f32 0.2, %v9533_v7  ;;  %vm3146_vm9 = vcmp.ge.f32.partialorder %v9344_v63, 0.0 }
 0x42d   :  { %v9575_v1 = vmul.f32 0.2, %v9536_v55  ;;  %v9582_v48 = vmul.f32 0.2, %v9344_v63  ;;  %v9585_v5 = vmul.f32 0.2, %v9347_v23  ;;  %v9607_v33 = vsel %vm3124_vm10, %v3060_v0, %v3188_v24 }
 0x42e   :  { %13794 = vst [vmem:[#allocation15_spill] sm:$0xff] %v9569_v26  ;;  %13795 = vst [vmem:[#allocation16_spill] sm:$0xff] %v9572_v37  ;;  %v9588_v15 = vmul.f32 0.2, %v9350_v41  ;;  %vm3148_vm6 = vcmp.ge.f32.partialorder %v9350_v41, 0.0  ;;  %vm3154_vm7 = vcmp.ge.f32.partialorder %v9368_v30, 0.0  ;;  %v9625_v0 = vsel %vm3125_vm11, %v9509_v10, %v3189_v32 }
 0x42f   :  { %13796 = vst [vmem:[#allocation17_spill] sm:$0xff] %v9575_v1  ;;  %13797 = vst [vmem:[#allocation18_spill] sm:$0xff] %v9591_v57  ;;  %v9598_v34 = vmul.f32 0.2, %v9353_v47  ;;  %v9601_v58 = vmul.f32 0.2, %v9362_v19  ;;  %v9643_v10 = vsel %vm3126_vm12, %v9512_v62, %v3190_v2  ;;  %v9655_v39 = vsel %vm3127_vm14, %v9515_v16, %v3191_v53 }
 0x430   :  { %v9604_v1 = vmul.f32 0.2, %v9365_v29  ;;  %13798 = vst [vmem:[#allocation19_spill] sm:$0xff] %v9607_v33  ;;  %v9614_v40 = vmul.f32 0.2, %v9368_v30  ;;  %13799 = vst [vmem:[#allocation20_spill] sm:$0xff] %v9625_v0 }
 0x431   :  { %v9617_v37 = vmul.f32 0.2, %v9371_v52  ;;  %v9620_v26 = vmul.f32 0.2, %v9374_v22  ;;  %vm3158_vm10 = vcmp.ge.f32.partialorder %v9380_v4, 0.0  ;;  %13800 = vst [vmem:[#allocation21_spill] sm:$0xff] %v9643_v10 }
 0x432   :  { %v9632_v24 = vmul.f32 0.2, %v9377_v51  ;;  %v9635_v33 = vmul.f32 0.2, %v9380_v4  ;;  %v9638_v55 = vmul.f32 0.2, %v9383_v54 }
 0x433   :  { %v3224_v32 = vmul.f32 0.2, %v9386_v56  ;;  %v3225_v0 = vmul.f32 0.2, %v9389_v35  ;;  %v3226_v57 = vmul.f32 0.2, %v9392_v45  ;;  %v9667_v45 = vsel %vm3128_vm15, %v9518_v31, %v3192_v8 }
 0x434   :  { %13801 = vst [vmem:[#allocation22_spill] sm:$0xff] %v9655_v39  ;;  %v3227_v2 = vmul.f32 0.2, %v9395_v21  ;;  %v3228_v62 = vmul.f32 0.2, %v9398_v50  ;;  %v3361_v10 = vshrl.u32 %v9577_v11, 16  ;;  %v9678_v50 = vsel %vm3129_vm0, %v9521_v44, %v3193_v12 }
 0x435   :  { %13802 = vst [vmem:[#allocation23_spill] sm:$0xff] %v9667_v45  ;;  %v3229_v53 = vmul.f32 0.2, %v9401_v27  ;;  %v3230_v16 = vmul.f32 0.2, %v9404_v13  ;;  %13803 = vst [vmem:[#allocation24_spill] sm:$0xff] %v9678_v50 }
 0x436   :  { %v3231_v39 = vmul.f32 0.2, %v9407_v17  ;;  %vm3175_vm14 = vcmp.ge.f32.partialorder %v9431_v59, 0.0  ;;  %vm3176_vm12 = vcmp.ge.f32.partialorder %v9434_v3, 0.0  ;;  %v3232_v31 = vmul.f32 0.2, %v9410_v61 }
 0x437   :  { %v3233_v8 = vmul.f32 0.2, %v9413_v28  ;;  %v9686_v45 = vrot.slane %v3361_v10, 7  ;;  %v3364_v17 = vshll.u32 %v9577_v11, 16  ;;  %vm3177_vm11 = vcmp.ge.f32.partialorder %v9437_v49, 0.0 }
 0x438   :  { %vm3178_vm0 = vcmp.ge.f32.partialorder %v9440_v38, 0.0  ;;  %vm3179_vm15 = vcmp.ge.f32.partialorder %v9443_v43, 0.0  ;;  %v3234_v12 = vmul.f32 0.2, %v9416_v20  ;;  %v3235_v44 = vmul.f32 0.2, %v9419_v6 }
 0x439   :  { %13804 = vst [vmem:[#allocation47_spill] sm:$0xff] %v9686_v45  ;;  %v3236_v50 = vmul.f32 0.2, %v9422_v42  ;;  %v9699_v10 = vsel %vm3130_vm1, %v9524_v60, %v9559_v9  ;;  %v3237_v11 = vmul.f32 0.2, %v9425_v46  ;;  %v3366_v13 = vor.u32 %v3364_v17, %v9686_v45 }
 0x43a   :  { %13805 = vst [vmem:[#allocation48_spill] sm:$0xff] %v9699_v10  ;;  %v3238_v28 = vmul.f32 0.2, %v9428_v36  ;;  %v3239_v61 = vmul.f32 0.2, %v9431_v59  ;;  %v9712_v9 = vsel %vm3131_vm8, %v9527_v14, %v9562_v25  ;;  %v3274_v17 = vsel %vm3146_vm9, %v9344_v63, %v9582_v48  ;;  %v13826_v48 = vld [vmem:[#allocation40_spill] sm:$0xff] }
 0x43b   :  { %v3240_v20 = vmul.f32 0.2, %v9434_v3  ;;  %v3241_v6 = vmul.f32 0.2, %v9437_v49  ;;  %v3242_v42 = vmul.f32 0.2, %v9440_v38  ;;  %v3275_v45 = vsel %vm3147_vm13, %v9347_v23, %v9585_v5 }
 0x43c   :  { %v3243_v60 = vmul.f32 0.2, %v9443_v43  ;;  %v9717_v36 = vsel %vm7294_vm2, 0, %v3366_v13  ;;  %v3276_v13 = vsel %vm3148_vm6, %v9350_v41, %v9588_v15  ;;  %vm13807_vm1 = vcmp.ge.f32.partialorder %v9353_v47, 0.0  ;;  %v13821_v15 = vld [vmem:[#allocation37_spill] sm:$0xff] }
 0x43d   :  { %4343 = vrot.lane.b32.xlu0 %v9717_v36, %s7238_s3  ;;  %v3277_v14 = vsel %vm13807_vm1, %v9353_v47, %v9598_v34  ;;  %vm13808_vm8 = vcmp.ge.f32.partialorder %v9362_v19, 0.0  ;;  %vm13809_vm13 = vcmp.ge.f32.partialorder %v9365_v29, 0.0  ;;  %v3282_v41 = vsel %vm3154_vm7, %v9368_v30, %v9614_v40  ;;  %v13828_v34 = vld [vmem:[#allocation41_spill] sm:$0xff]  ;;  %v13832_v40 = vld [vmem:[#allocation43_spill] sm:$0xff] }
 0x43e   :  { %v3280_v63 = vsel %vm13808_vm8, %v9362_v19, %v9601_v58  ;;  %v3281_v23 = vsel %vm13809_vm13, %v9365_v29, %v9604_v1  ;;  %vm13810_vm9 = vcmp.ge.f32.partialorder %v9371_v52, 0.0  ;;  %vm13811_vm6 = vcmp.ge.f32.partialorder %v9374_v22, 0.0  ;;  %v13825_v1 = vld [vmem:[#allocation39_spill] sm:$0xff]  ;;  %v13830_v58 = vld [vmem:[#allocation42_spill] sm:$0xff] }
 0x43f   :  { %v3283_v47 = vsel %vm13810_vm9, %v9371_v52, %v9617_v37  ;;  %v3284_v19 = vsel %vm13811_vm6, %v9374_v22, %v9620_v26  ;;  %vm13812_vm1 = vcmp.ge.f32.partialorder %v9377_v51, 0.0  ;;  %v3286_v30 = vsel %vm3158_vm10, %v9380_v4, %v9635_v33  ;;  %v13823_v37 = vld [vmem:[#allocation38_spill] sm:$0xff] }
 0x440   :  { %v3285_v29 = vsel %vm13812_vm1, %v9377_v51, %v9632_v24  ;;  %vm13813_vm7 = vcmp.ge.f32.partialorder %v9383_v54, 0.0  ;;  %vm13814_vm8 = vcmp.ge.f32.partialorder %v9386_v56, 0.0  ;;  %vm13815_vm13 = vcmp.ge.f32.partialorder %v9389_v35, 0.0  ;;  %v13816_v51 = vld [vmem:[#allocation35_spill] sm:$0xff]  ;;  %v13835_v24 = vld [vmem:[#allocation18_spill] sm:$0xff] }
 0x441   :  { %v3287_v52 = vsel %vm13813_vm7, %v9383_v54, %v9638_v55  ;;  %v3288_v25 = vsel %vm13814_vm8, %v9386_v56, %v3224_v32  ;;  %v3289_v22 = vsel %vm13815_vm13, %v9389_v35, %v3225_v0  ;;  %vm3132_vm9 = vcmp.ge.f32.partialorder %v9530_v18, 0.0  ;;  %v13819_v55 = vld [vmem:[#allocation36_spill] sm:$0xff]  ;;  %v13834_v0 = vld [vmem:[#allocation14_spill] sm:$0xff] }
 0x442   :  { %vm3133_vm6 = vcmp.ge.f32.partialorder %v9533_v7, 0.0  ;;  %vm13817_vm10 = vcmp.ge.f32.partialorder %v13816_v51, 0.0  ;;  %vm13818_vm1 = vcmp.ge.f32.partialorder %v9395_v21, 0.0  ;;  %vm13820_vm7 = vcmp.ge.f32.partialorder %v13819_v55, 0.0 }
 0x443   :  { %v3290_v4 = vsel %vm13817_vm10, %v13816_v51, %v3226_v57  ;;  %v3291_v54 = vsel %vm13818_vm1, %v9395_v21, %v3227_v2  ;;  %v3292_v56 = vsel %vm13820_vm7, %v13819_v55, %v3228_v62  ;;  %v3293_v35 = vsel %vm3165_vm3, %v9401_v27, %v3229_v53  ;;  %v13837_v62 = vld [vmem:[#allocation44_spill] sm:$0xff]  ;;  %v13843_v51 = vld [vmem:[#allocation22_spill] sm:$0xff] }
 0x444   :  { %vm13822_vm8 = vcmp.ge.f32.partialorder %v13821_v15, 0.0  ;;  %vm13824_vm13 = vcmp.ge.f32.partialorder %v13823_v37, 0.0  ;;  %v3296_v21 = vsel %vm3168_vm4, %v13825_v1, %v3232_v31  ;;  %vm13827_vm10 = vcmp.ge.f32.partialorder %v13826_v48, 0.0 }
 0x445   :  { %v3294_v26 = vsel %vm13822_vm8, %v13821_v15, %v3230_v16  ;;  %v3295_v57 = vsel %vm13824_vm13, %v13823_v37, %v3231_v39  ;;  %v3297_v5 = vsel %vm13827_vm10, %v13826_v48, %v3233_v8  ;;  %vm13829_vm1 = vcmp.ge.f32.partialorder %v13828_v34, 0.0  ;;  %v13839_v8 = vld [vmem:[#allocation11_spill] sm:$0xff]  ;;  %v13845_v37 = vld [vmem:[#allocation24_spill] sm:$0xff] }
 0x446   :  { %v3298_v27 = vsel %vm13829_vm1, %v13828_v34, %v3234_v12  ;;  %vm13831_vm3 = vcmp.ge.f32.partialorder %v13830_v58, 0.0  ;;  %vm13833_vm7 = vcmp.ge.f32.partialorder %v13832_v40, 0.0  ;;  %v3312_v32 = vpack.c.bf16 %v13835_v24, %v13834_v0  ;;  %v13844_v15 = vld [vmem:[#allocation23_spill] sm:$0xff]  ;;  %v13864_v24 = vld [vmem:[#allocation13_spill] sm:$0xff] }
 0x447   :  { %v3299_v33 = vsel %vm13831_vm3, %v13830_v58, %v3235_v44  ;;  %v3300_v39 = vsel %vm13833_vm7, %v13832_v40, %v3236_v50  ;;  %vm13836_vm4 = vcmp.ge.f32.partialorder %v9425_v46, 0.0  ;;  %v3302_v53 = vsel %vm3174_vm5, %v13837_v62, %v3238_v28  ;;  %v13838_v50 = vld [vmem:[#allocation10_spill] sm:$0xff]  ;;  %v13840_v44 = vld [vmem:[#allocation19_spill] sm:$0xff] }
 0x448   :  { %v3301_v2 = vsel %vm13836_vm4, %v9425_v46, %v3237_v11  ;;  %v3303_v16 = vsel %vm3175_vm14, %v9431_v59, %v3239_v61  ;;  %v3304_v31 = vsel %vm3176_vm12, %v9434_v3, %v3240_v20  ;;  %vm3134_vm8 = vcmp.ge.f32.partialorder %v13838_v50, 0.0  ;;  %v13841_v20 = vld [vmem:[#allocation20_spill] sm:$0xff]  ;;  %v13842_v11 = vld [vmem:[#allocation21_spill] sm:$0xff] }
 0x449   :  { %vm3135_vm13 = vcmp.ge.f32.partialorder %v13839_v8, 0.0  ;;  %v3305_v46 = vsel %vm3177_vm11, %v9437_v49, %v3241_v6  ;;  %v3306_v28 = vsel %vm3178_vm0, %v9440_v38, %v3242_v42  ;;  %v3307_v61 = vsel %vm3179_vm15, %v9443_v43, %v3243_v60 }
 0x44a   :  { %v3354_v59 = vshrl.u32 %v3312_v32, 16  ;;  %v3357_v12 = vshll.u32 %v3312_v32, 16  ;;  %v3314_v3 = vpack.c.bf16 %v13841_v20, %v13840_v44  ;;  %v3315_v55 = vpack.c.bf16 %v13843_v51, %v13842_v11  ;;  %v13866_v44 = vld [vmem:[#allocation25_spill] sm:$0xff]  ;;  %v13869_v11 = vld [vmem:[#allocation8_spill] sm:$0xff] }
 0x44b   :  { %v9841_v1 = vpack.c.bf16 %v13845_v37, %v13844_v15  ;;  %v9845_v49 = vpack.c.bf16 %v3275_v45, %v3274_v17  ;;  %v9847_v42 = vpack.c.bf16 %v3277_v14, %v3276_v13  ;;  %v9849_v38 = vpack.c.bf16 %v3281_v23, %v3280_v63 }
 0x44c   :  { %v9843_v6 = vrot.slane %v3354_v59, 7  ;;  %v9851_v43 = vpack.c.bf16 %v3283_v47, %v3282_v41  ;;  %v9853_v60 = vpack.c.bf16 %v3285_v29, %v3284_v19  ;;  %v9855_v48 = vpack.c.bf16 %v3287_v52, %v3286_v30  ;;  %v13857_v30 = vld [vmem:[#allocation15_spill] sm:$0xff] }
 0x44d   :  { %v9857_v34 = vpack.c.bf16 %v3289_v22, %v3288_v25  ;;  %v9860_v40 = vpack.c.bf16 %v3291_v54, %v3290_v4  ;;  %v9862_v0 = vpack.c.bf16 %v3293_v35, %v3292_v56  ;;  %v9864_v45 = vpack.c.bf16 %v3295_v57, %v3294_v26  ;;  %v13858_v25 = vld [vmem:[#allocation16_spill] sm:$0xff] }
 0x44e   :  { %13846 = vst [vmem:[#allocation2_spill] sm:$0xff] %v9855_v48  ;;  %v3359_v58 = vor.u32 %v3357_v12, %v9843_v6  ;;  %v9866_v17 = vpack.c.bf16 %v3297_v5, %v3296_v21  ;;  %v9868_v13 = vpack.c.bf16 %v3299_v33, %v3298_v27  ;;  %v9870_v14 = vpack.c.bf16 %v3301_v2, %v3300_v39  ;;  %v13859_v54 = vld [vmem:[#allocation48_spill] sm:$0xff]  ;;  %v13860_v21 = vld [vmem:[#allocation6_spill] sm:$0xff]  ;;  %v13861_v5 = vld [vmem:[#allocation31_spill] sm:$0xff] }
 0x44f   :  { %13847 = vst [vmem:[#allocation35_spill] sm:$0xff] %v9857_v34  ;;  %13848 = vst [vmem:[#allocation36_spill] sm:$0xff] %v9860_v40  ;;  %v9872_v63 = vpack.c.bf16 %v3303_v16, %v3302_v53  ;;  %v9878_v41 = vpack.c.bf16 %v3305_v46, %v3304_v31  ;;  %v9880_v47 = vpack.c.bf16 %v3307_v61, %v3306_v28  ;;  %v3368_v19 = vshrl.u32 %v3314_v3, 16  ;;  %v13862_v27 = vld [vmem:[#allocation7_spill] sm:$0xff]  ;;  %v13863_v39 = vld [vmem:[#allocation12_spill] sm:$0xff] }
 0x450   :  { %13849 = vst [vmem:[#allocation37_spill] sm:$0xff] %v9862_v0  ;;  %13850 = vst [vmem:[#allocation38_spill] sm:$0xff] %v9864_v45  ;;  %v9876_v23 = vsel %vm7294_vm2, 0, %v3359_v58  ;;  %v3199_v29 = vmul.f32 0.2, %v13839_v8  ;;  %v3260_v52 = vsel %vm3132_vm9, %v9530_v18, %v13857_v30  ;;  %v3261_v22 = vsel %vm3133_vm6, %v9533_v7, %v13858_v25  ;;  %v13865_v53 = vld [vmem:[#allocation17_spill] sm:$0xff] }
 0x451   :  { %13851 = vst [vmem:[#allocation39_spill] sm:$0xff] %v9866_v17  ;;  %13852 = vst [vmem:[#allocation40_spill] sm:$0xff] %v9868_v13  ;;  %4341 = vrot.lane.b32.xlu1 %v9876_v23, %s7238_s3  ;;  %v3375_v4 = vshrl.u32 %v3315_v55, 16  ;;  %v3317_v56 = vpack.c.bf16 %v9712_v9, %v13859_v54  ;;  %v9895_v35 = vrot.slane %v3368_v19, 7  ;;  %v3371_v26 = vshll.u32 %v3314_v3, 16  ;;  %v13868_v3 = vld [vmem:[#allocation26_spill] sm:$0xff] }
 0x452   :  { %13853 = vst [vmem:[#allocation41_spill] sm:$0xff] %v9870_v14  ;;  %13854 = vst [vmem:[#allocation42_spill] sm:$0xff] %v9872_v63  ;;  %v3382_v57 = vshrl.u32 %v9841_v1, 16  ;;  %v3074_v18 = vadd.f32 %v13861_v5, %v13860_v21  ;;  %v3075_v33 = vadd.f32 %v13861_v5, %v13862_v27  ;;  %vm3136_vm5 = vcmp.ge.f32.partialorder %v13863_v39, 0.0  ;;  %v13871_v54 = vld [vmem:[#allocation27_spill] sm:$0xff] }
 0x453   :  { %13855 = vst [vmem:[#allocation43_spill] sm:$0xff] %v9878_v41  ;;  %13856 = vst [vmem:[#allocation14_spill] sm:$0xff] %v9880_v47  ;;  %v9903_v7 = vrot.slane %v3375_v4, 7  ;;  %vm3137_vm11 = vcmp.ge.f32.partialorder %v13864_v24, 0.0  ;;  %v3200_v32 = vmul.f32 0.2, %v13863_v39  ;;  %v3373_v9 = vor.u32 %v3371_v26, %v9895_v35 }
 0x454   :  { %v3378_v2 = vshll.u32 %v3315_v55, 16  ;;  %v3201_v62 = vmul.f32 0.2, %v13864_v24  ;;  %v3262_v16 = vsel %vm3134_vm8, %v13838_v50, %v13865_v53  ;;  %v3263_v31 = vsel %vm3135_vm13, %v13839_v8, %v3199_v29  ;;  %v13867_v50 = vld [vmem:[#allocation30_spill] sm:$0xff]  ;;  %v13870_v55 = vld [vmem:[#allocation9_spill] sm:$0xff] }
 0x455   :  { %v3318_v46 = vpack.c.bf16 %v3261_v22, %v3260_v52  ;;  %4565 = vrot.lane.b32.xlu1 %v9717_v36, %s7239_s4  ;;  %v9920_v28 = vsel %vm7294_vm2, 0, %v3373_v9  ;;  %v9923_v59 = vrot.slane %v3382_v57, 7  ;;  %v3389_v12 = vshrl.u32 %v3317_v56, 16  ;;  %v13872_v57 = vld [vmem:[#allocation28_spill] sm:$0xff] }
 0x456   :  { %v3380_v61 = vor.u32 %v3378_v2, %v9903_v7  ;;  %v3008_v20 = vmul.f32 %v13867_v50, %v13866_v44  ;;  %v3009_v8 = vmul.f32 %v13867_v50, %v13868_v3  ;;  %v3076_v51 = vadd.f32 %v13861_v5, %v13869_v11  ;;  %4567 = vrot.lane.b32.xlu0 %v9920_v28, %s7239_s4 }
 0x457   :  { %v3077_v15 = vadd.f32 %v13861_v5, %v13870_v55  ;;  %vm3138_vm12 = vcmp.ge.f32.partialorder %v3074_v18, 0.0  ;;  %vm3139_vm14 = vcmp.ge.f32.partialorder %v3075_v33, 0.0  ;;  %v3202_v37 = vmul.f32 0.2, %v3074_v18 }
 0x458   :  { %v3385_v58 = vshll.u32 %v9841_v1, 16  ;;  %v3203_v19 = vmul.f32 0.2, %v3075_v33  ;;  %v3264_v29 = vsel %vm3136_vm5, %v13863_v39, %v3200_v32  ;;  %v3265_v30 = vsel %vm3137_vm11, %v13864_v24, %v3201_v62 }
 0x459   :  { %v3319_v52 = vpack.c.bf16 %v3263_v31, %v3262_v16  ;;  %4345 = vrot.lane.b32.xlu1 %v9920_v28, %s7238_s3  ;;  %v9946_v25 = vsel %vm7294_vm2, 0, %v3380_v61  ;;  %v9949_v1 = vrot.slane %v3389_v12, 7  ;;  %v3396_v4 = vshrl.u32 %v3318_v46, 16 }
 0x45a   :  { %v3387_v22 = vor.u32 %v3385_v58, %v9923_v59  ;;  %v3010_v26 = vmul.f32 %v13867_v50, %v13871_v54  ;;  %v3011_v21 = vmul.f32 %v13867_v50, %v13872_v57  ;;  %v3078_v27 = vadd.f32 %v13861_v5, %v3008_v20  ;;  %4347 = vrot.lane.b32.xlu0 %v9946_v25, %s7238_s3 }
 0x45b   :  { %v3079_v39 = vadd.f32 %v13861_v5, %v3009_v8  ;;  %vm3140_vm15 = vcmp.ge.f32.partialorder %v3076_v51, 0.0  ;;  %vm3141_vm0 = vcmp.ge.f32.partialorder %v3077_v15, 0.0  ;;  %v3204_v24 = vmul.f32 0.2, %v3076_v51 }
 0x45c   :  { %v3392_v32 = vshll.u32 %v3317_v56, 16  ;;  %v3205_v9 = vmul.f32 0.2, %v3077_v15  ;;  %v3266_v2 = vsel %vm3138_vm12, %v3074_v18, %v3202_v37  ;;  %v3267_v62 = vsel %vm3139_vm14, %v3075_v33, %v3203_v19 }
 0x45d   :  { %v3320_v53 = vpack.c.bf16 %v3265_v30, %v3264_v29  ;;  %4569 = vrot.lane.b32.xlu1 %v9946_v25, %s7239_s4  ;;  %v9965_v16 = vsel %vm7294_vm2, 0, %v3387_v22  ;;  %v9968_v61 = vrot.slane %v3396_v4, 7  ;;  %v3403_v12 = vshrl.u32 %v3319_v52, 16 }
 0x45e   :  { %v3394_v31 = vor.u32 %v3392_v32, %v9949_v1  ;;  %v3080_v56 = vadd.f32 %v13861_v5, %v3010_v26  ;;  %v3081_v44 = vadd.f32 %v13861_v5, %v3011_v21  ;;  %4571 = vrot.lane.b32.xlu0 %v9965_v16, %s7239_s4  ;;  %vm3142_vm9 = vcmp.ge.f32.partialorder %v3078_v27, 0.0 }
 0x45f   :  { %vm3143_vm6 = vcmp.ge.f32.partialorder %v3079_v39, 0.0  ;;  %v3206_v18 = vmul.f32 0.2, %v3078_v27  ;;  %v3399_v33 = vshll.u32 %v3318_v46, 16  ;;  %v3207_v50 = vmul.f32 0.2, %v3079_v39 }
 0x460   :  { %v3268_v20 = vsel %vm3140_vm15, %v3076_v51, %v3204_v24  ;;  %v3269_v3 = vsel %vm3141_vm0, %v3077_v15, %v3205_v9  ;;  %v3321_v8 = vpack.c.bf16 %v3267_v62, %v3266_v2  ;;  %v9980_v11 = vsel %vm7294_vm2, 0, %v3394_v31 }
 0x461   :  { %4349 = vrot.lane.b32.xlu1 %v9965_v16, %s7238_s3  ;;  %v3401_v5 = vor.u32 %v3399_v33, %v9968_v61  ;;  %v9983_v55 = vrot.slane %v3403_v12, 7  ;;  %v3410_v37 = vshrl.u32 %v3320_v53, 16  ;;  %vm3144_vm10 = vcmp.ge.f32.partialorder %v3080_v56, 0.0 }
 0x462   :  { %4351 = vrot.lane.b32.xlu0 %v9980_v11, %s7238_s3  ;;  %vm3145_vm1 = vcmp.ge.f32.partialorder %v3081_v44, 0.0  ;;  %v3208_v46 = vmul.f32 0.2, %v3080_v56  ;;  %v3406_v51 = vshll.u32 %v3319_v52, 16  ;;  %v3209_v15 = vmul.f32 0.2, %v3081_v44 }
 0x463   :  { %v3270_v58 = vsel %vm3142_vm9, %v3078_v27, %v3206_v18  ;;  %v3271_v19 = vsel %vm3143_vm6, %v3079_v39, %v3207_v50  ;;  %v3322_v29 = vpack.c.bf16 %v3269_v3, %v3268_v20  ;;  %v9993_v30 = vsel %vm7294_vm2, 0, %v3401_v5 }
 0x464   :  { %v3408_v22 = vor.u32 %v3406_v51, %v9983_v55  ;;  %v9996_v4 = vrot.slane %v3410_v37, 7  ;;  %v3417_v54 = vshrl.u32 %v3321_v8, 16  ;;  %v3413_v52 = vshll.u32 %v3320_v53, 16 }
 0x465   :  { %4573 = vrot.lane.b32.xlu1 %v9980_v11, %s7239_s4  ;;  %v3272_v26 = vsel %vm3144_vm10, %v3080_v56, %v3208_v46  ;;  %v3273_v57 = vsel %vm3145_vm1, %v3081_v44, %v3209_v15  ;;  %v3323_v21 = vpack.c.bf16 %v3271_v19, %v3270_v58  ;;  %v3424_v32 = vshrl.u32 %v3322_v29, 16  ;;  %v13878_v19 = vld [vmem:[#allocation33_spill] sm:$0xff] }
 0x466   :  { %4575 = vrot.lane.b32.xlu0 %v9993_v30, %s7239_s4  ;;  %v10004_v27 = vsel %vm7294_vm2, 0, %v3408_v22  ;;  %v3415_v39 = vor.u32 %v3413_v52, %v9996_v4  ;;  %v10007_v24 = vrot.slane %v3417_v54, 7  ;;  %v3420_v9 = vshll.u32 %v3321_v8, 16  ;;  %v13879_v22 = vld [vmem:[#allocation34_spill] sm:$0xff] }
 0x467   :  { %13873 = vst [vmem:[#allocation18_spill] sm:$0xff] %v10004_v27  ;;  %v3324_v2 = vpack.c.bf16 %v3273_v57, %v3272_v26  ;;  %v10018_v31 = vrot.slane %v3424_v32, 7  ;;  %v3431_v12 = vshrl.u32 %v3323_v21, 16  ;;  %v3427_v56 = vshll.u32 %v3322_v29, 16  ;;  %v13881_v26 = vld [vmem:[#allocation47_spill] sm:$0xff] }
 0x468   :  { %v10015_v62 = vsel %vm7294_vm2, 0, %v3415_v39  ;;  %v3422_v53 = vor.u32 %v3420_v9, %v10007_v24  ;;  %v3434_v20 = vshll.u32 %v3323_v21, 16  ;;  %v10056_v15 = vsel %vm7294_vm2, %v9843_v6, 0 }
 0x469   :  { %4353 = vrot.lane.b32.xlu1 %v9993_v30, %s7238_s3  ;;  %13874 = vst [vmem:[#allocation44_spill] sm:$0xff] %v10015_v62  ;;  %v3429_v18 = vor.u32 %v3427_v56, %v10018_v31  ;;  %v10029_v33 = vrot.slane %v3431_v12, 7  ;;  %v3438_v50 = vshrl.u32 %v3324_v2, 16  ;;  %v3441_v37 = vshll.u32 %v3324_v2, 16 }
 0x46a   :  { %4355 = vrot.lane.b32.xlu0 %v10004_v27, %s7238_s3  ;;  %v10026_v44 = vsel %vm7294_vm2, 0, %v3422_v53  ;;  %v4187_v58 = vrot.slane %v9876_v23, 1  ;;  %v3214_v29 = vmul.f32 0.2, %v13878_v19  ;;  %v3215_v54 = vmul.f32 0.2, %v13879_v22 }
 0x46b   :  { %13875 = vst [vmem:[#allocation10_spill] sm:$0xff] %v10026_v44  ;;  %v10037_v3 = vsel %vm7294_vm2, 0, %v3429_v18  ;;  %v3436_v8 = vor.u32 %v3434_v20, %v10029_v33  ;;  %v10040_v5 = vrot.slane %v3438_v50, 7  ;;  %vm3150_vm3 = vcmp.ge.f32.partialorder %v13878_v19, 0.0 }
 0x46c   :  { %13876 = vst [vmem:[#allocation11_spill] sm:$0xff] %v10037_v3  ;;  %vm3151_vm7 = vcmp.ge.f32.partialorder %v13879_v22, 0.0  ;;  %v4188_v6 = vrot.slane %v10056_v15, 1  ;;  %v10075_v57 = vsel %vm7294_vm2, %v13881_v26, 0  ;;  %vm13882_vm4 = vcmask 1046528  }
 0x46d   :  { %4577 = vrot.lane.b32.xlu1 %v10004_v27, %s7239_s4  ;;  %v10048_v46 = vsel %vm7294_vm2, 0, %v3436_v8  ;;  %v3443_v51 = vor.u32 %v3441_v37, %v10040_v5  ;;  %v4190_v39 = vrot.slane %v9717_v36, 1  ;;  %v3278_v32 = vsel %vm3150_vm3, %v13878_v19, %v3214_v29  ;;  %vm13883_vm8 = vmmov %vm13882_vm4 }
 0x46e   :  { %4579 = vrot.lane.b32.xlu0 %v10015_v62, %s7239_s4  ;;  %13877 = vst [vmem:[#allocation19_spill] sm:$0xff] %v10048_v46  ;;  %v4189_v21 = vsel %vm13882_vm4, %v4187_v58, %v4188_v6  ;;  %v3279_v9 = vsel %vm3151_vm7, %v13879_v22, %v3215_v54  ;;  %v4191_v2 = vrot.slane %v10075_v57, 1  ;;  %v10087_v53 = vsel %vm7294_vm2, %v9895_v35, 0  ;;  %vm13884_vm13 = vmmov %vm13882_vm4 }
 0x46f   :  { %v10067_v52 = vsel %vm7294_vm2, 0, %v3443_v51  ;;  %v4193_v56 = vrot.slane %v9920_v28, 1  ;;  %v10091_v18 = vpack.c.bf16 %v3279_v9, %v3278_v32  ;;  %v4194_v50 = vrot.slane %v10087_v53, 1  ;;  %vm13885_vm5 = vmmov %vm13882_vm4 }
 0x470   :  { %13880 = vst [vmem:[#allocation20_spill] sm:$0xff] %v10067_v52  ;;  %v4192_v12 = vsel %vm13883_vm8, %v4190_v39, %v4191_v2  ;;  %v10101_v35 = vsel %vm7294_vm2, %v9903_v7, 0  ;;  %v4196_v8 = vrot.slane %v9946_v25, 1  ;;  %v10110_v51 = vsel %vm7294_vm2, %v9923_v59, 0  ;;  %vm13886_vm11 = vmmov %vm13882_vm4 }
 0x471   :  { %4357 = vrot.lane.b32.xlu1 %v10015_v62, %s7238_s3  ;;  %v4195_v20 = vsel %vm13884_vm13, %v4193_v56, %v4194_v50  ;;  %v4197_v37 = vrot.slane %v10101_v35, 1  ;;  %v4199_v19 = vrot.slane %v9965_v16, 1  ;;  %v4200_v7 = vrot.slane %v10110_v51, 1  ;;  %vm13887_vm12 = vmmov %vm13882_vm4 }
 0x472   :  { %4359 = vrot.lane.b32.xlu0 %v10026_v44, %s7238_s3  ;;  %v10120_v29 = vsel %vm7294_vm2, %v9949_v1, 0  ;;  %v4202_v59 = vrot.slane %v9980_v11, 1  ;;  %v10130_v6 = vsel %vm7294_vm2, %v9968_v61, 0  ;;  %v4205_v1 = vrot.slane %v9993_v30, 1  ;;  %vm13888_vm14 = vmmov %vm13882_vm4 }
 0x473   :  { %v4198_v58 = vsel %vm13885_vm5, %v4196_v8, %v4197_v37  ;;  %v4201_v22 = vsel %vm13886_vm11, %v4199_v19, %v4200_v7  ;;  %v4203_v54 = vrot.slane %v10120_v29, 1  ;;  %v10140_v39 = vsel %vm7294_vm2, %v9983_v55, 0  ;;  %vm13889_vm15 = vmmov %vm13882_vm4 }
 0x474   :  { %v4208_v61 = vrot.slane %v10004_v27, 1  ;;  %v4209_v9 = vrot.slane %v10140_v39, 1  ;;  %v10150_v2 = vsel %vm7294_vm2, %v9996_v4, 0  ;;  %v4211_v55 = vrot.slane %v10015_v62, 1  ;;  %vm13890_vm0 = vmmov %vm13882_vm4 }
 0x475   :  { %4581 = vrot.lane.b32.xlu1 %v10026_v44, %s7239_s4  ;;  %v4204_v26 = vsel %vm13887_vm12, %v4202_v59, %v4203_v54  ;;  %v4212_v56 = vrot.slane %v10150_v2, 1  ;;  %v10163_v50 = vsel %vm7294_vm2, %v10007_v24, 0  ;;  %v10176_v37 = vsel %vm7294_vm2, %v10018_v31, 0  ;;  %vm13891_vm9 = vmmov %vm13890_vm0 }
 0x476   :  { %4583 = vrot.lane.b32.xlu0 %v10037_v3, %s7239_s4  ;;  %v4215_v8 = vrot.slane %v10163_v50, 1  ;;  %v3708_v19 = vshll.u32 %v9876_v23, 16  ;;  %v4218_v7 = vrot.slane %v10176_v37, 1  ;;  %vm13892_vm6 = vmmov %vm13890_vm0  ;;  %v4220_v59 = vrot.slane %v10048_v46, 1 }
 0x477   :  { %v10166_v4 = vsel %vm13890_vm0, %v4211_v55, %v4212_v56  ;;  %vm13893_vm10 = vmmov %vm13890_vm0  ;;  %vm13894_vm1 = vsmask.f32 7424  ;;  %vm13902_vm11 = vcmask 1043456   ;;  %v3778_v41 = vshrl.u32 %v9993_v30, 16 }
 0x478   :  { %v3710_v54 = vrot.slane %v3708_v19, 1  ;;  %v3725_v19 = vshll.u32 %v10075_v57, 16  ;;  %vm13897_vm4 = vmmov %vm13894_vm1  ;;  %v3785_v63 = vshll.u32 %v10130_v6, 16  ;;  %v3802_v13 = vshrl.u32 %v10015_v62, 16 }
 0x479   :  { %4361 = vrot.lane.b32.xlu1 %v10037_v3, %s7238_s3  ;;  %vm13898_vm8 = vmmov %vm13894_vm1  ;;  %v3809_v17 = vshll.u32 %v10150_v2, 16  ;;  %v3816_v2 = vshll.u32 %v10026_v44, 16  ;;  %v3826_v40 = vshrl.u32 %v10037_v3, 16 }
 0x47a   :  { %4363 = vrot.lane.b32.xlu0 %v10048_v46, %s7238_s3  ;;  %vm13900_vm13 = vmmov %vm13894_vm1 }
 0x47b   :  { %vm13901_vm5 = vmmov %vm13894_vm1 }
 0x47c   :  { %vm13903_vm12 = vmmov %vm13902_vm11 }
 0x47d   :  { %4585 = vrot.lane.b32.xlu1 %v10048_v46, %s7239_s4  ;;  %vm13906_vm0 = vmmov %vm13894_vm1 }
 0x47e   :  { %4587 = vrot.lane.b32.xlu0 %v10067_v52, %s7239_s4 }
 0x481   :  { %4501 = vrot.lane.b32.xlu1 %v4189_v21, %s7240_s22 }
 0x482   :  { %4279 = vrot.lane.b32.xlu0 %v4189_v21, %s7237_s2  ;;  %v4206_v21 = vrot.slane %v10130_v6, 1 }
 0x484   :  { %v4207_v32 = vsel %vm13888_vm14, %v4205_v1, %v4206_v21  ;;  %v3720_v1 = vshll.u32 %v9717_v36, 16  ;;  %vm13904_vm14 = vmmov %vm13902_vm11 }
 0x485   :  { %4689 = vrot.lane.b32.xlu1 %v4192_v12, %s7241_s25 }
 0x486   :  { %4503 = vrot.lane.b32.xlu0 %v4192_v12, %s7240_s22  ;;  %v3722_v56 = vrot.slane %v3720_v1, 1  ;;  %v3737_v1 = vshll.u32 %v10087_v53, 16  ;;  %v10230_v53 = vpop.permute.xlu1 %4065 }
 0x489   :  { %4691 = vrot.lane.b32.xlu1 %v4195_v20, %s7241_s25 }
 0x48a   :  { %4283 = vrot.lane.b32.xlu0 %v4195_v20, %s7237_s2 }
 0x48d   :  { %4281 = vrot.lane.b32.xlu1 %v4192_v12, %s7237_s2  ;;  %v10153_v12 = vsel %vm13889_vm15, %v4208_v61, %v4209_v9  ;;  %v3706_v61 = vshrl.u32 %v9876_v23, 16  ;;  %v3713_v9 = vshll.u32 %v10056_v15, 16  ;;  %vm13905_vm15 = vmmov %vm13894_vm1 }
 0x48e   :  { %4507 = vrot.lane.b32.xlu0 %v4198_v58, %s7240_s22 }
 0x48f   :  { %v3711_v55 = vor.u32 %v3710_v54, %v3706_v61  ;;  %v3730_v54 = vshrl.u32 %v9920_v28, 16 }
 0x491   :  { %4505 = vrot.lane.b32.xlu1 %v4195_v20, %s7240_s22  ;;  %v4214_v20 = vrot.slane %v10026_v44, 1 }
 0x492   :  { %4287 = vrot.lane.b32.xlu0 %v4201_v22, %s7237_s2 }
 0x493   :  { %v10179_v24 = vsel %vm13891_vm9, %v4214_v20, %v4215_v8  ;;  %v3732_v20 = vshll.u32 %v9920_v28, 16  ;;  %v3715_v8 = vrot.slane %v3713_v9, 1  ;;  %v13896_v9 = vld [vmem:[#allocation46_spill] sm:$0xff]  ;;  %vm13912_vm9 = vmmov %vm13906_vm0 }
 0x494   :  { %v3247_v47 = vmul.f32 0.2, %v13896_v9  ;;  %vm3183_vm7 = vcmp.ge.f32.partialorder %v13896_v9, 0.0 }
 0x495   :  { %4693 = vrot.lane.b32.xlu1 %v4198_v58, %s7241_s25  ;;  %v10213_v15 = vsel %vm13894_vm1, %v3711_v55, %v3715_v8  ;;  %v3739_v55 = vrot.slane %v3737_v1, 1  ;;  %v3742_v1 = vshrl.u32 %v9946_v25, 16  ;;  %vm13921_vm1 = vmmov %vm13906_vm0 }
 0x496   :  { %4511 = vrot.lane.b32.xlu0 %v4204_v26, %s7240_s22  ;;  %v3311_v8 = vsel %vm3183_vm7, %v13896_v9, %v3247_v47  ;;  %v10250_v47 = vpop.permute.xlu1 %4277  ;;  %vm13923_vm7 = vcmask 1046528  }
 0x499   :  { %4695 = vrot.lane.b32.xlu1 %v4201_v22, %s7241_s25 }
 0x49a   :  { %4291 = vrot.lane.b32.xlu0 %v4207_v32, %s7237_s2 }
 0x49d   :  { %4285 = vrot.lane.b32.xlu1 %v4198_v58, %s7237_s2  ;;  %v4217_v58 = vrot.slane %v10037_v3, 1 }
 0x49e   :  { %4515 = vrot.lane.b32.xlu0 %v10153_v12, %s7240_s22 }
 0x49f   :  { %v10193_v31 = vsel %vm13892_vm6, %v4217_v58, %v4218_v7  ;;  %v3718_v58 = vshrl.u32 %v9717_v36, 16  ;;  %v3734_v7 = vrot.slane %v3732_v20, 1  ;;  %vm13915_vm6 = vmmov %vm13906_vm0 }
 0x4a1   :  { %4509 = vrot.lane.b32.xlu1 %v4201_v22, %s7240_s22  ;;  %v10190_v22 = vsel %vm7294_vm2, %v10029_v33, 0 }
 0x4a2   :  { %4295 = vrot.lane.b32.xlu0 %v10166_v4, %s7237_s2  ;;  %v4221_v21 = vrot.slane %v10190_v22, 1 }
 0x4a4   :  { %v10204_v33 = vsel %vm13893_vm10, %v4220_v59, %v4221_v21  ;;  %v3727_v59 = vrot.slane %v3725_v19, 1  ;;  %v13895_v21 = vld [vmem:[#allocation45_spill] sm:$0xff]  ;;  %v3756_v19 = vshll.u32 %v9965_v16, 16  ;;  %vm13920_vm10 = vmmov %vm13906_vm0 }
 0x4a5   :  { %4697 = vrot.lane.b32.xlu1 %v4204_v26, %s7241_s25  ;;  %v3246_v61 = vmul.f32 0.2, %v13895_v21  ;;  %vm3182_vm3 = vcmp.ge.f32.partialorder %v13895_v21, 0.0 }
 0x4a6   :  { %4519 = vrot.lane.b32.xlu0 %v10179_v24, %s7240_s22 }
 0x4a7   :  { %v3310_v20 = vsel %vm3182_vm3, %v13895_v21, %v3246_v61  ;;  %v3749_v21 = vshll.u32 %v10101_v35, 16  ;;  %v3758_v61 = vrot.slane %v3756_v19, 1  ;;  %v7220_v35 = vld [vmem:[%s13478_s5 + $0x10] sm:$0xff]   ;;  %vm13922_vm3 = vmmov %vm13906_vm0 }
 0x4a9   :  { %4699 = vrot.lane.b32.xlu1 %v4207_v32, %s7241_s25 }
 0x4aa   :  { %4299 = vrot.lane.b32.xlu0 %v10193_v31, %s7237_s2 }
 0x4ad   :  { %4289 = vrot.lane.b32.xlu1 %v4204_v26, %s7237_s2  ;;  %v3723_v26 = vor.u32 %v3722_v56, %v3718_v58  ;;  %v3744_v56 = vshll.u32 %v9946_v25, 16 }
 0x4ae   :  { %4523 = vrot.lane.b32.xlu0 %v10204_v33, %s7240_s22 }
 0x4af   :  { %v10226_v57 = vsel %vm13897_vm4, %v3723_v26, %v3727_v59  ;;  %v3746_v26 = vrot.slane %v3744_v56, 1  ;;  %v10246_v59 = vpack.c.bf16 %v3311_v8, %v3310_v20  ;;  %v10263_v9 = vpop.permute.xlu0 %4343  ;;  %v3754_v56 = vshrl.u32 %v9965_v16, 16  ;;  %vm13924_vm4 = vmmov %vm13906_vm0 }
 0x4b1   :  { %4513 = vrot.lane.b32.xlu1 %v4207_v32, %s7240_s22  ;;  %v3735_v32 = vor.u32 %v3734_v7, %v3730_v54  ;;  %v7218_v7 = vld [vmem:[%s13478_s5] sm:$0xff]   ;;  %13899 = vst [vmem:[#allocation21_spill] sm:$0xff] %v10246_v59  ;;  %v7219_v54 = vld [vmem:[%s13478_s5 + $0x8] sm:$0xff]   ;;  %v3759_v8 = vor.u32 %v3758_v61, %v3754_v56 }
 0x4b2   :  { %4067 = vrot.lane.b32.xlu0 %v10213_v15, %s7235_s26  ;;  %7082 = vmatprep.subr.bf16.mxu0 %v7218_v7 }
 0x4b3   :  { %v10238_v58 = vsel %vm13898_vm8, %v3735_v32, %v3739_v55  ;;  %7156 = vmatprep.subr.bf16.mxu1 %v7218_v7  ;;  %7083 = vmatpush3.bf16.msra.mxu0 %v7218_v7  ;;  %v3751_v55 = vrot.slane %v3749_v21, 1  ;;  %vm13932_vm8 = vmmov %vm13906_vm0 }
 0x4b4   :  { %7161 = vmatpush3.bf16.msra.mxu1 %v7218_v7  ;;  %7084 = vmatprep.subr.bf16.mxu0 %v7219_v54 }
 0x4b5   :  { %4701 = vrot.lane.b32.xlu1 %v10153_v12, %s7241_s25  ;;  %7157 = vmatprep.subr.bf16.mxu1 %v7219_v54 }
 0x4b6   :  { %4431 = vrot.lane.b32.xlu0 %v10226_v57, %s7242_s27 }
 0x4b7   :  { %7085 = vmatpush3.bf16.msra.mxu0 %v7219_v54 }
 0x4b8   :  { %7162 = vmatpush3.bf16.msra.mxu1 %v7219_v54  ;;  %7086 = vmatprep.subr.bf16.mxu0 %v7220_v35 }
 0x4b9   :  { %4703 = vrot.lane.b32.xlu1 %v10166_v4, %s7241_s25  ;;  %7158 = vmatprep.subr.bf16.mxu1 %v7220_v35 }
 0x4ba   :  { %4629 = vrot.lane.b32.xlu0 %v10238_v58, %s7243_s28 }
 0x4bb   :  { %7087 = vmatpush3.bf16.msra.mxu0 %v7220_v35 }
 0x4bc   :  { %7163 = vmatpush3.bf16.msra.mxu1 %v7220_v35 }
 0x4bd   :  { %4293 = vrot.lane.b32.xlu1 %v10153_v12, %s7237_s2  ;;  %v3747_v12 = vor.u32 %v3746_v26, %v3742_v1  ;;  %v3768_v1 = vshll.u32 %v9980_v11, 16 }
 0x4be   :  { %4069 = vrot.lane.b32.xlu0 %v10226_v57, %s7235_s26 }
 0x4bf   :  { %v10275_v20 = vsel %vm13900_vm13, %v3747_v12, %v3751_v55  ;;  %v7222_v12 = vld [vmem:[%s13478_s5 + $0x20] ss:$0 sps:$4 sm:$0xff]   ;;  %v3770_v35 = vrot.slane %v3768_v1, 1  ;;  %v3780_v55 = vshll.u32 %v9993_v30, 16  ;;  %vm13934_vm13 = vmmov %vm13923_vm7 }
 0x4c0   :  { %v5363_v56 = vsel %vm13903_vm12, %v7222_v12, 0  ;;  %vm13943_vm12 = vcmask 64512  }
 0x4c1   :  { %4517 = vrot.lane.b32.xlu1 %v10166_v4, %s7240_s22  ;;  %v3761_v4 = vshll.u32 %v10110_v51, 16  ;;  %v7221_v51 = vld [vmem:[%s13478_s5 + $0x18] sm:$0xff]   ;;  %v3782_v1 = vrot.slane %v3780_v55, 1 }
 0x4c2   :  { %4071 = vrot.lane.b32.xlu0 %v10238_v58, %s7235_s26  ;;  %7088 = vmatprep.subr.bf16.mxu0 %v7221_v51 }
 0x4c3   :  { %v10265_v32 = vpop.permute.xlu1 %4341  ;;  %v3763_v26 = vrot.slane %v3761_v4, 1  ;;  %7159 = vmatprep.subr.bf16.mxu1 %v7221_v51  ;;  %7089 = vmatpush3.bf16.msra.mxu0 %v7221_v51 }
 0x4c4   :  { %7164 = vmatpush3.bf16.msra.mxu1 %v7221_v51  ;;  %7166 = vmatprep.subr.msk.bf16.mxu0 %vm13902_vm11, %v7222_v12  ;;  %v3773_v51 = vshll.u32 %v10120_v29, 16  ;;  %vm13938_vm11 = vmmov %vm13906_vm0 }
 0x4c5   :  { %4705 = vrot.lane.b32.xlu1 %v10179_v24, %s7241_s25  ;;  %v3764_v54 = vsel %vm13901_vm5, %v3759_v8, %v3763_v26  ;;  %7167 = vmatprep.subr.msk.bf16.mxu1 %vm13904_vm14, %v7222_v12  ;;  %v3766_v8 = vshrl.u32 %v9980_v11, 16  ;;  %vm13937_vm5 = vmmov %vm13923_vm7  ;;  %vm4813_vm14 = vcmask 130048  }
 0x4c6   :  { %4435 = vrot.lane.b32.xlu0 %v10275_v20, %s7242_s27  ;;  %v3775_v59 = vrot.slane %v3773_v51, 1 }
 0x4c7   :  { %v10279_v19 = vpop.permute.xlu1 %4565  ;;  %7091 = vmatpush3.bf16.msra.mxu0 %v5363_v56  ;;  %v3771_v26 = vor.u32 %v3770_v35, %v3766_v8  ;;  %v3787_v35 = vrot.slane %v3785_v63, 1  ;;  %v3792_v8 = vshll.u32 %v10004_v27, 16  ;;  %v3804_v63 = vshll.u32 %v10015_v62, 16 }
 0x4c8   :  { %v10284_v7 = vpop.permute.xlu0 %4567  ;;  %7165 = vmatpush3.bf16.msra.mxu1 %v5363_v56  ;;  %v3783_v56 = vor.u32 %v3782_v1, %v3778_v41 }
 0x4c9   :  { %4707 = vrot.lane.b32.xlu1 %v10193_v31, %s7241_s25  ;;  %v3776_v29 = vsel %vm13905_vm15, %v3771_v26, %v3775_v59  ;;  %v3794_v41 = vrot.slane %v3792_v8, 1  ;;  %v3797_v26 = vshll.u32 %v10140_v39, 16  ;;  %vm4876_vm15 = vcmask 195584  }
 0x4ca   :  { %4633 = vrot.lane.b32.xlu0 %v3764_v54, %s7243_s28  ;;  %v3788_v6 = vsel %vm13906_vm0, %v3783_v56, %v3787_v35  ;;  %v3806_v35 = vrot.slane %v3804_v63, 1 }
 0x4cb   :  { %v10291_v21 = vpop.permute.xlu1 %4345  ;;  %v3799_v8 = vrot.slane %v3797_v26, 1 }
 0x4cc   :  { %v10296_v61 = vpop.permute.xlu0 %4347  ;;  %v3807_v0 = vor.u32 %v3806_v35, %v3802_v13  ;;  %v3818_v13 = vrot.slane %v3816_v2, 1 }
 0x4cd   :  { %4297 = vrot.lane.b32.xlu1 %v10179_v24, %s7237_s2 }
 0x4ce   :  { %4073 = vrot.lane.b32.xlu0 %v10275_v20, %s7235_s26 }
 0x4cf   :  { %v10306_v4 = vpop.permute.xlu1 %4569 }
 0x4d0   :  { %v10310_v24 = vpop.permute.xlu0 %4571 }
 0x4d1   :  { %4521 = vrot.lane.b32.xlu1 %v10193_v31, %s7240_s22 }
 0x4d2   :  { %4075 = vrot.lane.b32.xlu0 %v3764_v54, %s7235_s26 }
 0x4d3   :  { %v10315_v12 = vpop.permute.xlu1 %4349 }
 0x4d4   :  { %v10319_v14 = vpop.permute.xlu0 %4351 }
 0x4d5   :  { %4429 = vrot.lane.b32.xlu1 %v10213_v15, %s7242_s27 }
 0x4d6   :  { %4439 = vrot.lane.b32.xlu0 %v3776_v29, %s7242_s27 }
 0x4d7   :  { %v10325_v31 = vpop.permute.xlu1 %4573 }
 0x4d8   :  { %v10327_v55 = vpop.permute.xlu0 %4575 }
 0x4d9   :  { %4627 = vrot.lane.b32.xlu1 %v10226_v57, %s7243_s28  ;;  %v3790_v57 = vshrl.u32 %v10004_v27, 16 }
 0x4da   :  { %4637 = vrot.lane.b32.xlu0 %v3788_v6, %s7243_s28 }
 0x4db   :  { %v10334_v15 = vpop.permute.xlu1 %4353  ;;  %v3795_v56 = vor.u32 %v3794_v41, %v3790_v57  ;;  %v3811_v41 = vrot.slane %v3809_v17, 1 }
 0x4dc   :  { %13907 = vst [vmem:[#allocation22_spill] sm:$0xff] %v10334_v15  ;;  %v10336_v59 = vpop.permute.xlu0 %4355 }
 0x4dd   :  { %4433 = vrot.lane.b32.xlu1 %v10238_v58, %s7242_s27  ;;  %v3800_v39 = vsel %vm13912_vm9, %v3795_v56, %v3799_v8  ;;  %v3812_v57 = vsel %vm13915_vm6, %v3807_v0, %v3811_v41  ;;  %v3828_v56 = vshll.u32 %v10037_v3, 16  ;;  %v3821_v0 = vshll.u32 %v10163_v50, 16  ;;  %vm13946_vm6 = vmmov %vm13943_vm12 }
 0x4de   :  { %4077 = vrot.lane.b32.xlu0 %v3776_v29, %s7235_s26  ;;  %v3845_v3 = vshll.u32 %v10190_v22, 16  ;;  %v3685_v22 = vsel %vm7294_vm2, %v10040_v5, 0  ;;  %vm4941_vm9 = vcmask 261120  }
 0x4df   :  { %v10342_v51 = vpop.permute.xlu1 %4577  ;;  %v3830_v41 = vrot.slane %v3828_v56, 1  ;;  %v3823_v2 = vrot.slane %v3821_v0, 1 }
 0x4e0   :  { %13908 = vst [vmem:[#allocation23_spill] sm:$0xff] %v10342_v51  ;;  %v10346_v1 = vpop.permute.xlu0 %4579 }
 0x4e1   :  { %13909 = vst [vmem:[#allocation24_spill] sm:$0xff] %v10346_v1  ;;  %4631 = vrot.lane.b32.xlu1 %v10275_v20, %s7243_s28 }
 0x4e2   :  { %4079 = vrot.lane.b32.xlu0 %v3788_v6, %s7235_s26 }
 0x4e3   :  { %v10351_v58 = vpop.permute.xlu1 %4357 }
 0x4e4   :  { %13910 = vst [vmem:[#allocation15_spill] sm:$0xff] %v10351_v58  ;;  %v10355_v45 = vpop.permute.xlu0 %4359 }
 0x4e5   :  { %13911 = vst [vmem:[#allocation16_spill] sm:$0xff] %v10355_v45  ;;  %4437 = vrot.lane.b32.xlu1 %v3764_v54, %s7242_s27 }
 0x4e6   :  { %4443 = vrot.lane.b32.xlu0 %v3800_v39, %s7242_s27 }
 0x4e7   :  { %v10360_v20 = vpop.permute.xlu1 %4581 }
 0x4e8   :  { %13913 = vst [vmem:[#allocation48_spill] sm:$0xff] %v10360_v20  ;;  %v10362_v63 = vpop.permute.xlu0 %4583  ;;  %v3448_v20 = vshll.u32 %v9845_v49, 16 }
 0x4e9   :  { %13914 = vst [vmem:[#allocation6_spill] sm:$0xff] %v10362_v63  ;;  %4635 = vrot.lane.b32.xlu1 %v3776_v29, %s7243_s28  ;;  %v3814_v29 = vshrl.u32 %v10026_v44, 16 }
 0x4ea   :  { %4641 = vrot.lane.b32.xlu0 %v3812_v57, %s7243_s28 }
 0x4eb   :  { %v10368_v26 = vpop.permute.xlu1 %4361  ;;  %v3819_v8 = vor.u32 %v3818_v13, %v3814_v29 }
 0x4ec   :  { %13916 = vst [vmem:[#allocation31_spill] sm:$0xff] %v10368_v26  ;;  %v10370_v54 = vpop.permute.xlu0 %4363 }
 0x4ed   :  { %13917 = vst [vmem:[#allocation7_spill] sm:$0xff] %v10370_v54  ;;  %4441 = vrot.lane.b32.xlu1 %v3788_v6, %s7242_s27  ;;  %v3833_v54 = vshll.u32 %v10176_v37, 16  ;;  %v3824_v50 = vsel %vm13920_vm10, %v3819_v8, %v3823_v2  ;;  %vm13947_vm10 = vmmov %vm13946_vm6 }
 0x4ee   :  { %4081 = vrot.lane.b32.xlu0 %v3800_v39, %s7235_s26 }
 0x4ef   :  { %v10375_v17 = vpop.permute.xlu1 %4585  ;;  %v3835_v56 = vrot.slane %v3833_v54, 1  ;;  %v3847_v54 = vrot.slane %v3845_v3, 1 }
 0x4f0   :  { %13918 = vst [vmem:[#allocation12_spill] sm:$0xff] %v10375_v17  ;;  %v10379_v35 = vpop.permute.xlu0 %4587  ;;  %v3840_v17 = vshll.u32 %v10048_v46, 16 }
 0x4f1   :  { %13919 = vst [vmem:[#allocation13_spill] sm:$0xff] %v10379_v35  ;;  %4639 = vrot.lane.b32.xlu1 %v3800_v39, %s7243_s28  ;;  %v3831_v39 = vor.u32 %v3830_v41, %v3826_v40  ;;  %v3838_v35 = vshrl.u32 %v10048_v46, 16  ;;  %v4224_v46 = vrot.slane %v3685_v22, 1 }
 0x4f2   :  { %4083 = vrot.lane.b32.xlu0 %v3812_v57, %s7235_s26  ;;  %v3842_v29 = vrot.slane %v3840_v17, 1  ;;  %v3852_v17 = vshll.u32 %v10067_v52, 16 }
 0x4f3   :  { %v10383_v6 = vpop.permute.xlu1 %4501  ;;  %v3836_v37 = vsel %vm13921_vm1, %v3831_v39, %v3835_v56  ;;  %v3445_v56 = vshrl.u32 %v9845_v49, 16  ;;  %v3452_v49 = vshrl.u32 %v9847_v42, 16  ;;  %vm5006_vm1 = vcmask 326656  }
 0x4f4   :  { %v10388_v26 = vpop.permute.xlu0 %4279  ;;  %v3843_v40 = vor.u32 %v3842_v29, %v3838_v35  ;;  %v3854_v35 = vrot.slane %v3852_v17, 1  ;;  %v3850_v29 = vshrl.u32 %v10067_v52, 16 }
 0x4f5   :  { %4445 = vrot.lane.b32.xlu1 %v3812_v57, %s7242_s27 }
 0x4f6   :  { %4447 = vrot.lane.b32.xlu0 %v3824_v50, %s7242_s27  ;;  %v3848_v2 = vsel %vm13922_vm3, %v3843_v40, %v3847_v54  ;;  %v3857_v40 = vshll.u32 %v3685_v22, 16  ;;  %v3855_v44 = vor.u32 %v3854_v35, %v3850_v29  ;;  %vm13948_vm3 = vmmov %vm13937_vm5 }
 0x4f7   :  { %v10393_v13 = vpop.permute.xlu1 %4689 }
 0x4f8   :  { %v10395_v0 = vpop.permute.xlu0 %4503  ;;  %v3859_v63 = vrot.slane %v3857_v40, 1  ;;  %v3455_v40 = vshll.u32 %v9847_v42, 16 }
 0x4f9   :  { %4643 = vrot.lane.b32.xlu1 %v3824_v50, %s7243_s28 }
 0x4fa   :  { %4645 = vrot.lane.b32.xlu0 %v3836_v37, %s7243_s28  ;;  %v3860_v45 = vsel %vm13924_vm4, %v3855_v44, %v3859_v63  ;;  %v3454_v63 = vrot.slane %v3452_v49, 7  ;;  %vm5135_vm4 = vcmask 457728  }
 0x4fb   :  { %v10402_v57 = vpop.permute.xlu1 %4691 }
 0x4fc   :  { %v10404_v8 = vpop.permute.xlu0 %4283  ;;  %v3457_v58 = vor.u32 %v3455_v40, %v3454_v63 }
 0x4fd   :  { %4449 = vrot.lane.b32.xlu1 %v3836_v37, %s7242_s27 }
 0x4fe   :  { %4085 = vrot.lane.b32.xlu0 %v3824_v50, %s7235_s26  ;;  %v4223_v50 = vrot.slane %v10067_v52, 1  ;;  %v10479_v42 = vsel %vm7294_vm2, 0, %v3457_v58 }
 0x4ff   :  { %v10409_v41 = vpop.permute.xlu1 %4281  ;;  %13930 = vst [vmem:[#allocation9_spill] sm:$0xff] %v10479_v42 }
 0x500   :  { %v10412_v39 = vpop.permute.xlu0 %4507  ;;  %v4225_v17 = vsel %vm13923_vm7, %v4223_v50, %v4224_v46  ;;  %vm5071_vm7 = vcmask 392192  }
 0x501   :  { %4647 = vrot.lane.b32.xlu1 %v3848_v2, %s7243_s28 }
 0x502   :  { %4087 = vrot.lane.b32.xlu0 %v3836_v37, %s7235_s26  ;;  %v3447_v37 = vrot.slane %v3445_v56, 7 }
 0x503   :  { %v10419_v3 = vpop.permute.xlu1 %4505 }
 0x504   :  { %v10424_v54 = vpop.permute.xlu0 %4287  ;;  %v3450_v35 = vor.u32 %v3448_v20, %v3447_v37  ;;  %v3686_v50 = vsel %vm7294_vm2, %v3447_v37, 0 }
 0x505   :  { %4709 = vrot.lane.b32.xlu1 %v10204_v33, %s7241_s25  ;;  %v3869_v51 = vshll.u32 %v3686_v50, 16 }
 0x506   :  { %4451 = vrot.lane.b32.xlu0 %v3848_v2, %s7242_s27  ;;  %v10449_v56 = vsel %vm7294_vm2, 0, %v3450_v35 }
 0x507   :  { %v10429_v5 = vpop.permute.xlu1 %4693  ;;  %13925 = vst [vmem:[#allocation17_spill] sm:$0xff] %v10449_v56  ;;  %v3864_v20 = vshll.u32 %v10449_v56, 16  ;;  %v3862_v62 = vshrl.u32 %v10449_v56, 16  ;;  %v3871_v37 = vrot.slane %v3869_v51, 1  ;;  %v3687_v51 = vsel %vm7294_vm2, %v3454_v63, 0 }
 0x508   :  { %v10432_v34 = vpop.permute.xlu0 %4511  ;;  %v3881_v1 = vshll.u32 %v3687_v51, 16  ;;  %v4230_v48 = vrot.slane %v3687_v51, 1 }
 0x509   :  { %4711 = vrot.lane.b32.xlu1 %v4225_v17, %s7241_s25  ;;  %v3866_v35 = vrot.slane %v3864_v20, 1 }
 0x50a   :  { %4649 = vrot.lane.b32.xlu0 %v3860_v45, %s7243_s28 }
 0x50b   :  { %v10438_v22 = vpop.permute.xlu1 %4695  ;;  %v3867_v49 = vor.u32 %v3866_v35, %v3862_v62  ;;  %v3876_v62 = vshll.u32 %v10479_v42, 16 }
 0x50c   :  { %v10440_v29 = vpop.permute.xlu0 %4291 }
 0x50d   :  { %4301 = vrot.lane.b32.xlu1 %v10204_v33, %s7237_s2  ;;  %v3872_v40 = vsel %vm13932_vm8, %v3867_v49, %v3871_v37  ;;  %v3459_v37 = vshrl.u32 %v10091_v18, 16  ;;  %vm13949_vm8 = vmmov %vm13906_vm0 }
 0x50e   :  { %4089 = vrot.lane.b32.xlu0 %v3848_v2, %s7235_s26 }
 0x50f   :  { %v10445_v46 = vpop.permute.xlu1 %4285  ;;  %v3461_v63 = vrot.slane %v3459_v37, 7  ;;  %v3466_v37 = vshrl.u32 %v9849_v38, 16 }
 0x510   :  { %v10452_v44 = vpop.permute.xlu0 %4515 }
 0x511   :  { %4365 = vrot.lane.b32.xlu1 %v10067_v52, %s7238_s3 }
 0x512   :  { %4091 = vrot.lane.b32.xlu0 %v3860_v45, %s7235_s26 }
 0x513   :  { %v10458_v33 = vpop.permute.xlu1 %4509 }
 0x514   :  { %v10460_v2 = vpop.permute.xlu0 %4295 }
 0x515   :  { %13926 = vst [vmem:[#allocation25_spill] sm:$0xff] %v10460_v2  ;;  %4453 = vrot.lane.b32.xlu1 %v3860_v45, %s7242_s27 }
 0x516   :  { %4303 = vrot.lane.b32.xlu0 %v4225_v17, %s7237_s2 }
 0x517   :  { %v10467_v52 = vpop.permute.xlu1 %4697 }
 0x518   :  { %13927 = vst [vmem:[#allocation30_spill] sm:$0xff] %v10467_v52  ;;  %v10470_v27 = vpop.permute.xlu0 %4519 }
 0x519   :  { %13928 = vst [vmem:[#allocation26_spill] sm:$0xff] %v10470_v27  ;;  %4525 = vrot.lane.b32.xlu1 %v4225_v17, %s7240_s22  ;;  %v4226_v17 = vrot.slane %v10449_v56, 1  ;;  %v4227_v27 = vrot.slane %v3686_v50, 1  ;;  %v3874_v50 = vshrl.u32 %v10479_v42, 16 }
 0x51a   :  { %4367 = vrot.lane.b32.xlu0 %v10449_v56, %s7238_s3 }
 0x51b   :  { %v10475_v45 = vpop.permute.xlu1 %4699  ;;  %v4228_v58 = vsel %vm13934_vm13, %v4226_v17, %v4227_v27  ;;  %vm13950_vm13 = vmmov %vm13946_vm6 }
 0x51c   :  { %13929 = vst [vmem:[#allocation8_spill] sm:$0xff] %v10475_v45  ;;  %v10481_v20 = vpop.permute.xlu0 %4299  ;;  %v3462_v45 = vshll.u32 %v10091_v18, 16 }
 0x51d   :  { %13931 = vst [vmem:[#allocation27_spill] sm:$0xff] %v10481_v20  ;;  %4589 = vrot.lane.b32.xlu1 %v10449_v56, %s7239_s4  ;;  %v3878_v20 = vrot.slane %v3876_v62, 1  ;;  %v4229_v56 = vrot.slane %v10479_v42, 1  ;;  %v3883_v62 = vrot.slane %v3881_v1, 1 }
 0x51e   :  { %4455 = vrot.lane.b32.xlu0 %v3872_v40, %s7242_s27 }
 0x51f   :  { %v10489_v35 = vpop.permute.xlu1 %4289  ;;  %v3879_v15 = vor.u32 %v3878_v20, %v3874_v50  ;;  %v4231_v17 = vsel %vm13937_vm5, %v4229_v56, %v4230_v48  ;;  %v3464_v20 = vor.u32 %v3462_v45, %v3461_v63  ;;  %v3469_v45 = vshll.u32 %v9849_v38, 16  ;;  %vm13951_vm5 = vmmov %vm13946_vm6 }
 0x520   :  { %v10491_v2 = vpop.permute.xlu0 %4523 }
 0x521   :  { %13933 = vst [vmem:[#allocation28_spill] sm:$0xff] %v10491_v2  ;;  %4651 = vrot.lane.b32.xlu1 %v3872_v40, %s7243_s28  ;;  %v3884_v52 = vsel %vm13938_vm11, %v3879_v15, %v3883_v62  ;;  %v3656_v18 = vsel %vm7294_vm2, 0, %v3464_v20  ;;  %v3468_v15 = vrot.slane %v3466_v37, 7  ;;  %vm5199_vm11 = vcmask 523264  }
 0x522   :  { %4527 = vrot.lane.b32.xlu0 %v4228_v58, %s7240_s22  ;;  %v4408_v56 = vshll.u32 %v3656_v18, 16  ;;  %v4406_v37 = vshrl.u32 %v3656_v18, 16 }
 0x523   :  { %v10498_v49 = vpop.permute.xlu1 %4513  ;;  %v3471_v20 = vor.u32 %v3469_v45, %v3468_v15 }
 0x524   :  { %13935 = vst [vmem:[#allocation33_spill] sm:$0xff] %v10498_v49  ;;  %v4068_v2 = vpop.permute.xlu0 %4067 }
 0x525   :  { %4713 = vrot.lane.b32.xlu1 %v4228_v58, %s7241_s25  ;;  %v4754_v38 = vsel %vm13943_vm12, %v9876_v23, %v4068_v2  ;;  %vm5297_vm12 = vcmask 588800  }
 0x526   :  { %4591 = vrot.lane.b32.xlu0 %v10479_v42, %s7239_s4 }
 0x527   :  { %v10506_v27 = vpop.permute.xlu1 %4701 }
 0x528   :  { %13936 = vst [vmem:[#allocation34_spill] sm:$0xff] %v10506_v27  ;;  %v4432_v49 = vpop.permute.xlu0 %4431 }
 0x529   :  { %4715 = vrot.lane.b32.xlu1 %v4231_v17, %s7241_s25 }
 0x52a   :  { %4653 = vrot.lane.b32.xlu0 %v3884_v52, %s7243_s28 }
 0x52b   :  { %v10513_v51 = vpop.permute.xlu1 %4703 }
 0x52c   :  { %13939 = vst [vmem:[#allocation47_spill] sm:$0xff] %v10513_v51  ;;  %v10515_v50 = vpop.permute.xlu0 %4629  ;;  %v4410_v51 = vrot.slane %v4408_v56, 1  ;;  %v4817_v56 = vsel %vm4813_vm14, %v4754_v38, %v10388_v26 }
 0x52d   :  { %4305 = vrot.lane.b32.xlu1 %v4228_v58, %s7237_s2 }
 0x52e   :  { %4093 = vrot.lane.b32.xlu0 %v3872_v40, %s7235_s26  ;;  %v3688_v40 = vsel %vm7294_vm2, %v3461_v63, 0 }
 0x52f   :  { %v10520_v48 = vpop.permute.xlu1 %4293 }
 0x530   :  { %13940 = vst [vmem:[#allocation45_spill] sm:$0xff] %v10520_v48  ;;  %v10524_v1 = vpop.permute.xlu0 %4069 }
 0x531   :  { %4369 = vrot.lane.b32.xlu1 %v10479_v42, %s7238_s3  ;;  %v4413_v42 = vshll.u32 %v3688_v40, 16 }
 0x532   :  { %4095 = vrot.lane.b32.xlu0 %v3884_v52, %s7235_s26 }
 0x533   :  { %v10530_v58 = vpop.permute.xlu1 %4517  ;;  %v4415_v45 = vrot.slane %v4413_v42, 1  ;;  %v3473_v42 = vshrl.u32 %v9851_v43, 16 }
 0x534   :  { %13941 = vst [vmem:[#allocation46_spill] sm:$0xff] %v10530_v58  ;;  %v4072_v62 = vpop.permute.xlu0 %4071  ;;  %v4411_v58 = vor.u32 %v4410_v51, %v4406_v37  ;;  %v10557_v51 = vsel %vm7294_vm2, %v3468_v15, 0  ;;  %v4496_v37 = vrot.slane %v3688_v40, 1 }
 0x535   :  { %4457 = vrot.lane.b32.xlu1 %v3884_v52, %s7242_s27  ;;  %v10543_v52 = vsel %vm7294_vm2, 0, %v3471_v20  ;;  %v4880_v20 = vsel %vm4876_vm15, %v4817_v56, %v10263_v9  ;;  %v4758_v15 = vsel %vm13947_vm10, %v9920_v28, %v4072_v62  ;;  %v3893_v9 = vshll.u32 %v10557_v51, 16 }
 0x536   :  { %4307 = vrot.lane.b32.xlu0 %v4231_v17, %s7237_s2  ;;  %v4416_v2 = vsel %vm13906_vm0, %v4411_v58, %v4415_v45  ;;  %v4945_v56 = vsel %vm4941_vm9, %v4880_v20, %v4432_v49  ;;  %v4821_v62 = vsel %vm4813_vm14, %v4758_v15, %v10404_v8  ;;  %v3476_v20 = vshll.u32 %v9851_v43, 16  ;;  %vm13954_vm0 = vmmov %vm13951_vm5 }
 0x537   :  { %v10536_v27 = vpop.permute.xlu1 %4705  ;;  %v5010_v49 = vsel %vm5006_vm1, %v4945_v56, %v10395_v0  ;;  %v3480_v56 = vshrl.u32 %v9853_v60, 16  ;;  %vm13956_vm10 = vmmov %vm13954_vm0 }
 0x538   :  { %13942 = vst [vmem:[#allocation49_spill] sm:$0xff] %v10536_v27  ;;  %v4436_v48 = vpop.permute.xlu0 %4435  ;;  %v3888_v27 = vshll.u32 %v10543_v52, 16  ;;  %v5075_v0 = vsel %vm5071_vm7, %v5010_v49, %v10284_v7 }
 0x539   :  { %4529 = vrot.lane.b32.xlu1 %v4231_v17, %s7240_s22  ;;  %v4495_v17 = vrot.slane %v3656_v18, 1 }
 0x53a   :  { %4371 = vrot.lane.b32.xlu0 %v3656_v18, %s7238_s3  ;;  %v3890_v38 = vrot.slane %v3888_v27, 1  ;;  %v3886_v27 = vshrl.u32 %v10543_v52, 16 }
 0x53b   :  { %v10546_v63 = vpop.permute.xlu1 %4707  ;;  %v4497_v45 = vsel %vm13948_vm3, %v4495_v17, %v4496_v37  ;;  %v3895_v37 = vrot.slane %v3893_v9, 1 }
 0x53c   :  { %13944 = vst [vmem:[#allocation50_spill] sm:$0xff] %v10546_v63  ;;  %v10551_v23 = vpop.permute.xlu0 %4633  ;;  %v13945_v63 = vld [vmem:[#allocation3_spill] sm:$0xff] }
 0x53d   :  { %4593 = vrot.lane.b32.xlu1 %v3656_v18, %s7239_s4  ;;  %v4752_v18 = vsel %vm13946_vm6, %v13945_v63, %v10230_v53  ;;  %v3475_v53 = vrot.slane %v3473_v42, 7  ;;  %vm13955_vm6 = vmmov %vm13948_vm3 }
 0x53e   :  { %4459 = vrot.lane.b32.xlu0 %v4416_v2, %s7242_s27  ;;  %v10582_v28 = vsel %vm4813_vm14, %v4752_v18, %v10250_v47  ;;  %v4884_v47 = vsel %vm4876_vm15, %v4821_v62, %v10296_v61  ;;  %vm13957_vm3 = vmmov %vm13954_vm0 }
 0x53f   :  { %v10562_v26 = vpop.permute.xlu1 %4297  ;;  %v4878_v42 = vsel %vm4876_vm15, %v10582_v28, %v10265_v32  ;;  %v4756_v32 = vsel %vm13950_vm13, %v9717_v36, %v10524_v1  ;;  %v4949_v7 = vsel %vm4941_vm9, %v4884_v47, %v4436_v48  ;;  %v5139_v36 = vsel %vm5135_vm4, %v5075_v0, %v10515_v50  ;;  %v13952_v1 = vld [vmem:[#allocation5_spill] sm:$0xff]  ;;  %vm13959_vm13 = vmmov %vm13955_vm6 }
 0x540   :  { %v10570_v58 = vpop.permute.xlu0 %4073  ;;  %v4819_v48 = vsel %vm4813_vm14, %v4756_v32, %v10409_v41  ;;  %v5014_v50 = vsel %vm5006_vm1, %v4949_v7, %v10412_v39  ;;  %v4232_v41 = vrot.slane %v10543_v52, 1  ;;  %v13953_v39 = vld [vmem:[#allocation4_spill] sm:$0xff] }
 0x541   :  { %4655 = vrot.lane.b32.xlu1 %v4416_v2, %s7243_s28  ;;  %v3891_v2 = vor.u32 %v3890_v38, %v3886_v27  ;;  %v3478_v38 = vor.u32 %v3476_v20, %v3475_v53  ;;  %v4882_v20 = vsel %vm4876_vm15, %v4819_v48, %v10291_v21  ;;  %v3690_v21 = vsel %vm7294_vm2, %v3475_v53, 0 }
 0x542   :  { %4531 = vrot.lane.b32.xlu0 %v4497_v45, %s7240_s22  ;;  %v3905_v32 = vshll.u32 %v3690_v21, 16 }
 0x543   :  { %v10578_v40 = vpop.permute.xlu1 %4521  ;;  %v3896_v43 = vsel %vm13949_vm8, %v3891_v2, %v3895_v37  ;;  %v5203_v2 = vsel %vm5199_vm11, %v5139_v36, %v10402_v57  ;;  %v5079_v57 = vsel %vm5071_vm7, %v5014_v50, %v10310_v24 }
 0x544   :  { %v4076_v17 = vpop.permute.xlu0 %4075 }
 0x545   :  { %4717 = vrot.lane.b32.xlu1 %v4497_v45, %s7241_s25  ;;  %v4762_v61 = vsel %vm13951_vm5, %v9965_v16, %v4076_v17  ;;  %vm13966_vm5 = vmmov %vm13954_vm0 }
 0x546   :  { %4595 = vrot.lane.b32.xlu0 %v13945_v63, %s7239_s4 }
 0x547   :  { %v4430_v8 = vpop.permute.xlu1 %4429 }
 0x548   :  { %v4943_v18 = vsel %vm4941_vm9, %v4878_v42, %v4430_v8  ;;  %v4440_v15 = vpop.permute.xlu0 %4439  ;;  %v4233_v42 = vrot.slane %v10557_v51, 1 }
 0x549   :  { %v5008_v63 = vsel %vm5006_vm1, %v4943_v18, %v10383_v6  ;;  %4097 = vrot.lane.b32.xlu1 %v3896_v43, %s7235_s26  ;;  %v10619_v6 = vsel %vm7294_vm2, 0, %v3478_v38  ;;  %v3483_v38 = vshll.u32 %v9853_v60, 16 }
 0x54a   :  { %v5073_v9 = vsel %vm5071_vm7, %v5008_v63, %v10279_v19  ;;  %4657 = vrot.lane.b32.xlu0 %v13952_v1, %s7243_s28  ;;  %v4825_v19 = vsel %vm4813_vm14, %v4762_v61, %v10424_v54  ;;  %v3900_v54 = vshll.u32 %v10619_v6, 16  ;;  %v4234_v0 = vsel %vm13955_vm6, %v4232_v41, %v4233_v42 }
 0x54b   :  { %v4628_v16 = vpop.permute.xlu1 %4627  ;;  %v4888_v49 = vsel %vm4876_vm15, %v4825_v19, %v10319_v14  ;;  %v4760_v14 = vsel %vm13954_vm0, %v9946_v25, %v10570_v58  ;;  %v5143_v25 = vsel %vm5135_vm4, %v5079_v57, %v10551_v23  ;;  %vm13969_vm0 = vmmov %vm13955_vm6 }
 0x54c   :  { %v5137_v45 = vsel %vm5135_vm4, %v5073_v9, %v4628_v16  ;;  %v4638_v27 = vpop.permute.xlu0 %4637  ;;  %v4953_v24 = vsel %vm4941_vm9, %v4888_v49, %v4440_v15  ;;  %v3902_v18 = vrot.slane %v3900_v54, 1  ;;  %v4823_v53 = vsel %vm4813_vm14, %v4760_v14, %v10445_v46  ;;  %v13963_v14 = vld [vmem:[#allocation24_spill] sm:$0xff]  ;;  %vm13972_vm6 = vmmov %vm13957_vm3 }
 0x54d   :  { %4373 = vrot.lane.b32.xlu1 %v10543_v52, %s7238_s3  ;;  %v5201_v62 = vsel %vm5199_vm11, %v5137_v45, %v10393_v13  ;;  %v3482_v13 = vrot.slane %v3480_v56, 7  ;;  %v5018_v61 = vsel %vm5006_vm1, %v4953_v24, %v10432_v34  ;;  %v5207_v46 = vsel %vm5199_vm11, %v5143_v25, %v10438_v22  ;;  %v13964_v24 = vld [vmem:[#allocation33_spill] sm:$0xff] }
 0x54e   :  { %7092 = vmatprep.mubr.msk.bf16.mxu0 %vm5297_vm12, %v5201_v62  ;;  %4719 = vrot.lane.b32.xlu0 %v13953_v39, %s7241_s25  ;;  %v4886_v9 = vsel %vm4876_vm15, %v4823_v53, %v10315_v12  ;;  %v3907_v56 = vrot.slane %v3905_v32, 1  ;;  %v4235_v16 = vrot.slane %v10619_v6, 1  ;;  %v4236_v62 = vrot.slane %v3690_v21, 1 }
 0x54f   :  { %v4434_v17 = vpop.permute.xlu1 %4433  ;;  %7093 = vmatmul.mubr.msk.bf16.vlgmr.msra.gmra.mrb[64].mxu0 %vm5297_vm12, %v5203_v2  ;;  %v3485_v58 = vor.u32 %v3483_v38, %v3482_v13  ;;  %v3691_v2 = vsel %vm7294_vm2, %v3482_v13, 0  ;;  %v13961_v13 = vld [vmem:[#allocation22_spill] sm:$0xff] }
 0x550   :  { %v4947_v37 = vsel %vm4941_vm9, %v4882_v20, %v4434_v17  ;;  %v4078_v8 = vpop.permute.xlu0 %4077  ;;  %v4237_v49 = vsel %vm13959_vm13, %v4235_v16, %v4236_v62  ;;  %v3917_v57 = vshll.u32 %v3691_v2, 16  ;;  %v4239_v53 = vrot.slane %v3691_v2, 1  ;;  %v13978_v62 = vld [vmem:[#allocation46_spill] sm:$0xff] }
 0x551   :  { %v5012_v47 = vsel %vm5006_vm1, %v4947_v37, %v10419_v3  ;;  %4461 = vrot.lane.b32.xlu1 %v3896_v43, %s7242_s27  ;;  %v3898_v43 = vshrl.u32 %v10619_v6, 16  ;;  %v4764_v36 = vsel %vm13957_vm3, %v9980_v11, %v4078_v8  ;;  %v13962_v37 = vld [vmem:[#allocation2_spill] sm:$0xff] }
 0x552   :  { %v5077_v51 = vsel %vm5071_vm7, %v5012_v47, %v10306_v4  ;;  %4309 = vrot.lane.b32.xlu0 %v4234_v0, %s7237_s2  ;;  %v4827_v45 = vsel %vm4813_vm14, %v4764_v36, %v10489_v35  ;;  %v13960_v35 = vld [vmem:[#allocation8_spill] sm:$0xff]  ;;  %v3487_v42 = vshrl.u32 %v13962_v37, 16  ;;  %v13974_v36 = vld [vmem:[#allocation47_spill] sm:$0xff] }
 0x553   :  { %v4632_v3 = vpop.permute.xlu1 %4631  ;;  %v3903_v15 = vor.u32 %v3902_v18, %v3898_v43  ;;  %v13965_v18 = vld [vmem:[#allocation18_spill] sm:$0xff] }
 0x554   :  { %v5141_v60 = vsel %vm5135_vm4, %v5077_v51, %v4632_v3  ;;  %v4080_v4 = vpop.permute.xlu0 %4079  ;;  %v13967_v3 = vld [vmem:[#allocation23_spill] sm:$0xff] }
 0x555   :  { %4533 = vrot.lane.b32.xlu1 %v4234_v0, %s7240_s22  ;;  %v5205_v23 = vsel %vm5199_vm11, %v5141_v60, %v10429_v5  ;;  %v4766_v63 = vsel %vm13956_vm10, %v9993_v30, %v4080_v4  ;;  %v10687_v30 = vsel %vm7294_vm2, 0, %v3485_v58  ;;  %v5083_v5 = vsel %vm5071_vm7, %v5018_v61, %v10327_v55  ;;  %v13968_v4 = vld [vmem:[#allocation45_spill] sm:$0xff]  ;;  %vm13973_vm10 = vmmov %vm13949_vm8 }
 0x556   :  { %7096 = vmatprep.mubr.msk.bf16.mxu1 %vm5297_vm12, %v5205_v23  ;;  %v4829_v7 = vsel %vm4813_vm14, %v4766_v63, %v10440_v29  ;;  %4375 = vrot.lane.b32.xlu0 %v10619_v6, %s7238_s3  ;;  %v10703_v48 = vsel %vm13949_vm8, %v3903_v15, %v3907_v56  ;;  %v3912_v19 = vshll.u32 %v10687_v30, 16  ;;  %v5147_v11 = vsel %vm5135_vm4, %v5083_v5, %v4638_v27  ;;  %v13958_v27 = vld [vmem:[#allocation30_spill] sm:$0xff]  ;;  %vm13988_vm8 = vmmov %vm13957_vm3 }
 0x557   :  { %v4438_v34 = vpop.permute.xlu1 %4437  ;;  %7097 = vmatmul.mubr.msk.bf16.vlgmr.msra.gmra.mrb[0].mxu1 %vm5297_vm12, %v5207_v46  ;;  %v4892_v29 = vsel %vm4876_vm15, %v4829_v7, %v10336_v59  ;;  %v5211_v39 = vsel %vm5199_vm11, %v5147_v11, %v13960_v35  ;;  %v4238_v21 = vrot.slane %v10687_v30, 1  ;;  %v3910_v38 = vshrl.u32 %v10687_v30, 16  ;;  %v13980_v35 = vld [vmem:[#allocation26_spill] sm:$0xff]  ;;  %vm13992_vm13 = vmmov %vm13973_vm10 }
 0x558   :  { %v4951_v22 = vsel %vm4941_vm9, %v4886_v9, %v4438_v34  ;;  %v4444_v1 = vpop.permute.xlu0 %4443  ;;  %v3914_v17 = vrot.slane %v3912_v19, 1  ;;  %v3489_v61 = vrot.slane %v3487_v42, 7  ;;  %v3919_v15 = vrot.slane %v3917_v57, 1  ;;  %v13970_v34 = vld [vmem:[#allocation34_spill] sm:$0xff] }
 0x559   :  { %v5016_v12 = vsel %vm5006_vm1, %v4951_v22, %v10458_v33  ;;  %4597 = vrot.lane.b32.xlu1 %v10619_v6, %s7239_s4  ;;  %v4957_v55 = vsel %vm4941_vm9, %v4892_v29, %v4444_v1  ;;  %v4240_v46 = vsel %vm13969_vm0, %v4238_v21, %v4239_v53  ;;  %v3490_v5 = vshll.u32 %v13962_v37, 16  ;;  %v13971_v22 = vld [vmem:[#allocation44_spill] sm:$0xff]  ;;  %v13975_v1 = vld [vmem:[#allocation25_spill] sm:$0xff]  ;;  %v13982_v57 = vld [vmem:[#allocation6_spill] sm:$0xff] }
 0x55a   :  { %v5081_v59 = vsel %vm5071_vm7, %v5016_v12, %v10325_v31  ;;  %4463 = vrot.lane.b32.xlu0 %v10703_v48, %s7242_s27  ;;  %v5022_v31 = vsel %vm5006_vm1, %v4957_v55, %v10452_v44  ;;  %v4890_v44 = vsel %vm4876_vm15, %v4827_v45, %v13961_v13  ;;  %v3915_v60 = vor.u32 %v3914_v17, %v3910_v38  ;;  %v13977_v45 = vld [vmem:[#allocation16_spill] sm:$0xff]  ;;  %v13981_v13 = vld [vmem:[#allocation35_spill] sm:$0xff]  ;;  %v13984_v38 = vld [vmem:[#allocation50_spill] sm:$0xff] }
 0x55b   :  { %v4636_v33 = vpop.permute.xlu1 %4635  ;;  %v5087_v47 = vsel %vm5071_vm7, %v5022_v31, %v13963_v14  ;;  %v3492_v11 = vor.u32 %v3490_v5, %v3489_v61  ;;  %v13983_v14 = vld [vmem:[#allocation49_spill] sm:$0xff] }
 0x55c   :  { %v5145_v50 = vsel %vm5135_vm4, %v5081_v59, %v4636_v33  ;;  %v4642_v41 = vpop.permute.xlu0 %4641  ;;  %v3920_v56 = vsel %vm13973_vm10, %v3915_v60, %v3919_v15  ;;  %v13976_v59 = vld [vmem:[#allocation15_spill] sm:$0xff] }
 0x55d   :  { %4659 = vrot.lane.b32.xlu1 %v10703_v48, %s7243_s28  ;;  %v5209_v54 = vsel %vm5199_vm11, %v5145_v50, %v13958_v27  ;;  %v5151_v43 = vsel %vm5135_vm4, %v5087_v47, %v4642_v41  ;;  %v13979_v27 = vld [vmem:[#allocation48_spill] sm:$0xff] }
 0x55e   :  { %7100 = vmatprep.mubr.msk.bf16.mxu1 %vm5297_vm12, %v5209_v54  ;;  %4535 = vrot.lane.b32.xlu0 %v4237_v49, %s7240_s22  ;;  %v5215_v12 = vsel %vm5199_vm11, %v5151_v43, %v13974_v36 }
 0x55f   :  { %v4442_v20 = vpop.permute.xlu1 %4441  ;;  %7101 = vmatmul.mubr.msk.bf16.gmra.mrb[4].mxu1 %vm5297_vm12, %v5211_v39 }
 0x560   :  { %v4955_v8 = vsel %vm4941_vm9, %v4890_v44, %v4442_v20  ;;  %v4082_v51 = vpop.permute.xlu0 %4081  ;;  %v10781_v20 = vsel %vm7294_vm2, 0, %v3492_v11  ;;  %v3494_v44 = vshrl.u32 %v13981_v13, 16 }
 0x561   :  { %v5020_v0 = vsel %vm5006_vm1, %v4955_v8, %v13964_v24  ;;  %4721 = vrot.lane.b32.xlu1 %v4237_v49, %s7241_s25  ;;  %v4768_v25 = vsel %vm13966_vm5, %v13965_v18, %v4082_v51  ;;  %v3924_v8 = vshll.u32 %v10781_v20, 16  ;;  %v3692_v18 = vsel %vm7294_vm2, %v3489_v61, 0  ;;  %vm13995_vm5 = vmmov %vm13969_vm0 }
 0x562   :  { %v5085_v58 = vsel %vm5071_vm7, %v5020_v0, %v13967_v3  ;;  %4599 = vrot.lane.b32.xlu0 %v10687_v30, %s7239_s4  ;;  %v4831_v23 = vsel %vm4813_vm14, %v4768_v25, %v13968_v4  ;;  %v3496_v0 = vrot.slane %v3494_v44, 7  ;;  %v3497_v25 = vshll.u32 %v13981_v13, 16  ;;  %v13985_v3 = vld [vmem:[#allocation10_spill] sm:$0xff]  ;;  %v13986_v4 = vld [vmem:[#allocation31_spill] sm:$0xff] }
 0x563   :  { %v4640_v32 = vpop.permute.xlu1 %4639  ;;  %v4894_v19 = vsel %vm4876_vm15, %v4831_v23, %v13976_v59  ;;  %v3926_v53 = vrot.slane %v3924_v8, 1  ;;  %v3929_v15 = vshll.u32 %v3692_v18, 16 }
 0x564   :  { %v5149_v63 = vsel %vm5135_vm4, %v5085_v58, %v4640_v32  ;;  %v4084_v7 = vpop.permute.xlu0 %4083  ;;  %v3499_v32 = vor.u32 %v3497_v25, %v3496_v0 }
 0x565   :  { %4723 = vrot.lane.b32.xlu1 %v4240_v46, %s7241_s25  ;;  %v5213_v9 = vsel %vm5199_vm11, %v5149_v63, %v13970_v34  ;;  %v4770_v29 = vsel %vm13972_vm6, %v13971_v22, %v4084_v7  ;;  %v3922_v63 = vshrl.u32 %v10781_v20, 16  ;;  %v13989_v22 = vld [vmem:[#allocation12_spill] sm:$0xff]  ;;  %vm13997_vm6 = vmmov %vm13973_vm10 }
 0x566   :  { %7104 = vmatprep.mubr.msk.bf16.mxu1 %vm5297_vm12, %v5213_v9  ;;  %v4833_v16 = vsel %vm4813_vm14, %v4770_v29, %v13975_v1  ;;  %4661 = vrot.lane.b32.xlu0 %v3920_v56, %s7243_s28  ;;  %v13987_v9 = vld [vmem:[#allocation11_spill] sm:$0xff]  ;;  %vm14000_vm10 = vmmov %vm13957_vm3 }
 0x567   :  { %v4446_v55 = vpop.permute.xlu1 %4445  ;;  %7105 = vmatmul.mubr.msk.bf16.gmra.mrb[8].mxu1 %vm5297_vm12, %v5215_v12  ;;  %v4896_v50 = vsel %vm4876_vm15, %v4833_v16, %v13977_v45  ;;  %v3927_v5 = vor.u32 %v3926_v53, %v3922_v63  ;;  %v13991_v1 = vld [vmem:[#allocation7_spill] sm:$0xff]  ;;  %v4241_v45 = vrot.slane %v10781_v20, 1 }
 0x568   :  { %v4959_v33 = vsel %vm4941_vm9, %v4894_v19, %v4446_v55  ;;  %v4448_v31 = vpop.permute.xlu0 %4447  ;;  %v3931_v55 = vrot.slane %v3929_v15, 1 }
 0x569   :  { %v5024_v2 = vsel %vm5006_vm1, %v4959_v33, %v13978_v62  ;;  %4311 = vrot.lane.b32.xlu1 %v4237_v49, %s7237_s2  ;;  %v4961_v41 = vsel %vm4941_vm9, %v4896_v50, %v4448_v31  ;;  %v13993_v62 = vld [vmem:[#allocation28_spill] sm:$0xff] }
 0x56a   :  { %v5089_v54 = vsel %vm5071_vm7, %v5024_v2, %v13979_v27  ;;  %v5026_v39 = vsel %vm5006_vm1, %v4961_v41, %v13980_v35  ;;  %4099 = vrot.lane.b32.xlu0 %v10703_v48, %s7235_s26  ;;  %v3932_v33 = vsel %vm13992_vm13, %v3927_v5, %v3931_v55  ;;  %v13994_v41 = vld [vmem:[#allocation13_spill] sm:$0xff]  ;;  %vm14003_vm13 = vmmov %vm13969_vm0 }
 0x56b   :  { %v4644_v17 = vpop.permute.xlu1 %4643  ;;  %v5091_v37 = vsel %vm5071_vm7, %v5026_v39, %v13982_v57  ;;  %v3693_v39 = vsel %vm7294_vm2, %v3496_v0, 0 }
 0x56c   :  { %v5153_v49 = vsel %vm5135_vm4, %v5089_v54, %v4644_v17  ;;  %v4646_v42 = vpop.permute.xlu0 %4645  ;;  %v4242_v54 = vrot.slane %v3692_v18, 1 }
 0x56d   :  { %4377 = vrot.lane.b32.xlu1 %v10687_v30, %s7238_s3  ;;  %v5217_v47 = vsel %vm5199_vm11, %v5153_v49, %v13983_v14  ;;  %v5155_v48 = vsel %vm5135_vm4, %v5091_v37, %v4646_v42  ;;  %v13996_v37 = vld [vmem:[#allocation36_spill] sm:$0xff] }
 0x56e   :  { %7108 = vmatprep.mubr.msk.bf16.mxu1 %vm5297_vm12, %v5217_v47  ;;  %4101 = vrot.lane.b32.xlu0 %v3920_v56, %s7235_s26  ;;  %v5219_v24 = vsel %vm5199_vm11, %v5155_v48, %v13984_v38  ;;  %v4243_v13 = vsel %vm13995_vm5, %v4241_v45, %v4242_v54  ;;  %v3501_v42 = vshrl.u32 %v13996_v37, 16  ;;  %v3941_v48 = vshll.u32 %v3693_v39, 16  ;;  %vm14005_vm5 = vmmov %vm13969_vm0 }
 0x56f   :  { %v4450_v21 = vpop.permute.xlu1 %4449  ;;  %7109 = vmatmul.mubr.msk.bf16.gmra.mrb[12].mxu1 %vm5297_vm12, %v5219_v24 }
 0x570   :  { %v4086_v51 = vpop.permute.xlu0 %4085  ;;  %v3503_v0 = vrot.slane %v3501_v42, 7  ;;  %v3943_v18 = vrot.slane %v3941_v48, 1 }
 0x571   :  { %4465 = vrot.lane.b32.xlu1 %v3920_v56, %s7242_s27  ;;  %v4772_v58 = vsel %vm13957_vm3, %v13985_v3, %v4086_v51  ;;  %v13990_v56 = vld [vmem:[#allocation27_spill] sm:$0xff]  ;;  %v3504_v3 = vshll.u32 %v13996_v37, 16 }
 0x572   :  { %v4835_v60 = vsel %vm4813_vm14, %v4772_v58, %v10562_v26  ;;  %4313 = vrot.lane.b32.xlu0 %v4240_v46, %s7237_s2 }
 0x573   :  { %v4648_v43 = vpop.permute.xlu1 %4647  ;;  %v4898_v23 = vsel %vm4876_vm15, %v4835_v60, %v13986_v4  ;;  %v3506_v60 = vor.u32 %v3504_v3, %v3503_v0 }
 0x574   :  { %v4963_v61 = vsel %vm4941_vm9, %v4898_v23, %v4450_v21  ;;  %v4088_v7 = vpop.permute.xlu0 %4087  ;;  %v4245_v21 = vrot.slane %v3693_v39, 1  ;;  %v13998_v23 = vld [vmem:[#allocation37_spill] sm:$0xff] }
 0x575   :  { %4537 = vrot.lane.b32.xlu1 %v4240_v46, %s7240_s22  ;;  %v5028_v34 = vsel %vm5006_vm1, %v4963_v61, %v10578_v40  ;;  %v4774_v26 = vsel %vm13988_vm8, %v13987_v9, %v4088_v7  ;;  %v10824_v46 = vsel %vm7294_vm2, 0, %v3499_v32  ;;  %v10865_v4 = vsel %vm7294_vm2, 0, %v3506_v60  ;;  %v13999_v7 = vld [vmem:[#allocation19_spill] sm:$0xff]  ;;  %vm14002_vm8 = vmmov %vm13997_vm6 }
 0x576   :  { %v5093_v29 = vsel %vm5071_vm7, %v5028_v34, %v13989_v22  ;;  %v4837_v36 = vsel %vm4813_vm14, %v4774_v26, %v13990_v56  ;;  %4379 = vrot.lane.b32.xlu0 %v10781_v20, %s7238_s3  ;;  %v3936_v50 = vshll.u32 %v10824_v46, 16  ;;  %v4244_v14 = vrot.slane %v10824_v46, 1 }
 0x577   :  { %v4710_v12 = vpop.permute.xlu1 %4709  ;;  %v5157_v40 = vsel %vm5135_vm4, %v5093_v29, %v4648_v43  ;;  %v4900_v16 = vsel %vm4876_vm15, %v4837_v36, %v13991_v1  ;;  %v3934_v47 = vshrl.u32 %v10824_v46, 16  ;;  %v3508_v63 = vshrl.u32 %v13998_v23, 16 }
 0x578   :  { %v5221_v59 = vsel %vm5199_vm11, %v5157_v40, %v4710_v12  ;;  %v4452_v19 = vpop.permute.xlu0 %4451  ;;  %v3938_v44 = vrot.slane %v3936_v50, 1  ;;  %v4246_v51 = vsel %vm13969_vm0, %v4244_v14, %v4245_v21  ;;  %v3948_v61 = vshll.u32 %v10865_v4, 16  ;;  %vm14006_vm0 = vmmov %vm13997_vm6 }
 0x579   :  { %4601 = vrot.lane.b32.xlu1 %v10781_v20, %s7239_s4  ;;  %v4965_v11 = vsel %vm4941_vm9, %v4900_v16, %v4452_v19  ;;  %7112 = vmatprep.mubr.msk.bf16.mxu1 %vm5297_vm12, %v5221_v59  ;;  %v3510_v26 = vrot.slane %v3508_v63, 7  ;;  %v3694_v22 = vsel %vm7294_vm2, %v3503_v0, 0  ;;  %v3511_v29 = vshll.u32 %v13998_v23, 16 }
 0x57a   :  { %v5030_v2 = vsel %vm5006_vm1, %v4965_v11, %v13993_v62  ;;  %4467 = vrot.lane.b32.xlu0 %v3932_v33, %s7242_s27  ;;  %v3939_v38 = vor.u32 %v3938_v44, %v3934_v47  ;;  %v3950_v36 = vrot.slane %v3948_v61, 1  ;;  %v3946_v55 = vshrl.u32 %v10865_v4, 16 }
 0x57b   :  { %v4712_v31 = vpop.permute.xlu1 %4711  ;;  %v5095_v27 = vsel %vm5071_vm7, %v5030_v2, %v13994_v41  ;;  %v3513_v1 = vor.u32 %v3511_v29, %v3510_v26  ;;  %v3953_v59 = vshll.u32 %v3694_v22, 16  ;;  %v4247_v44 = vrot.slane %v10865_v4, 1 }
 0x57c   :  { %v4650_v35 = vpop.permute.xlu0 %4649  ;;  %v3944_v58 = vsel %vm13997_vm6, %v3939_v38, %v3943_v18  ;;  %v3951_v45 = vor.u32 %v3950_v36, %v3946_v55  ;;  %v4248_v14 = vrot.slane %v3694_v22, 1  ;;  %v14004_v18 = vld [vmem:[#allocation38_spill] sm:$0xff]  ;;  %v14007_v36 = vld [vmem:[#allocation39_spill] sm:$0xff]  ;;  %vm14009_vm6 = vmmov %vm13957_vm3 }
 0x57d   :  { %4663 = vrot.lane.b32.xlu1 %v3932_v33, %s7243_s28  ;;  %v5159_v17 = vsel %vm5135_vm4, %v5095_v27, %v4650_v35  ;;  %v10891_v2 = vsel %vm7294_vm2, 0, %v3513_v1  ;;  %v3955_v54 = vrot.slane %v3953_v59, 1 }
 0x57e   :  { %4539 = vrot.lane.b32.xlu0 %v4243_v13, %s7240_s22  ;;  %v5223_v49 = vsel %vm5199_vm11, %v5159_v17, %v4712_v31  ;;  %v14001_v31 = vld [vmem:[#allocation20_spill] sm:$0xff]  ;;  %v4249_v38 = vsel %vm14003_vm13, %v4247_v44, %v4248_v14  ;;  %v4250_v3 = vrot.slane %v10891_v2, 1  ;;  %vm14014_vm13 = vmmov %vm14005_vm5 }
 0x57f   :  { %v4302_v57 = vpop.permute.xlu1 %4301  ;;  %7113 = vmatmul.mubr.msk.bf16.gmra.mrb[16].mxu1 %vm5297_vm12, %v5223_v49  ;;  %v3960_v49 = vshll.u32 %v10891_v2, 16 }
 0x580   :  { %v4090_v8 = vpop.permute.xlu0 %4089 }
 0x581   :  { %4725 = vrot.lane.b32.xlu1 %v4243_v13, %s7241_s25  ;;  %v4776_v34 = vsel %vm14000_vm10, %v13999_v7, %v4090_v8  ;;  %v3695_v8 = vsel %vm7294_vm2, %v3510_v26, 0  ;;  %vm14010_vm10 = vmmov %vm14006_vm0 }
 0x582   :  { %4603 = vrot.lane.b32.xlu0 %v10824_v46, %s7239_s4  ;;  %v4839_v56 = vsel %vm4813_vm14, %v4776_v34, %v4302_v57  ;;  %v3518_v34 = vshll.u32 %v14004_v18, 16 }
 0x583   :  { %v4366_v24 = vpop.permute.xlu1 %4365 }
 0x584   :  { %v4092_v25 = vpop.permute.xlu0 %4091  ;;  %v4902_v12 = vsel %vm4876_vm15, %v4839_v56, %v4366_v24  ;;  %v3962_v24 = vrot.slane %v3960_v49, 1 }
 0x585   :  { %4727 = vrot.lane.b32.xlu1 %v4246_v51, %s7241_s25  ;;  %v4778_v41 = vsel %vm13957_vm3, %v14001_v31, %v4092_v25  ;;  %v3515_v25 = vshrl.u32 %v14004_v18, 16 }
 0x586   :  { %4665 = vrot.lane.b32.xlu0 %v3944_v58, %s7243_s28 }
 0x587   :  { %v4454_v53 = vpop.permute.xlu1 %4453  ;;  %v3517_v63 = vrot.slane %v3515_v25, 7 }
 0x588   :  { %v4304_v43 = vpop.permute.xlu0 %4303  ;;  %v4967_v16 = vsel %vm4941_vm9, %v4902_v12, %v4454_v53  ;;  %v3965_v53 = vshll.u32 %v3695_v8, 16  ;;  %v3522_v12 = vshrl.u32 %v14007_v36, 16 }
 0x589   :  { %4315 = vrot.lane.b32.xlu1 %v4243_v13, %s7237_s2  ;;  %v4841_v35 = vsel %vm4813_vm14, %v4778_v41, %v4304_v43  ;;  %v3956_v13 = vsel %vm14002_vm8, %v3951_v45, %v3955_v54  ;;  %v4251_v43 = vrot.slane %v3695_v8, 1  ;;  %v3525_v45 = vshll.u32 %v14007_v36, 16  ;;  %vm14012_vm8 = vmmov %vm14005_vm5 }
 0x58a   :  { %4103 = vrot.lane.b32.xlu0 %v3932_v33, %s7235_s26  ;;  %v3967_v61 = vrot.slane %v3965_v53, 1 }
 0x58b   :  { %v4526_v32 = vpop.permute.xlu1 %4525 }
 0x58c   :  { %v4368_v15 = vpop.permute.xlu0 %4367  ;;  %v5032_v19 = vsel %vm5006_vm1, %v4967_v16, %v4526_v32  ;;  %v14008_v16 = vld [vmem:[#allocation17_spill] sm:$0xff] }
 0x58d   :  { %4381 = vrot.lane.b32.xlu1 %v10824_v46, %s7238_s3  ;;  %v4904_v17 = vsel %vm4876_vm15, %v4841_v35, %v4368_v15  ;;  %v4252_v15 = vsel %vm14005_vm5, %v4250_v3, %v4251_v43  ;;  %vm14015_vm5 = vmmov %vm14006_vm0 }
 0x58e   :  { %4105 = vrot.lane.b32.xlu0 %v3944_v58, %s7235_s26 }
 0x58f   :  { %v4590_v9 = vpop.permute.xlu1 %4589 }
 0x590   :  { %v4456_v5 = vpop.permute.xlu0 %4455  ;;  %v5097_v33 = vsel %vm5071_vm7, %v5032_v19, %v4590_v9  ;;  %v3524_v19 = vrot.slane %v3522_v12, 7 }
 0x591   :  { %4469 = vrot.lane.b32.xlu1 %v3944_v58, %s7242_s27  ;;  %v4969_v57 = vsel %vm4941_vm9, %v4904_v17, %v4456_v5  ;;  %v3958_v58 = vshrl.u32 %v10891_v2, 16  ;;  %v3520_v5 = vor.u32 %v3518_v34, %v3517_v63 }
 0x592   :  { %4317 = vrot.lane.b32.xlu0 %v4246_v51, %s7237_s2  ;;  %v3697_v53 = vsel %vm7294_vm2, %v3524_v19, 0 }
 0x593   :  { %v4652_v40 = vpop.permute.xlu1 %4651  ;;  %v3963_v32 = vor.u32 %v3962_v24, %v3958_v58  ;;  %v10931_v56 = vsel %vm7294_vm2, 0, %v3520_v5  ;;  %v14011_v24 = vld [vmem:[#allocation9_spill] sm:$0xff]  ;;  %v4257_v36 = vrot.slane %v3697_v53, 1 }
 0x594   :  { %v4528_v11 = vpop.permute.xlu0 %4527  ;;  %v5161_v50 = vsel %vm5135_vm4, %v5097_v33, %v4652_v40  ;;  %v3972_v1 = vshll.u32 %v10931_v56, 16  ;;  %v3696_v33 = vsel %vm7294_vm2, %v3517_v63, 0  ;;  %v3970_v35 = vshrl.u32 %v10931_v56, 16 }
 0x595   :  { %4541 = vrot.lane.b32.xlu1 %v4246_v51, %s7240_s22  ;;  %v5034_v42 = vsel %vm5006_vm1, %v4969_v57, %v4528_v11  ;;  %v3968_v9 = vsel %vm14006_vm0, %v3963_v32, %v3967_v61  ;;  %v4254_v25 = vrot.slane %v3696_v33, 1  ;;  %vm14017_vm0 = vmmov %vm13957_vm3 }
 0x596   :  { %4383 = vrot.lane.b32.xlu0 %v10865_v4, %s7238_s3 }
 0x597   :  { %v4714_v62 = vpop.permute.xlu1 %4713 }
 0x598   :  { %v5225_v27 = vsel %vm5199_vm11, %v5161_v50, %v4714_v62  ;;  %v4592_v39 = vpop.permute.xlu0 %4591  ;;  %v3974_v62 = vrot.slane %v3972_v1, 1 }
 0x599   :  { %4605 = vrot.lane.b32.xlu1 %v10865_v4, %s7239_s4  ;;  %7116 = vmatprep.mubr.msk.bf16.mxu1 %vm5297_vm12, %v5225_v27  ;;  %v5099_v47 = vsel %vm5071_vm7, %v5034_v42, %v4592_v39  ;;  %v3527_v27 = vor.u32 %v3525_v45, %v3524_v19  ;;  %v3977_v39 = vshll.u32 %v3696_v33, 16 }
 0x59a   :  { %4471 = vrot.lane.b32.xlu0 %v3956_v13, %s7242_s27  ;;  %v3975_v49 = vor.u32 %v3974_v62, %v3970_v35 }
 0x59b   :  { %v4716_v37 = vpop.permute.xlu1 %4715  ;;  %v10957_v42 = vsel %vm7294_vm2, 0, %v3527_v27 }
 0x59c   :  { %v4654_v48 = vpop.permute.xlu0 %4653  ;;  %v4256_v34 = vrot.slane %v10957_v42, 1 }
 0x59d   :  { %4667 = vrot.lane.b32.xlu1 %v3956_v13, %s7243_s28  ;;  %v5163_v21 = vsel %vm5135_vm4, %v5099_v47, %v4654_v48  ;;  %v3979_v47 = vrot.slane %v3977_v39, 1 }
 0x59e   :  { %4543 = vrot.lane.b32.xlu0 %v4249_v38, %s7240_s22  ;;  %v5227_v0 = vsel %vm5199_vm11, %v5163_v21, %v4716_v37  ;;  %v4253_v21 = vrot.slane %v10931_v56, 1 }
 0x59f   :  { %v4306_v51 = vpop.permute.xlu1 %4305  ;;  %7117 = vmatmul.mubr.msk.bf16.gmra.mrb[20].mxu1 %vm5297_vm12, %v5227_v0  ;;  %v3980_v8 = vsel %vm14010_vm10, %v3975_v49, %v3979_v47  ;;  %vm14019_vm10 = vmmov %vm14012_vm8 }
 0x5a0   :  { %v4094_v60 = vpop.permute.xlu0 %4093  ;;  %v4255_v43 = vsel %vm14012_vm8, %v4253_v21, %v4254_v25 }
 0x5a1   :  { %4729 = vrot.lane.b32.xlu1 %v4249_v38, %s7241_s25  ;;  %v4780_v55 = vsel %vm14009_vm6, %v14008_v16, %v4094_v60  ;;  %v4258_v16 = vsel %vm14014_vm13, %v4256_v34, %v4257_v36  ;;  %vm14018_vm6 = vmmov %vm14015_vm5 }
 0x5a2   :  { %4607 = vrot.lane.b32.xlu0 %v10891_v2, %s7239_s4  ;;  %v4843_v50 = vsel %vm4813_vm14, %v4780_v55, %v4306_v51  ;;  %vm14023_vm13 = vmmov %vm14017_vm0 }
 0x5a3   :  { %v4370_v23 = vpop.permute.xlu1 %4369 }
 0x5a4   :  { %v4096_v7 = vpop.permute.xlu0 %4095  ;;  %v4906_v31 = vsel %vm4876_vm15, %v4843_v50, %v4370_v23 }
 0x5a5   :  { %4731 = vrot.lane.b32.xlu1 %v4252_v15, %s7241_s25  ;;  %v4782_v0 = vsel %vm13957_vm3, %v14011_v24, %v4096_v7  ;;  %vm14021_vm3 = vmmov %vm14012_vm8 }
 0x5a6   :  { %4669 = vrot.lane.b32.xlu0 %v3968_v9, %s7243_s28  ;;  %vm14022_vm8 = vmmov %vm14015_vm5 }
 0x5a7   :  { %v4458_v26 = vpop.permute.xlu1 %4457 }
 0x5a8   :  { %v4308_v22 = vpop.permute.xlu0 %4307  ;;  %v4971_v54 = vsel %vm4941_vm9, %v4906_v31, %v4458_v26  ;;  %v3989_v26 = vshll.u32 %v3697_v53, 16 }
 0x5a9   :  { %4319 = vrot.lane.b32.xlu1 %v4249_v38, %s7237_s2  ;;  %v3984_v38 = vshll.u32 %v10957_v42, 16  ;;  %v4845_v18 = vsel %vm4813_vm14, %v4782_v0, %v4308_v22 }
 0x5aa   :  { %4107 = vrot.lane.b32.xlu0 %v3956_v13, %s7235_s26  ;;  %v3991_v55 = vrot.slane %v3989_v26, 1 }
 0x5ab   :  { %v4530_v29 = vpop.permute.xlu1 %4529  ;;  %v3986_v32 = vrot.slane %v3984_v38, 1 }
 0x5ac   :  { %v4372_v40 = vpop.permute.xlu0 %4371  ;;  %v5036_v17 = vsel %vm5006_vm1, %v4971_v54, %v4530_v29 }
 0x5ad   :  { %4385 = vrot.lane.b32.xlu1 %v10891_v2, %s7238_s3  ;;  %v4908_v3 = vsel %vm4876_vm15, %v4845_v18, %v4372_v40 }
 0x5ae   :  { %4109 = vrot.lane.b32.xlu0 %v3968_v9, %s7235_s26 }
 0x5af   :  { %v4594_v59 = vpop.permute.xlu1 %4593 }
 0x5b0   :  { %v4460_v11 = vpop.permute.xlu0 %4459  ;;  %v5101_v44 = vsel %vm5071_vm7, %v5036_v17, %v4594_v59 }
 0x5b1   :  { %4473 = vrot.lane.b32.xlu1 %v3968_v9, %s7242_s27  ;;  %v4973_v60 = vsel %vm4941_vm9, %v4908_v3, %v4460_v11  ;;  %v3982_v9 = vshrl.u32 %v10957_v42, 16 }
 0x5b2   :  { %4321 = vrot.lane.b32.xlu0 %v4252_v15, %s7237_s2 }
 0x5b3   :  { %v4656_v41 = vpop.permute.xlu1 %4655  ;;  %v3987_v12 = vor.u32 %v3986_v32, %v3982_v9 }
 0x5b4   :  { %v4532_v13 = vpop.permute.xlu0 %4531  ;;  %v5165_v57 = vsel %vm5135_vm4, %v5101_v44, %v4656_v41  ;;  %v14016_v41 = vld [vmem:[#allocation41_spill] sm:$0xff] }
 0x5b5   :  { %4545 = vrot.lane.b32.xlu1 %v4252_v15, %s7240_s22  ;;  %v5038_v23 = vsel %vm5006_vm1, %v4973_v60, %v4532_v13  ;;  %v14013_v15 = vld [vmem:[#allocation40_spill] sm:$0xff]  ;;  %v3992_v11 = vsel %vm14015_vm5, %v3987_v12, %v3991_v55  ;;  %v3536_v27 = vshrl.u32 %v14016_v41, 16  ;;  %vm14025_vm5 = vmmov %vm14017_vm0 }
 0x5b6   :  { %4387 = vrot.lane.b32.xlu0 %v10931_v56, %s7238_s3  ;;  %v3529_v61 = vshrl.u32 %v14013_v15, 16  ;;  %v3532_v19 = vshll.u32 %v14013_v15, 16 }
 0x5b7   :  { %v4718_v37 = vpop.permute.xlu1 %4717  ;;  %v3538_v13 = vrot.slane %v3536_v27, 7 }
 0x5b8   :  { %v5229_v14 = vsel %vm5199_vm11, %v5165_v57, %v4718_v37  ;;  %v10960_v48 = vpop.permute.xlu0 %4595  ;;  %v3531_v1 = vrot.slane %v3529_v61, 7 }
 0x5b9   :  { %4609 = vrot.lane.b32.xlu1 %v10931_v56, %s7239_s4  ;;  %7120 = vmatprep.mubr.msk.bf16.mxu1 %vm5297_vm12, %v5229_v14  ;;  %v5103_v7 = vsel %vm5071_vm7, %v5038_v23, %v10960_v48  ;;  %v3539_v14 = vshll.u32 %v14016_v41, 16 }
 0x5ba   :  { %4475 = vrot.lane.b32.xlu0 %v3980_v8, %s7242_s27  ;;  %v3534_v45 = vor.u32 %v3532_v19, %v3531_v1  ;;  %v3698_v37 = vsel %vm7294_vm2, %v3531_v1, 0 }
 0x5bb   :  { %v10971_v51 = vpop.permute.xlu1 %4097  ;;  %v3541_v38 = vor.u32 %v3539_v14, %v3538_v13  ;;  %v4001_v25 = vshll.u32 %v3698_v37, 16  ;;  %v4260_v36 = vrot.slane %v3698_v37, 1 }
 0x5bc   :  { %v10975_v58 = vpop.permute.xlu0 %4657  ;;  %v11008_v31 = vsel %vm7294_vm2, 0, %v3534_v45  ;;  %v4784_v24 = vsel %vm14017_vm0, %v10543_v52, %v10971_v51  ;;  %vm14026_vm0 = vmmov %vm14018_vm6 }
 0x5bd   :  { %4671 = vrot.lane.b32.xlu1 %v3980_v8, %s7243_s28  ;;  %v5167_v5 = vsel %vm5135_vm4, %v5103_v7, %v10975_v58  ;;  %v3996_v35 = vshll.u32 %v11008_v31, 16  ;;  %v3994_v18 = vshrl.u32 %v11008_v31, 16  ;;  %v11040_v51 = vsel %vm7294_vm2, 0, %v3541_v38 }
 0x5be   :  { %4547 = vrot.lane.b32.xlu0 %v4255_v43, %s7240_s22  ;;  %v4259_v9 = vrot.slane %v11008_v31, 1  ;;  %v4008_v26 = vshll.u32 %v11040_v51, 16 }
 0x5bf   :  { %v4374_v63 = vpop.permute.xlu1 %4373 }
 0x5c0   :  { %v10991_v22 = vpop.permute.xlu0 %4719  ;;  %v4910_v39 = vsel %vm4876_vm15, %v10582_v28, %v4374_v63  ;;  %v4003_v63 = vrot.slane %v4001_v25, 1  ;;  %v4261_v1 = vsel %vm14019_vm10, %v4259_v9, %v4260_v36  ;;  %vm14029_vm10 = vmmov %vm14021_vm3 }
 0x5c1   :  { %4733 = vrot.lane.b32.xlu1 %v4255_v43, %s7241_s25  ;;  %v5231_v29 = vsel %vm5199_vm11, %v5167_v5, %v10991_v22 }
 0x5c2   :  { %4611 = vrot.lane.b32.xlu0 %v10957_v42, %s7239_s4  ;;  %7121 = vmatmul.mubr.msk.bf16.gmra.mrb[24].mxu1 %vm5297_vm12, %v5231_v29 }
 0x5c3   :  { %v4462_v40 = vpop.permute.xlu1 %4461 }
 0x5c4   :  { %v4310_v59 = vpop.permute.xlu0 %4309  ;;  %v4975_v44 = vsel %vm4941_vm9, %v4910_v39, %v4462_v40  ;;  %v3699_v40 = vsel %vm7294_vm2, %v3538_v13, 0 }
 0x5c5   :  { %4735 = vrot.lane.b32.xlu1 %v4258_v16, %s7241_s25  ;;  %v4847_v3 = vsel %vm4813_vm14, %v4784_v24, %v4310_v59  ;;  %v14020_v59 = vld [vmem:[#allocation42_spill] sm:$0xff]  ;;  %v4013_v45 = vshll.u32 %v3699_v40, 16 }
 0x5c6   :  { %4673 = vrot.lane.b32.xlu0 %v3992_v11, %s7243_s28  ;;  %v3543_v19 = vshrl.u32 %v14020_v59, 16  ;;  %v3546_v13 = vshll.u32 %v14020_v59, 16 }
 0x5c7   :  { %v4534_v33 = vpop.permute.xlu1 %4533  ;;  %v4015_v39 = vrot.slane %v4013_v45, 1 }
 0x5c8   :  { %v4376_v50 = vpop.permute.xlu0 %4375  ;;  %v5040_v49 = vsel %vm5006_vm1, %v4975_v44, %v4534_v33  ;;  %v4006_v33 = vshrl.u32 %v11040_v51, 16 }
 0x5c9   :  { %4323 = vrot.lane.b32.xlu1 %v4255_v43, %s7237_s2  ;;  %v4912_v60 = vsel %vm4876_vm15, %v4847_v3, %v4376_v50 }
 0x5ca   :  { %4111 = vrot.lane.b32.xlu0 %v3980_v8, %s7235_s26  ;;  %v3998_v8 = vrot.slane %v3996_v35, 1 }
 0x5cb   :  { %v4598_v62 = vpop.permute.xlu1 %4597 }
 0x5cc   :  { %v4464_v54 = vpop.permute.xlu0 %4463  ;;  %v5105_v47 = vsel %vm5071_vm7, %v5040_v49, %v4598_v62  ;;  %v3999_v43 = vor.u32 %v3998_v8, %v3994_v18  ;;  %v4263_v62 = vrot.slane %v3699_v40, 1 }
 0x5cd   :  { %4389 = vrot.lane.b32.xlu1 %v10957_v42, %s7238_s3  ;;  %v4977_v32 = vsel %vm4941_vm9, %v4912_v60, %v4464_v54  ;;  %v3545_v54 = vrot.slane %v3543_v19, 7 }
 0x5ce   :  { %4113 = vrot.lane.b32.xlu0 %v3992_v11, %s7235_s26  ;;  %v4004_v34 = vsel %vm14018_vm6, %v3999_v43, %v4003_v63  ;;  %vm14027_vm6 = vmmov %vm14021_vm3 }
 0x5cf   :  { %v4660_v17 = vpop.permute.xlu1 %4659  ;;  %v3700_v43 = vsel %vm7294_vm2, %v3545_v54, 0 }
 0x5d0   :  { %v4536_v57 = vpop.permute.xlu0 %4535  ;;  %v5169_v28 = vsel %vm5135_vm4, %v5105_v47, %v4660_v17 }
 0x5d1   :  { %4477 = vrot.lane.b32.xlu1 %v3992_v11, %s7242_s27  ;;  %v5042_v23 = vsel %vm5006_vm1, %v4977_v32, %v4536_v57  ;;  %v4262_v11 = vrot.slane %v11040_v51, 1  ;;  %v3548_v57 = vor.u32 %v3546_v13, %v3545_v54 }
 0x5d2   :  { %4325 = vrot.lane.b32.xlu0 %v4258_v16, %s7237_s2 }
 0x5d3   :  { %v4722_v21 = vpop.permute.xlu1 %4721  ;;  %v4264_v35 = vsel %vm14021_vm3, %v4262_v11, %v4263_v62  ;;  %v11075_v8 = vsel %vm7294_vm2, 0, %v3548_v57  ;;  %vm14030_vm3 = vmmov %vm14026_vm0 }
 0x5d4   :  { %v5233_v0 = vsel %vm5199_vm11, %v5169_v28, %v4722_v21  ;;  %v4600_v53 = vpop.permute.xlu0 %4599  ;;  %v14024_v28 = vld [vmem:[#allocation43_spill] sm:$0xff]  ;;  %v4018_v9 = vshrl.u32 %v11075_v8, 16  ;;  %v4265_v45 = vrot.slane %v11075_v8, 1 }
 0x5d5   :  { %4549 = vrot.lane.b32.xlu1 %v4258_v16, %s7240_s22  ;;  %7124 = vmatprep.mubr.msk.bf16.mxu1 %vm5297_vm12, %v5233_v0  ;;  %v5107_v15 = vsel %vm5071_vm7, %v5042_v23, %v4600_v53  ;;  %v4010_v16 = vrot.slane %v4008_v26, 1  ;;  %v3550_v21 = vshrl.u32 %v14024_v28, 16  ;;  %v4020_v0 = vshll.u32 %v11075_v8, 16 }
 0x5d6   :  { %4391 = vrot.lane.b32.xlu0 %v11008_v31, %s7238_s3  ;;  %v3553_v32 = vshll.u32 %v14024_v28, 16  ;;  %v4025_v26 = vshll.u32 %v3700_v43, 16 }
 0x5d7   :  { %v4724_v52 = vpop.permute.xlu1 %4723  ;;  %v4011_v41 = vor.u32 %v4010_v16, %v4006_v33  ;;  %v3552_v25 = vrot.slane %v3550_v21, 7  ;;  %v4022_v23 = vrot.slane %v4020_v0, 1 }
 0x5d8   :  { %v4662_v61 = vpop.permute.xlu0 %4661 }
 0x5d9   :  { %4613 = vrot.lane.b32.xlu1 %v11008_v31, %s7239_s4  ;;  %v5171_v7 = vsel %vm5135_vm4, %v5107_v15, %v4662_v61  ;;  %v4016_v44 = vsel %vm14022_vm8, %v4011_v41, %v4015_v39  ;;  %v3555_v61 = vor.u32 %v3553_v32, %v3552_v25  ;;  %vm14031_vm8 = vmmov %vm14025_vm5 }
 0x5da   :  { %4479 = vrot.lane.b32.xlu0 %v4004_v34, %s7242_s27  ;;  %v5235_v5 = vsel %vm5199_vm11, %v5171_v7, %v4724_v52 }
 0x5db   :  { %v4312_v29 = vpop.permute.xlu1 %4311  ;;  %7125 = vmatmul.mubr.msk.bf16.gmra.mrb[28].mxu1 %vm5297_vm12, %v5235_v5 }
 0x5dc   :  { %v4100_v12 = vpop.permute.xlu0 %4099 }
 0x5dd   :  { %4675 = vrot.lane.b32.xlu1 %v4004_v34, %s7243_s28  ;;  %v4786_v14 = vsel %vm14023_vm13, %v10619_v6, %v4100_v12  ;;  %v4023_v12 = vor.u32 %v4022_v23, %v4018_v9  ;;  %vm14033_vm13 = vmmov %vm14025_vm5 }
 0x5de   :  { %4551 = vrot.lane.b32.xlu0 %v4261_v1, %s7240_s22  ;;  %v4849_v24 = vsel %vm4813_vm14, %v4786_v14, %v4312_v29 }
 0x5df   :  { %v4378_v55 = vpop.permute.xlu1 %4377 }
 0x5e0   :  { %v4102_v50 = vpop.permute.xlu0 %4101  ;;  %v4914_v18 = vsel %vm4876_vm15, %v4849_v24, %v4378_v55  ;;  %v4027_v55 = vrot.slane %v4025_v26, 1 }
 0x5e1   :  { %4737 = vrot.lane.b32.xlu1 %v4261_v1, %s7241_s25  ;;  %v4788_v7 = vsel %vm14025_vm5, %v10687_v30, %v4102_v50  ;;  %vm14034_vm5 = vmmov %vm14026_vm0 }
 0x5e2   :  { %4615 = vrot.lane.b32.xlu0 %v11040_v51, %s7239_s4  ;;  %v4028_v33 = vsel %vm14026_vm0, %v4023_v12, %v4027_v55  ;;  %vm14035_vm0 = vmmov %vm14027_vm6 }
 0x5e3   :  { %v4466_v27 = vpop.permute.xlu1 %4465 }
 0x5e4   :  { %v4314_v17 = vpop.permute.xlu0 %4313  ;;  %v4979_v3 = vsel %vm4941_vm9, %v4914_v18, %v4466_v27  ;;  %v4266_v27 = vrot.slane %v3700_v43, 1 }
 0x5e5   :  { %4739 = vrot.lane.b32.xlu1 %v4264_v35, %s7241_s25  ;;  %v4851_v5 = vsel %vm4813_vm14, %v4788_v7, %v4314_v17 }
 0x5e6   :  { %4677 = vrot.lane.b32.xlu0 %v4016_v44, %s7243_s28  ;;  %v4267_v39 = vsel %vm14027_vm6, %v4265_v45, %v4266_v27  ;;  %vm14037_vm6 = vmmov %vm14035_vm0 }
 0x5e7   :  { %v4538_v49 = vpop.permute.xlu1 %4537 }
 0x5e8   :  { %v4380_v37 = vpop.permute.xlu0 %4379  ;;  %v5044_v53 = vsel %vm5006_vm1, %v4979_v3, %v4538_v49 }
 0x5e9   :  { %4327 = vrot.lane.b32.xlu1 %v4261_v1, %s7237_s2  ;;  %v4916_v36 = vsel %vm4876_vm15, %v4851_v5, %v4380_v37  ;;  %v11106_v1 = vsel %vm7294_vm2, 0, %v3555_v61 }
 0x5ea   :  { %4115 = vrot.lane.b32.xlu0 %v4004_v34, %s7235_s26  ;;  %v4032_v50 = vshll.u32 %v11106_v1, 16  ;;  %v4268_v57 = vrot.slane %v11106_v1, 1  ;;  %v4030_v37 = vshrl.u32 %v11106_v1, 16 }
 0x5eb   :  { %v4602_v47 = vpop.permute.xlu1 %4601 }
 0x5ec   :  { %v4468_v38 = vpop.permute.xlu0 %4467  ;;  %v5109_v52 = vsel %vm5071_vm7, %v5044_v53, %v4602_v47  ;;  %v4034_v17 = vrot.slane %v4032_v50, 1 }
 0x5ed   :  { %4393 = vrot.lane.b32.xlu1 %v11040_v51, %s7238_s3  ;;  %v4981_v40 = vsel %vm4941_vm9, %v4916_v36, %v4468_v38 }
 0x5ee   :  { %4117 = vrot.lane.b32.xlu0 %v4016_v44, %s7235_s26  ;;  %v4035_v21 = vor.u32 %v4034_v17, %v4030_v37 }
 0x5ef   :  { %v4664_v6 = vpop.permute.xlu1 %4663 }
 0x5f0   :  { %v4540_v60 = vpop.permute.xlu0 %4539  ;;  %v5173_v63 = vsel %vm5135_vm4, %v5109_v52, %v4664_v6 }
 0x5f1   :  { %4481 = vrot.lane.b32.xlu1 %v4016_v44, %s7242_s27  ;;  %v5046_v16 = vsel %vm5006_vm1, %v4981_v40, %v4540_v60  ;;  %v14028_v44 = vld [vmem:[#allocation14_spill] sm:$0xff] }
 0x5f2   :  { %4329 = vrot.lane.b32.xlu0 %v4264_v35, %s7237_s2  ;;  %v3557_v49 = vshrl.u32 %v14028_v44, 16 }
 0x5f3   :  { %v4726_v15 = vpop.permute.xlu1 %4725 }
 0x5f4   :  { %v5237_v34 = vsel %vm5199_vm11, %v5173_v63, %v4726_v15  ;;  %v4604_v29 = vpop.permute.xlu0 %4603  ;;  %v3559_v24 = vrot.slane %v3557_v49, 7  ;;  %v14032_v63 = vld [vmem:[#allocation32_spill] sm:$0xff] }
 0x5f5   :  { %4553 = vrot.lane.b32.xlu1 %v4264_v35, %s7240_s22  ;;  %7128 = vmatprep.mubr.msk.bf16.mxu1 %vm5297_vm12, %v5237_v34  ;;  %v5111_v59 = vsel %vm5071_vm7, %v5046_v16, %v4604_v29  ;;  %v3701_v35 = vsel %vm7294_vm2, %v3552_v25, 0  ;;  %v3560_v25 = vshll.u32 %v14028_v44, 16  ;;  %v3564_v15 = vshrl.u32 %v14032_v63, 16 }
 0x5f6   :  { %4395 = vrot.lane.b32.xlu0 %v11075_v8, %s7238_s3  ;;  %v4037_v14 = vshll.u32 %v3701_v35, 16  ;;  %v4269_v28 = vrot.slane %v3701_v35, 1  ;;  %v3702_v12 = vsel %vm7294_vm2, %v3559_v24, 0  ;;  %v3567_v40 = vshll.u32 %v14032_v63, 16 }
 0x5f7   :  { %v4728_v30 = vpop.permute.xlu1 %4727  ;;  %v3562_v60 = vor.u32 %v3560_v25, %v3559_v24  ;;  %v3566_v26 = vrot.slane %v3564_v15, 7  ;;  %v4049_v50 = vshll.u32 %v3702_v12, 16 }
 0x5f8   :  { %v4666_v19 = vpop.permute.xlu0 %4665  ;;  %v4270_v0 = vsel %vm14029_vm10, %v4268_v57, %v4269_v28  ;;  %v4039_v18 = vrot.slane %v4037_v14, 1  ;;  %vm14038_vm10 = vmmov %vm14030_vm3 }
 0x5f9   :  { %4617 = vrot.lane.b32.xlu1 %v11075_v8, %s7239_s4  ;;  %v5175_v11 = vsel %vm5135_vm4, %v5111_v59, %v4666_v19  ;;  %v11141_v23 = vsel %vm7294_vm2, 0, %v3562_v60  ;;  %v3569_v19 = vor.u32 %v3567_v40, %v3566_v26 }
 0x5fa   :  { %4483 = vrot.lane.b32.xlu0 %v4028_v33, %s7242_s27  ;;  %v5239_v62 = vsel %vm5199_vm11, %v5175_v11, %v4728_v30  ;;  %v4040_v3 = vsel %vm14030_vm3, %v4035_v21, %v4039_v18  ;;  %v4044_v34 = vshll.u32 %v11141_v23, 16  ;;  %v4042_v45 = vshrl.u32 %v11141_v23, 16  ;;  %vm14039_vm3 = vmmov %vm14031_vm8 }
 0x5fb   :  { %v4316_v41 = vpop.permute.xlu1 %4315  ;;  %7129 = vmatmul.mubr.msk.bf16.gmra.mrb[32].mxu1 %vm5297_vm12, %v5239_v62  ;;  %v4271_v14 = vrot.slane %v11141_v23, 1 }
 0x5fc   :  { %v4104_v54 = vpop.permute.xlu0 %4103  ;;  %v4046_v16 = vrot.slane %v4044_v34, 1 }
 0x5fd   :  { %4679 = vrot.lane.b32.xlu1 %v4028_v33, %s7243_s28  ;;  %v4790_v32 = vsel %vm14031_vm8, %v10781_v20, %v4104_v54  ;;  %vm14040_vm8 = vmmov %vm14039_vm3 }
 0x5fe   :  { %4555 = vrot.lane.b32.xlu0 %v4267_v39, %s7240_s22  ;;  %v4853_v7 = vsel %vm4813_vm14, %v4790_v32, %v4316_v41  ;;  %v4047_v54 = vor.u32 %v4046_v16, %v4042_v45 }
 0x5ff   :  { %v4382_v13 = vpop.permute.xlu1 %4381 }
 0x600   :  { %v4106_v47 = vpop.permute.xlu0 %4105  ;;  %v4918_v9 = vsel %vm4876_vm15, %v4853_v7, %v4382_v13  ;;  %v4051_v13 = vrot.slane %v4049_v50, 1 }
 0x601   :  { %4741 = vrot.lane.b32.xlu1 %v4267_v39, %s7241_s25  ;;  %v4792_v11 = vsel %vm14033_vm13, %v10824_v46, %v4106_v47  ;;  %vm14042_vm13 = vmmov %vm14035_vm0 }
 0x602   :  { %4619 = vrot.lane.b32.xlu0 %v11106_v1, %s7239_s4  ;;  %v4052_v37 = vsel %vm14034_vm5, %v4047_v54, %v4051_v13 }
 0x603   :  { %v4470_v38 = vpop.permute.xlu1 %4469 }
 0x604   :  { %v4318_v6 = vpop.permute.xlu0 %4317  ;;  %v4983_v5 = vsel %vm4941_vm9, %v4918_v9, %v4470_v38  ;;  %v4272_v38 = vrot.slane %v3702_v12, 1 }
 0x605   :  { %4743 = vrot.lane.b32.xlu1 %v4270_v0, %s7241_s25  ;;  %v4855_v62 = vsel %vm4813_vm14, %v4792_v11, %v4318_v6 }
 0x606   :  { %4681 = vrot.lane.b32.xlu0 %v4040_v3, %s7243_s28  ;;  %v4273_v18 = vsel %vm14035_vm0, %v4271_v14, %v4272_v38  ;;  %vm14044_vm0 = vmmov %vm14039_vm3 }
 0x607   :  { %v4542_v53 = vpop.permute.xlu1 %4541 }
 0x608   :  { %v4384_v43 = vpop.permute.xlu0 %4383  ;;  %v5048_v29 = vsel %vm5006_vm1, %v4983_v5, %v4542_v53 }
 0x609   :  { %4331 = vrot.lane.b32.xlu1 %v4267_v39, %s7237_s2  ;;  %v4920_v27 = vsel %vm4876_vm15, %v4855_v62, %v4384_v43  ;;  %v11172_v39 = vsel %vm7294_vm2, 0, %v3569_v19 }
 0x60a   :  { %4119 = vrot.lane.b32.xlu0 %v4028_v33, %s7235_s26  ;;  %v4056_v47 = vshll.u32 %v11172_v39, 16  ;;  %v4274_v60 = vrot.slane %v11172_v39, 1  ;;  %v4054_v43 = vshrl.u32 %v11172_v39, 16 }
 0x60b   :  { %v4606_v52 = vpop.permute.xlu1 %4605 }
 0x60c   :  { %v4472_v61 = vpop.permute.xlu0 %4471  ;;  %v5113_v30 = vsel %vm5071_vm7, %v5048_v29, %v4606_v52  ;;  %v4058_v6 = vrot.slane %v4056_v47, 1 }
 0x60d   :  { %4397 = vrot.lane.b32.xlu1 %v11106_v1, %s7238_s3  ;;  %v4985_v35 = vsel %vm4941_vm9, %v4920_v27, %v4472_v61 }
 0x60e   :  { %4121 = vrot.lane.b32.xlu0 %v4040_v3, %s7235_s26  ;;  %v4059_v61 = vor.u32 %v4058_v6, %v4054_v43 }
 0x60f   :  { %v4668_v20 = vpop.permute.xlu1 %4667 }
 0x610   :  { %v4544_v36 = vpop.permute.xlu0 %4543  ;;  %v5177_v55 = vsel %vm5135_vm4, %v5113_v30, %v4668_v20 }
 0x611   :  { %4485 = vrot.lane.b32.xlu1 %v4040_v3, %s7242_s27  ;;  %v5050_v17 = vsel %vm5006_vm1, %v4985_v35, %v4544_v36  ;;  %v14036_v3 = vld [vmem:[#allocation21_spill] sm:$0xff] }
 0x612   :  { %4333 = vrot.lane.b32.xlu0 %v4270_v0, %s7237_s2  ;;  %v3571_v53 = vshrl.u32 %v14036_v3, 16  ;;  %v3574_v12 = vshll.u32 %v14036_v3, 16 }
 0x613   :  { %v4730_v59 = vpop.permute.xlu1 %4729 }
 0x614   :  { %v5241_v33 = vsel %vm5199_vm11, %v5177_v55, %v4730_v59  ;;  %v4608_v41 = vpop.permute.xlu0 %4607  ;;  %v3573_v9 = vrot.slane %v3571_v53, 7 }
 0x615   :  { %4557 = vrot.lane.b32.xlu1 %v4270_v0, %s7240_s22  ;;  %7132 = vmatprep.mubr.msk.bf16.mxu1 %vm5297_vm12, %v5241_v33  ;;  %v5115_v44 = vsel %vm5071_vm7, %v5050_v17, %v4608_v41  ;;  %v3703_v0 = vsel %vm7294_vm2, %v3566_v26, 0 }
 0x616   :  { %4399 = vrot.lane.b32.xlu0 %v11141_v23, %s7238_s3  ;;  %v4061_v32 = vshll.u32 %v3703_v0, 16  ;;  %v4275_v15 = vrot.slane %v3703_v0, 1  ;;  %v3576_v16 = vor.u32 %v3574_v12, %v3573_v9 }
 0x617   :  { %v4732_v46 = vpop.permute.xlu1 %4731 }
 0x618   :  { %v4670_v49 = vpop.permute.xlu0 %4669  ;;  %v4276_v26 = vsel %vm14037_vm6, %v4274_v60, %v4275_v15  ;;  %v4063_v5 = vrot.slane %v4061_v32, 1  ;;  %v3672_v45 = vsel %vm7294_vm2, 0, %v3576_v16  ;;  %vm14045_vm6 = vmmov %vm14044_vm0 }
 0x619   :  { %4621 = vrot.lane.b32.xlu1 %v11141_v23, %s7239_s4  ;;  %v5179_v57 = vsel %vm5135_vm4, %v5115_v44, %v4670_v49  ;;  %v4420_v54 = vshll.u32 %v3672_v45, 16  ;;  %v3704_v44 = vsel %vm7294_vm2, %v3573_v9, 0  ;;  %v4418_v10 = vshrl.u32 %v3672_v45, 16  ;;  %vm14041_vm2 = vmmov %vm14034_vm5 }
 0x61a   :  { %4487 = vrot.lane.b32.xlu0 %v4052_v37, %s7242_s27  ;;  %v5243_v28 = vsel %vm5199_vm11, %v5179_v57, %v4732_v46  ;;  %v4064_v40 = vsel %vm14038_vm10, %v4059_v61, %v4063_v5  ;;  %v4425_v0 = vshll.u32 %v3704_v44, 16  ;;  %v4499_v5 = vrot.slane %v3704_v44, 1  ;;  %vm14043_vm5 = vmmov %vm14039_vm3 }
 0x61b   :  { %v4320_v21 = vpop.permute.xlu1 %4319  ;;  %7133 = vmatmul.mubr.msk.bf16.gmra.mrb[36].mxu1 %vm5297_vm12, %v5243_v28  ;;  %vm14046_vm10 = vmmov %vm14044_vm0 }
 0x61c   :  { %v4108_v24 = vpop.permute.xlu0 %4107  ;;  %v4427_v32 = vrot.slane %v4425_v0, 1 }
 0x61d   :  { %4683 = vrot.lane.b32.xlu1 %v4052_v37, %s7243_s28  ;;  %v4794_v19 = vsel %vm14039_vm3, %v10865_v4, %v4108_v24  ;;  %vm14047_vm3 = vmmov %vm14044_vm0 }
 0x61e   :  { %4559 = vrot.lane.b32.xlu0 %v4273_v18, %s7240_s22  ;;  %v4857_v27 = vsel %vm4813_vm14, %v4794_v19, %v4320_v21 }
 0x61f   :  { %v4386_v25 = vpop.permute.xlu1 %4385 }
 0x620   :  { %v4110_v52 = vpop.permute.xlu0 %4109  ;;  %v4922_v4 = vsel %vm4876_vm15, %v4857_v27, %v4386_v25 }
 0x621   :  { %4745 = vrot.lane.b32.xlu1 %v4273_v18, %s7241_s25  ;;  %v4796_v21 = vsel %vm14040_vm8, %v10891_v2, %v4110_v52  ;;  %v4498_v52 = vrot.slane %v3672_v45, 1  ;;  %vm14048_vm8 = vmmov %vm14044_vm0 }
 0x622   :  { %v11194_v63 = vpop.f32.mrb[64].mxu0  ;;  %4623 = vrot.lane.b32.xlu0 %v11172_v39, %s7239_s4 }
 0x623   :  { %v4474_v7 = vpop.permute.xlu1 %4473  ;;  %v11198_v34 = vpop.f32.mrb[65].mxu0  ;;  %v4500_v16 = vsel %vm14042_vm13, %v4498_v52, %v4499_v5  ;;  %vm14050_vm13 = vmmov %vm14044_vm0 }
 0x624   :  { %v11200_v20 = vpop.f32.mrb[66].mxu0  ;;  %v4322_v29 = vpop.permute.xlu0 %4321  ;;  %v4987_v46 = vsel %vm4941_vm9, %v4922_v4, %v4474_v7 }
 0x625   :  { %4747 = vrot.lane.b32.xlu1 %v4276_v26, %s7241_s25  ;;  %v11204_v36 = vpop.f32.mrb[67].mxu0 }
 0x626   :  { %4685 = vrot.lane.b32.xlu0 %v4064_v40, %s7243_s28 }
 0x627   :  { %v4546_v30 = vpop.permute.xlu1 %4545 }
 0x628   :  { %v4388_v55 = vpop.permute.xlu0 %4387  ;;  %v5052_v17 = vsel %vm5006_vm1, %v4987_v46, %v4546_v30 }
 0x629   :  { %4335 = vrot.lane.b32.xlu1 %v4273_v18, %s7237_s2  ;;  %v4859_v18 = vsel %vm4813_vm14, %v4796_v21, %v4322_v29 }
 0x62a   :  { %v11210_v59 = vpop.f32.mrb[0].mxu1  ;;  %4123 = vrot.lane.b32.xlu0 %v4052_v37, %s7235_s26  ;;  %v4422_v37 = vrot.slane %v4420_v54, 1  ;;  %v4924_v3 = vsel %vm4876_vm15, %v4859_v18, %v4388_v55 }
 0x62b   :  { %v4610_v11 = vpop.permute.xlu1 %4609  ;;  %v11215_v33 = vpop.f32.mrb[1].mxu1 }
 0x62c   :  { %v11219_v50 = vpop.f32.mrb[2].mxu1  ;;  %v4476_v62 = vpop.permute.xlu0 %4475  ;;  %v5117_v49 = vsel %vm5071_vm7, %v5052_v17, %v4610_v11  ;;  %v4423_v53 = vor.u32 %v4422_v37, %v4418_v10 }
 0x62d   :  { %4401 = vrot.lane.b32.xlu1 %v11172_v39, %s7238_s3  ;;  %v11223_v41 = vpop.f32.mrb[3].mxu1  ;;  %v4989_v2 = vsel %vm4941_vm9, %v4924_v3, %v4476_v62 }
 0x62e   :  { %4125 = vrot.lane.b32.xlu0 %v4064_v40, %s7235_s26  ;;  %v4428_v9 = vsel %vm14041_vm2, %v4423_v53, %v4427_v32  ;;  %vm14049_vm2 = vmmov %vm14044_vm0 }
 0x62f   :  { %v4672_v35 = vpop.permute.xlu1 %4671 }
 0x630   :  { %v4548_v13 = vpop.permute.xlu0 %4547  ;;  %v5181_v14 = vsel %vm5135_vm4, %v5117_v49, %v4672_v35 }
 0x631   :  { %4489 = vrot.lane.b32.xlu1 %v4064_v40, %s7242_s27  ;;  %v5054_v43 = vsel %vm5006_vm1, %v4989_v2, %v4548_v13 }
 0x632   :  { %v11234_v57 = vpop.f32.mrb[4].mxu1  ;;  %4337 = vrot.lane.b32.xlu0 %v4276_v26, %s7237_s2 }
 0x633   :  { %v4734_v47 = vpop.permute.xlu1 %4733  ;;  %v11238_v28 = vpop.f32.mrb[5].mxu1 }
 0x634   :  { %v5245_v38 = vsel %vm5199_vm11, %v5181_v14, %v4734_v47  ;;  %v11243_v24 = vpop.f32.mrb[6].mxu1  ;;  %v4612_v6 = vpop.permute.xlu0 %4611 }
 0x635   :  { %4561 = vrot.lane.b32.xlu1 %v4276_v26, %s7240_s22  ;;  %v11247_v25 = vpop.f32.mrb[7].mxu1  ;;  %7136 = vmatprep.mubr.msk.bf16.mxu1 %vm5297_vm12, %v5245_v38  ;;  %v5119_v15 = vsel %vm5071_vm7, %v5054_v43, %v4612_v6 }
 0x636   :  { %4403 = vrot.lane.b32.xlu0 %v3672_v45, %s7238_s3 }
 0x637   :  { %v4736_v60 = vpop.permute.xlu1 %4735 }
 0x638   :  { %v4674_v61 = vpop.permute.xlu0 %4673 }
 0x639   :  { %4625 = vrot.lane.b32.xlu1 %v3672_v45, %s7239_s4  ;;  %v5183_v7 = vsel %vm5135_vm4, %v5119_v15, %v4674_v61 }
 0x63a   :  { %v11258_v26 = vpop.f32.mrb[8].mxu1  ;;  %4491 = vrot.lane.b32.xlu0 %v4428_v9, %s7242_s27  ;;  %v5247_v29 = vsel %vm5199_vm11, %v5183_v7, %v4736_v60 }
 0x63b   :  { %v4324_v12 = vpop.permute.xlu1 %4323  ;;  %v11262_v40 = vpop.f32.mrb[9].mxu1  ;;  %7137 = vmatmul.mubr.msk.bf16.gmra.mrb[40].mxu1 %vm5297_vm12, %v5247_v29 }
 0x63c   :  { %v11265_v30 = vpop.f32.mrb[10].mxu1  ;;  %v4112_v55 = vpop.permute.xlu0 %4111 }
 0x63d   :  { %4749 = vrot.lane.b32.xlu1 %v4500_v16, %s7241_s25  ;;  %v11269_v19 = vpop.f32.mrb[11].mxu1  ;;  %v4798_v44 = vsel %vm14043_vm5, %v10931_v56, %v4112_v55  ;;  %vm14062_vm5 = vmmov %vm14044_vm0 }
 0x63e   :  { %4563 = vrot.lane.b32.xlu0 %v4500_v16, %s7240_s22  ;;  %v4861_v14 = vsel %vm4813_vm14, %v4798_v44, %v4324_v12 }
 0x63f   :  { %v4390_v11 = vpop.permute.xlu1 %4389 }
 0x640   :  { %v4114_v45 = vpop.permute.xlu0 %4113  ;;  %v4926_v47 = vsel %vm4876_vm15, %v4861_v14, %v4390_v11 }
 0x641   :  { %v4800_v56 = vsel %vm14044_vm0, %v10957_v42, %v4114_v45 }
 0x642   :  { %4687 = vrot.lane.b32.xlu0 %v4428_v9, %s7243_s28  ;;  %v11273_v62 = vpop.f32.mrb[12].mxu1 }
 0x643   :  { %v4478_v27 = vpop.permute.xlu1 %4477  ;;  %v11275_v54 = vpop.f32.mrb[13].mxu1 }
 0x644   :  { %v4326_v4 = vpop.permute.xlu0 %4325  ;;  %v11277_v35 = vpop.f32.mrb[14].mxu1  ;;  %v4991_v38 = vsel %vm4941_vm9, %v4926_v47, %v4478_v27 }
 0x645   :  { %v11279_v46 = vpop.f32.mrb[15].mxu1  ;;  %v4863_v43 = vsel %vm4813_vm14, %v4800_v56, %v4326_v4 }
 0x647   :  { %v4550_v17 = vpop.permute.xlu1 %4549 }
 0x648   :  { %v4392_v13 = vpop.permute.xlu0 %4391  ;;  %v5056_v10 = vsel %vm5006_vm1, %v4991_v38, %v4550_v17 }
 0x649   :  { %v4928_v15 = vsel %vm4876_vm15, %v4863_v43, %v4392_v13 }
 0x64b   :  { %v4614_v49 = vpop.permute.xlu1 %4613 }
 0x64c   :  { %v4480_v37 = vpop.permute.xlu0 %4479  ;;  %v5121_v18 = vsel %vm5071_vm7, %v5056_v10, %v4614_v49 }
 0x64d   :  { %v4993_v7 = vsel %vm4941_vm9, %v4928_v15, %v4480_v37 }
 0x64f   :  { %v4676_v21 = vpop.permute.xlu1 %4675 }
 0x650   :  { %v4552_v0 = vpop.permute.xlu0 %4551  ;;  %v5185_v6 = vsel %vm5135_vm4, %v5121_v18, %v4676_v21 }
 0x651   :  { %v5058_v42 = vsel %vm5006_vm1, %v4993_v7, %v4552_v0 }
 0x652   :  { %v11289_v3 = vpop.f32.mrb[16].mxu1 }
 0x653   :  { %v4738_v53 = vpop.permute.xlu1 %4737  ;;  %v11293_v2 = vpop.f32.mrb[17].mxu1 }
 0x654   :  { %v5249_v60 = vsel %vm5199_vm11, %v5185_v6, %v4738_v53  ;;  %v11297_v32 = vpop.f32.mrb[18].mxu1  ;;  %v4616_v52 = vpop.permute.xlu0 %4615 }
 0x655   :  { %7140 = vmatprep.mubr.msk.bf16.mxu1 %vm5297_vm12, %v5249_v60  ;;  %v11301_v61 = vpop.f32.mrb[19].mxu1  ;;  %v5123_v5 = vsel %vm5071_vm7, %v5058_v42, %v4616_v52 }
 0x657   :  { %v4740_v9 = vpop.permute.xlu1 %4739 }
 0x658   :  { %v4678_v29 = vpop.permute.xlu0 %4677 }
 0x659   :  { %v5187_v12 = vsel %vm5135_vm4, %v5123_v5, %v4678_v29 }
 0x65a   :  { %v5251_v16 = vsel %vm5199_vm11, %v5187_v12, %v4740_v9 }
 0x65b   :  { %v4328_v55 = vpop.permute.xlu1 %4327  ;;  %7141 = vmatmul.mubr.msk.bf16.gmra.mrb[44].mxu1 %vm5297_vm12, %v5251_v16 }
 0x65c   :  { %v4116_v11 = vpop.permute.xlu0 %4115 }
 0x65d   :  { %v4802_v49 = vsel %vm14045_vm6, %v11008_v31, %v4116_v11  ;;  %vm14063_vm6 = vmmov %vm14044_vm0 }
 0x65e   :  { %v4865_v47 = vsel %vm4813_vm14, %v4802_v49, %v4328_v55 }
 0x65f   :  { %v4394_v45 = vpop.permute.xlu1 %4393 }
 0x660   :  { %v4118_v27 = vpop.permute.xlu0 %4117  ;;  %v4930_v21 = vsel %vm4876_vm15, %v4865_v47, %v4394_v45 }
 0x661   :  { %v4804_v31 = vsel %vm14046_vm10, %v11040_v51, %v4118_v27  ;;  %vm14064_vm10 = vmmov %vm14044_vm0 }
 0x663   :  { %v4482_v4 = vpop.permute.xlu1 %4481 }
 0x664   :  { %v4330_v17 = vpop.permute.xlu0 %4329  ;;  %v4995_v10 = vsel %vm4941_vm9, %v4930_v21, %v4482_v4 }
 0x665   :  { %v4867_v15 = vsel %vm4813_vm14, %v4804_v31, %v4330_v17 }
 0x667   :  { %v4554_v13 = vpop.permute.xlu1 %4553 }
 0x668   :  { %v4396_v44 = vpop.permute.xlu0 %4395  ;;  %v5060_v0 = vsel %vm5006_vm1, %v4995_v10, %v4554_v13 }
 0x669   :  { %v4932_v42 = vsel %vm4876_vm15, %v4867_v15, %v4396_v44 }
 0x66b   :  { %v4618_v37 = vpop.permute.xlu1 %4617 }
 0x66c   :  { %v4484_v14 = vpop.permute.xlu0 %4483  ;;  %v5125_v6 = vsel %vm5071_vm7, %v5060_v0, %v4618_v37 }
 0x66d   :  { %v4997_v29 = vsel %vm4941_vm9, %v4932_v42, %v4484_v14 }
 0x66f   :  { %v4680_v38 = vpop.permute.xlu1 %4679 }
 0x670   :  { %v4556_v18 = vpop.permute.xlu0 %4555  ;;  %v5189_v53 = vsel %vm5135_vm4, %v5125_v6, %v4680_v38 }
 0x671   :  { %v5062_v51 = vsel %vm5006_vm1, %v4997_v29, %v4556_v18 }
 0x672   :  { %v11317_v56 = vpop.f32.mrb[20].mxu1 }
 0x673   :  { %v4742_v60 = vpop.permute.xlu1 %4741  ;;  %v11321_v43 = vpop.f32.mrb[21].mxu1 }
 0x674   :  { %v5253_v52 = vsel %vm5199_vm11, %v5189_v53, %v4742_v60  ;;  %v11325_v7 = vpop.f32.mrb[22].mxu1  ;;  %v4620_v9 = vpop.permute.xlu0 %4619 }
 0x675   :  { %7144 = vmatprep.mubr.msk.bf16.mxu1 %vm5297_vm12, %v5253_v52  ;;  %v11329_v5 = vpop.f32.mrb[23].mxu1  ;;  %v5127_v16 = vsel %vm5071_vm7, %v5062_v51, %v4620_v9 }
 0x677   :  { %v4744_v12 = vpop.permute.xlu1 %4743 }
 0x678   :  { %v4682_v55 = vpop.permute.xlu0 %4681 }
 0x679   :  { %v5191_v11 = vsel %vm5135_vm4, %v5127_v16, %v4682_v55 }
 0x67a   :  { %v5255_v45 = vsel %vm5199_vm11, %v5191_v11, %v4744_v12 }
 0x67b   :  { %v4332_v27 = vpop.permute.xlu1 %4331  ;;  %7145 = vmatmul.mubr.msk.bf16.gmra.mrb[48].mxu1 %vm5297_vm12, %v5255_v45 }
 0x67c   :  { %v4120_v4 = vpop.permute.xlu0 %4119 }
 0x67d   :  { %v4806_v47 = vsel %vm14047_vm3, %v11075_v8, %v4120_v4  ;;  %vm14065_vm3 = vmmov %vm14044_vm0 }
 0x67e   :  { %v4869_v10 = vsel %vm4813_vm14, %v4806_v47, %v4332_v27 }
 0x67f   :  { %v4398_v17 = vpop.permute.xlu1 %4397 }
 0x680   :  { %v4122_v13 = vpop.permute.xlu0 %4121  ;;  %v4934_v0 = vsel %vm4876_vm15, %v4869_v10, %v4398_v17 }
 0x681   :  { %v4808_v8 = vsel %vm14048_vm8, %v11106_v1, %v4122_v13  ;;  %vm14066_vm8 = vmmov %vm14044_vm0 }
 0x683   :  { %v4486_v44 = vpop.permute.xlu1 %4485 }
 0x684   :  { %v4334_v49 = vpop.permute.xlu0 %4333  ;;  %v4999_v6 = vsel %vm4941_vm9, %v4934_v0, %v4486_v44 }
 0x685   :  { %v4871_v42 = vsel %vm4813_vm14, %v4808_v8, %v4334_v49 }
 0x687   :  { %v4558_v37 = vpop.permute.xlu1 %4557 }
 0x688   :  { %v4400_v14 = vpop.permute.xlu0 %4399  ;;  %v5064_v53 = vsel %vm5006_vm1, %v4999_v6, %v4558_v37 }
 0x689   :  { %v4936_v12 = vsel %vm4876_vm15, %v4871_v42, %v4400_v14 }
 0x68b   :  { %v4622_v21 = vpop.permute.xlu1 %4621 }
 0x68c   :  { %v4488_v38 = vpop.permute.xlu0 %4487  ;;  %v5129_v31 = vsel %vm5071_vm7, %v5064_v53, %v4622_v21 }
 0x68d   :  { %v5001_v16 = vsel %vm4941_vm9, %v4936_v12, %v4488_v38 }
 0x68f   :  { %v4684_v18 = vpop.permute.xlu1 %4683 }
 0x690   :  { %v4560_v60 = vpop.permute.xlu0 %4559  ;;  %v5193_v52 = vsel %vm5135_vm4, %v5129_v31, %v4684_v18 }
 0x691   :  { %v5066_v45 = vsel %vm5006_vm1, %v5001_v16, %v4560_v60 }
 0x693   :  { %v4746_v15 = vpop.permute.xlu1 %4745 }
 0x694   :  { %v5257_v9 = vsel %vm5199_vm11, %v5193_v52, %v4746_v15  ;;  %v4624_v29 = vpop.permute.xlu0 %4623 }
 0x695   :  { %7148 = vmatprep.mubr.msk.bf16.mxu1 %vm5297_vm12, %v5257_v9  ;;  %v11351_v51 = vpop.f32.mrb[24].mxu1  ;;  %v5131_v1 = vsel %vm5071_vm7, %v5066_v45, %v4624_v29 }
 0x696   :  { %v11354_v55 = vpop.f32.mrb[25].mxu1 }
 0x697   :  { %v4748_v11 = vpop.permute.xlu1 %4747  ;;  %v11357_v27 = vpop.f32.mrb[26].mxu1 }
 0x698   :  { %v11360_v4 = vpop.f32.mrb[27].mxu1  ;;  %v4686_v17 = vpop.permute.xlu0 %4685 }
 0x699   :  { %v5195_v13 = vsel %vm5135_vm4, %v5131_v1, %v4686_v17  ;;  %v11390_v17 = vld [vmem:[%s13479_s6] ss:$0 sm:$0xff] }
 0x69a   :  { %v5259_v44 = vsel %vm5199_vm11, %v5195_v13, %v4748_v11 }
 0x69b   :  { %v4336_v49 = vpop.permute.xlu1 %4335  ;;  %7149 = vmatmul.mubr.msk.bf16.gmra.mrb[52].mxu1 %vm5297_vm12, %v5259_v44 }
 0x69c   :  { %v4124_v37 = vpop.permute.xlu0 %4123 }
 0x69d   :  { %v4810_v6 = vsel %vm14049_vm2, %v11141_v23, %v4124_v37  ;;  %v11397_v37 = vadd.f32 %v11390_v17, %v11204_v36  ;;  %v11413_v36 = vadd.f32 %v11194_v63, %v11390_v17  ;;  %vm14067_vm2 = vmmov %vm14044_vm0 }
 0x69e   :  { %v4873_v9 = vsel %vm4813_vm14, %v4810_v6, %v4336_v49  ;;  %v11425_v6 = vadd.f32 %v11390_v17, %v11215_v33 }
 0x69f   :  { %v4402_v14 = vpop.permute.xlu1 %4401 }
 0x6a0   :  { %v4126_v47 = vpop.permute.xlu0 %4125  ;;  %v4938_v23 = vsel %vm4876_vm15, %v4873_v9, %v4402_v14  ;;  %14055 = vst [vmem:[#allocation5_spill] sm:$0xff] %v11425_v6  ;;  %v11439_v9 = vadd.f32 %v11210_v59, %v11390_v17 }
 0x6a1   :  { %v4812_v53 = vsel %vm14050_vm13, %v11172_v39, %v4126_v47  ;;  %vm14068_vm13 = vmmov %vm14044_vm0 }
 0x6a3   :  { %v4490_v21 = vpop.permute.xlu1 %4489 }
 0x6a4   :  { %v4338_v38 = vpop.permute.xlu0 %4337  ;;  %v5003_v11 = vsel %vm4941_vm9, %v4938_v23, %v4490_v21  ;;  %v11403_v21 = vadd.f32 %v11390_v17, %v11198_v34  ;;  %v11447_v23 = vadd.f32 %v11219_v50, %v11390_v17  ;;  %v11465_v50 = vadd.f32 %v11390_v17, %v11247_v25 }
 0x6a5   :  { %v4875_v60 = vsel %vm4813_vm14, %v4812_v53, %v4338_v38  ;;  %vm14051_vm14 = vmmov %vm14044_vm0  ;;  %v11481_v25 = vadd.f32 %v11390_v17, %v11262_v40 }
 0x6a7   :  { %v4562_v0 = vpop.permute.xlu1 %4561 }
 0x6a8   :  { %v4404_v10 = vpop.permute.xlu0 %4403  ;;  %v5068_v1 = vsel %vm5006_vm1, %v5003_v11, %v4562_v0 }
 0x6a9   :  { %v4940_v52 = vsel %vm4876_vm15, %v4875_v60, %v4404_v10  ;;  %vm14052_vm15 = vmmov %vm14044_vm0 }
 0x6aa   :  { %v5656_v10 = vsel %vm14052_vm15, %v11403_v21, 0.0  ;;  %vm14070_vm15 = vmmov %vm14044_vm0 }
 0x6ab   :  { %v4626_v15 = vpop.permute.xlu1 %4625 }
 0x6ac   :  { %v4492_v18 = vpop.permute.xlu0 %4491  ;;  %v5133_v13 = vsel %vm5071_vm7, %v5068_v1, %v4626_v15 }
 0x6ad   :  { %v5005_v42 = vsel %vm4941_vm9, %v4940_v52, %v4492_v18  ;;  %vm14053_vm9 = vmmov %vm14044_vm0  ;;  %v11421_v18 = vadd.f32 %v11200_v20, %v11390_v17  ;;  %v11433_v52 = vadd.f32 %v11390_v17, %v11223_v41 }
 0x6ae   :  { %v11370_v31 = vpop.f32.mrb[28].mxu1  ;;  %v5659_v34 = vsel %vm14053_vm9, %v11413_v36, 0.0  ;;  %vm14071_vm9 = vmmov %vm14044_vm0 }
 0x6af   :  { %v11373_v8 = vpop.f32.mrb[29].mxu1  ;;  %v4750_v14 = vpop.permute.xlu1 %4749  ;;  %14054 = vst [vmem:[#allocation3_spill] sm:$0xff] %v11421_v18  ;;  %14058 = vst [vmem:[#allocation4_spill] sm:$0xff] %v11433_v52 }
 0x6b0   :  { %v11377_v29 = vpop.f32.mrb[30].mxu1  ;;  %v4564_v12 = vpop.permute.xlu0 %4563 }
 0x6b1   :  { %v5070_v39 = vsel %vm5006_vm1, %v5005_v42, %v4564_v12  ;;  %v11381_v16 = vpop.f32.mrb[31].mxu1  ;;  %vm14056_vm1 = vmmov %vm14044_vm0 }
 0x6b2   :  { %v5134_v45 = vsel %vm5071_vm7, %v5070_v39, %v10960_v48  ;;  %v5661_v63 = vsel %vm14056_vm1, %v11421_v18, 0.0  ;;  %vm14057_vm7 = vmmov %vm14044_vm0 }
 0x6b3   :  { %v5198_v49 = vsel %vm5135_vm4, %v5134_v45, %v10975_v58  ;;  %v5657_v58 = vsel %vm14051_vm14, %v11397_v37, 0.0  ;;  %v5663_v60 = vsel %vm14057_vm7, %v11425_v6, 0.0  ;;  %v11455_v45 = vadd.f32 %v11390_v17, %v11238_v28  ;;  %vm14069_vm14 = vmmov %vm14044_vm0 }
 0x6b4   :  { %v4688_v44 = vpop.permute.xlu0 %4687  ;;  %v5262_v38 = vsel %vm5199_vm11, %v5198_v49, %v10991_v22  ;;  %v5658_v0 = vadd.f32 %v5657_v58, %v5656_v10  ;;  %v11471_v28 = vadd.f32 %v11234_v57, %v11390_v17  ;;  %v5679_v57 = vsel %vm14065_vm3, %v11481_v25, 0.0  ;;  %vm14072_vm1 = vmmov %vm14044_vm0 }
 0x6b5   :  { %v5197_v48 = vsel %vm5135_vm4, %v5133_v13, %v4688_v44  ;;  %vm14059_vm4 = vmmov %vm14044_vm0  ;;  %v5671_v44 = vsel %vm14062_vm5, %v11455_v45, 0.0 }
 0x6b6   :  { %v5261_v47 = vsel %vm5199_vm11, %v5197_v48, %v4750_v14  ;;  %v5660_v22 = vadd.f32 %v5659_v34, %v5658_v0  ;;  %v5665_v20 = vsel %vm14059_vm4, %v11433_v52, 0.0  ;;  %vm14060_vm11 = vmmov %vm14044_vm0  ;;  %v5673_v14 = vsel %vm14044_vm0, %v11465_v50, 0.0 }
 0x6b7   :  { %7152 = vmatprep.mubr.msk.bf16.mxu1 %vm5297_vm12, %v5261_v47  ;;  %v5667_v12 = vsel %vm14060_vm11, %v11439_v9, 0.0  ;;  %v5675_v47 = vsel %vm14063_vm6, %v11471_v28, 0.0  ;;  %v11489_v34 = vadd.f32 %v11390_v17, %v11269_v19  ;;  %vm14073_vm7 = vmmov %vm14044_vm0 }
 0x6b8   :  { %7153 = vmatmul.mubr.msk.bf16.gmra.mrb[56].mxu1 %vm5297_vm12, %v5262_v38  ;;  %v5662_v53 = vadd.f32 %v5661_v63, %v5660_v22  ;;  %vm14061_vm12 = vmmov %vm14044_vm0  ;;  %v11477_v38 = vadd.f32 %v11243_v24, %v11390_v17  ;;  %v11495_v63 = vadd.f32 %v11258_v26, %v11390_v17 }
 0x6b9   :  { %v5669_v1 = vsel %vm14061_vm12, %v11447_v23, 0.0  ;;  %v5681_v24 = vsel %vm14066_vm8, %v11489_v34, 0.0  ;;  %vm14074_vm4 = vmmov %vm14044_vm0 }
 0x6ba   :  { %v5664_v15 = vadd.f32 %v5663_v60, %v5662_v53  ;;  %v5677_v10 = vsel %vm14064_vm10, %v11477_v38, 0.0  ;;  %v5683_v60 = vsel %vm14067_vm2, %v11495_v63, 0.0  ;;  %vm14075_vm11 = vmmov %vm14044_vm0 }
 0x6bb   :  { %vm14076_vm12 = vmmov %vm14044_vm0 }
 0x6bc   :  { %v5666_v33 = vadd.f32 %v5665_v20, %v5664_v15  ;;  %v11503_v15 = vadd.f32 %v11265_v30, %v11390_v17  ;;  %v11521_v30 = vadd.f32 %v11390_v17, %v11279_v46  ;;  %v11537_v46 = vadd.f32 %v11390_v17, %v11293_v2  ;;  %vm14077_vm5 = vmmov %vm14044_vm0 }
 0x6bd   :  { %v11551_v2 = vadd.f32 %v11289_v3, %v11390_v17  ;;  %vm14078_vm6 = vmmov %vm14044_vm0 }
 0x6be   :  { %v5668_v39 = vadd.f32 %v5667_v12, %v5666_v33  ;;  %v11511_v12 = vadd.f32 %v11390_v17, %v11275_v54  ;;  %v11527_v54 = vadd.f32 %v11273_v62, %v11390_v17  ;;  %v5695_v62 = vsel %vm14073_vm7, %v11537_v46, 0.0  ;;  %vm14079_vm10 = vmmov %vm14044_vm0 }
 0x6bf   :  { %vm14080_vm3 = vmmov %vm14044_vm0 }
 0x6c0   :  { %v5670_v13 = vadd.f32 %v5669_v1, %v5668_v39  ;;  %v5685_v39 = vsel %vm14068_vm13, %v11503_v15, 0.0  ;;  %vm14081_vm8 = vmmov %vm14044_vm0 }
 0x6c1   :  { %vm14082_vm2 = vmmov %vm14044_vm0 }
 0x6c2   :  { %v5672_v49 = vadd.f32 %v5671_v44, %v5670_v13  ;;  %v5687_v13 = vsel %vm14069_vm14, %v11511_v12, 0.0  ;;  %vm14083_vm13 = vmmov %vm14044_vm0 }
 0x6c3   :  { %vm14084_vm14 = vmmov %vm14044_vm0 }
 0x6c4   :  { %v5674_v48 = vadd.f32 %v5673_v14, %v5672_v49  ;;  %v5689_v49 = vsel %vm14070_vm15, %v11521_v30, 0.0  ;;  %vm14085_vm15 = vmmov %vm14044_vm0 }
 0x6c5   :  { %vm14090_vm7 = vmmov %vm14044_vm0 }
 0x6c6   :  { %v5676_v58 = vadd.f32 %v5675_v47, %v5674_v48  ;;  %v5691_v48 = vsel %vm14071_vm9, %v11527_v54, 0.0  ;;  %v11533_v47 = vadd.f32 %v11277_v35, %v11390_v17  ;;  %vm14086_vm9 = vmmov %vm14044_vm0 }
 0x6c8   :  { %v5678_v0 = vadd.f32 %v5677_v10, %v5676_v58  ;;  %v5693_v10 = vsel %vm14072_vm1, %v11533_v47, 0.0  ;;  %vm14089_vm1 = vmmov %vm14044_vm0 }
 0x6ca   :  { %v5680_v22 = vadd.f32 %v5679_v57, %v5678_v0  ;;  %v11545_v0 = vadd.f32 %v11390_v17, %v11301_v61  ;;  %v11561_v61 = vadd.f32 %v11390_v17, %v11321_v43 }
 0x6cc   :  { %v5682_v40 = vadd.f32 %v5681_v24, %v5680_v22  ;;  %v5697_v35 = vsel %vm14074_vm4, %v11545_v0, 0.0  ;;  %vm14092_vm4 = vmmov %vm14044_vm0 }
 0x6ce   :  { %v11441_v42 = vpop.f32.mrb[32].mxu1  ;;  %v5684_v20 = vadd.f32 %v5683_v60, %v5682_v40  ;;  %v5699_v40 = vsel %vm14075_vm11, %v11551_v2, 0.0  ;;  %v11557_v60 = vadd.f32 %v11297_v32, %v11390_v17  ;;  %v11575_v32 = vadd.f32 %v11390_v17, %v11329_v5  ;;  %vm14094_vm11 = vmmov %vm14044_vm0 }
 0x6cf   :  { %v11449_v41 = vpop.f32.mrb[33].mxu1  ;;  %v11593_v5 = vadd.f32 %v11390_v17, %v11354_v55  ;;  %v11607_v55 = vadd.f32 %v11351_v51, %v11390_v17 }
 0x6d0   :  { %v11451_v11 = vpop.f32.mrb[34].mxu1  ;;  %v5686_v1 = vadd.f32 %v5685_v39, %v5684_v20  ;;  %v5701_v3 = vsel %vm14076_vm12, %v11557_v60, 0.0  ;;  %vm14097_vm12 = vmmov %vm14044_vm0 }
 0x6d1   :  { %v11457_v59 = vpop.f32.mrb[35].mxu1 }
 0x6d2   :  { %v5688_v44 = vadd.f32 %v5687_v13, %v5686_v1 }
 0x6d4   :  { %v5690_v14 = vadd.f32 %v5689_v49, %v5688_v44  ;;  %v5703_v44 = vsel %vm14077_vm5, %v11561_v61, 0.0  ;;  %vm14098_vm5 = vmmov %vm14044_vm0 }
 0x6d6   :  { %v5692_v58 = vadd.f32 %v5691_v48, %v5690_v14  ;;  %v5705_v48 = vsel %vm14044_vm0, %v11575_v32, 0.0 }
 0x6d8   :  { %v5694_v57 = vadd.f32 %v5693_v10, %v5692_v58  ;;  %v11583_v58 = vadd.f32 %v11317_v56, %v11390_v17  ;;  %v5711_v56 = vsel %vm14080_vm3, %v11593_v5, 0.0  ;;  %vm14104_vm3 = vmmov %vm14044_vm0 }
 0x6da   :  { %v5696_v22 = vadd.f32 %v5695_v62, %v5694_v57  ;;  %v5707_v62 = vsel %vm14078_vm6, %v11583_v58, 0.0  ;;  %v11589_v57 = vadd.f32 %v11325_v7, %v11390_v17  ;;  %vm14100_vm6 = vmmov %vm14044_vm0 }
 0x6dc   :  { %v5698_v24 = vadd.f32 %v5697_v35, %v5696_v22  ;;  %v5709_v35 = vsel %vm14079_vm10, %v11589_v57, 0.0  ;;  %vm14103_vm10 = vmmov %vm14044_vm0 }
 0x6de   :  { %v5700_v20 = vadd.f32 %v5699_v40, %v5698_v24  ;;  %v11601_v24 = vadd.f32 %v11390_v17, %v11360_v4  ;;  %v11617_v4 = vadd.f32 %v11390_v17, %v11373_v8 }
 0x6e0   :  { %v5702_v43 = vadd.f32 %v5701_v3, %v5700_v20  ;;  %v5713_v7 = vsel %vm14081_vm8, %v11601_v24, 0.0  ;;  %v5719_v51 = vsel %vm14084_vm14, %v11617_v4, 0.0  ;;  %vm14106_vm8 = vmmov %vm14044_vm0 }
 0x6e1   :  { %vm14112_vm14 = vmmov %vm14044_vm0 }
 0x6e2   :  { %v5704_v14 = vadd.f32 %v5703_v44, %v5702_v43  ;;  %v5715_v44 = vsel %vm14082_vm2, %v11607_v55, 0.0  ;;  %v11613_v43 = vadd.f32 %v11357_v27, %v11390_v17  ;;  %vm14108_vm2 = vmmov %vm14044_vm0 }
 0x6e4   :  { %v5706_v10 = vadd.f32 %v5705_v48, %v5704_v14  ;;  %v5717_v48 = vsel %vm14083_vm13, %v11613_v43, 0.0  ;;  %vm14111_vm13 = vmmov %vm14044_vm0 }
 0x6e6   :  { %v5708_v22 = vadd.f32 %v5707_v62, %v5706_v10  ;;  %v11625_v10 = vadd.f32 %v11390_v17, %v11381_v16  ;;  %v11637_v16 = vadd.f32 %v11377_v29, %v11390_v17 }
 0x6e8   :  { %v5710_v40 = vadd.f32 %v5709_v35, %v5708_v22  ;;  %v5721_v8 = vsel %vm14085_vm15, %v11625_v10, 0.0  ;;  %14087 = vst [vmem:[#allocation30_spill] sm:$0xff] %v11637_v16  ;;  %vm14114_vm15 = vmmov %vm14044_vm0 }
 0x6ea   :  { %v5712_v20 = vadd.f32 %v5711_v56, %v5710_v40 }
 0x6ec   :  { %v5714_v3 = vadd.f32 %v5713_v7, %v5712_v20  ;;  %v11631_v20 = vadd.f32 %v11370_v31, %v11390_v17 }
 0x6ee   :  { %v11497_v53 = vpop.f32.mrb[36].mxu1  ;;  %v5716_v14 = vadd.f32 %v5715_v44, %v5714_v3  ;;  %v5723_v3 = vsel %vm14086_vm9, %v11631_v20, 0.0  ;;  %v11641_v44 = vadd.f32 %v11390_v17, %v11449_v41  ;;  %v11655_v41 = vadd.f32 %v11441_v42, %v11390_v17  ;;  %vm14116_vm9 = vmmov %vm14044_vm0 }
 0x6ef   :  { %v11505_v19 = vpop.f32.mrb[37].mxu1 }
 0x6f0   :  { %v11507_v33 = vpop.f32.mrb[38].mxu1  ;;  %v5718_v62 = vadd.f32 %v5717_v48, %v5716_v14  ;;  %14088 = vst [vmem:[#allocation8_spill] sm:$0xff] %v11641_v44  ;;  %v5725_v48 = vsel %vm14089_vm1, %v11637_v16, 0.0  ;;  %v5727_v31 = vsel %vm14090_vm7, %v11641_v44, 0.0  ;;  %14093 = vst [vmem:[#allocation2_spill] sm:$0xff] %v11655_v41 }
 0x6f1   :  { %v11513_v26 = vpop.f32.mrb[39].mxu1  ;;  %vm14119_vm1 = vmmov %vm14044_vm0 }
 0x6f2   :  { %v5720_v27 = vadd.f32 %v5719_v51, %v5718_v62  ;;  %v11649_v51 = vadd.f32 %v11390_v17, %v11457_v59  ;;  %v11665_v59 = vadd.f32 %v11390_v17, %v11505_v19  ;;  %v11679_v19 = vadd.f32 %v11497_v53, %v11390_v17  ;;  %vm14120_vm7 = vmmov %vm14044_vm0 }
 0x6f4   :  { %v5722_v7 = vadd.f32 %v5721_v8, %v5720_v27  ;;  %14091 = vst [vmem:[#allocation22_spill] sm:$0xff] %v11649_v51  ;;  %v5729_v29 = vsel %vm14092_vm4, %v11649_v51, 0.0  ;;  %14096 = vst [vmem:[#allocation33_spill] sm:$0xff] %v11665_v59  ;;  %v5735_v42 = vsel %vm14098_vm5, %v11665_v59, 0.0  ;;  %v5739_v59 = vsel %vm14100_vm6, %v11679_v19, 0.0 }
 0x6f5   :  { %vm14122_vm4 = vmmov %vm14044_vm0 }
 0x6f6   :  { %v5724_v14 = vadd.f32 %v5723_v3, %v5722_v7  ;;  %v5731_v7 = vsel %vm14094_vm11, %v11655_v41, 0.0  ;;  %v11661_v3 = vadd.f32 %v11451_v11, %v11390_v17  ;;  %vm14124_vm11 = vmmov %vm14044_vm0 }
 0x6f7   :  { %vm14128_vm5 = vmmov %vm14044_vm0 }
 0x6f8   :  { %v5726_v62 = vadd.f32 %v5725_v48, %v5724_v14  ;;  %14095 = vst [vmem:[#allocation24_spill] sm:$0xff] %v11661_v3  ;;  %v5733_v48 = vsel %vm14097_vm12, %v11661_v3, 0.0  ;;  %vm14127_vm12 = vmmov %vm14044_vm0 }
 0x6f9   :  { %vm14131_vm6 = vmmov %vm14044_vm0 }
 0x6fa   :  { %v5728_v27 = vadd.f32 %v5727_v31, %v5726_v62  ;;  %v11673_v31 = vadd.f32 %v11390_v17, %v11513_v26  ;;  %v11685_v26 = vadd.f32 %v11507_v33, %v11390_v17 }
 0x6fc   :  { %v5730_v8 = vadd.f32 %v5729_v29, %v5728_v27  ;;  %14099 = vst [vmem:[#allocation18_spill] sm:$0xff] %v11673_v31  ;;  %v5737_v11 = vsel %vm14044_vm0, %v11673_v31, 0.0  ;;  %14101 = vst [vmem:[#allocation23_spill] sm:$0xff] %v11685_v26  ;;  %v5741_v53 = vsel %vm14103_vm10, %v11685_v26, 0.0 }
 0x6fd   :  { %vm14134_vm10 = vmmov %vm14044_vm0 }
 0x6fe   :  { %v5732_v14 = vadd.f32 %v5731_v7, %v5730_v8 }
 0x700   :  { %v5734_v62 = vadd.f32 %v5733_v48, %v5732_v14 }
 0x702   :  { %v5736_v27 = vadd.f32 %v5735_v42, %v5734_v62 }
 0x704   :  { %v5738_v7 = vadd.f32 %v5737_v11, %v5736_v27 }
 0x706   :  { %v5740_v48 = vadd.f32 %v5739_v59, %v5738_v7 }
 0x708   :  { %v5742_v27 = vadd.f32 %v5741_v53, %v5740_v48 }
 0x70e   :  { %v11563_v39 = vpop.f32.mrb[40].mxu1 }
 0x70f   :  { %v11565_v1 = vpop.f32.mrb[41].mxu1 }
 0x710   :  { %v11567_v13 = vpop.f32.mrb[42].mxu1  ;;  %v11689_v14 = vadd.f32 %v11390_v17, %v11565_v1  ;;  %v11703_v1 = vadd.f32 %v11563_v39, %v11390_v17 }
 0x711   :  { %v11577_v49 = vpop.f32.mrb[43].mxu1 }
 0x712   :  { %14102 = vst [vmem:[#allocation45_spill] sm:$0xff] %v11689_v14  ;;  %v5743_v42 = vsel %vm14104_vm3, %v11689_v14, 0.0  ;;  %v11697_v62 = vadd.f32 %v11390_v17, %v11577_v49  ;;  %14107 = vst [vmem:[#allocation44_spill] sm:$0xff] %v11703_v1  ;;  %v5747_v7 = vsel %vm14108_vm2, %v11703_v1, 0.0  ;;  %v11709_v14 = vadd.f32 %v11567_v13, %v11390_v17 }
 0x713   :  { %v5744_v11 = vadd.f32 %v5743_v42, %v5742_v27  ;;  %vm14135_vm3 = vmmov %vm14044_vm0 }
 0x714   :  { %14105 = vst [vmem:[#allocation34_spill] sm:$0xff] %v11697_v62  ;;  %v5745_v33 = vsel %vm14106_vm8, %v11697_v62, 0.0  ;;  %14109 = vst [vmem:[#allocation47_spill] sm:$0xff] %v11709_v14  ;;  %v5749_v53 = vsel %vm14111_vm13, %v11709_v14, 0.0 }
 0x715   :  { %v5746_v59 = vadd.f32 %v5745_v33, %v5744_v11  ;;  %vm14137_vm8 = vmmov %vm14044_vm0 }
 0x716   :  { %vm14139_vm2 = vmmov %vm14044_vm0 }
 0x717   :  { %v5748_v48 = vadd.f32 %v5747_v7, %v5746_v59  ;;  %vm14141_vm13 = vmmov %vm14044_vm0 }
 0x719   :  { %v5750_v27 = vadd.f32 %v5749_v53, %v5748_v48 }
 0x72e   :  { %v7142_v22 = vpop.f32.mrb[44].mxu1 }
 0x72f   :  { %v5591_v35 = vpop.f32.mrb[45].mxu1  ;;  %v11724_v13 = vadd.f32 %v7142_v22, %v11390_v17 }
 0x730   :  { %v7143_v56 = vpop.f32.mrb[46].mxu1  ;;  %v11712_v49 = vadd.f32 %v11390_v17, %v5591_v35 }
 0x731   :  { %v5594_v40 = vpop.f32.mrb[47].mxu1  ;;  %14115 = vst [vmem:[#allocation16_spill] sm:$0xff] %v11724_v13  ;;  %v5755_v59 = vsel %vm14116_vm9, %v11724_v13, 0.0  ;;  %v11729_v7 = vadd.f32 %v7143_v56, %v11390_v17  ;;  %vm14144_vm9 = vmmov %vm14044_vm0 }
 0x732   :  { %14110 = vst [vmem:[#allocation25_spill] sm:$0xff] %v11712_v49  ;;  %v5751_v42 = vsel %vm14112_vm14, %v11712_v49, 0.0  ;;  %v11719_v39 = vadd.f32 %v11390_v17, %v5594_v40  ;;  %vm14142_vm14 = vmmov %vm14044_vm0 }
 0x733   :  { %v5752_v11 = vadd.f32 %v5751_v42, %v5750_v27  ;;  %14117 = vst [vmem:[#allocation46_spill] sm:$0xff] %v11729_v7  ;;  %v5757_v27 = vsel %vm14119_vm1, %v11729_v7, 0.0  ;;  %vm14145_vm1 = vmmov %vm14044_vm0 }
 0x734   :  { %14113 = vst [vmem:[#allocation15_spill] sm:$0xff] %v11719_v39  ;;  %v5753_v33 = vsel %vm14114_vm15, %v11719_v39, 0.0  ;;  %vm14143_vm15 = vmmov %vm14044_vm0 }
 0x735   :  { %v5754_v35 = vadd.f32 %v5753_v33, %v5752_v11 }
 0x737   :  { %v5756_v48 = vadd.f32 %v5755_v59, %v5754_v35 }
 0x739   :  { %v5758_v33 = vadd.f32 %v5757_v27, %v5756_v48 }
 0x74e   :  { %v7146_v29 = vpop.f32.mrb[48].mxu1 }
 0x74f   :  { %v5607_v8 = vpop.f32.mrb[49].mxu1 }
 0x750   :  { %v7147_v3 = vpop.f32.mrb[50].mxu1  ;;  %v11732_v49 = vadd.f32 %v11390_v17, %v5607_v8  ;;  %v11744_v8 = vadd.f32 %v7146_v29, %v11390_v17 }
 0x751   :  { %v5610_v41 = vpop.f32.mrb[51].mxu1  ;;  %v11749_v7 = vadd.f32 %v7147_v3, %v11390_v17 }
 0x752   :  { %14118 = vst [vmem:[#allocation48_spill] sm:$0xff] %v11732_v49  ;;  %v5759_v22 = vsel %vm14120_vm7, %v11732_v49, 0.0  ;;  %v11739_v11 = vadd.f32 %v11390_v17, %v5610_v41  ;;  %14123 = vst [vmem:[#allocation35_spill] sm:$0xff] %v11744_v8  ;;  %v5763_v59 = vsel %vm14124_vm11, %v11744_v8, 0.0 }
 0x753   :  { %v5760_v13 = vadd.f32 %v5759_v22, %v5758_v33  ;;  %14125 = vst [vmem:[#allocation6_spill] sm:$0xff] %v11749_v7  ;;  %v5765_v48 = vsel %vm14127_vm12, %v11749_v7, 0.0  ;;  %vm14146_vm7 = vmmov %vm14044_vm0 }
 0x754   :  { %14121 = vst [vmem:[#allocation26_spill] sm:$0xff] %v11739_v11  ;;  %v5761_v56 = vsel %vm14122_vm4, %v11739_v11, 0.0  ;;  %vm14147_vm4 = vmmov %vm14044_vm0 }
 0x755   :  { %v5762_v35 = vadd.f32 %v5761_v56, %v5760_v13  ;;  %vm14148_vm11 = vmmov %vm14044_vm0 }
 0x756   :  { %vm14149_vm12 = vmmov %vm14044_vm0 }
 0x757   :  { %v5764_v41 = vadd.f32 %v5763_v59, %v5762_v35 }
 0x759   :  { %v5766_v13 = vadd.f32 %v5765_v48, %v5764_v41 }
 0x76e   :  { %v7150_v1 = vpop.f32.mrb[52].mxu1 }
 0x76f   :  { %v5623_v40 = vpop.f32.mrb[53].mxu1  ;;  %v11764_v3 = vadd.f32 %v7150_v1, %v11390_v17 }
 0x770   :  { %v7151_v53 = vpop.f32.mrb[54].mxu1  ;;  %v11752_v49 = vadd.f32 %v11390_v17, %v5623_v40 }
 0x771   :  { %v5626_v42 = vpop.f32.mrb[55].mxu1  ;;  %14130 = vst [vmem:[#allocation10_spill] sm:$0xff] %v11764_v3  ;;  %v5771_v56 = vsel %vm14131_vm6, %v11764_v3, 0.0  ;;  %v11769_v35 = vadd.f32 %v7151_v53, %v11390_v17  ;;  %vm14151_vm6 = vmmov %vm14044_vm0 }
 0x772   :  { %14126 = vst [vmem:[#allocation49_spill] sm:$0xff] %v11752_v49  ;;  %v5767_v27 = vsel %vm14128_vm5, %v11752_v49, 0.0  ;;  %v11759_v29 = vadd.f32 %v11390_v17, %v5626_v42  ;;  %vm14150_vm5 = vmmov %vm14044_vm0 }
 0x773   :  { %v5768_v22 = vadd.f32 %v5767_v27, %v5766_v13  ;;  %14132 = vst [vmem:[#allocation31_spill] sm:$0xff] %v11769_v35  ;;  %v5773_v27 = vsel %vm14134_vm10, %v11769_v35, 0.0  ;;  %vm14152_vm10 = vmmov %vm14044_vm0 }
 0x774   :  { %14129 = vst [vmem:[#allocation50_spill] sm:$0xff] %v11759_v29  ;;  %v5769_v33 = vsel %vm14044_vm0, %v11759_v29, 0.0 }
 0x775   :  { %v5770_v40 = vadd.f32 %v5769_v33, %v5768_v22 }
 0x777   :  { %v5772_v49 = vadd.f32 %v5771_v56, %v5770_v40 }
 0x779   :  { %v5774_v22 = vadd.f32 %v5773_v27, %v5772_v49 }
 0x78b   :  { %v7154_v59 = vpop.f32.mrb[56].mxu1 }
 0x78c   :  { %v5639_v7 = vpop.f32.mrb[57].mxu1  ;;  %v11784_v40 = vadd.f32 %v7154_v59, %v11390_v17 }
 0x78d   :  { %v11772_v42 = vadd.f32 %v11390_v17, %v5639_v7  ;;  %v7155_v41 = vpop.f32.mrb[58].mxu1 }
 0x78e   :  { %v5642_v48 = vpop.f32.mrb[59].mxu1  ;;  %14138 = vst [vmem:[#allocation27_spill] sm:$0xff] %v11784_v40  ;;  %v5779_v56 = vsel %vm14139_vm2, %v11784_v40, 0.0  ;;  %v11789_v35 = vadd.f32 %v7155_v41, %v11390_v17  ;;  %vm14155_vm2 = vmmov %vm14044_vm0 }
 0x78f   :  { %14133 = vst [vmem:[#allocation11_spill] sm:$0xff] %v11772_v42  ;;  %v5775_v1 = vsel %vm14135_vm3, %v11772_v42, 0.0  ;;  %v11779_v13 = vadd.f32 %v11390_v17, %v5642_v48  ;;  %vm14153_vm3 = vmmov %vm14044_vm0 }
 0x790   :  { %v5776_v53 = vadd.f32 %v5775_v1, %v5774_v22  ;;  %14140 = vst [vmem:[#allocation7_spill] sm:$0xff] %v11789_v35  ;;  %v5781_v48 = vsel %vm14141_vm13, %v11789_v35, 0.0  ;;  %vm14156_vm13 = vmmov %vm14044_vm0 }
 0x791   :  { %14136 = vst [vmem:[#allocation12_spill] sm:$0xff] %v11779_v13  ;;  %v5777_v33 = vsel %vm14137_vm8, %v11779_v13, 0.0  ;;  %vm14154_vm8 = vmmov %vm14044_vm0 }
 0x792   :  { %v5778_v7 = vadd.f32 %v5777_v33, %v5776_v53 }
 0x794   :  { %v5780_v3 = vadd.f32 %v5779_v56, %v5778_v7 }
 0x796   :  { %v5782_v42 = vadd.f32 %v5781_v48, %v5780_v3 }
 0x798   :  { %v5783_v49 = vrot.slane %v5782_v42, 4 }
 0x79a   :  { %v5784_v27 = vadd.f32 %v5783_v49, %v5782_v42 }
 0x79c   :  { %v5785_v1 = vrot.slane %v5784_v27, 2 }
 0x79e   :  { %v5786_v22 = vadd.f32 %v5785_v1, %v5784_v27 }
 0x7a0   :  { %v5787_v13 = vrot.slane %v5786_v22, 1 }
 0x7a2   :  { %v5788_v29 = vadd.f32 %v5787_v13, %v5786_v22 }
 0x7a4   :  { %v11793_v59 = vmul.f32 0.001953125, %v5788_v29 }
 0x7a6   :  { %v5790_v53 = vsub.f32 %v11403_v21, %v11793_v59  ;;  %v5791_v17 = vsub.f32 %v11397_v37, %v11793_v59  ;;  %v5792_v41 = vsub.f32 %v11413_v36, %v11793_v59  ;;  %v5793_v3 = vsub.f32 %v11421_v18, %v11793_v59 }
 0x7a7   :  { %v5794_v7 = vsub.f32 %v11425_v6, %v11793_v59  ;;  %v5795_v29 = vsub.f32 %v11433_v52, %v11793_v59  ;;  %v5796_v1 = vsub.f32 %v11439_v9, %v11793_v59  ;;  %v5797_v6 = vsub.f32 %v11447_v23, %v11793_v59 }
 0x7a8   :  { %v5854_v33 = vmul.f32 %v5790_v53, %v5790_v53  ;;  %v5855_v42 = vmul.f32 %v5791_v17, %v5791_v17  ;;  %v5856_v13 = vmul.f32 %v5792_v41, %v5792_v41  ;;  %v5857_v56 = vmul.f32 %v5793_v3, %v5793_v3 }
 0x7a9   :  { %v5858_v22 = vmul.f32 %v5794_v7, %v5794_v7  ;;  %v5859_v41 = vmul.f32 %v5795_v29, %v5795_v29  ;;  %v5798_v3 = vsub.f32 %v11455_v45, %v11793_v59  ;;  %v5799_v7 = vsub.f32 %v11465_v50, %v11793_v59 }
 0x7aa   :  { %v5918_v48 = vsel %vm14142_vm14, %v5854_v33, 0.0  ;;  %v5919_v49 = vsel %vm14143_vm15, %v5855_v42, 0.0  ;;  %v5921_v53 = vsel %vm14144_vm9, %v5856_v13, 0.0  ;;  %v5923_v18 = vsel %vm14145_vm1, %v5857_v56, 0.0  ;;  %vm14157_vm14 = vmmov %vm14044_vm0 }
 0x7ab   :  { %v5920_v27 = vadd.f32 %v5919_v49, %v5918_v48  ;;  %v5860_v33 = vmul.f32 %v5796_v1, %v5796_v1  ;;  %v5925_v42 = vsel %vm14146_vm7, %v5858_v22, 0.0  ;;  %v5861_v49 = vmul.f32 %v5797_v6, %v5797_v6  ;;  %vm14158_vm15 = vmmov %vm14044_vm0 }
 0x7ac   :  { %v5927_v13 = vsel %vm14147_vm4, %v5859_v41, 0.0  ;;  %v5800_v29 = vsub.f32 %v11471_v28, %v11793_v59  ;;  %v5801_v1 = vsub.f32 %v11477_v38, %v11793_v59  ;;  %v5802_v6 = vsub.f32 %v11481_v25, %v11793_v59  ;;  %vm14159_vm9 = vmmov %vm14044_vm0 }
 0x7ad   :  { %v5922_v17 = vadd.f32 %v5921_v53, %v5920_v27  ;;  %v5862_v53 = vmul.f32 %v5798_v3, %v5798_v3  ;;  %v5803_v3 = vsub.f32 %v11489_v34, %v11793_v59  ;;  %vm14160_vm1 = vmmov %vm14044_vm0 }
 0x7ae   :  { %vm14161_vm7 = vmmov %vm14044_vm0 }
 0x7af   :  { %v5924_v52 = vadd.f32 %v5923_v18, %v5922_v17  ;;  %v5929_v18 = vsel %vm14148_vm11, %v5860_v33, 0.0  ;;  %v5863_v17 = vmul.f32 %v5799_v7, %v5799_v7  ;;  %v5933_v41 = vsel %vm14150_vm5, %v5862_v53, 0.0  ;;  %vm14162_vm4 = vmmov %vm14044_vm0 }
 0x7b0   :  { %v5804_v7 = vsub.f32 %v11495_v63, %v11793_v59  ;;  %vm14163_vm11 = vmmov %vm14044_vm0 }
 0x7b1   :  { %v5926_v48 = vadd.f32 %v5925_v42, %v5924_v52  ;;  %v5931_v52 = vsel %vm14149_vm12, %v5861_v49, 0.0  ;;  %v5864_v42 = vmul.f32 %v5800_v29, %v5800_v29  ;;  %v5935_v33 = vsel %vm14044_vm0, %v5863_v17, 0.0  ;;  %vm14164_vm12 = vmmov %vm14044_vm0 }
 0x7b2   :  { %v5805_v29 = vsub.f32 %v11503_v15, %v11793_v59  ;;  %vm14165_vm5 = vmmov %vm14044_vm0 }
 0x7b3   :  { %v5928_v27 = vadd.f32 %v5927_v13, %v5926_v48  ;;  %v5865_v13 = vmul.f32 %v5801_v1, %v5801_v1  ;;  %v5937_v49 = vsel %vm14151_vm6, %v5864_v42, 0.0  ;;  %v5806_v1 = vsub.f32 %v11511_v12, %v11793_v59  ;;  %vm14166_vm6 = vmmov %vm14044_vm0 }
 0x7b5   :  { %v5930_v56 = vadd.f32 %v5929_v18, %v5928_v27  ;;  %v5866_v18 = vmul.f32 %v5802_v6, %v5802_v6  ;;  %v5939_v53 = vsel %vm14152_vm10, %v5865_v13, 0.0  ;;  %v5807_v6 = vsub.f32 %v11521_v30, %v11793_v59  ;;  %vm14167_vm10 = vmmov %vm14044_vm0 }
 0x7b7   :  { %v5932_v22 = vadd.f32 %v5931_v52, %v5930_v56  ;;  %v5867_v52 = vmul.f32 %v5803_v3, %v5803_v3  ;;  %v5941_v17 = vsel %vm14153_vm3, %v5866_v18, 0.0  ;;  %v5808_v3 = vsub.f32 %v11527_v54, %v11793_v59  ;;  %vm14168_vm3 = vmmov %vm14044_vm0 }
 0x7b9   :  { %v5934_v48 = vadd.f32 %v5933_v41, %v5932_v22  ;;  %v5868_v41 = vmul.f32 %v5804_v7, %v5804_v7  ;;  %v5943_v42 = vsel %vm14154_vm8, %v5867_v52, 0.0  ;;  %v5809_v7 = vsub.f32 %v11533_v47, %v11793_v59  ;;  %vm14169_vm8 = vmmov %vm14044_vm0 }
 0x7bb   :  { %v5936_v27 = vadd.f32 %v5935_v33, %v5934_v48  ;;  %v5869_v33 = vmul.f32 %v5805_v29, %v5805_v29  ;;  %v5945_v13 = vsel %vm14155_vm2, %v5868_v41, 0.0  ;;  %v5810_v29 = vsub.f32 %v11537_v46, %v11793_v59  ;;  %vm14170_vm2 = vmmov %vm14044_vm0 }
 0x7bd   :  { %v5938_v56 = vadd.f32 %v5937_v49, %v5936_v27  ;;  %v5870_v49 = vmul.f32 %v5806_v1, %v5806_v1  ;;  %v5947_v18 = vsel %vm14156_vm13, %v5869_v33, 0.0  ;;  %v5811_v1 = vsub.f32 %v11545_v0, %v11793_v59  ;;  %vm14171_vm13 = vmmov %vm14044_vm0 }
 0x7bf   :  { %v5940_v22 = vadd.f32 %v5939_v53, %v5938_v56  ;;  %v5871_v53 = vmul.f32 %v5807_v6, %v5807_v6  ;;  %v5949_v52 = vsel %vm14157_vm14, %v5870_v49, 0.0  ;;  %v5812_v6 = vsub.f32 %v11551_v2, %v11793_v59  ;;  %vm14172_vm14 = vmmov %vm14044_vm0 }
 0x7c1   :  { %v5942_v48 = vadd.f32 %v5941_v17, %v5940_v22  ;;  %v5872_v17 = vmul.f32 %v5808_v3, %v5808_v3  ;;  %v5951_v41 = vsel %vm14158_vm15, %v5871_v53, 0.0  ;;  %v5813_v3 = vsub.f32 %v11557_v60, %v11793_v59  ;;  %vm14173_vm15 = vmmov %vm14044_vm0 }
 0x7c3   :  { %v5944_v27 = vadd.f32 %v5943_v42, %v5942_v48  ;;  %v5873_v42 = vmul.f32 %v5809_v7, %v5809_v7  ;;  %v5953_v33 = vsel %vm14159_vm9, %v5872_v17, 0.0  ;;  %v5814_v7 = vsub.f32 %v11561_v61, %v11793_v59  ;;  %vm14175_vm9 = vmmov %vm14044_vm0 }
 0x7c5   :  { %v5946_v56 = vadd.f32 %v5945_v13, %v5944_v27  ;;  %v5874_v13 = vmul.f32 %v5810_v29, %v5810_v29  ;;  %v5955_v49 = vsel %vm14160_vm1, %v5873_v42, 0.0  ;;  %v5815_v29 = vsub.f32 %v11575_v32, %v11793_v59  ;;  %vm14177_vm1 = vmmov %vm14044_vm0 }
 0x7c7   :  { %v5948_v22 = vadd.f32 %v5947_v18, %v5946_v56  ;;  %v5875_v18 = vmul.f32 %v5811_v1, %v5811_v1  ;;  %v5957_v53 = vsel %vm14161_vm7, %v5874_v13, 0.0  ;;  %v5816_v1 = vsub.f32 %v11583_v58, %v11793_v59  ;;  %vm14179_vm7 = vmmov %vm14044_vm0 }
 0x7c9   :  { %v5950_v48 = vadd.f32 %v5949_v52, %v5948_v22  ;;  %v5876_v52 = vmul.f32 %v5812_v6, %v5812_v6  ;;  %v5959_v17 = vsel %vm14162_vm4, %v5875_v18, 0.0  ;;  %v5817_v6 = vsub.f32 %v11589_v57, %v11793_v59  ;;  %vm14180_vm4 = vmmov %vm14044_vm0 }
 0x7cb   :  { %v5952_v27 = vadd.f32 %v5951_v41, %v5950_v48  ;;  %v5877_v41 = vmul.f32 %v5813_v3, %v5813_v3  ;;  %v5961_v42 = vsel %vm14163_vm11, %v5876_v52, 0.0  ;;  %v5818_v3 = vsub.f32 %v11593_v5, %v11793_v59  ;;  %vm14181_vm11 = vmmov %vm14044_vm0 }
 0x7cd   :  { %v5954_v56 = vadd.f32 %v5953_v33, %v5952_v27  ;;  %v5878_v33 = vmul.f32 %v5814_v7, %v5814_v7  ;;  %v5963_v13 = vsel %vm14164_vm12, %v5877_v41, 0.0  ;;  %v5819_v7 = vsub.f32 %v11601_v24, %v11793_v59  ;;  %vm14182_vm12 = vmmov %vm14044_vm0 }
 0x7cf   :  { %v5956_v22 = vadd.f32 %v5955_v49, %v5954_v56  ;;  %v5879_v49 = vmul.f32 %v5815_v29, %v5815_v29  ;;  %v5965_v18 = vsel %vm14165_vm5, %v5878_v33, 0.0  ;;  %v5820_v29 = vsub.f32 %v11607_v55, %v11793_v59  ;;  %vm14184_vm5 = vmmov %vm14044_vm0 }
 0x7d1   :  { %v5958_v48 = vadd.f32 %v5957_v53, %v5956_v22  ;;  %v5880_v53 = vmul.f32 %v5816_v1, %v5816_v1  ;;  %v5967_v52 = vsel %vm14044_vm0, %v5879_v49, 0.0  ;;  %v5821_v1 = vsub.f32 %v11613_v43, %v11793_v59 }
 0x7d3   :  { %v5960_v27 = vadd.f32 %v5959_v17, %v5958_v48  ;;  %v5881_v17 = vmul.f32 %v5817_v6, %v5817_v6  ;;  %v5969_v41 = vsel %vm14166_vm6, %v5880_v53, 0.0  ;;  %v5822_v6 = vsub.f32 %v11617_v4, %v11793_v59  ;;  %vm14186_vm6 = vmmov %vm14044_vm0 }
 0x7d5   :  { %v5962_v56 = vadd.f32 %v5961_v42, %v5960_v27  ;;  %v5882_v42 = vmul.f32 %v5818_v3, %v5818_v3  ;;  %v5971_v33 = vsel %vm14167_vm10, %v5881_v17, 0.0  ;;  %v5823_v3 = vsub.f32 %v11625_v10, %v11793_v59  ;;  %vm14187_vm10 = vmmov %vm14044_vm0 }
 0x7d7   :  { %v5964_v22 = vadd.f32 %v5963_v13, %v5962_v56  ;;  %v5883_v13 = vmul.f32 %v5819_v7, %v5819_v7  ;;  %v5973_v49 = vsel %vm14168_vm3, %v5882_v42, 0.0  ;;  %v5824_v7 = vsub.f32 %v11631_v20, %v11793_v59  ;;  %vm14189_vm3 = vmmov %vm14044_vm0 }
 0x7d9   :  { %v5966_v48 = vadd.f32 %v5965_v18, %v5964_v22  ;;  %v5884_v18 = vmul.f32 %v5820_v29, %v5820_v29  ;;  %v5975_v53 = vsel %vm14169_vm8, %v5883_v13, 0.0  ;;  %v5825_v29 = vsub.f32 %v11637_v16, %v11793_v59  ;;  %vm14190_vm8 = vmmov %vm14044_vm0 }
 0x7db   :  { %v5968_v27 = vadd.f32 %v5967_v52, %v5966_v48  ;;  %v5885_v52 = vmul.f32 %v5821_v1, %v5821_v1  ;;  %v5977_v17 = vsel %vm14170_vm2, %v5884_v18, 0.0  ;;  %v5826_v1 = vsub.f32 %v11641_v44, %v11793_v59  ;;  %vm14192_vm2 = vmmov %vm14044_vm0 }
 0x7dd   :  { %v5970_v56 = vadd.f32 %v5969_v41, %v5968_v27  ;;  %v5886_v41 = vmul.f32 %v5822_v6, %v5822_v6  ;;  %v5979_v42 = vsel %vm14171_vm13, %v5885_v52, 0.0  ;;  %v5827_v6 = vsub.f32 %v11649_v51, %v11793_v59  ;;  %vm14194_vm13 = vmmov %vm14044_vm0 }
 0x7de   :  { %v5890_v16 = vmul.f32 %v5826_v1, %v5826_v1  ;;  %v5831_v1 = vsub.f32 %v11673_v31, %v11793_v59 }
 0x7df   :  { %v5972_v22 = vadd.f32 %v5971_v33, %v5970_v56  ;;  %v5887_v33 = vmul.f32 %v5823_v3, %v5823_v3  ;;  %v5981_v13 = vsel %vm14172_vm14, %v5886_v41, 0.0  ;;  %v5891_v44 = vmul.f32 %v5827_v6, %v5827_v6  ;;  %vm14196_vm14 = vmmov %vm14044_vm0 }
 0x7e0   :  { %v5832_v6 = vsub.f32 %v11679_v19, %v11793_v59 }
 0x7e1   :  { %v5974_v48 = vadd.f32 %v5973_v49, %v5972_v22  ;;  %v5888_v49 = vmul.f32 %v5824_v7, %v5824_v7  ;;  %v5983_v18 = vsel %vm14173_vm15, %v5887_v33, 0.0  ;;  %v5989_v33 = vsel %vm14179_vm7, %v5890_v16, 0.0  ;;  %vm14197_vm15 = vmmov %vm14044_vm0 }
 0x7e2   :  { %v5896_v31 = vmul.f32 %v5832_v6, %v5832_v6  ;;  %v5837_v6 = vsub.f32 %v11709_v14, %v11793_v59  ;;  %vm14202_vm7 = vmmov %vm14044_vm0 }
 0x7e3   :  { %v5976_v27 = vadd.f32 %v5975_v53, %v5974_v48  ;;  %v5889_v53 = vmul.f32 %v5825_v29, %v5825_v29  ;;  %v5985_v52 = vsel %vm14175_vm9, %v5888_v49, 0.0  ;;  %v5991_v49 = vsel %vm14180_vm4, %v5891_v44, 0.0  ;;  %vm14198_vm9 = vmmov %vm14044_vm0 }
 0x7e4   :  { %vm14204_vm4 = vmmov %vm14044_vm0 }
 0x7e5   :  { %v5978_v56 = vadd.f32 %v5977_v17, %v5976_v27  ;;  %v14174_v17 = vld [vmem:[#allocation2_spill] sm:$0xff]  ;;  %v5987_v41 = vsel %vm14177_vm1, %v5889_v53, 0.0  ;;  %vm14200_vm1 = vmmov %vm14044_vm0 }
 0x7e6   :  { %v5828_v3 = vsub.f32 %v14174_v17, %v11793_v59 }
 0x7e7   :  { %v5980_v22 = vadd.f32 %v5979_v42, %v5978_v56  ;;  %v14176_v42 = vld [vmem:[#allocation24_spill] sm:$0xff] }
 0x7e8   :  { %v5829_v7 = vsub.f32 %v14176_v42, %v11793_v59  ;;  %v5892_v51 = vmul.f32 %v5828_v3, %v5828_v3  ;;  %v5833_v3 = vsub.f32 %v11685_v26, %v11793_v59 }
 0x7e9   :  { %v5982_v48 = vadd.f32 %v5981_v13, %v5980_v22  ;;  %v14178_v13 = vld [vmem:[#allocation33_spill] sm:$0xff] }
 0x7ea   :  { %v5830_v29 = vsub.f32 %v14178_v13, %v11793_v59  ;;  %v5993_v53 = vsel %vm14181_vm11, %v5892_v51, 0.0  ;;  %vm14206_vm11 = vmmov %vm14044_vm0 }
 0x7eb   :  { %v5984_v27 = vadd.f32 %v5983_v18, %v5982_v48  ;;  %v5893_v18 = vmul.f32 %v5829_v7, %v5829_v7 }
 0x7ed   :  { %v5986_v56 = vadd.f32 %v5985_v52, %v5984_v27  ;;  %v5894_v52 = vmul.f32 %v5830_v29, %v5830_v29  ;;  %v5995_v16 = vsel %vm14182_vm12, %v5893_v18, 0.0  ;;  %v5835_v29 = vsub.f32 %v11697_v62, %v11793_v59  ;;  %vm14208_vm12 = vmmov %vm14044_vm0 }
 0x7ee   :  { %v6001_v18 = vsel %vm14186_vm6, %v5896_v31, 0.0  ;;  %vm14212_vm6 = vmmov %vm14044_vm0 }
 0x7ef   :  { %v5988_v22 = vadd.f32 %v5987_v41, %v5986_v56  ;;  %v5895_v41 = vmul.f32 %v5831_v1, %v5831_v1  ;;  %v5997_v44 = vsel %vm14184_vm5, %v5894_v52, 0.0  ;;  %vm14210_vm5 = vmmov %vm14044_vm0 }
 0x7f1   :  { %v5990_v48 = vadd.f32 %v5989_v33, %v5988_v22  ;;  %v14183_v33 = vld [vmem:[#allocation45_spill] sm:$0xff]  ;;  %v5999_v51 = vsel %vm14044_vm0, %v5895_v41, 0.0 }
 0x7f2   :  { %v5834_v7 = vsub.f32 %v14183_v33, %v11793_v59 }
 0x7f3   :  { %v5992_v27 = vadd.f32 %v5991_v49, %v5990_v48  ;;  %v5897_v49 = vmul.f32 %v5833_v3, %v5833_v3 }
 0x7f4   :  { %v5898_v26 = vmul.f32 %v5834_v7, %v5834_v7  ;;  %v5839_v7 = vsub.f32 %v11719_v39, %v11793_v59 }
 0x7f5   :  { %v5994_v56 = vadd.f32 %v5993_v53, %v5992_v27  ;;  %v14185_v53 = vld [vmem:[#allocation44_spill] sm:$0xff]  ;;  %v6003_v52 = vsel %vm14187_vm10, %v5897_v49, 0.0  ;;  %vm14213_vm10 = vmmov %vm14044_vm0 }
 0x7f6   :  { %v5836_v1 = vsub.f32 %v14185_v53, %v11793_v59  ;;  %v6005_v41 = vsel %vm14189_vm3, %v5898_v26, 0.0  ;;  %vm14214_vm3 = vmmov %vm14044_vm0 }
 0x7f7   :  { %v5996_v22 = vadd.f32 %v5995_v16, %v5994_v56  ;;  %v5899_v16 = vmul.f32 %v5835_v29, %v5835_v29 }
 0x7f8   :  { %v5900_v62 = vmul.f32 %v5836_v1, %v5836_v1 }
 0x7f9   :  { %v5998_v48 = vadd.f32 %v5997_v44, %v5996_v22  ;;  %v14188_v44 = vld [vmem:[#allocation25_spill] sm:$0xff]  ;;  %v6007_v31 = vsel %vm14190_vm8, %v5899_v16, 0.0  ;;  %vm14215_vm8 = vmmov %vm14044_vm0 }
 0x7fa   :  { %v5838_v3 = vsub.f32 %v14188_v44, %v11793_v59  ;;  %v6009_v49 = vsel %vm14192_vm2, %v5900_v62, 0.0  ;;  %v5903_v44 = vmul.f32 %v5839_v7, %v5839_v7  ;;  %v5844_v7 = vsub.f32 %v11744_v8, %v11793_v59  ;;  %vm14216_vm2 = vmmov %vm14044_vm0 }
 0x7fb   :  { %v6000_v27 = vadd.f32 %v5999_v51, %v5998_v48  ;;  %v5901_v51 = vmul.f32 %v5837_v6, %v5837_v6 }
 0x7fc   :  { %v5902_v14 = vmul.f32 %v5838_v3, %v5838_v3  ;;  %v5843_v3 = vsub.f32 %v11739_v11, %v11793_v59  ;;  %v6015_v62 = vsel %vm14197_vm15, %v5903_v44, 0.0  ;;  %v5908_v11 = vmul.f32 %v5844_v7, %v5844_v7 }
 0x7fd   :  { %v6002_v56 = vadd.f32 %v6001_v18, %v6000_v27  ;;  %v14191_v18 = vld [vmem:[#allocation16_spill] sm:$0xff]  ;;  %v6011_v26 = vsel %vm14194_vm13, %v5901_v51, 0.0  ;;  %vm14217_vm13 = vmmov %vm14044_vm0 }
 0x7fe   :  { %v5840_v29 = vsub.f32 %v14191_v18, %v11793_v59  ;;  %v6013_v16 = vsel %vm14196_vm14, %v5902_v14, 0.0 }
 0x7ff   :  { %v6004_v22 = vadd.f32 %v6003_v52, %v6002_v56  ;;  %v14193_v52 = vld [vmem:[#allocation46_spill] sm:$0xff] }
 0x800   :  { %v5841_v1 = vsub.f32 %v14193_v52, %v11793_v59  ;;  %v5904_v39 = vmul.f32 %v5840_v29, %v5840_v29 }
 0x801   :  { %v6006_v48 = vadd.f32 %v6005_v41, %v6004_v22  ;;  %v14195_v41 = vld [vmem:[#allocation48_spill] sm:$0xff] }
 0x802   :  { %v5842_v6 = vsub.f32 %v14195_v41, %v11793_v59  ;;  %v6017_v51 = vsel %vm14198_vm9, %v5904_v39, 0.0  ;;  %v5907_v41 = vmul.f32 %v5843_v3, %v5843_v3 }
 0x803   :  { %v6008_v27 = vadd.f32 %v6007_v31, %v6006_v48  ;;  %v5905_v31 = vmul.f32 %v5841_v1, %v5841_v1 }
 0x804   :  { %v6023_v39 = vsel %vm14204_vm4, %v5907_v41, 0.0 }
 0x805   :  { %v6010_v56 = vadd.f32 %v6009_v49, %v6008_v27  ;;  %v5906_v49 = vmul.f32 %v5842_v6, %v5842_v6  ;;  %v6019_v14 = vsel %vm14200_vm1, %v5905_v31, 0.0  ;;  %v6025_v31 = vsel %vm14206_vm11, %v5908_v11, 0.0 }
 0x807   :  { %v6012_v22 = vadd.f32 %v6011_v26, %v6010_v56  ;;  %v14199_v26 = vld [vmem:[#allocation6_spill] sm:$0xff]  ;;  %v6021_v44 = vsel %vm14202_vm7, %v5906_v49, 0.0 }
 0x808   :  { %v5845_v29 = vsub.f32 %v14199_v26, %v11793_v59 }
 0x809   :  { %v6014_v48 = vadd.f32 %v6013_v16, %v6012_v22  ;;  %v14201_v16 = vld [vmem:[#allocation49_spill] sm:$0xff] }
 0x80a   :  { %v5846_v1 = vsub.f32 %v14201_v16, %v11793_v59  ;;  %v5909_v8 = vmul.f32 %v5845_v29, %v5845_v29 }
 0x80b   :  { %v6016_v27 = vadd.f32 %v6015_v62, %v6014_v48  ;;  %v14203_v62 = vld [vmem:[#allocation50_spill] sm:$0xff] }
 0x80c   :  { %v5847_v6 = vsub.f32 %v14203_v62, %v11793_v59  ;;  %v5910_v26 = vmul.f32 %v5846_v1, %v5846_v1  ;;  %v6027_v49 = vsel %vm14208_vm12, %v5909_v8, 0.0 }
 0x80d   :  { %v6018_v56 = vadd.f32 %v6017_v51, %v6016_v27  ;;  %v14205_v51 = vld [vmem:[#allocation10_spill] sm:$0xff] }
 0x80e   :  { %v5848_v3 = vsub.f32 %v14205_v51, %v11793_v59  ;;  %v5911_v16 = vmul.f32 %v5847_v6, %v5847_v6  ;;  %v6029_v41 = vsel %vm14210_vm5, %v5910_v26, 0.0  ;;  %v5852_v6 = vsub.f32 %v11784_v40, %v11793_v59 }
 0x80f   :  { %v6020_v22 = vadd.f32 %v6019_v14, %v6018_v56  ;;  %v14207_v14 = vld [vmem:[#allocation31_spill] sm:$0xff] }
 0x810   :  { %v5849_v7 = vsub.f32 %v14207_v14, %v11793_v59  ;;  %v5912_v62 = vmul.f32 %v5848_v3, %v5848_v3  ;;  %v6031_v11 = vsel %vm14044_vm0, %v5911_v16, 0.0  ;;  %v5853_v3 = vsub.f32 %v11789_v35, %v11793_v59 }
 0x811   :  { %v6022_v48 = vadd.f32 %v6021_v44, %v6020_v22  ;;  %v14209_v44 = vld [vmem:[#allocation11_spill] sm:$0xff] }
 0x812   :  { %v5850_v29 = vsub.f32 %v14209_v44, %v11793_v59  ;;  %v5913_v51 = vmul.f32 %v5849_v7, %v5849_v7  ;;  %v6033_v8 = vsel %vm14212_vm6, %v5912_v62, 0.0  ;;  %v5917_v16 = vmul.f32 %v5853_v3, %v5853_v3 }
 0x813   :  { %v6024_v27 = vadd.f32 %v6023_v39, %v6022_v48  ;;  %v14211_v39 = vld [vmem:[#allocation12_spill] sm:$0xff] }
 0x814   :  { %v5851_v1 = vsub.f32 %v14211_v39, %v11793_v59  ;;  %v6035_v26 = vsel %vm14213_vm10, %v5913_v51, 0.0  ;;  %v6043_v62 = vsel %vm14217_vm13, %v5917_v16, 0.0 }
 0x815   :  { %v6026_v56 = vadd.f32 %v6025_v31, %v6024_v27  ;;  %v5914_v31 = vmul.f32 %v5850_v29, %v5850_v29 }
 0x817   :  { %v6028_v22 = vadd.f32 %v6027_v49, %v6026_v56  ;;  %v5915_v49 = vmul.f32 %v5851_v1, %v5851_v1  ;;  %v6037_v7 = vsel %vm14214_vm3, %v5914_v31, 0.0 }
 0x819   :  { %v6030_v48 = vadd.f32 %v6029_v41, %v6028_v22  ;;  %v5916_v41 = vmul.f32 %v5852_v6, %v5852_v6 }
 0x81b   :  { %v6032_v27 = vadd.f32 %v6031_v11, %v6030_v48  ;;  %v6039_v48 = vsel %vm14215_vm8, %v5915_v49, 0.0  ;;  %v6041_v29 = vsel %vm14216_vm2, %v5916_v41, 0.0 }
 0x81d   :  { %v6034_v56 = vadd.f32 %v6033_v8, %v6032_v27 }
 0x81f   :  { %v6036_v22 = vadd.f32 %v6035_v26, %v6034_v56 }
 0x821   :  { %v6038_v39 = vadd.f32 %v6037_v7, %v6036_v22  ;;  %v14218_v22 = vld [vmem:[#allocation29_spill] sm:$0xff] }
 0x823   :  { %v6040_v11 = vadd.f32 %v6039_v48, %v6038_v39  ;;  %v5654_v39 = vld [vmem:[%s13480_s7] sm:$0x1] }
 0x825   :  { %v6042_v40 = vadd.f32 %v6041_v29, %v6040_v11  ;;  %v14220_v11 = vld [vmem:[#allocation5_spill] sm:$0xff] }
 0x827   :  { %v6044_v27 = vadd.f32 %v6043_v62, %v6042_v40  ;;  %v5655_v40 = vld [vmem:[%s13481_s8] sm:$0x1]  ;;  %v14221_v62 = vld [vmem:[#allocation4_spill] sm:$0xff] }
 0x829   :  { %v6045_v8 = vrot.slane %v6044_v27, 4 }
 0x82b   :  { %v6046_v35 = vadd.f32 %v6045_v8, %v6044_v27 }
 0x82d   :  { %v6047_v1 = vrot.slane %v6046_v35, 2 }
 0x82f   :  { %v6048_v44 = vadd.f32 %v6047_v1, %v6046_v35 }
 0x831   :  { %v6049_v51 = vrot.slane %v6048_v44, 1 }
 0x833   :  { %v6050_v56 = vadd.f32 %v6049_v51, %v6048_v44  ;;  %v14222_v51 = vld [vmem:[#allocation30_spill] sm:$0xff] }
 0x835   :  { %v6051_v6 = vmul.f32 0.001953125, %v6050_v56  ;;  %v14223_v56 = vld [vmem:[#allocation8_spill] sm:$0xff] }
 0x837   :  { %v6052_v26 = vadd.f32 1e-05, %v6051_v6  ;;  %v14224_v6 = vld [vmem:[#allocation22_spill] sm:$0xff] }
 0x839   :  { %7225 = vrsqrt.f32 %v6052_v26 }
 0x843   :  { %v7226_v31 = vpop.eup %7225 }
 0x844   :  { %v6054_v3 = vmul.f32 %v7226_v31, %v5654_v39  ;;  %v14225_v31 = vld [vmem:[#allocation18_spill] sm:$0xff] }
 0x846   :  { %v6055_v49 = vmul.f32 %v6054_v3, %v11793_v59  ;;  %v11995_v41 = vrot.slane %v6054_v3, %v14218_v22  ;;  %v14219_v59 = vld [vmem:[#allocation3_spill] sm:$0xff] }
 0x848   :  { %v6056_v35 = vsub.f32 %v5655_v40, %v6055_v49  ;;  %v11999_v44 = vmul.f32 %v11995_v41, %v11403_v21  ;;  %v12003_v7 = vmul.f32 %v11995_v41, %v11397_v37  ;;  %v12007_v16 = vmul.f32 %v11995_v41, %v11413_v36  ;;  %v14226_v49 = vld [vmem:[#allocation23_spill] sm:$0xff]  ;;  %v14227_v40 = vld [vmem:[#allocation34_spill] sm:$0xff] }
 0x849   :  { %v12011_v48 = vmul.f32 %v11995_v41, %v14219_v59  ;;  %v12015_v29 = vmul.f32 %v11995_v41, %v14220_v11  ;;  %v12019_v21 = vmul.f32 %v11995_v41, %v14221_v62  ;;  %v12023_v37 = vmul.f32 %v11995_v41, %v11439_v9  ;;  %v14228_v11 = vld [vmem:[#allocation47_spill] sm:$0xff]  ;;  %v14229_v62 = vld [vmem:[#allocation25_spill] sm:$0xff] }
 0x84a   :  { %v12027_v36 = vmul.f32 %v11995_v41, %v11447_v23  ;;  %v12031_v27 = vmul.f32 %v11995_v41, %v11455_v45  ;;  %v12035_v8 = vmul.f32 %v11995_v41, %v11465_v50  ;;  %v12039_v1 = vmul.f32 %v11995_v41, %v11471_v28 }
 0x84b   :  { %v12043_v9 = vmul.f32 %v11995_v41, %v11477_v38  ;;  %v12047_v23 = vmul.f32 %v11995_v41, %v11481_v25  ;;  %v12051_v45 = vmul.f32 %v11995_v41, %v11489_v34  ;;  %v12055_v50 = vmul.f32 %v11995_v41, %v11495_v63 }
 0x84c   :  { %v12059_v28 = vmul.f32 %v11995_v41, %v11503_v15  ;;  %v12063_v38 = vmul.f32 %v11995_v41, %v11511_v12  ;;  %v12067_v25 = vmul.f32 %v11995_v41, %v11521_v30  ;;  %v12071_v34 = vmul.f32 %v11995_v41, %v11527_v54 }
 0x84d   :  { %v12075_v63 = vmul.f32 %v11995_v41, %v11533_v47  ;;  %v12079_v15 = vmul.f32 %v11995_v41, %v11537_v46  ;;  %v12083_v12 = vmul.f32 %v11995_v41, %v11545_v0  ;;  %v12087_v30 = vmul.f32 %v11995_v41, %v11551_v2 }
 0x84e   :  { %v12091_v54 = vmul.f32 %v11995_v41, %v11557_v60  ;;  %v12095_v47 = vmul.f32 %v11995_v41, %v11561_v61  ;;  %v12099_v46 = vmul.f32 %v11995_v41, %v11575_v32  ;;  %v12103_v0 = vmul.f32 %v11995_v41, %v11583_v58 }
 0x84f   :  { %v12107_v2 = vmul.f32 %v11995_v41, %v11589_v57  ;;  %v12111_v60 = vmul.f32 %v11995_v41, %v11593_v5  ;;  %v12115_v61 = vmul.f32 %v11995_v41, %v11601_v24  ;;  %v12119_v32 = vmul.f32 %v11995_v41, %v11607_v55 }
 0x850   :  { %v12123_v58 = vmul.f32 %v11995_v41, %v11613_v43  ;;  %v12127_v57 = vmul.f32 %v11995_v41, %v11617_v4  ;;  %v12131_v5 = vmul.f32 %v11995_v41, %v11625_v10  ;;  %v12135_v24 = vmul.f32 %v11995_v41, %v11631_v20 }
 0x851   :  { %v12139_v55 = vmul.f32 %v11995_v41, %v14222_v51  ;;  %v12143_v43 = vmul.f32 %v11995_v41, %v14223_v56  ;;  %v12147_v4 = vmul.f32 %v11995_v41, %v14224_v6  ;;  %v12151_v10 = vmul.f32 %v11995_v41, %v14174_v17  ;;  %v14230_v56 = vld [vmem:[#allocation15_spill] sm:$0xff] }
 0x852   :  { %v12155_v20 = vmul.f32 %v11995_v41, %v14176_v42  ;;  %v12159_v26 = vmul.f32 %v11995_v41, %v14178_v13  ;;  %v12163_v39 = vmul.f32 %v11995_v41, %v14225_v31  ;;  %v12167_v3 = vmul.f32 %v11995_v41, %v11679_v19 }
 0x853   :  { %v12171_v17 = vmul.f32 %v11995_v41, %v14226_v49  ;;  %v12175_v42 = vmul.f32 %v11995_v41, %v14183_v33  ;;  %v12179_v13 = vmul.f32 %v11995_v41, %v14227_v40  ;;  %v12183_v59 = vmul.f32 %v11995_v41, %v14185_v53  ;;  %v14233_v49 = vld [vmem:[#allocation48_spill] sm:$0xff] }
 0x854   :  { %v12187_v19 = vmul.f32 %v11995_v41, %v14228_v11  ;;  %v12191_v51 = vmul.f32 %v11995_v41, %v14229_v62  ;;  %v12195_v33 = vmul.f32 %v11995_v41, %v14230_v56  ;;  %v12199_v6 = vmul.f32 %v11995_v41, %v14191_v18  ;;  %v14235_v11 = vld [vmem:[#allocation26_spill] sm:$0xff]  ;;  %v14236_v56 = vld [vmem:[#allocation35_spill] sm:$0xff] }
 0x855   :  { %v12202_v31 = vrot.slane %v6056_v35, %v14218_v22  ;;  %v12206_v53 = vmul.f32 %v11995_v41, %v14193_v52  ;;  %v12210_v40 = vmul.f32 %v11995_v41, %v14233_v49  ;;  %v12214_v62 = vmul.f32 %v11995_v41, %v14235_v11  ;;  %v14238_v18 = vld [vmem:[#allocation6_spill] sm:$0xff]  ;;  %v14240_v35 = vld [vmem:[#allocation49_spill] sm:$0xff] }
 0x856   :  { %14231 = vst [vmem:[#allocation28_spill] sm:$0xff] %v12195_v33  ;;  %v12218_v33 = vmul.f32 %v11995_v41, %v14236_v56  ;;  %v12222_v22 = vmul.f32 %v11995_v41, %v14238_v18  ;;  %v12226_v52 = vmul.f32 %v11995_v41, %v14240_v35  ;;  %v12238_v56 = vmul.f32 %v11995_v41, %v14207_v14 }
 0x857   :  { %14232 = vst [vmem:[#allocation13_spill] sm:$0xff] %v12206_v53  ;;  %14234 = vst [vmem:[#allocation36_spill] sm:$0xff] %v12210_v40  ;;  %v14242_v53 = vld [vmem:[#allocation50_spill] sm:$0xff]  ;;  %v12258_v14 = vadd.f32 %v12202_v31, %v11999_v44  ;;  %v12278_v44 = vadd.f32 %v12202_v31, %v12019_v21  ;;  %v12298_v21 = vadd.f32 %v12202_v31, %v12039_v1 }
 0x858   :  { %14237 = vst [vmem:[#allocation37_spill] sm:$0xff] %v12218_v33  ;;  %14239 = vst [vmem:[#allocation19_spill] sm:$0xff] %v12222_v22  ;;  %v12230_v49 = vmul.f32 %v11995_v41, %v14242_v53  ;;  %v14244_v40 = vld [vmem:[#allocation10_spill] sm:$0xff]  ;;  %v14245_v33 = vld [vmem:[#allocation11_spill] sm:$0xff]  ;;  %v12318_v1 = vadd.f32 %v12202_v31, %v12059_v28  ;;  %v12338_v28 = vadd.f32 %v12202_v31, %v12079_v15 }
 0x859   :  { %14241 = vst [vmem:[#allocation20_spill] sm:$0xff] %v12226_v52  ;;  %v12234_v11 = vmul.f32 %v11995_v41, %v14244_v40  ;;  %v12242_v18 = vmul.f32 %v11995_v41, %v14245_v33  ;;  %v14246_v22 = vld [vmem:[#allocation12_spill] sm:$0xff]  ;;  %v14247_v52 = vld [vmem:[#allocation27_spill] sm:$0xff]  ;;  %v12262_v33 = vadd.f32 %v12202_v31, %v12003_v7  ;;  %v12282_v7 = vadd.f32 %v12202_v31, %v12023_v37 }
 0x85a   :  { %14243 = vst [vmem:[#allocation38_spill] sm:$0xff] %v12230_v49  ;;  %v12246_v35 = vmul.f32 %v11995_v41, %v14246_v22  ;;  %v12250_v53 = vmul.f32 %v11995_v41, %v14247_v52  ;;  %v14248_v49 = vld [vmem:[#allocation7_spill] sm:$0xff]  ;;  %v12266_v22 = vadd.f32 %v12202_v31, %v12007_v16  ;;  %v12270_v52 = vadd.f32 %v12202_v31, %v12011_v48 }
 0x85b   :  { %v12254_v40 = vmul.f32 %v11995_v41, %v14248_v49  ;;  %v12274_v41 = vadd.f32 %v12202_v31, %v12015_v29  ;;  %v12286_v16 = vadd.f32 %v12202_v31, %v12027_v36  ;;  %v12290_v48 = vadd.f32 %v12202_v31, %v12031_v27 }
 0x85c   :  { %v12294_v29 = vadd.f32 %v12202_v31, %v12035_v8  ;;  %v12302_v37 = vadd.f32 %v12202_v31, %v12043_v9  ;;  %v12306_v36 = vadd.f32 %v12202_v31, %v12047_v23  ;;  %v12310_v27 = vadd.f32 %v12202_v31, %v12051_v45 }
 0x85d   :  { %v12314_v8 = vadd.f32 %v12202_v31, %v12055_v50  ;;  %v12322_v9 = vadd.f32 %v12202_v31, %v12063_v38  ;;  %v12326_v23 = vadd.f32 %v12202_v31, %v12067_v25  ;;  %v12330_v45 = vadd.f32 %v12202_v31, %v12071_v34  ;;  %v14253_v49 = vld [vmem:[#allocation28_spill] sm:$0xff] }
 0x85e   :  { %v12334_v50 = vadd.f32 %v12202_v31, %v12075_v63  ;;  %v12342_v38 = vadd.f32 %v12202_v31, %v12083_v12  ;;  %v12346_v25 = vadd.f32 %v12202_v31, %v12087_v30  ;;  %v12350_v34 = vadd.f32 %v12202_v31, %v12091_v54 }
 0x85f   :  { %v12354_v63 = vadd.f32 %v12202_v31, %v12095_v47  ;;  %v12358_v15 = vadd.f32 %v12202_v31, %v12099_v46  ;;  %v12362_v12 = vadd.f32 %v12202_v31, %v12103_v0  ;;  %v12366_v30 = vadd.f32 %v12202_v31, %v12107_v2 }
 0x860   :  { %v12370_v54 = vadd.f32 %v12202_v31, %v12111_v60  ;;  %v12374_v47 = vadd.f32 %v12202_v31, %v12115_v61  ;;  %v12378_v46 = vadd.f32 %v12202_v31, %v12119_v32  ;;  %v12382_v0 = vadd.f32 %v12202_v31, %v12123_v58 }
 0x861   :  { %v12386_v2 = vadd.f32 %v12202_v31, %v12127_v57  ;;  %v12390_v60 = vadd.f32 %v12202_v31, %v12131_v5  ;;  %v12394_v61 = vadd.f32 %v12202_v31, %v12135_v24  ;;  %v12398_v32 = vadd.f32 %v12202_v31, %v12139_v55 }
 0x862   :  { %v12402_v58 = vadd.f32 %v12202_v31, %v12143_v43  ;;  %v12406_v57 = vadd.f32 %v12202_v31, %v12147_v4  ;;  %v12410_v5 = vadd.f32 %v12202_v31, %v12151_v10  ;;  %v12414_v24 = vadd.f32 %v12202_v31, %v12155_v20 }
 0x863   :  { %v12418_v55 = vadd.f32 %v12202_v31, %v12159_v26  ;;  %v12422_v43 = vadd.f32 %v12202_v31, %v12163_v39  ;;  %v12426_v4 = vadd.f32 %v12202_v31, %v12167_v3  ;;  %v12430_v10 = vadd.f32 %v12202_v31, %v12171_v17 }
 0x864   :  { %v12434_v20 = vadd.f32 %v12202_v31, %v12175_v42  ;;  %v12438_v26 = vadd.f32 %v12202_v31, %v12179_v13  ;;  %v12442_v39 = vadd.f32 %v12202_v31, %v12183_v59  ;;  %v12446_v3 = vadd.f32 %v12202_v31, %v12187_v19 }
 0x865   :  { %14249 = vst [vmem:[#allocation39_spill] sm:$0xff] %v12422_v43  ;;  %v12450_v17 = vadd.f32 %v12202_v31, %v12191_v51  ;;  %v12454_v42 = vadd.f32 %v12202_v31, %v14253_v49  ;;  %v12458_v13 = vadd.f32 %v12202_v31, %v12199_v6  ;;  %v12470_v51 = vadd.f32 %v12202_v31, %v12214_v62 }
 0x866   :  { %14250 = vst [vmem:[#allocation17_spill] sm:$0xff] %v12438_v26  ;;  %14251 = vst [vmem:[#allocation9_spill] sm:$0xff] %v12442_v39  ;;  %v14256_v26 = vld [vmem:[#allocation13_spill] sm:$0xff]  ;;  %v14258_v39 = vld [vmem:[#allocation36_spill] sm:$0xff]  ;;  %v12490_v62 = vadd.f32 %v12202_v31, %v12234_v11  ;;  %vm6197_vm14 = vcmp.ge.f32.partialorder %v12258_v14, 0.0  ;;  %vm6198_vm15 = vcmp.ge.f32.partialorder %v12262_v33, 0.0  ;;  %v12515_v11 = vadd.f32 %v12202_v31, %v12250_v53 }
 0x867   :  { %14252 = vst [vmem:[#allocation40_spill] sm:$0xff] %v12450_v17  ;;  %14254 = vst [vmem:[#allocation41_spill] sm:$0xff] %v12454_v42  ;;  %v12462_v59 = vadd.f32 %v12202_v31, %v14256_v26  ;;  %v12466_v19 = vadd.f32 %v12202_v31, %v14258_v39  ;;  %v14261_v17 = vld [vmem:[#allocation37_spill] sm:$0xff]  ;;  %v14263_v42 = vld [vmem:[#allocation19_spill] sm:$0xff]  ;;  %vm6199_vm9 = vcmp.ge.f32.partialorder %v12266_v22, 0.0  ;;  %vm6200_vm1 = vcmp.ge.f32.partialorder %v12270_v52, 0.0 }
 0x868   :  { %14255 = vst [vmem:[#allocation42_spill] sm:$0xff] %v12458_v13  ;;  %14260 = vst [vmem:[#allocation32_spill] sm:$0xff] %v12470_v51  ;;  %v12474_v49 = vadd.f32 %v12202_v31, %v14261_v17  ;;  %v12478_v6 = vadd.f32 %v12202_v31, %v14263_v42  ;;  %v14265_v13 = vld [vmem:[#allocation20_spill] sm:$0xff]  ;;  %v12494_v17 = vadd.f32 %v12202_v31, %v12238_v56  ;;  %vm6201_vm7 = vcmp.ge.f32.partialorder %v12274_v41, 0.0 }
 0x869   :  { %14257 = vst [vmem:[#allocation43_spill] sm:$0xff] %v12462_v59  ;;  %14259 = vst [vmem:[#allocation14_spill] sm:$0xff] %v12466_v19  ;;  %v12482_v26 = vadd.f32 %v12202_v31, %v14265_v13  ;;  %v14267_v59 = vld [vmem:[#allocation38_spill] sm:$0xff]  ;;  %v12498_v42 = vadd.f32 %v12202_v31, %v12242_v18  ;;  %v12502_v13 = vadd.f32 %v12202_v31, %v12246_v35  ;;  %vm6202_vm4 = vcmp.ge.f32.partialorder %v12278_v44, 0.0 }
 0x86a   :  { %14262 = vst [vmem:[#allocation21_spill] sm:$0xff] %v12474_v49  ;;  %14264 = vst [vmem:[#allocation2_spill] sm:$0xff] %v12478_v6  ;;  %v12486_v39 = vadd.f32 %v12202_v31, %v14267_v59  ;;  %vm6203_vm11 = vcmp.ge.f32.partialorder %v12282_v7, 0.0  ;;  %vm6204_vm12 = vcmp.ge.f32.partialorder %v12286_v16, 0.0  ;;  %vm6205_vm5 = vcmp.ge.f32.partialorder %v12290_v48, 0.0 }
 0x86b   :  { %14266 = vst [vmem:[#allocation24_spill] sm:$0xff] %v12482_v26  ;;  %14269 = vst [vmem:[#allocation45_spill] sm:$0xff] %v12490_v62  ;;  %vm6206_vm0 = vcmp.ge.f32.partialorder %v12294_v29, 0.0  ;;  %v6261_v56 = vmul.f32 0.2, %v12258_v14  ;;  %v12523_v59 = vadd.f32 %v12202_v31, %v12254_v40  ;;  %vm6207_vm6 = vcmp.ge.f32.partialorder %v12298_v21, 0.0 }
 0x86c   :  { %14268 = vst [vmem:[#allocation33_spill] sm:$0xff] %v12486_v39  ;;  %14270 = vst [vmem:[#allocation44_spill] sm:$0xff] %v12494_v17  ;;  %v6262_v18 = vmul.f32 0.2, %v12262_v33  ;;  %v6263_v35 = vmul.f32 0.2, %v12266_v22 }
 0x86d   :  { %14271 = vst [vmem:[#allocation16_spill] sm:$0xff] %v12498_v42  ;;  %14272 = vst [vmem:[#allocation46_spill] sm:$0xff] %v12502_v13  ;;  %v6264_v13 = vmul.f32 0.2, %v12270_v52  ;;  %v6265_v42 = vmul.f32 0.2, %v12274_v41  ;;  %v12536_v31 = vsel %vm6197_vm14, %v12258_v14, %v6261_v56 }
 0x86e   :  { %14273 = vst [vmem:[#allocation31_spill] sm:$0xff] %v12515_v11  ;;  %14274 = vst [vmem:[#allocation29_spill] sm:$0xff] %v12523_v59  ;;  %v6266_v53 = vmul.f32 0.2, %v12278_v44  ;;  %vm6208_vm10 = vcmp.ge.f32.partialorder %v12302_v37, 0.0  ;;  %vm6209_vm3 = vcmp.ge.f32.partialorder %v12306_v36, 0.0  ;;  %v12547_v26 = vsel %vm6198_vm15, %v12262_v33, %v6262_v18 }
 0x86f   :  { %v6267_v11 = vmul.f32 0.2, %v12282_v7  ;;  %v6268_v17 = vmul.f32 0.2, %v12286_v16  ;;  %v6269_v62 = vmul.f32 0.2, %v12290_v48  ;;  %v12577_v49 = vsel %vm6200_vm1, %v12270_v52, %v6264_v13 }
 0x870   :  { %14275 = vst [vmem:[#allocation3_spill] sm:$0xff] %v12536_v31  ;;  %v6270_v40 = vmul.f32 0.2, %v12294_v29  ;;  %v6271_v59 = vmul.f32 0.2, %v12298_v21  ;;  %14276 = vst [vmem:[#allocation5_spill] sm:$0xff] %v12547_v26  ;;  %v12562_v31 = vsel %vm6199_vm9, %v12266_v22, %v6263_v35 }
 0x871   :  { %v12542_v39 = vmul.f32 0.2, %v12302_v37  ;;  %vm6210_vm8 = vcmp.ge.f32.partialorder %v12310_v27, 0.0  ;;  %v12551_v6 = vmul.f32 0.2, %v12306_v36  ;;  %14277 = vst [vmem:[#allocation4_spill] sm:$0xff] %v12562_v31 }
 0x872   :  { %v12554_v14 = vmul.f32 0.2, %v12310_v27  ;;  %v12557_v56 = vmul.f32 0.2, %v12314_v8  ;;  %vm6211_vm2 = vcmp.ge.f32.partialorder %v12314_v8, 0.0  ;;  %14279 = vst [vmem:[#allocation8_spill] sm:$0xff] %v12577_v49 }
 0x873   :  { %v12566_v33 = vmul.f32 0.2, %v12318_v1  ;;  %v12569_v18 = vmul.f32 0.2, %v12322_v9  ;;  %v12572_v26 = vmul.f32 0.2, %v12326_v23 }
 0x874   :  { %vm6212_vm13 = vcmp.ge.f32.partialorder %v12318_v1, 0.0  ;;  %v12581_v22 = vmul.f32 0.2, %v12330_v45  ;;  %v12584_v35 = vmul.f32 0.2, %v12334_v50  ;;  %vm6213_vm14 = vcmp.ge.f32.partialorder %v12322_v9, 0.0 }
 0x875   :  { %14278 = vst [vmem:[#allocation30_spill] sm:$0xff] %v12572_v26  ;;  %v12587_v31 = vmul.f32 0.2, %v12338_v28  ;;  %v12592_v26 = vsel %vm6201_vm7, %v12274_v41, %v6265_v42  ;;  %v12596_v52 = vmul.f32 0.2, %v12342_v38  ;;  %vm6214_vm15 = vcmp.ge.f32.partialorder %v12326_v23, 0.0 }
 0x876   :  { %14281 = vst [vmem:[#allocation18_spill] sm:$0xff] %v12592_v26  ;;  %v12599_v13 = vmul.f32 0.2, %v12346_v25  ;;  %v12602_v49 = vmul.f32 0.2, %v12350_v34  ;;  %vm6215_vm9 = vcmp.ge.f32.partialorder %v12330_v45, 0.0 }
 0x877   :  { %14280 = vst [vmem:[#allocation22_spill] sm:$0xff] %v12587_v31  ;;  %v12607_v31 = vsel %vm6202_vm4, %v12278_v44, %v6266_v53  ;;  %v12611_v41 = vmul.f32 0.2, %v12354_v63  ;;  %v12614_v42 = vmul.f32 0.2, %v12358_v15  ;;  %vm6216_vm1 = vcmp.ge.f32.partialorder %v12334_v50, 0.0 }
 0x878   :  { %14282 = vst [vmem:[#allocation23_spill] sm:$0xff] %v12602_v49  ;;  %14283 = vst [vmem:[#allocation34_spill] sm:$0xff] %v12607_v31  ;;  %v12617_v26 = vmul.f32 0.2, %v12362_v12  ;;  %v12622_v49 = vsel %vm6203_vm11, %v12282_v7, %v6267_v11  ;;  %v12626_v44 = vmul.f32 0.2, %v12366_v30 }
 0x879   :  { %14285 = vst [vmem:[#allocation25_spill] sm:$0xff] %v12622_v49  ;;  %v12629_v53 = vmul.f32 0.2, %v12370_v54  ;;  %v12632_v31 = vmul.f32 0.2, %v12374_v47  ;;  %vm6219_vm11 = vcmp.ge.f32.partialorder %v12346_v25, 0.0 }
 0x87a   :  { %14284 = vst [vmem:[#allocation47_spill] sm:$0xff] %v12617_v26  ;;  %v12637_v26 = vsel %vm6204_vm12, %v12286_v16, %v6268_v17  ;;  %v12643_v7 = vmul.f32 0.2, %v12378_v46  ;;  %v12646_v11 = vmul.f32 0.2, %v12382_v0  ;;  %v12654_v16 = vsel %vm6205_vm5, %v12290_v48, %v6269_v62 }
 0x87b   :  { %14286 = vst [vmem:[#allocation15_spill] sm:$0xff] %v12637_v26  ;;  %v12649_v49 = vmul.f32 0.2, %v12386_v2  ;;  %14288 = vst [vmem:[#allocation26_spill] sm:$0xff] %v12654_v16  ;;  %v12661_v17 = vmul.f32 0.2, %v12390_v60  ;;  %v12672_v48 = vsel %vm6206_vm0, %v12294_v29, %v6270_v40  ;;  %v12690_v29 = vsel %vm6207_vm6, %v12298_v21, %v6271_v59 }
 0x87c   :  { %v12664_v26 = vmul.f32 0.2, %v12394_v61  ;;  %14290 = vst [vmem:[#allocation6_spill] sm:$0xff] %v12672_v48  ;;  %vm6223_vm5 = vcmp.ge.f32.partialorder %v12362_v12, 0.0  ;;  %v12679_v62 = vmul.f32 0.2, %v12402_v58  ;;  %v12709_v21 = vsel %vm6208_vm10, %v12302_v37, %v12542_v39 }
 0x87d   :  { %14287 = vst [vmem:[#allocation48_spill] sm:$0xff] %v12649_v49  ;;  %v12667_v49 = vmul.f32 0.2, %v12398_v32  ;;  %v12682_v16 = vmul.f32 0.2, %v12406_v57  ;;  %14292 = vst [vmem:[#allocation50_spill] sm:$0xff] %v12690_v29  ;;  %v12728_v37 = vsel %vm6209_vm3, %v12306_v36, %v12551_v6  ;;  %v12747_v36 = vsel %vm6210_vm8, %v12310_v27, %v12554_v14 }
 0x87e   :  { %vm6227_vm0 = vcmp.ge.f32.partialorder %v12378_v46, 0.0  ;;  %v12697_v40 = vmul.f32 0.2, %v12414_v24  ;;  %v12700_v48 = vmul.f32 0.2, %v12418_v55  ;;  %14294 = vst [vmem:[#allocation11_spill] sm:$0xff] %v12709_v21  ;;  %v12766_v27 = vsel %vm6211_vm2, %v12314_v8, %v12557_v56 }
 0x87f   :  { %14289 = vst [vmem:[#allocation35_spill] sm:$0xff] %v12667_v49  ;;  %v12685_v49 = vmul.f32 0.2, %v12410_v5  ;;  %vm6231_vm6 = vcmp.ge.f32.partialorder %v12394_v61, 0.0  ;;  %v12716_v59 = vmul.f32 0.2, %v12426_v4  ;;  %v12785_v8 = vsel %vm6212_vm13, %v12318_v1, %v12566_v33 }
 0x880   :  { %v12719_v29 = vmul.f32 0.2, %v12430_v10  ;;  %14298 = vst [vmem:[#allocation28_spill] sm:$0xff] %v12728_v37  ;;  %vm6235_vm10 = vcmp.ge.f32.partialorder %v12410_v5, 0.0  ;;  %v14299_v39 = vld [vmem:[#allocation17_spill] sm:$0xff]  ;;  %14304 = vst [vmem:[#allocation19_spill] sm:$0xff] %v12747_v36  ;;  %v12798_v1 = vsel %vm6213_vm14, %v12322_v9, %v12569_v18 }
 0x881   :  { %14291 = vst [vmem:[#allocation49_spill] sm:$0xff] %v12685_v49  ;;  %v12703_v49 = vmul.f32 0.2, %v12422_v43  ;;  %14295 = vst [vmem:[#allocation12_spill] sm:$0xff] %v12716_v59  ;;  %v12735_v21 = vmul.f32 0.2, %v14299_v39 }
 0x882   :  { %14296 = vst [vmem:[#allocation27_spill] sm:$0xff] %v12719_v29  ;;  %v14301_v29 = vld [vmem:[#allocation9_spill] sm:$0xff]  ;;  %vm6239_vm3 = vcmp.ge.f32.partialorder %v12426_v4, 0.0  ;;  %v14305_v6 = vld [vmem:[#allocation40_spill] sm:$0xff]  ;;  %14310 = vst [vmem:[#allocation17_spill] sm:$0xff] %v12766_v27  ;;  %vm14330_vm12 = vcmp.ge.f32.partialorder %v12338_v28, 0.0 }
 0x883   :  { %14293 = vst [vmem:[#allocation10_spill] sm:$0xff] %v12703_v49  ;;  %v12722_v49 = vmul.f32 0.2, %v12434_v20  ;;  %14300 = vst [vmem:[#allocation13_spill] sm:$0xff] %v12735_v21  ;;  %v12738_v59 = vmul.f32 0.2, %v14301_v29 }
 0x884   :  { %v12754_v37 = vmul.f32 0.2, %v14305_v6  ;;  %vm6243_vm8 = vcmp.ge.f32.partialorder %v14301_v29, 0.0  ;;  %v14311_v14 = vld [vmem:[#allocation43_spill] sm:$0xff]  ;;  %14315 = vst [vmem:[#allocation53_spill] sm:$0xff] %v12785_v8  ;;  %v14316_v56 = vld [vmem:[#allocation21_spill] sm:$0xff] }
 0x885   :  { %14297 = vst [vmem:[#allocation7_spill] sm:$0xff] %v12722_v49  ;;  %14302 = vst [vmem:[#allocation36_spill] sm:$0xff] %v12738_v59  ;;  %v12741_v49 = vmul.f32 0.2, %v12446_v3  ;;  %v14306_v59 = vld [vmem:[#allocation41_spill] sm:$0xff]  ;;  %vm6251_vm13 = vcmp.ge.f32.partialorder %v14316_v56, 0.0 }
 0x886   :  { %v12757_v21 = vmul.f32 0.2, %v14306_v59  ;;  %v12773_v36 = vmul.f32 0.2, %v14311_v14  ;;  %v6315_v27 = vmul.f32 0.2, %v14316_v56 }
 0x887   :  { %14303 = vst [vmem:[#allocation37_spill] sm:$0xff] %v12741_v49  ;;  %v14308_v49 = vld [vmem:[#allocation42_spill] sm:$0xff]  ;;  %v14318_v59 = vld [vmem:[#allocation24_spill] sm:$0xff]  ;;  %14319 = vst [vmem:[#allocation54_spill] sm:$0xff] %v12798_v1 }
 0x888   :  { %14307 = vst [vmem:[#allocation20_spill] sm:$0xff] %v12757_v21  ;;  %v12760_v43 = vmul.f32 0.2, %v14308_v49  ;;  %14312 = vst [vmem:[#allocation9_spill] sm:$0xff] %v12773_v36  ;;  %v12776_v21 = vmul.f32 0.2, %v12466_v19 }
 0x889   :  { %vm6247_vm2 = vcmp.ge.f32.partialorder %v14308_v49, 0.0  ;;  %v14320_v33 = vld [vmem:[#allocation33_spill] sm:$0xff]  ;;  %v14322_v14 = vld [vmem:[#allocation44_spill] sm:$0xff]  ;;  %v14323_v6 = vld [vmem:[#allocation30_spill] sm:$0xff] }
 0x88a   :  { %14309 = vst [vmem:[#allocation38_spill] sm:$0xff] %v12760_v43  ;;  %14313 = vst [vmem:[#allocation51_spill] sm:$0xff] %v12776_v21  ;;  %v12779_v43 = vmul.f32 0.2, %v12470_v51  ;;  %v14317_v21 = vld [vmem:[#allocation2_spill] sm:$0xff]  ;;  %v14321_v51 = vld [vmem:[#allocation45_spill] sm:$0xff]  ;;  %v12811_v9 = vsel %vm6214_vm15, %v12326_v23, %v14323_v6  ;;  %v12824_v23 = vsel %vm6215_vm9, %v12330_v45, %v12581_v22  ;;  %v12851_v22 = vsel %vm6219_vm11, %v12346_v25, %v12599_v13 }
 0x88b   :  { %v6316_v36 = vmul.f32 0.2, %v14317_v21  ;;  %v6318_v8 = vmul.f32 0.2, %v14320_v33  ;;  %v6319_v19 = vmul.f32 0.2, %v14321_v51 }
 0x88c   :  { %14314 = vst [vmem:[#allocation52_spill] sm:$0xff] %v12779_v43  ;;  %v6317_v43 = vmul.f32 0.2, %v14318_v59  ;;  %v6320_v49 = vmul.f32 0.2, %v14322_v14  ;;  %14324 = vst [vmem:[#allocation45_spill] sm:$0xff] %v12811_v9 }
 0x88d   :  { %vm6255_vm14 = vcmp.ge.f32.partialorder %v14321_v51, 0.0  ;;  %v14325_v18 = vld [vmem:[#allocation16_spill] sm:$0xff]  ;;  %v14326_v1 = vld [vmem:[#allocation46_spill] sm:$0xff]  ;;  %v14327_v21 = vld [vmem:[#allocation31_spill] sm:$0xff]  ;;  %vm14331_vm9 = vcmp.ge.f32.partialorder %v12342_v38, 0.0  ;;  %vm14337_vm11 = vcmp.ge.f32.partialorder %v12366_v30, 0.0 }
 0x88e   :  { %vm6257_vm7 = vcmp.ge.f32.partialorder %v14325_v18, 0.0  ;;  %v6321_v33 = vmul.f32 0.2, %v14325_v18  ;;  %v6322_v59 = vmul.f32 0.2, %v14326_v1  ;;  %vm6259_vm15 = vcmp.ge.f32.partialorder %v14327_v21, 0.0 }
 0x88f   :  { %v6323_v56 = vmul.f32 0.2, %v14327_v21  ;;  %v14328_v6 = vld [vmem:[#allocation29_spill] sm:$0xff]  ;;  %v12833_v18 = vsel %vm6216_vm1, %v12334_v50, %v12584_v35  ;;  %v14329_v1 = vld [vmem:[#allocation22_spill] sm:$0xff]  ;;  %v12845_v45 = vsel %vm14331_vm9, %v12342_v38, %v12596_v52  ;;  %v14332_v50 = vld [vmem:[#allocation23_spill] sm:$0xff]  ;;  %vm14333_vm1 = vcmp.ge.f32.partialorder %v12350_v34, 0.0 }
 0x890   :  { %vm6260_vm4 = vcmp.ge.f32.partialorder %v14328_v6, 0.0  ;;  %v6324_v9 = vmul.f32 0.2, %v14328_v6  ;;  %v12839_v14 = vsel %vm14330_vm12, %v12338_v28, %v14329_v1  ;;  %v12857_v35 = vsel %vm14333_vm1, %v12350_v34, %v14332_v50  ;;  %v14336_v25 = vld [vmem:[#allocation47_spill] sm:$0xff]  ;;  %v14370_v50 = vld [vmem:[#allocation42_spill] sm:$0xff] }
 0x891   :  { %vm14334_vm12 = vcmp.ge.f32.partialorder %v12354_v63, 0.0  ;;  %vm14335_vm9 = vcmp.ge.f32.partialorder %v12358_v15, 0.0  ;;  %v12875_v52 = vsel %vm6223_vm5, %v12362_v12, %v14336_v25  ;;  %v12881_v34 = vsel %vm14337_vm11, %v12366_v30, %v12626_v44 }
 0x892   :  { %v12863_v28 = vsel %vm14334_vm12, %v12354_v63, %v12611_v41  ;;  %v12869_v38 = vsel %vm14335_vm9, %v12358_v15, %v12614_v42  ;;  %vm14338_vm1 = vcmp.ge.f32.partialorder %v12370_v54, 0.0  ;;  %vm14339_vm12 = vcmp.ge.f32.partialorder %v12374_v47, 0.0  ;;  %v14352_v41 = vld [vmem:[#allocation39_spill] sm:$0xff] }
 0x893   :  { %v12887_v63 = vsel %vm14338_vm1, %v12370_v54, %v12629_v53  ;;  %v12893_v15 = vsel %vm14339_vm12, %v12374_v47, %v12632_v31  ;;  %vm6645_vm5 = vcmask 60416   ;;  %v12899_v12 = vsel %vm6227_vm0, %v12378_v46, %v12643_v7  ;;  %v14341_v54 = vld [vmem:[#allocation48_spill] sm:$0xff] }
 0x894   :  { %vm14340_vm9 = vcmp.ge.f32.partialorder %v12382_v0, 0.0  ;;  %vm14342_vm11 = vcmp.ge.f32.partialorder %v12386_v2, 0.0  ;;  %vm14343_vm1 = vcmp.ge.f32.partialorder %v12390_v60, 0.0  ;;  %v12923_v46 = vsel %vm6231_vm6, %v12394_v61, %v12664_v26  ;;  %v14348_v61 = vld [vmem:[#allocation49_spill] sm:$0xff] }
 0x895   :  { %v12905_v30 = vsel %vm14340_vm9, %v12382_v0, %v12646_v11  ;;  %v12911_v13 = vsel %vm14342_vm11, %v12386_v2, %v14341_v54  ;;  %v12917_v47 = vsel %vm14343_vm1, %v12390_v60, %v12661_v17  ;;  %v14344_v0 = vld [vmem:[#allocation35_spill] sm:$0xff]  ;;  %vm14345_vm0 = vcmp.ge.f32.partialorder %v12398_v32, 0.0  ;;  %v14359_v11 = vld [vmem:[#allocation13_spill] sm:$0xff] }
 0x896   :  { %v12929_v31 = vsel %vm14345_vm0, %v12398_v32, %v14344_v0  ;;  %vm14346_vm12 = vcmp.ge.f32.partialorder %v12402_v58, 0.0  ;;  %vm14347_vm9 = vcmp.ge.f32.partialorder %v12406_v57, 0.0  ;;  %v12947_v26 = vsel %vm6235_vm10, %v12410_v5, %v14348_v61  ;;  %v14354_v5 = vld [vmem:[#allocation12_spill] sm:$0xff]  ;;  %v14372_v54 = vld [vmem:[#allocation43_spill] sm:$0xff]  ;;  %v14375_v61 = vld [vmem:[#allocation14_spill] sm:$0xff] }
 0x897   :  { %v12935_v2 = vsel %vm14346_vm12, %v12402_v58, %v12679_v62  ;;  %v12941_v60 = vsel %vm14347_vm9, %v12406_v57, %v12682_v16  ;;  %vm14349_vm6 = vcmp.ge.f32.partialorder %v12414_v24, 0.0  ;;  %vm14350_vm11 = vcmp.ge.f32.partialorder %v12418_v55, 0.0  ;;  %v14351_v57 = vld [vmem:[#allocation10_spill] sm:$0xff] }
 0x898   :  { %v12953_v32 = vsel %vm14349_vm6, %v12414_v24, %v12697_v40  ;;  %v12959_v58 = vsel %vm14350_vm11, %v12418_v55, %v12700_v48  ;;  %vm14353_vm1 = vcmp.ge.f32.partialorder %v14352_v41, 0.0  ;;  %v12971_v44 = vsel %vm6239_vm3, %v12426_v4, %v14354_v5  ;;  %v14355_v24 = vld [vmem:[#allocation27_spill] sm:$0xff]  ;;  %v14361_v4 = vld [vmem:[#allocation36_spill] sm:$0xff] }
 0x899   :  { %v12965_v42 = vsel %vm14353_vm1, %v14352_v41, %v14351_v57  ;;  %vm14356_vm10 = vcmp.ge.f32.partialorder %v12430_v10, 0.0  ;;  %v14357_v55 = vld [vmem:[#allocation7_spill] sm:$0xff]  ;;  %vm14358_vm0 = vcmp.ge.f32.partialorder %v12434_v20, 0.0  ;;  %vm14360_vm12 = vcmp.ge.f32.partialorder %v14299_v39, 0.0  ;;  %v14366_v40 = vld [vmem:[#allocation20_spill] sm:$0xff] }
 0x89a   :  { %v12977_v53 = vsel %vm14356_vm10, %v12430_v10, %v14355_v24  ;;  %v12983_v7 = vsel %vm14358_vm0, %v12434_v20, %v14357_v55  ;;  %v12989_v16 = vsel %vm14360_vm12, %v14299_v39, %v14359_v11  ;;  %v12995_v17 = vsel %vm6243_vm8, %v14301_v29, %v14361_v4  ;;  %v14362_v10 = vld [vmem:[#allocation37_spill] sm:$0xff]  ;;  %v14364_v20 = vld [vmem:[#allocation40_spill] sm:$0xff]  ;;  %v14369_v29 = vld [vmem:[#allocation38_spill] sm:$0xff] }
 0x89b   :  { %vm14363_vm3 = vcmp.ge.f32.partialorder %v12446_v3, 0.0  ;;  %vm14365_vm9 = vcmp.ge.f32.partialorder %v14364_v20, 0.0  ;;  %v14367_v39 = vld [vmem:[#allocation41_spill] sm:$0xff]  ;;  %v13019_v25 = vsel %vm6247_vm2, %v14370_v50, %v14369_v29  ;;  %vm14373_vm8 = vcmp.ge.f32.partialorder %v14372_v54, 0.0  ;;  %v14377_v41 = vld [vmem:[#allocation52_spill] sm:$0xff]  ;;  %v14381_v4 = vld [vmem:[#allocation2_spill] sm:$0xff] }
 0x89c   :  { %v13001_v48 = vsel %vm14363_vm3, %v12446_v3, %v14362_v10  ;;  %v13007_v62 = vsel %vm14365_vm9, %v14364_v20, %v12754_v37  ;;  %vm14368_vm6 = vcmp.ge.f32.partialorder %v14367_v39, 0.0  ;;  %v14371_v3 = vld [vmem:[#allocation9_spill] sm:$0xff]  ;;  %v14374_v37 = vld [vmem:[#allocation51_spill] sm:$0xff]  ;;  %vm14376_vm11 = vcmp.ge.f32.partialorder %v14375_v61, 0.0  ;;  %v14378_v5 = vld [vmem:[#allocation32_spill] sm:$0xff] }
 0x89d   :  { %v13013_v1 = vsel %vm14368_vm6, %v14367_v39, %v14366_v40  ;;  %v13025_v0 = vsel %vm14373_vm8, %v14372_v54, %v14371_v3  ;;  %v13031_v57 = vsel %vm14376_vm11, %v14375_v61, %v14374_v37  ;;  %vm14379_vm1 = vcmp.ge.f32.partialorder %v14378_v5, 0.0  ;;  %v14380_v55 = vld [vmem:[#allocation21_spill] sm:$0xff]  ;;  %v14383_v20 = vld [vmem:[#allocation24_spill] sm:$0xff]  ;;  %v14390_v54 = vld [vmem:[#allocation46_spill] sm:$0xff] }
 0x89e   :  { %v13037_v24 = vsel %vm14379_vm1, %v14378_v5, %v14377_v41  ;;  %v13042_v11 = vsel %vm6251_vm13, %v14380_v55, %v6315_v27  ;;  %vm14382_vm2 = vcmp.ge.f32.partialorder %v14381_v4, 0.0  ;;  %vm14384_vm10 = vcmp.ge.f32.partialorder %v14383_v20, 0.0  ;;  %v14385_v39 = vld [vmem:[#allocation33_spill] sm:$0xff]  ;;  %v14387_v50 = vld [vmem:[#allocation44_spill] sm:$0xff] }
 0x89f   :  { %v13047_v10 = vsel %vm14382_vm2, %v14381_v4, %v6316_v36  ;;  %v13052_v40 = vsel %vm14384_vm10, %v14383_v20, %v6317_v43  ;;  %vm14386_vm0 = vcmp.ge.f32.partialorder %v14385_v39, 0.0  ;;  %v13062_v27 = vsel %vm6255_vm14, %v14321_v51, %v6319_v19  ;;  %v14389_v3 = vld [vmem:[#allocation16_spill] sm:$0xff]  ;;  %v14396_v4 = vld [vmem:[#allocation18_spill] sm:$0xff] }
 0x8a0   :  { %v13057_v29 = vsel %vm14386_vm0, %v14385_v39, %v6318_v8  ;;  %vm14388_vm13 = vcmp.ge.f32.partialorder %v14387_v50, 0.0  ;;  %v13072_v43 = vsel %vm6257_vm7, %v14389_v3, %v6321_v33  ;;  %vm14391_vm12 = vcmp.ge.f32.partialorder %v14390_v54, 0.0  ;;  %v14393_v33 = vld [vmem:[#allocation5_spill] sm:$0xff]  ;;  %v14394_v41 = vld [vmem:[#allocation4_spill] sm:$0xff]  ;;  %v14399_v39 = vld [vmem:[#allocation15_spill] sm:$0xff] }
 0x8a1   :  { %v13067_v36 = vsel %vm14388_vm13, %v14387_v50, %v6320_v49  ;;  %v13077_v8 = vsel %vm14391_vm12, %v14390_v54, %v6322_v59  ;;  %v13082_v19 = vsel %vm6259_vm15, %v14327_v21, %v6323_v56  ;;  %v13087_v51 = vsel %vm6260_vm4, %v14328_v6, %v6324_v9  ;;  %v14392_v49 = vld [vmem:[#allocation3_spill] sm:$0xff]  ;;  %v14395_v5 = vld [vmem:[#allocation8_spill] sm:$0xff]  ;;  %v14397_v56 = vld [vmem:[#allocation34_spill] sm:$0xff] }
 0x8a2   :  { %v6882_v37 = vpack.c.bf16 %v14392_v49, %v14392_v49  ;;  %v6883_v61 = vpack.c.bf16 %v14393_v33, %v14393_v33  ;;  %v6884_v59 = vpack.c.bf16 %v14394_v41, %v14394_v41  ;;  %v6885_v55 = vpack.c.bf16 %v14395_v5, %v14395_v5  ;;  %v14398_v9 = vld [vmem:[#allocation25_spill] sm:$0xff]  ;;  %v14400_v3 = vld [vmem:[#allocation26_spill] sm:$0xff] }
 0x8a3   :  { %v6886_v21 = vpack.c.bf16 %v14396_v4, %v14396_v4  ;;  %v6887_v20 = vpack.c.bf16 %v14397_v56, %v14397_v56  ;;  %v6888_v6 = vpack.c.bf16 %v14398_v9, %v14398_v9  ;;  %v6889_v50 = vpack.c.bf16 %v14399_v39, %v14399_v39  ;;  %v14401_v49 = vld [vmem:[#allocation6_spill] sm:$0xff]  ;;  %v14403_v4 = vld [vmem:[#allocation11_spill] sm:$0xff]  ;;  %v14404_v9 = vld [vmem:[#allocation28_spill] sm:$0xff] }
 0x8a4   :  { %v6890_v54 = vpack.c.bf16 %v14400_v3, %v14400_v3  ;;  %v6891_v33 = vpack.c.bf16 %v14401_v49, %v14401_v49  ;;  %6646 = vst.msk [vmem:[%s13482_s9] sm:$0xf] %vm6645_vm5, %v6882_v37  ;;  %6647 = vst.msk [vmem:[%s13482_s9 + $0x4] sm:$0xf] %vm6645_vm5, %v6883_v61  ;;  %v14402_v41 = vld [vmem:[#allocation50_spill] sm:$0xff]  ;;  %v6893_v56 = vpack.c.bf16 %v14403_v4, %v14403_v4  ;;  %v14405_v3 = vld [vmem:[#allocation19_spill] sm:$0xff] }
 0x8a5   :  { %v6892_v5 = vpack.c.bf16 %v14402_v41, %v14402_v41  ;;  %v6894_v39 = vpack.c.bf16 %v14404_v9, %v14404_v9  ;;  %v6895_v49 = vpack.c.bf16 %v14405_v3, %v14405_v3  ;;  %6648 = vst.msk [vmem:[%s13482_s9 + $0x8] sm:$0xf] %vm6645_vm5, %v6884_v59  ;;  %6649 = vst.msk [vmem:[%s13482_s9 + $0xc] sm:$0xf] %vm6645_vm5, %v6885_v55  ;;  %v14406_v37 = vld [vmem:[#allocation17_spill] sm:$0xff]  ;;  %v14408_v4 = vld [vmem:[#allocation54_spill] sm:$0xff] }
 0x8a6   :  { %6650 = vst.msk [vmem:[%s13482_s9 + $0x10] sm:$0xf] %vm6645_vm5, %v6886_v21  ;;  %6651 = vst.msk [vmem:[%s13482_s9 + $0x14] sm:$0xf] %vm6645_vm5, %v6887_v20  ;;  %v6896_v61 = vpack.c.bf16 %v14406_v37, %v14406_v37  ;;  %v14407_v41 = vld [vmem:[#allocation53_spill] sm:$0xff]  ;;  %v6898_v9 = vpack.c.bf16 %v14408_v4, %v14408_v4  ;;  %v6900_v21 = vpack.c.bf16 %v12824_v23, %v12824_v23 }
 0x8a7   :  { %v6897_v59 = vpack.c.bf16 %v14407_v41, %v14407_v41  ;;  %v14409_v55 = vld [vmem:[#allocation45_spill] sm:$0xff]  ;;  %6652 = vst.msk [vmem:[%s13482_s9 + $0x18] sm:$0xf] %vm6645_vm5, %v6888_v6  ;;  %6653 = vst.msk [vmem:[%s13482_s9 + $0x1c] sm:$0xf] %vm6645_vm5, %v6889_v50  ;;  %v6901_v20 = vpack.c.bf16 %v12833_v18, %v12833_v18  ;;  %v6902_v6 = vpack.c.bf16 %v12839_v14, %v12839_v14 }
 0x8a8   :  { %v6899_v3 = vpack.c.bf16 %v14409_v55, %v14409_v55  ;;  %6654 = vst.msk [vmem:[%s13482_s9 + $0x20] sm:$0xf] %vm6645_vm5, %v6890_v54  ;;  %6655 = vst.msk [vmem:[%s13482_s9 + $0x24] sm:$0xf] %vm6645_vm5, %v6891_v33  ;;  %v6903_v50 = vpack.c.bf16 %v12845_v45, %v12845_v45  ;;  %v6904_v14 = vpack.c.bf16 %v12851_v22, %v12851_v22 }
 0x8a9   :  { %6656 = vst.msk [vmem:[%s13482_s9 + $0x28] sm:$0xf] %vm6645_vm5, %v6892_v5  ;;  %6657 = vst.msk [vmem:[%s13482_s9 + $0x2c] sm:$0xf] %vm6645_vm5, %v6893_v56  ;;  %v6905_v18 = vpack.c.bf16 %v12857_v35, %v12857_v35  ;;  %v6906_v23 = vpack.c.bf16 %v12863_v28, %v12863_v28  ;;  %v6907_v45 = vpack.c.bf16 %v12869_v38, %v12869_v38 }
 0x8aa   :  { %6658 = vst.msk [vmem:[%s13482_s9 + $0x30] sm:$0xf] %vm6645_vm5, %v6894_v39  ;;  %6659 = vst.msk [vmem:[%s13482_s9 + $0x34] sm:$0xf] %vm6645_vm5, %v6895_v49  ;;  %v6908_v22 = vpack.c.bf16 %v12875_v52, %v12875_v52  ;;  %v6909_v35 = vpack.c.bf16 %v12881_v34, %v12881_v34  ;;  %v6910_v28 = vpack.c.bf16 %v12887_v63, %v12887_v63 }
 0x8ab   :  { %6660 = vst.msk [vmem:[%s13482_s9 + $0x38] sm:$0xf] %vm6645_vm5, %v6896_v61  ;;  %6661 = vst.msk [vmem:[%s13482_s9 + $0x3c] sm:$0xf] %vm6645_vm5, %v6897_v59  ;;  %v6911_v38 = vpack.c.bf16 %v12893_v15, %v12893_v15  ;;  %v6912_v52 = vpack.c.bf16 %v12899_v12, %v12899_v12  ;;  %v6913_v34 = vpack.c.bf16 %v12905_v30, %v12905_v30 }
 0x8ac   :  { %6662 = vst.msk [vmem:[%s13482_s9 + $0x40] sm:$0xf] %vm6645_vm5, %v6898_v9  ;;  %6663 = vst.msk [vmem:[%s13482_s9 + $0x44] sm:$0xf] %vm6645_vm5, %v6899_v3  ;;  %v6914_v63 = vpack.c.bf16 %v12911_v13, %v12911_v13  ;;  %v6915_v15 = vpack.c.bf16 %v12917_v47, %v12917_v47  ;;  %v6916_v12 = vpack.c.bf16 %v12923_v46, %v12923_v46 }
 0x8ad   :  { %6664 = vst.msk [vmem:[%s13482_s9 + $0x48] sm:$0xf] %vm6645_vm5, %v6900_v21  ;;  %6665 = vst.msk [vmem:[%s13482_s9 + $0x4c] sm:$0xf] %vm6645_vm5, %v6901_v20  ;;  %v6917_v30 = vpack.c.bf16 %v12929_v31, %v12929_v31  ;;  %v6918_v13 = vpack.c.bf16 %v12935_v2, %v12935_v2  ;;  %v6919_v47 = vpack.c.bf16 %v12941_v60, %v12941_v60 }
 0x8ae   :  { %6666 = vst.msk [vmem:[%s13482_s9 + $0x50] sm:$0xf] %vm6645_vm5, %v6902_v6  ;;  %6667 = vst.msk [vmem:[%s13482_s9 + $0x54] sm:$0xf] %vm6645_vm5, %v6903_v50  ;;  %v6920_v46 = vpack.c.bf16 %v12947_v26, %v12947_v26  ;;  %v6921_v31 = vpack.c.bf16 %v12953_v32, %v12953_v32  ;;  %v6922_v2 = vpack.c.bf16 %v12959_v58, %v12959_v58 }
 0x8af   :  { %6668 = vst.msk [vmem:[%s13482_s9 + $0x58] sm:$0xf] %vm6645_vm5, %v6904_v14  ;;  %6669 = vst.msk [vmem:[%s13482_s9 + $0x5c] sm:$0xf] %vm6645_vm5, %v6905_v18  ;;  %v6923_v60 = vpack.c.bf16 %v12965_v42, %v12965_v42  ;;  %v6924_v26 = vpack.c.bf16 %v12971_v44, %v12971_v44  ;;  %v6925_v32 = vpack.c.bf16 %v12977_v53, %v12977_v53 }
 0x8b0   :  { %6670 = vst.msk [vmem:[%s13482_s9 + $0x60] sm:$0xf] %vm6645_vm5, %v6906_v23  ;;  %6671 = vst.msk [vmem:[%s13482_s9 + $0x64] sm:$0xf] %vm6645_vm5, %v6907_v45  ;;  %v6926_v58 = vpack.c.bf16 %v12983_v7, %v12983_v7  ;;  %v6927_v42 = vpack.c.bf16 %v12989_v16, %v12989_v16  ;;  %v6928_v44 = vpack.c.bf16 %v12995_v17, %v12995_v17 }
 0x8b1   :  { %6672 = vst.msk [vmem:[%s13482_s9 + $0x68] sm:$0xf] %vm6645_vm5, %v6908_v22  ;;  %6673 = vst.msk [vmem:[%s13482_s9 + $0x6c] sm:$0xf] %vm6645_vm5, %v6909_v35  ;;  %v6929_v53 = vpack.c.bf16 %v13001_v48, %v13001_v48  ;;  %v6930_v7 = vpack.c.bf16 %v13007_v62, %v13007_v62  ;;  %v6931_v16 = vpack.c.bf16 %v13013_v1, %v13013_v1 }
 0x8b2   :  { %6674 = vst.msk [vmem:[%s13482_s9 + $0x70] sm:$0xf] %vm6645_vm5, %v6910_v28  ;;  %6675 = vst.msk [vmem:[%s13482_s9 + $0x74] sm:$0xf] %vm6645_vm5, %v6911_v38  ;;  %v6932_v17 = vpack.c.bf16 %v13019_v25, %v13019_v25  ;;  %v6933_v48 = vpack.c.bf16 %v13025_v0, %v13025_v0  ;;  %v6934_v62 = vpack.c.bf16 %v13031_v57, %v13031_v57 }
 0x8b3   :  { %6676 = vst.msk [vmem:[%s13482_s9 + $0x78] sm:$0xf] %vm6645_vm5, %v6912_v52  ;;  %6677 = vst.msk [vmem:[%s13482_s9 + $0x7c] sm:$0xf] %vm6645_vm5, %v6913_v34  ;;  %v6935_v1 = vpack.c.bf16 %v13037_v24, %v13037_v24  ;;  %v6936_v25 = vpack.c.bf16 %v13042_v11, %v13042_v11  ;;  %v6937_v0 = vpack.c.bf16 %v13047_v10, %v13047_v10 }
 0x8b4   :  { %6678 = vst.msk [vmem:[%s13482_s9 + $0x80] sm:$0xf] %vm6645_vm5, %v6914_v63  ;;  %6679 = vst.msk [vmem:[%s13482_s9 + $0x84] sm:$0xf] %vm6645_vm5, %v6915_v15  ;;  %v6938_v57 = vpack.c.bf16 %v13052_v40, %v13052_v40  ;;  %v6939_v24 = vpack.c.bf16 %v13057_v29, %v13057_v29  ;;  %v6940_v11 = vpack.c.bf16 %v13062_v27, %v13062_v27 }
 0x8b5   :  { %6680 = vst.msk [vmem:[%s13482_s9 + $0x88] sm:$0xf] %vm6645_vm5, %v6916_v12  ;;  %6681 = vst.msk [vmem:[%s13482_s9 + $0x8c] sm:$0xf] %vm6645_vm5, %v6917_v30  ;;  %v6941_v10 = vpack.c.bf16 %v13067_v36, %v13067_v36  ;;  %v6942_v40 = vpack.c.bf16 %v13072_v43, %v13072_v43  ;;  %v6943_v29 = vpack.c.bf16 %v13077_v8, %v13077_v8 }
 0x8b6   :  { %6682 = vst.msk [vmem:[%s13482_s9 + $0x90] sm:$0xf] %vm6645_vm5, %v6918_v13  ;;  %6683 = vst.msk [vmem:[%s13482_s9 + $0x94] sm:$0xf] %vm6645_vm5, %v6919_v47  ;;  %v6944_v27 = vpack.c.bf16 %v13082_v19, %v13082_v19  ;;  %v6945_v36 = vpack.c.bf16 %v13087_v51, %v13087_v51 }
 0x8b7   :  { %6684 = vst.msk [vmem:[%s13482_s9 + $0x98] sm:$0xf] %vm6645_vm5, %v6920_v46  ;;  %6685 = vst.msk [vmem:[%s13482_s9 + $0x9c] sm:$0xf] %vm6645_vm5, %v6921_v31 }
 0x8b8   :  { %6686 = vst.msk [vmem:[%s13482_s9 + $0xa0] sm:$0xf] %vm6645_vm5, %v6922_v2  ;;  %6687 = vst.msk [vmem:[%s13482_s9 + $0xa4] sm:$0xf] %vm6645_vm5, %v6923_v60 }
 0x8b9   :  { %6688 = vst.msk [vmem:[%s13482_s9 + $0xa8] sm:$0xf] %vm6645_vm5, %v6924_v26  ;;  %6689 = vst.msk [vmem:[%s13482_s9 + $0xac] sm:$0xf] %vm6645_vm5, %v6925_v32 }
 0x8ba   :  { %6690 = vst.msk [vmem:[%s13482_s9 + $0xb0] sm:$0xf] %vm6645_vm5, %v6926_v58  ;;  %6691 = vst.msk [vmem:[%s13482_s9 + $0xb4] sm:$0xf] %vm6645_vm5, %v6927_v42 }
 0x8bb   :  { %6692 = vst.msk [vmem:[%s13482_s9 + $0xb8] sm:$0xf] %vm6645_vm5, %v6928_v44  ;;  %6693 = vst.msk [vmem:[%s13482_s9 + $0xbc] sm:$0xf] %vm6645_vm5, %v6929_v53 }
 0x8bc   :  { %6694 = vst.msk [vmem:[%s13482_s9 + $0xc0] sm:$0xf] %vm6645_vm5, %v6930_v7  ;;  %6695 = vst.msk [vmem:[%s13482_s9 + $0xc4] sm:$0xf] %vm6645_vm5, %v6931_v16 }
 0x8bd   :  { %6696 = vst.msk [vmem:[%s13482_s9 + $0xc8] sm:$0xf] %vm6645_vm5, %v6932_v17  ;;  %6697 = vst.msk [vmem:[%s13482_s9 + $0xcc] sm:$0xf] %vm6645_vm5, %v6933_v48 }
 0x8be   :  { %6698 = vst.msk [vmem:[%s13482_s9 + $0xd0] sm:$0xf] %vm6645_vm5, %v6934_v62  ;;  %6699 = vst.msk [vmem:[%s13482_s9 + $0xd4] sm:$0xf] %vm6645_vm5, %v6935_v1 }
 0x8bf   :  { %6700 = vst.msk [vmem:[%s13482_s9 + $0xd8] sm:$0xf] %vm6645_vm5, %v6936_v25  ;;  %6701 = vst.msk [vmem:[%s13482_s9 + $0xdc] sm:$0xf] %vm6645_vm5, %v6937_v0 }
 0x8c0   :  { %6702 = vst.msk [vmem:[%s13482_s9 + $0xe0] sm:$0xf] %vm6645_vm5, %v6938_v57  ;;  %6703 = vst.msk [vmem:[%s13482_s9 + $0xe4] sm:$0xf] %vm6645_vm5, %v6939_v24 }
 0x8c1   :  { %6704 = vst.msk [vmem:[%s13482_s9 + $0xe8] sm:$0xf] %vm6645_vm5, %v6940_v11  ;;  %6705 = vst.msk [vmem:[%s13482_s9 + $0xec] sm:$0xf] %vm6645_vm5, %v6941_v10 }
 0x8c2   :  { %6706 = vst.msk [vmem:[%s13482_s9 + $0xf0] sm:$0xf] %vm6645_vm5, %v6942_v40  ;;  %6707 = vst.msk [vmem:[%s13482_s9 + $0xf4] sm:$0xf] %vm6645_vm5, %v6943_v29 }
 0x8c3   :  { %6708 = vst.msk [vmem:[%s13482_s9 + $0xf8] sm:$0xf] %vm6645_vm5, %v6944_v27  ;;  %6709 = vst.msk [vmem:[%s13482_s9 + $0xfc] sm:$0xf] %vm6645_vm5, %v6945_v36 }

</bundles_post_ra>
